<compile_context>
chip_gen: v7x
topology: tpu7x:2x2x1
jax: 0.10.0
libtpu: 0.0.40
codegen_flags: <defaults>
</compile_context>

<pallas_src>
import functools
import numpy as np

import jax
import jax.numpy as jnp
from jax.experimental import pallas as pl
from jax.experimental.pallas import tpu as pltpu

LN_EPS = 1e-5  # nn.LayerNorm default

# Cast matmul operands to this dtype at the MXU boundary (accumulation is always
# f32 via preferred_element_type).  Set to jnp.bfloat16 on v6e/v7x for ~2x MXU
# throughput; jnp.float32 keeps exact parity with the PyTorch reference.  All
# LayerNorm / softmax / GELU elementwise math stays in f32 (v5e has no bf16 VPU).
MATMUL_DTYPE = jnp.float32

# Explicit scoped-VMEM budget (safe on v5e/v6e/v7x; v7x scoped default is 32 MiB).
VMEM_LIMIT_BYTES = 32 * 1024 * 1024


# ----------------------------------------------------------------------------
# Tiling helpers
# ----------------------------------------------------------------------------
def _largest_divisor_le(n, cap):
    cap = max(1, min(n, cap))
    for d in range(cap, 0, -1):
        if n % d == 0:
            return d
    return 1


def _pick_row_tile(m, target=512):
    """Largest row tile <= target that divides m (sublane-aligned); else full m."""
    if m <= target:
        return m
    for t in range(target, 0, -1):
        if m % t == 0 and t % 8 == 0:
            return t
    return m


# ----------------------------------------------------------------------------
# Pallas kernels
# ----------------------------------------------------------------------------
def layernorm_kernel(x_ref, g_ref, b_ref, o_ref):
    """Standalone LayerNorm (only used on the zero-padded fallback path)."""
    x = x_ref[...].astype(jnp.float32)
    mu = jnp.mean(x, axis=-1, keepdims=True)
    var = jnp.mean((x - mu) ** 2, axis=-1, keepdims=True)
    xn = (x - mu) * jax.lax.rsqrt(var + LN_EPS)
    o_ref[...] = (xn * g_ref[0] + b_ref[0]).astype(o_ref.dtype)


def window_attn_kernel(x_ref, g1_ref, b1_ref, wqkv_ref, bqkv_ref, bm_ref,
                       wproj_ref, bproj_ref, o_ref, *,
                       num_heads, head_dim, fuse_ln, mm_dtype):
    """(optionally fused norm1) + multi-head window attention for WB windows.

    x_ref   : (1, WB, N, C)           windows of tokens
    bm_ref  : (nH, WB or 1, N, N)     relative-position bias (+ shift mask)
    wproj_ref: (nH, hd, C)            output projection split per head
    """
    _, wb, n_tok, c = x_ref.shape
    t = wb * n_tok
    scale = head_dim ** -0.5

    x = x_ref[0].reshape(t, c).astype(jnp.float32)            # (T, C) tokens
    if fuse_ln:
        mu = jnp.mean(x, axis=-1, keepdims=True)
        var = jnp.mean((x - mu) ** 2, axis=-1, keepdims=True)
        x = (x - mu) * jax.lax.rsqrt(var + LN_EPS) * g1_ref[0] + b1_ref[0]

    qkv = jnp.dot(x.astype(mm_dtype), wqkv_ref[...].astype(mm_dtype),
                  preferred_element_type=jnp.float32) + bqkv_ref[0]   # (T, 3C)

    def gather_heads(base):
        # Assemble a single (num_heads*WB, N, hd) batch from per-head lane slices
        # (loop only does slicing/reshapes; all matmuls below are batched).
        parts = [qkv[:, base + h * head_dim: base + (h + 1) * head_dim]
                 .reshape(wb, n_tok, head_dim) for h in range(num_heads)]
        return jnp.concatenate(parts, axis=0)                 # (nH*WB, N, hd)

    q = gather_heads(0) * scale
    k = gather_heads(c)
    v = gather_heads(2 * c)

    # batched q @ k^T over (head, window)
    attn = jnp.einsum('bqd,bkd->bqk', q.astype(mm_dtype), k.astype(mm_dtype),
                      preferred_element_type=jnp.float32)     # (nH*WB, N, N)
    attn = attn.reshape(num_heads, wb, n_tok, n_tok) + bm_ref[...]
    attn = attn.reshape(num_heads * wb, n_tok, n_tok)

    # softmax (normalization on the EUP via approximate reciprocal)
    attn = attn - jnp.max(attn, axis=-1, keepdims=True)
    p = jnp.exp(attn)
    p = p * pl.reciprocal(jnp.sum(p, axis=-1, keepdims=True), approx=True)

    # batched attn @ v over (head, window)
    out = jnp.einsum('bqk,bkd->bqd', p.astype(mm_dtype), v.astype(mm_dtype),
                     preferred_element_type=jnp.float32)      # (nH*WB, N, hd)

    # head-merge folded into the projection:  y = sum_h out_h @ Wproj[h]
    out = out.reshape(num_heads, t, head_dim)
    proj = jnp.einsum('htd,hdc->htc', out.astype(mm_dtype),
                      wproj_ref[...].astype(mm_dtype),
                      preferred_element_type=jnp.float32)     # (nH, T, C)
    y = proj[0]
    for h in range(1, num_heads):
        y = y + proj[h]
    y = y + bproj_ref[0]                                      # (T, C)
    o_ref[0] = y.reshape(wb, n_tok, c).astype(o_ref.dtype)


def mlp_residual_kernel(sc_ref, at_ref, g_ref, b_ref,
                        w1_ref, b1_ref, w2_ref, b2_ref, o_ref, *, mm_dtype):
    """x1 = shortcut + attn ; out = x1 + MLP(LayerNorm(x1))  (norm2 + mlp)."""
    x1 = sc_ref[...].astype(jnp.float32) + at_ref[...].astype(jnp.float32)
    mu = jnp.mean(x1, axis=-1, keepdims=True)
    var = jnp.mean((x1 - mu) ** 2, axis=-1, keepdims=True)
    xn = (x1 - mu) * jax.lax.rsqrt(var + LN_EPS) * g_ref[0] + b_ref[0]
    h = jnp.dot(xn.astype(mm_dtype), w1_ref[...].astype(mm_dtype),
                preferred_element_type=jnp.float32) + b1_ref[0]
    h = jax.nn.gelu(h, approximate=False)                     # exact GELU (erf)
    y = jnp.dot(h.astype(mm_dtype), w2_ref[...].astype(mm_dtype),
                preferred_element_type=jnp.float32) + b2_ref[0]
    o_ref[...] = (x1 + y).astype(o_ref.dtype)


# ----------------------------------------------------------------------------
# Pallas wrappers
# ----------------------------------------------------------------------------
def layernorm_pallas(x2d, gamma, beta):
    M, C = x2d.shape
    tm = _pick_row_tile(M)
    return pl.pallas_call(
        layernorm_kernel,
        out_shape=jax.ShapeDtypeStruct((M, C), x2d.dtype),
        grid=(M // tm,),
        in_specs=[pl.BlockSpec((tm, C), lambda i: (i, 0)),
                  pl.BlockSpec((1, C), lambda i: (0, 0)),
                  pl.BlockSpec((1, C), lambda i: (0, 0))],
        out_specs=pl.BlockSpec((tm, C), lambda i: (i, 0)),
        compiler_params=pltpu.CompilerParams(
            dimension_semantics=("parallel",),
            vmem_limit_bytes=VMEM_LIMIT_BYTES),
    )(x2d, gamma.reshape(1, C), beta.reshape(1, C))


def window_attention_pallas(wins, gamma1, beta1, wqkv, bqkv, bias_mask,
                            wproj, bproj, num_heads, *, fuse_ln,
                            mm_dtype=MATMUL_DTYPE):
    B, nW, N, C = wins.shape
    head_dim = C // num_heads
    # Batch enough windows per grid step to amortize per-step overhead and feed
    # the MXU with >=128 LHS rows.
    wb = _largest_divisor_le(nW, max(1, 1024 // N))
    shifted = bias_mask.shape[1] != 1        # (nH, nW, N, N) vs (nH, 1, N, N)

    # NOTE(perf): the review's lane-dense (N*C)-wide out_spec was intentionally
    # skipped at C=32 because it requires a minor-dim split/merge relayout inside
    # the kernel; window batching already amortizes the small masked stores.
    kernel = functools.partial(window_attn_kernel, num_heads=num_heads,
                               head_dim=head_dim, fuse_ln=fuse_ln,
                               mm_dtype=mm_dtype)
    if shifted:
        bm_block, bm_map = (num_heads, wb, N, N), (lambda b, w: (0, w, 0, 0))
    else:
        bm_block, bm_map = (num_heads, 1, N, N), (lambda b, w: (0, 0, 0, 0))

    return pl.pallas_call(
        kernel,
        out_shape=jax.ShapeDtypeStruct((B, nW, N, C), wins.dtype),
        grid=(B, nW // wb),
        in_specs=[
            pl.BlockSpec((1, wb, N, C), lambda b, w: (b, w, 0, 0)),   # windows
            pl.BlockSpec((1, C), lambda b, w: (0, 0)),                # norm1 gamma
            pl.BlockSpec((1, C), lambda b, w: (0, 0)),                # norm1 beta
            # weights: constant index_maps -> fetched once, single-resident
            pl.BlockSpec((C, 3 * C), lambda b, w: (0, 0)),            # Wqkv
            pl.BlockSpec((1, 3 * C), lambda b, w: (0, 0)),            # bqkv
            pl.BlockSpec(bm_block, bm_map),                           # bias (+mask)
            pl.BlockSpec((num_heads, head_dim, C), lambda b, w: (0, 0, 0)),  # Wproj
            pl.BlockSpec((1, C), lambda b, w: (0, 0)),                # bproj
        ],
        out_specs=pl.BlockSpec((1, wb, N, C), lambda b, w: (b, w, 0, 0)),
        compiler_params=pltpu.CompilerParams(
            dimension_semantics=("parallel", "parallel"),   # shards across v7x's 2 TCs
            vmem_limit_bytes=VMEM_LIMIT_BYTES),
    )(wins, gamma1.reshape(1, C), beta1.reshape(1, C),
      wqkv, bqkv.reshape(1, -1), bias_mask,
      wproj.reshape(num_heads, head_dim, C), bproj.reshape(1, C))


def mlp_residual_pallas(shortcut2d, attn2d, gamma, beta, w1, b1, w2, b2,
                        mm_dtype=MATMUL_DTYPE):
    M, C = shortcut2d.shape
    Hd = w1.shape[1]
    tm = _pick_row_tile(M, target=512)
    kernel = functools.partial(mlp_residual_kernel, mm_dtype=mm_dtype)
    return pl.pallas_call(
        kernel,
        out_shape=jax.ShapeDtypeStruct((M, C), shortcut2d.dtype),
        grid=(M // tm,),
        in_specs=[pl.BlockSpec((tm, C), lambda i: (i, 0)),
                  pl.BlockSpec((tm, C), lambda i: (i, 0)),
                  pl.BlockSpec((1, C), lambda i: (0, 0)),
                  pl.BlockSpec((1, C), lambda i: (0, 0)),
                  pl.BlockSpec((C, Hd), lambda i: (0, 0)),
                  pl.BlockSpec((1, Hd), lambda i: (0, 0)),
                  pl.BlockSpec((Hd, C), lambda i: (0, 0)),
                  pl.BlockSpec((1, C), lambda i: (0, 0))],
        out_specs=pl.BlockSpec((tm, C), lambda i: (i, 0)),
        compiler_params=pltpu.CompilerParams(
            dimension_semantics=("parallel",),
            vmem_limit_bytes=VMEM_LIMIT_BYTES),
    )(shortcut2d, attn2d, gamma.reshape(1, C), beta.reshape(1, C),
      w1, b1.reshape(1, Hd), w2, b2.reshape(1, C))


# ----------------------------------------------------------------------------
# Glue: window partition / reverse / real sizes / mask / rel-pos index
# ----------------------------------------------------------------------------
def get_real_sizes(x_size, win_size, shift_size):
    ws, ss = list(win_size), list(shift_size)
    for i in range(len(x_size)):
        if x_size[i] <= win_size[i]:
            ws[i] = x_size[i]
            ss[i] = 0
    return tuple(ws), tuple(ss)


def window_partition(x, win):
    B, D, H, W, C = x.shape
    wd, wh, ww = win
    x = x.reshape(B, D // wd, wd, H // wh, wh, W // ww, ww, C)
    x = jnp.transpose(x, (0, 1, 3, 5, 2, 4, 6, 7))
    return x.reshape(-1, wd * wh * ww, C)


def window_reverse(wins, win, shape):
    B, D, H, W = shape
    wd, wh, ww = win
    C = wins.shape[-1]
    x = wins.reshape(B, D // wd, H // wh, W // ww, wd, wh, ww, C)
    x = jnp.transpose(x, (0, 1, 4, 2, 5, 3, 6, 7))
    return x.reshape(B, D, H, W, C)


def compute_shift_mask(dims, win_size, shift_size):
    """Standard 3D shifted-window attention mask, shape (nW, N, N).

    `dims` must be the *padded* spatial dims used for window partitioning."""
    D, H, W = dims
    img_mask = np.zeros((1, D, H, W, 1), np.float32)
    cnt = 0
    for d in (slice(-win_size[0]), slice(-win_size[0], -shift_size[0]),
              slice(-shift_size[0], None)):
        for h in (slice(-win_size[1]), slice(-win_size[1], -shift_size[1]),
                  slice(-shift_size[1], None)):
            for w in (slice(-win_size[2]), slice(-win_size[2], -shift_size[2]),
                      slice(-shift_size[2], None)):
                img_mask[:, d, h, w, :] = cnt
                cnt += 1
    mw = np.asarray(window_partition(jnp.asarray(img_mask), win_size))[..., 0]
    attn_mask = mw[:, None, :] - mw[:, :, None]
    attn_mask = np.where(attn_mask != 0, -100.0, 0.0).astype(np.float32)
    return jnp.asarray(attn_mask)


def relative_position_index(win):
    wd, wh, ww = win
    coords = np.stack(np.meshgrid(np.arange(wd), np.arange(wh), np.arange(ww),
                                  indexing="ij"))
    cf = coords.reshape(3, -1)
    rel = cf[:, :, None] - cf[:, None, :]
    rel = rel.transpose(1, 2, 0).astype(np.int64)
    rel[:, :, 0] += wd - 1
    rel[:, :, 1] += wh - 1
    rel[:, :, 2] += ww - 1
    rel[:, :, 0] *= (2 * wh - 1) * (2 * ww - 1)
    rel[:, :, 1] *= (2 * ww - 1)
    return rel.sum(-1)  # (N, N)


# ----------------------------------------------------------------------------
# SwinTrBlock forward
# ----------------------------------------------------------------------------
def swin_tr_block_forward(x, mask, params, win_size_cfg, shift_size_cfg,
                          num_heads):
    B, D, H, W, C = x.shape
    shortcut2d = x.reshape(-1, C)

    win_size, shift_size = get_real_sizes((D, H, W), win_size_cfg,
                                          shift_size_cfg)
    pad_d = (win_size[0] - D % win_size[0]) % win_size[0]
    pad_h = (win_size[1] - H % win_size[1]) % win_size[1]
    pad_w = (win_size[2] - W % win_size[2]) % win_size[2]
    needs_pad = (pad_d + pad_h + pad_w) > 0

    if needs_pad:
        # Zero-padding must happen *after* norm1 (as in the reference), so the
        # fused-LN fast path only applies when no padding is needed.
        xn = layernorm_pallas(x.reshape(-1, C), params["g1"], params["b1"])
        xw = jnp.pad(xn.reshape(B, D, H, W, C),
                     ((0, 0), (0, pad_d), (0, pad_h), (0, pad_w), (0, 0)))
        fuse_ln = False
    else:
        xw = x          # norm1 is applied per token inside the attention kernel
        fuse_ln = True
    _, pD, pH, pW, _ = xw.shape

    shifted = any(s > 0 for s in shift_size)
    if shifted:
        xw = jnp.roll(xw, shift=(-shift_size[0], -shift_size[1],
                                 -shift_size[2]), axis=(1, 2, 3))

    # TODO(synk): absorb roll + window_partition/reverse into the attention
    # kernel's index_map (scalar-prefetched window offsets) to remove these
    # XLA relayout passes over HBM.
    N = win_size[0] * win_size[1] * win_size[2]
    wins = window_partition(xw, win_size)                 # (B*nW, N, C)
    nW = wins.shape[0] // B
    wins = wins.reshape(B, nW, N, C)

    # relative-position bias (and shift mask) folded into one additive tensor
    rel_idx = relative_position_index(win_size)
    rel_bias = params["rel_table"][rel_idx.reshape(-1)]
    rel_bias = rel_bias.reshape(N, N, num_heads).transpose(2, 0, 1)  # (nH,N,N)
    if shifted:
        assert mask.shape == (nW, N, N), "shift mask must be built on padded dims"
        bias_mask = rel_bias[:, None] + mask.astype(jnp.float32)[None, :]
    else:
        bias_mask = rel_bias[:, None]                     # (nH, 1, N, N): no dense mask

    # window attention (Pallas; norm1 fused when fuse_ln=True)
    attn_wins = window_attention_pallas(
        wins, params["g1"], params["b1"], params["wqkv"], params["bqkv"],
        bias_mask, params["wproj"], params["bproj"], num_heads, fuse_ln=fuse_ln)

    xw = window_reverse(attn_wins.reshape(-1, N, C), win_size, (B, pD, pH, pW))
    if shifted:
        xw = jnp.roll(xw, shift=shift_size, axis=(1, 2, 3))
    x_attn = xw[:, :D, :H, :W, :]

    # residual + norm2 + MLP + residual (Pallas); drop_path / dropout are identity
    out2d = mlp_residual_pallas(
        shortcut2d, x_attn.reshape(-1, C),
        params["g2"], params["b2"],
        params["w_mlp1"], params["b_mlp1"],
        params["w_mlp2"], params["b_mlp2"])
    return out2d.reshape(B, D, H, W, C)


# ----------------------------------------------------------------------------
# Deterministic parameter init
# ----------------------------------------------------------------------------
def init_params(key, C, num_heads, win_size, mlp_ratio=4.0):
    hidden = int(C * mlp_ratio)
    ntab = (2 * win_size[0] - 1) * (2 * win_size[1] - 1) * (2 * win_size[2] - 1)
    ks = jax.random.split(key, 5)
    std = 0.02
    return {
        "g1": jnp.ones((C,), jnp.float32),
        "b1": jnp.zeros((C,), jnp.float32),
        "wqkv": std * jax.random.normal(ks[0], (C, 3 * C), jnp.float32),
        "bqkv": jnp.zeros((3 * C,), jnp.float32),
        "rel_table": std * jax.random.normal(ks[1], (ntab, num_heads),
                                             jnp.float32),
        "wproj": std * jax.random.normal(ks[2], (C, C), jnp.float32),
        "bproj": jnp.zeros((C,), jnp.float32),
        "g2": jnp.ones((C,), jnp.float32),
        "b2": jnp.zeros((C,), jnp.float32),
        "w_mlp1": std * jax.random.normal(ks[3], (C, hidden), jnp.float32),
        "b_mlp1": jnp.zeros((hidden,), jnp.float32),
        "w_mlp2": std * jax.random.normal(ks[4], (hidden, C), jnp.float32),
        "b_mlp2": jnp.zeros((C,), jnp.float32),
    }


if __name__ == "__main__":
    B, D, H, W, C = 2, 4, 8, 8, 32
    num_heads = 4
    win_size = (2, 4, 4)
    shift_size = (1, 2, 2)

    key = jax.random.PRNGKey(0)
    kx, kp = jax.random.split(key)
    x = jax.random.normal(kx, (B, D, H, W, C), jnp.float32)
    params = init_params(kp, C, num_heads, win_size)

    # Shift mask built on the *padded* dims (equal to the originals here since
    # they are already multiples of the window size).
    win_real, shift_real = get_real_sizes((D, H, W), win_size, shift_size)
    pdims = tuple(d + (w - d % w) % w for d, w in zip((D, H, W), win_real))
    mask = compute_shift_mask(pdims, win_real, shift_real)

    out = swin_tr_block_forward(x, mask, params, win_size, shift_size,
                                num_heads)
    jax.block_until_ready(out)
    assert out.shape == (B, D, H, W, C)
    print("KERNEL_OK")
</pallas_src>

<mosaic_0001>
module attributes {stable_mosaic.version = 11 : i64} {
  func.func @window_attn_kernel(%arg0: i32, %arg1: i32, %arg2: memref<1x8x32x32xf32, #tpu.memory_space<vmem>>, %arg3: memref<1x32xf32, #tpu.memory_space<vmem>>, %arg4: memref<1x32xf32, #tpu.memory_space<vmem>>, %arg5: memref<32x96xf32, #tpu.memory_space<vmem>>, %arg6: memref<1x96xf32, #tpu.memory_space<vmem>>, %arg7: memref<4x8x32x32xf32, #tpu.memory_space<vmem>>, %arg8: memref<4x8x32xf32, #tpu.memory_space<vmem>>, %arg9: memref<1x32xf32, #tpu.memory_space<vmem>>, %arg10: memref<1x8x32x32xf32, #tpu.memory_space<vmem>>) attributes {dimension_semantics = [#tpu.dimension_semantics<parallel>, #tpu.dimension_semantics<parallel>], iteration_bounds = array<i64: 2, 1>, scalar_prefetch = 0 : i64, scratch_operands = 0 : i64, tpu.core_type = #tpu.core_type<tc>, window_params = [{transform_indices = @transform_0, window_bounds = array<i64: 1, 8, 32, 32>}, {pipeline_mode = #tpu.pipeline_mode<synchronous>, transform_indices = @transform_1, window_bounds = array<i64: 1, 32>}, {pipeline_mode = #tpu.pipeline_mode<synchronous>, transform_indices = @transform_2, window_bounds = array<i64: 1, 32>}, {pipeline_mode = #tpu.pipeline_mode<synchronous>, transform_indices = @transform_3, window_bounds = array<i64: 32, 96>}, {pipeline_mode = #tpu.pipeline_mode<synchronous>, transform_indices = @transform_4, window_bounds = array<i64: 1, 96>}, {transform_indices = @transform_5, window_bounds = array<i64: 4, 8, 32, 32>}, {pipeline_mode = #tpu.pipeline_mode<synchronous>, transform_indices = @transform_6, window_bounds = array<i64: 4, 8, 32>}, {pipeline_mode = #tpu.pipeline_mode<synchronous>, transform_indices = @transform_7, window_bounds = array<i64: 1, 32>}, {transform_indices = @transform_8, window_bounds = array<i64: 1, 8, 32, 32>}]} {
    %c0 = arith.constant 0 : index
    %c0_0 = arith.constant 0 : index
    %c0_1 = arith.constant 0 : index
    %c0_2 = arith.constant 0 : index
    %0 = vector.load %arg2[%c0, %c0_0, %c0_1, %c0_2] : memref<1x8x32x32xf32, #tpu.memory_space<vmem>>, vector<1x8x32x32xf32>
    %1 = vector.shape_cast %0 : vector<1x8x32x32xf32> to vector<8x32x32xf32>
    %2 = vector.shape_cast %1 : vector<8x32x32xf32> to vector<256x32xf32>
    %cst = arith.constant dense<0.000000e+00> : vector<256xf32>
    %3 = vector.multi_reduction <add>, %2, %cst [1] : vector<256x32xf32> to vector<256xf32>
    %4 = vector.shape_cast %3 : vector<256xf32> to vector<256x1xf32>
    %cst_3 = arith.constant 3.200000e+01 : f32
    %5 = vector.broadcast %cst_3 : f32 to vector<256x1xf32>
    %6 = arith.divf %4, %5 : vector<256x1xf32>
    %7 = vector.broadcast %6 : vector<256x1xf32> to vector<256x32xf32>
    %8 = arith.subf %2, %7 : vector<256x32xf32>
    %9 = arith.mulf %8, %8 : vector<256x32xf32>
    %cst_4 = arith.constant dense<0.000000e+00> : vector<256xf32>
    %10 = vector.multi_reduction <add>, %9, %cst_4 [1] : vector<256x32xf32> to vector<256xf32>
    %11 = vector.shape_cast %10 : vector<256xf32> to vector<256x1xf32>
    %cst_5 = arith.constant 3.200000e+01 : f32
    %12 = vector.broadcast %cst_5 : f32 to vector<256x1xf32>
    %13 = arith.divf %11, %12 : vector<256x1xf32>
    %14 = vector.broadcast %6 : vector<256x1xf32> to vector<256x32xf32>
    %15 = arith.subf %2, %14 : vector<256x32xf32>
    %cst_6 = arith.constant 9.99999974E-6 : f32
    %16 = vector.broadcast %cst_6 : f32 to vector<256x1xf32>
    %17 = arith.addf %13, %16 : vector<256x1xf32>
    %18 = math.rsqrt %17 : vector<256x1xf32>
    %19 = vector.broadcast %18 : vector<256x1xf32> to vector<256x32xf32>
    %20 = arith.mulf %15, %19 : vector<256x32xf32>
    %c0_7 = arith.constant 0 : index
    %c0_8 = arith.constant 0 : index
    %21 = vector.load %arg3[%c0_7, %c0_8] : memref<1x32xf32, #tpu.memory_space<vmem>>, vector<1x32xf32>
    %22 = vector.shape_cast %21 : vector<1x32xf32> to vector<32xf32>
    %23 = vector.shape_cast %22 : vector<32xf32> to vector<1x32xf32>
    %24 = vector.broadcast %23 : vector<1x32xf32> to vector<256x32xf32>
    %25 = arith.mulf %20, %24 : vector<256x32xf32>
    %c0_9 = arith.constant 0 : index
    %c0_10 = arith.constant 0 : index
    %26 = vector.load %arg4[%c0_9, %c0_10] : memref<1x32xf32, #tpu.memory_space<vmem>>, vector<1x32xf32>
    %27 = vector.shape_cast %26 : vector<1x32xf32> to vector<32xf32>
    %28 = vector.shape_cast %27 : vector<32xf32> to vector<1x32xf32>
    %29 = vector.broadcast %28 : vector<1x32xf32> to vector<256x32xf32>
    %30 = arith.addf %25, %29 : vector<256x32xf32>
    %c0_11 = arith.constant 0 : index
    %c0_12 = arith.constant 0 : index
    %31 = vector.load %arg5[%c0_11, %c0_12] : memref<32x96xf32, #tpu.memory_space<vmem>>, vector<32x96xf32>
    %cst_13 = arith.constant dense<0.000000e+00> : vector<256x96xf32>
    %32 = tpu.matmul %30, %31, %cst_13 {dimension_numbers = #tpu.dot_dimension_numbers<[1], [0], [0], [1], [0, 0, 1, 1], [], []>} : vector<256x32xf32>, vector<32x96xf32>, vector<256x96xf32> -> vector<256x96xf32>
    %c0_14 = arith.constant 0 : index
    %c0_15 = arith.constant 0 : index
    %33 = vector.load %arg6[%c0_14, %c0_15] : memref<1x96xf32, #tpu.memory_space<vmem>>, vector<1x96xf32>
    %34 = vector.shape_cast %33 : vector<1x96xf32> to vector<96xf32>
    %35 = vector.shape_cast %34 : vector<96xf32> to vector<1x96xf32>
    %36 = vector.broadcast %35 : vector<1x96xf32> to vector<256x96xf32>
    %37 = arith.addf %32, %36 : vector<256x96xf32>
    %38 = vector.extract_strided_slice %37 {offsets = [0, 0], sizes = [256, 8], strides = [1, 1]} : vector<256x96xf32> to vector<256x8xf32>
    %39 = vector.shape_cast %38 : vector<256x8xf32> to vector<8x32x8xf32>
    %40 = vector.extract_strided_slice %37 {offsets = [0, 8], sizes = [256, 8], strides = [1, 1]} : vector<256x96xf32> to vector<256x8xf32>
    %41 = vector.shape_cast %40 : vector<256x8xf32> to vector<8x32x8xf32>
    %42 = vector.extract_strided_slice %37 {offsets = [0, 16], sizes = [256, 8], strides = [1, 1]} : vector<256x96xf32> to vector<256x8xf32>
    %43 = vector.shape_cast %42 : vector<256x8xf32> to vector<8x32x8xf32>
    %44 = vector.extract_strided_slice %37 {offsets = [0, 24], sizes = [256, 8], strides = [1, 1]} : vector<256x96xf32> to vector<256x8xf32>
    %45 = vector.shape_cast %44 : vector<256x8xf32> to vector<8x32x8xf32>
    %46 = tpu.concatenate %39, %41, %43, %45 in 0 : vector<8x32x8xf32>, vector<8x32x8xf32>, vector<8x32x8xf32>, vector<8x32x8xf32> -> vector<32x32x8xf32>
    %cst_16 = arith.constant 0.353553385 : f32
    %47 = vector.broadcast %cst_16 : f32 to vector<32x32x8xf32>
    %48 = arith.mulf %46, %47 : vector<32x32x8xf32>
    %49 = vector.extract_strided_slice %37 {offsets = [0, 32], sizes = [256, 8], strides = [1, 1]} : vector<256x96xf32> to vector<256x8xf32>
    %50 = vector.shape_cast %49 : vector<256x8xf32> to vector<8x32x8xf32>
    %51 = vector.extract_strided_slice %37 {offsets = [0, 40], sizes = [256, 8], strides = [1, 1]} : vector<256x96xf32> to vector<256x8xf32>
    %52 = vector.shape_cast %51 : vector<256x8xf32> to vector<8x32x8xf32>
    %53 = vector.extract_strided_slice %37 {offsets = [0, 48], sizes = [256, 8], strides = [1, 1]} : vector<256x96xf32> to vector<256x8xf32>
    %54 = vector.shape_cast %53 : vector<256x8xf32> to vector<8x32x8xf32>
    %55 = vector.extract_strided_slice %37 {offsets = [0, 56], sizes = [256, 8], strides = [1, 1]} : vector<256x96xf32> to vector<256x8xf32>
    %56 = vector.shape_cast %55 : vector<256x8xf32> to vector<8x32x8xf32>
    %57 = tpu.concatenate %50, %52, %54, %56 in 0 : vector<8x32x8xf32>, vector<8x32x8xf32>, vector<8x32x8xf32>, vector<8x32x8xf32> -> vector<32x32x8xf32>
    %58 = vector.extract_strided_slice %37 {offsets = [0, 64], sizes = [256, 8], strides = [1, 1]} : vector<256x96xf32> to vector<256x8xf32>
    %59 = vector.shape_cast %58 : vector<256x8xf32> to vector<8x32x8xf32>
    %60 = vector.extract_strided_slice %37 {offsets = [0, 72], sizes = [256, 8], strides = [1, 1]} : vector<256x96xf32> to vector<256x8xf32>
    %61 = vector.shape_cast %60 : vector<256x8xf32> to vector<8x32x8xf32>
    %62 = vector.extract_strided_slice %37 {offsets = [0, 80], sizes = [256, 8], strides = [1, 1]} : vector<256x96xf32> to vector<256x8xf32>
    %63 = vector.shape_cast %62 : vector<256x8xf32> to vector<8x32x8xf32>
    %64 = vector.extract_strided_slice %37 {offsets = [0, 88], sizes = [256, 8], strides = [1, 1]} : vector<256x96xf32> to vector<256x8xf32>
    %65 = vector.shape_cast %64 : vector<256x8xf32> to vector<8x32x8xf32>
    %66 = tpu.concatenate %59, %61, %63, %65 in 0 : vector<8x32x8xf32>, vector<8x32x8xf32>, vector<8x32x8xf32>, vector<8x32x8xf32> -> vector<32x32x8xf32>
    "tpu.trace_start"() <{level = 10 : i32, message = "bqd,bkd->bqk"}> : () -> ()
    %cst_17 = arith.constant dense<0.000000e+00> : vector<32x32x32xf32>
    %67 = tpu.matmul %48, %57, %cst_17 {dimension_numbers = #tpu.dot_dimension_numbers<[2], [2], [1], [1], [0, 0, 0, 1, 1, 1], [0], [0]>} : vector<32x32x8xf32>, vector<32x32x8xf32>, vector<32x32x32xf32> -> vector<32x32x32xf32>
    "tpu.trace_stop"() : () -> ()
    %68 = vector.shape_cast %67 : vector<32x32x32xf32> to vector<4x8x32x32xf32>
    %c0_18 = arith.constant 0 : index
    %c0_19 = arith.constant 0 : index
    %c0_20 = arith.constant 0 : index
    %c0_21 = arith.constant 0 : index
    %69 = vector.load %arg7[%c0_18, %c0_19, %c0_20, %c0_21] : memref<4x8x32x32xf32, #tpu.memory_space<vmem>>, vector<4x8x32x32xf32>
    %70 = arith.addf %68, %69 : vector<4x8x32x32xf32>
    %71 = vector.shape_cast %70 : vector<4x8x32x32xf32> to vector<32x32x32xf32>
    %cst_22 = arith.constant dense<0xFF800000> : vector<32x32xf32>
    %72 = vector.multi_reduction <maximumf>, %71, %cst_22 [2] : vector<32x32x32xf32> to vector<32x32xf32>
    %73 = vector.shape_cast %72 : vector<32x32xf32> to vector<32x32x1xf32>
    %74 = vector.broadcast %73 : vector<32x32x1xf32> to vector<32x32x32xf32>
    %75 = arith.subf %71, %74 : vector<32x32x32xf32>
    %76 = math.exp %75 : vector<32x32x32xf32>
    %cst_23 = arith.constant dense<0.000000e+00> : vector<32x32xf32>
    %77 = vector.multi_reduction <add>, %76, %cst_23 [2] : vector<32x32x32xf32> to vector<32x32xf32>
    %78 = vector.shape_cast %77 : vector<32x32xf32> to vector<32x32x1xf32>
    %79 = tpu.reciprocal %78 {approx = true} : vector<32x32x1xf32> -> vector<32x32x1xf32>
    %80 = vector.broadcast %79 : vector<32x32x1xf32> to vector<32x32x32xf32>
    %81 = arith.mulf %76, %80 : vector<32x32x32xf32>
    "tpu.trace_start"() <{level = 10 : i32, message = "bqk,bkd->bqd"}> : () -> ()
    %cst_24 = arith.constant dense<0.000000e+00> : vector<32x32x8xf32>
    %82 = tpu.matmul %81, %66, %cst_24 {dimension_numbers = #tpu.dot_dimension_numbers<[2], [1], [1], [2], [0, 0, 0, 1, 1, 2], [0], [0]>} : vector<32x32x32xf32>, vector<32x32x8xf32>, vector<32x32x8xf32> -> vector<32x32x8xf32>
    "tpu.trace_stop"() : () -> ()
    %83 = vector.shape_cast %82 : vector<32x32x8xf32> to vector<4x256x8xf32>
    %c0_25 = arith.constant 0 : index
    %c0_26 = arith.constant 0 : index
    %c0_27 = arith.constant 0 : index
    %84 = vector.load %arg8[%c0_25, %c0_26, %c0_27] : memref<4x8x32xf32, #tpu.memory_space<vmem>>, vector<4x8x32xf32>
    "tpu.trace_start"() <{level = 10 : i32, message = "htd,hdc->htc"}> : () -> ()
    %cst_28 = arith.constant dense<0.000000e+00> : vector<4x256x32xf32>
    %85 = tpu.matmul %83, %84, %cst_28 {dimension_numbers = #tpu.dot_dimension_numbers<[2], [1], [1], [2], [0, 0, 0, 1, 1, 2], [0], [0]>} : vector<4x256x8xf32>, vector<4x8x32xf32>, vector<4x256x32xf32> -> vector<4x256x32xf32>
    "tpu.trace_stop"() : () -> ()
    %86 = vector.extract_strided_slice %85 {offsets = [0, 0, 0], sizes = [1, 256, 32], strides = [1, 1, 1]} : vector<4x256x32xf32> to vector<1x256x32xf32>
    %87 = vector.shape_cast %86 : vector<1x256x32xf32> to vector<256x32xf32>
    %88 = vector.extract_strided_slice %85 {offsets = [1, 0, 0], sizes = [1, 256, 32], strides = [1, 1, 1]} : vector<4x256x32xf32> to vector<1x256x32xf32>
    %89 = vector.shape_cast %88 : vector<1x256x32xf32> to vector<256x32xf32>
    %90 = arith.addf %87, %89 : vector<256x32xf32>
    %91 = vector.extract_strided_slice %85 {offsets = [2, 0, 0], sizes = [1, 256, 32], strides = [1, 1, 1]} : vector<4x256x32xf32> to vector<1x256x32xf32>
    %92 = vector.shape_cast %91 : vector<1x256x32xf32> to vector<256x32xf32>
    %93 = arith.addf %90, %92 : vector<256x32xf32>
    %94 = vector.extract_strided_slice %85 {offsets = [3, 0, 0], sizes = [1, 256, 32], strides = [1, 1, 1]} : vector<4x256x32xf32> to vector<1x256x32xf32>
    %95 = vector.shape_cast %94 : vector<1x256x32xf32> to vector<256x32xf32>
    %96 = arith.addf %93, %95 : vector<256x32xf32>
    %c0_29 = arith.constant 0 : index
    %c0_30 = arith.constant 0 : index
    %97 = vector.load %arg9[%c0_29, %c0_30] : memref<1x32xf32, #tpu.memory_space<vmem>>, vector<1x32xf32>
    %98 = vector.shape_cast %97 : vector<1x32xf32> to vector<32xf32>
    %99 = vector.shape_cast %98 : vector<32xf32> to vector<1x32xf32>
    %100 = vector.broadcast %99 : vector<1x32xf32> to vector<256x32xf32>
    %101 = arith.addf %96, %100 : vector<256x32xf32>
    %102 = vector.shape_cast %101 : vector<256x32xf32> to vector<8x32x32xf32>
    %c0_31 = arith.constant 0 : index
    %c0_32 = arith.constant 0 : index
    %c0_33 = arith.constant 0 : index
    %c0_34 = arith.constant 0 : index
    %103 = vector.load %arg10[%c0_31, %c0_32, %c0_33, %c0_34] : memref<1x8x32x32xf32, #tpu.memory_space<vmem>>, vector<1x8x32x32xf32>
    %104 = vector.shape_cast %103 : vector<1x8x32x32xf32> to vector<8x32x32xf32>
    %105 = vector.shape_cast %102 : vector<8x32x32xf32> to vector<1x8x32x32xf32>
    tpu.vector_store %arg10[%c0_31, %c0_32, %c0_33, %c0_34], %105 {strides = array<i32>} : memref<1x8x32x32xf32, #tpu.memory_space<vmem>>, vector<1x8x32x32xf32>,
    return
  }
  func.func @transform_0(%arg0: i32, %arg1: i32) -> (i32, i32, i32, i32) {
    %c0_i32 = arith.constant 0 : i32
    %c0_i32_0 = arith.constant 0 : i32
    %c0_i32_1 = arith.constant 0 : i32
    return %arg0, %arg1, %c0_i32, %c0_i32_0 : i32, i32, i32, i32
  }
  func.func @transform_1(%arg0: i32, %arg1: i32) -> (i32, i32) {
    %c0_i32 = arith.constant 0 : i32
    %c0_i32_0 = arith.constant 0 : i32
    %c0_i32_1 = arith.constant 0 : i32
    return %c0_i32, %c0_i32_0 : i32, i32
  }
  func.func @transform_2(%arg0: i32, %arg1: i32) -> (i32, i32) {
    %c0_i32 = arith.constant 0 : i32
    %c0_i32_0 = arith.constant 0 : i32
    %c0_i32_1 = arith.constant 0 : i32
    return %c0_i32, %c0_i32_0 : i32, i32
  }
  func.func @transform_3(%arg0: i32, %arg1: i32) -> (i32, i32) {
    %c0_i32 = arith.constant 0 : i32
    %c0_i32_0 = arith.constant 0 : i32
    %c0_i32_1 = arith.constant 0 : i32
    return %c0_i32, %c0_i32_0 : i32, i32
  }
  func.func @transform_4(%arg0: i32, %arg1: i32) -> (i32, i32) {
    %c0_i32 = arith.constant 0 : i32
    %c0_i32_0 = arith.constant 0 : i32
    %c0_i32_1 = arith.constant 0 : i32
    return %c0_i32, %c0_i32_0 : i32, i32
  }
  func.func @transform_5(%arg0: i32, %arg1: i32) -> (i32, i32, i32, i32) {
    %c0_i32 = arith.constant 0 : i32
    %c0_i32_0 = arith.constant 0 : i32
    %c0_i32_1 = arith.constant 0 : i32
    %c0_i32_2 = arith.constant 0 : i32
    return %c0_i32, %arg1, %c0_i32_0, %c0_i32_1 : i32, i32, i32, i32
  }
  func.func @transform_6(%arg0: i32, %arg1: i32) -> (i32, i32, i32) {
    %c0_i32 = arith.constant 0 : i32
    %c0_i32_0 = arith.constant 0 : i32
    %c0_i32_1 = arith.constant 0 : i32
    %c0_i32_2 = arith.constant 0 : i32
    return %c0_i32, %c0_i32_0, %c0_i32_1 : i32, i32, i32
  }
  func.func @transform_7(%arg0: i32, %arg1: i32) -> (i32, i32) {
    %c0_i32 = arith.constant 0 : i32
    %c0_i32_0 = arith.constant 0 : i32
    %c0_i32_1 = arith.constant 0 : i32
    return %c0_i32, %c0_i32_0 : i32, i32
  }
  func.func @transform_8(%arg0: i32, %arg1: i32) -> (i32, i32, i32, i32) {
    %c0_i32 = arith.constant 0 : i32
    %c0_i32_0 = arith.constant 0 : i32
    %c0_i32_1 = arith.constant 0 : i32
    return %arg0, %arg1, %c0_i32, %c0_i32_0 : i32, i32, i32, i32
  }
}

</mosaic_0001>

<bundles_post_ra>
// kernel: tpu_custom_call.1
= control target key start
LH: loop header
LB: loop body
LE: loop exit
PB: predicated region body
PF: predicated region fallthrough
CT: control target
= control target key end

     0   :  { %s22015_s0 = inlined_call_operand.hbm [shape: f32[2,8,32,32], index: 0, kind: input, shape index: {}]   ;;  %s22016_s1 = inlined_call_operand.vmem [shape: f32[1,32], index: 1, kind: input, shape index: {}]   ;;  %s22017_s2 = inlined_call_operand.vmem [shape: f32[1,32], index: 2, kind: input, shape index: {}]   ;;  %s22018_s3 = inlined_call_operand.hbm [shape: f32[32,96], index: 3, kind: input, shape index: {}]   ;;  %s22019_s4 = inlined_call_operand.vmem [shape: f32[1,96], index: 4, kind: input, shape index: {}]   ;;  %s22020_s5 = inlined_call_operand.hbm [shape: f32[4,8,32,32], index: 5, kind: input, shape index: {}]   ;;  %s22021_s6 = inlined_call_operand.hbm [shape: f32[4,8,32], index: 6, kind: input, shape index: {}]   ;;  %s22022_s7 = inlined_call_operand.vmem [shape: f32[1,32], index: 7, kind: input, shape index: {}]   ;;  %s22023_s8 = inlined_call_operand.hbm [shape: f32[2,8,32,32], index: 8, kind: output, shape index: {}]  }
   0x1   :  { %22287 = sst [smem:[#allocation183_spill]] %s22022_s7 }
   0x2   :  { %22288 = sst [smem:[#allocation184_spill]] %s22023_s8 }
   0x3   :  { %13 = vsyncpa [#allocation3], 0 }
   0x4   :  { %15 = vsyncpa [#allocation3 + $0x1], 0 }
   0x5   :  { %16 = vsyncpa [#allocation6], 0 }
   0x6   :  { %17 = vsyncpa [#allocation9], 0 }
   0x7   :  { %18 = vsyncpa [#allocation4], 0 }
   0x8   :  { %20 = vsyncpa [#allocation4 + $0x1], 0  ;;  %s16798_s27 = smov 0   ;;  %s16800_s28 = smov 0  }
   0x9   :  { %s16802_s29 = smov 0   ;;  %s16804_s30 = smov 0  }
   0xa   :  { %s16806_s9 = smov 0   ;;  %s16808_s10 = smov 0  }
   0xb LB: > { %22289 = sst [smem:[#allocation15_spill]] %s16717_s27  ;;  %s12066_s11 = sadd.s32 4294967295, %s16737_s10   ;;  %s16737_s10 = sphi %s16808_s10, %s26_s10   ;;  %s16733_s9 = sphi %s16806_s9, %s23109_s9   ;;  %s16729_s30 = sphi %s16804_s30, %s23108_s30   ;;  %s16725_s29 = sphi %s16802_s29, %s23107_s29   ;;  %s16721_s28 = sphi %s16800_s28, %s23106_s28   ;;  %s16717_s27 = sphi %s16798_s27, %s23105_s27  }
   0xc   : > { %22290 = sst [smem:[#allocation16_spill]] %s16729_s30  ;;  %s12067_s12 = sadd.s32 4294967294, %s16737_s10  }
   0xd   : > { %p60_p0 = scmp.ne.s32.totalorder %s16721_s28, %s16717_s27  ;;  %p16832_p1 = scmp.eq.s32.totalorder %s12066_s11, 0 }
   0xe   : > { %p16836_p2 = scmp.eq.s32.totalorder %s12066_s11, 1  ;;  %p244_p3 = scmp.eq.s32.totalorder %s12067_s12, 1 }
   0xf   : > { %s22291_s13 = scalar_select %p16832_p1, 1, 0 }
  0x10   : > { %s22292_s14 = scalar_select %p16836_p2, 1, 0 }
  0x11   : > { %p16842_p4 = por %p16832_p1, %p60_p0  ;;  %p12068_p5 = scmp.ge.s32.totalorder %s16737_s10, 1 }
  0x12   : > { %p16847_p6 = por %p244_p3, %p60_p0  ;;  %p251_p7 = scmp.lt.s32.totalorder %s16737_s10, 3 }
  0x13   : > { %s22293_s15 = scalar_select %p16842_p4, 1, 0 }
  0x14   : > { %s22294_s16 = scalar_select %p16847_p6, 1, 0 }
  0x15   : > { %p16852_p8 = pnand %p12068_p5, %p251_p7  ;;  %s16739_s18 = smov [#allocation5]  }
  0x16   : > { %22295 = sst [smem:[#allocation17_spill]] %s22294_s16  ;;  %s269_s19 = sshll.u32 %s16739_s18, 4  ;;  %s16856_s19 = int_to_ptr.vmem [resolvable:$true] %s269_s19 }
  0x17   : > { %s22296_s17 = scalar_select %p16852_p8, 1, 0 }
  0x18   : > { %p15231_p9 = pneg %p16852_p8  ;;  %s16740_s21 = smov [#allocation7]  }
  0x19   : > { %s289_s22 = sshll.u32 %s16740_s21, 4  ;;  %s16741_s23 = smov [#allocation8]   ;;  %s16867_s22 = int_to_ptr.vmem [resolvable:$true] %s289_s22 }
  0x1a   : > { %p16863_p11 = pnand %p15231_p9, %p16832_p1  ;;  %s16869_s24 = sshll.u32 %s16741_s23, 4  ;;  %s303_s24 = int_to_ptr.vmem [resolvable:$true] %s16869_s24 }
  0x1b   : > { %s16533_s11 = scalar_lea.hbm %s22018_s3, 512 }
  0x1c   : > { %p16534_p12 = scmp.ne.s32.totalorder %s22018_s3, %s16533_s11  ;;  %p16879_p13 = pneg %p16863_p11 }
  0x1d   : > { %p16540_p5 = scmp.lt.u32.totalorder %s16533_s11, %s22018_s3 }
  0x1e   : > { %p16536_p0 = pnand %p16879_p13, %p16534_p12 }
  0x20   : > { %p16537_p3 = pneg %p16536_p0 }
  0x22   : > { %p16542_p7 = pnand %p16540_p5, %p16537_p3 }
  0x24   : > { %16545 = shalt.err (!%p16542_p7)
}
  0x25   : > { %s16546_s25 = scalar_lea.vmem %s16856_s19, 512  ;;  %p16554_p1 = scmp.lt.s32.totalorder %s16856_s19, %s16856_s19 }
  0x26   : > { %p16547_p9 = scmp.ne.s32.totalorder %s16856_s19, %s16546_s25  ;;  %p16555_p4 = scmp.lt.s32.totalorder %s16546_s25, %s16546_s25 }
  0x28   : > { %p16549_p10 = pnand %p16547_p9, %p16879_p13  ;;  %p16556_p12 = por %p16555_p4, %p16554_p1 }
  0x2a   : > { %p16550_p6 = pneg %p16549_p10 }
  0x2c   : > { %p16557_p0 = pnand %p16556_p12, %p16550_p6 }
  0x2e   : > { %16560 = shalt.err (!%p16557_p0)
}
  0x2f   : > { %s16742_s26 = smov 128   ;;  %s16743_s11 = smov 8  }
  0x30   : > { %15234 = dma.hbm_to_vmem [thread:$0]  (!%p16863_p11), %s22018_s3, 512, %s16856_s19, [#allocation6], %s16742_s26, %s16742_s26, %s16743_s11  }
  0x31   : > { %s16561_s25 = scalar_lea.hbm %s22020_s5, 16384 }
  0x32   : > { %p16562_p1 = scmp.ne.s32.totalorder %s22020_s5, %s16561_s25  ;;  %p16568_p10 = scmp.lt.u32.totalorder %s16561_s25, %s22020_s5 }
  0x34   : > { %p16564_p4 = pnand %p16562_p1, %p16879_p13 }
  0x36   : > { %p16565_p6 = pneg %p16564_p4 }
  0x38   : > { %p16570_p3 = pnand %p16568_p10, %p16565_p6 }
  0x3a   : > { %16573 = shalt.err (!%p16570_p3)
}
  0x3b   : > { %s16574_s19 = scalar_lea.vmem %s16867_s22, 16384  ;;  %p16582_p12 = scmp.lt.s32.totalorder %s16867_s22, %s16867_s22 }
  0x3c   : > { %p16575_p5 = scmp.ne.s32.totalorder %s16867_s22, %s16574_s19  ;;  %p16583_p0 = scmp.lt.s32.totalorder %s16574_s19, %s16574_s19 }
  0x3e   : > { %p16577_p7 = pnand %p16575_p5, %p16879_p13  ;;  %p16584_p1 = por %p16583_p0, %p16582_p12 }
  0x40   : > { %p16578_p9 = pneg %p16577_p7 }
  0x42   : > { %p16585_p4 = pnand %p16584_p1, %p16578_p9 }
  0x44   : > { %16588 = shalt.err (!%p16585_p4)
}
  0x45   : > { %15237 = dma.hbm_to_vmem [thread:$0]  (!%p16863_p11), %s22020_s5, 16384, %s16867_s22, [#allocation6], %s16742_s26, %s16742_s26, %s16743_s11  }
  0x46   : > { %s16589_s12 = scalar_lea.hbm %s22021_s6, 512 }
  0x47   : > { %p16590_p6 = scmp.ne.s32.totalorder %s22021_s6, %s16589_s12  ;;  %p16596_p5 = scmp.lt.u32.totalorder %s16589_s12, %s22021_s6 }
  0x49   : > { %p16592_p10 = pnand %p16590_p6, %p16879_p13 }
  0x4b   : > { %p16593_p3 = pneg %p16592_p10 }
  0x4d   : > { %p16598_p7 = pnand %p16596_p5, %p16593_p3 }
  0x4f   : > { %16601 = shalt.err (!%p16598_p7)
}
  0x50   : > { %s16602_s19 = scalar_lea.vmem %s303_s24, 512  ;;  %p16610_p1 = scmp.lt.s32.totalorder %s303_s24, %s303_s24 }
  0x51   : > { %p16603_p9 = scmp.ne.s32.totalorder %s303_s24, %s16602_s19  ;;  %p16611_p4 = scmp.lt.s32.totalorder %s16602_s19, %s16602_s19 }
  0x53   : > { %p16605_p12 = pnand %p16603_p9, %p16879_p13  ;;  %p16612_p8 = por %p16611_p4, %p16610_p1 }
  0x55   : > { %p16606_p0 = pneg %p16605_p12 }
  0x57   : > { %p16613_p2 = pnand %p16612_p8, %p16606_p0 }
  0x59   : > { %16616 = shalt.err (!%p16613_p2)
}
  0x5a   : > { %15240 = dma.hbm_to_vmem [thread:$0]  (!%p16863_p11), %s22021_s6, 512, %s303_s24, [#allocation9], %s16742_s26, %s16742_s26, %s16743_s11  }
  0x5b   : > { %s47_s16 = sadd.s32 1, %s16725_s29  ;;  %s38_s20 = sadd.s32 1, %s16733_s9 }
  0x5c   : > { %p54_p2 = scmp.ne.s32.totalorder %s16725_s29, %s16721_s28  ;;  %p40_p8 = scmp.ge.s32.totalorder %s38_s20, 2 }
  0x5d   : > { %p55_p13 = scmp.eq.s32.totalorder %s16737_s10, 0  ;;  %p22299_p6 = scmp.ne.s32.totalorder %s22292_s14, 0 }
  0x5e   : > { %p15252_p3 = scmp.lt.s32.totalorder %s16737_s10, 2  ;;  %s23111_s20 = smov (%p40_p8, %s38_s20), 0 }
  0x5f   : > { %p16958_p10 = por %p22299_p6, %p54_p2  ;;  %p56_p5 = por %p55_p13, %p54_p2 }
  0x60   : > { %s319_s27 = sand.u32 1, %s16725_s29   ;;  %s42_s30 = ssub.s32 %s16733_s9, %s23111_s20 }
  0x61   : > { %p45_p7 = scmp.eq.s32.totalorder %s42_s30, 0  ;;  %s12073_s24 = sshll.u32 %s319_s27, 8 }
  0x62   : > { %s12635_s12 = sshll.u32 %s16733_s9, 12  ;;  %s323_s25 = scalar_lea.vmem [#allocation2], %s12073_s24 }
  0x63   : > { %s16970_s18 = scalar_select %p45_p7, %s16725_s29, %s47_s16  }
  0x64   : > { %s16975_s14 = scalar_lea.hbm %s22015_s0, %s12635_s12  ;;  %s333_s19 = sshll.u32 %s323_s25, 4  ;;  %s16977_s19 = int_to_ptr.vmem [resolvable:$true] %s333_s19 }
  0x65   : > { %p16981_p11 = pnand %p15252_p3, %p56_p5  ;;  %s16985_s7 = scalar_lea.sflag [#allocation3], %s319_s27 }
  0x66   : > { %s16617_s16 = scalar_lea.hbm %s16975_s14, 4096  ;;  %s16622_s12 = scalar_lea.hbm %s22015_s0, 8192 }
  0x67   : > { %p16618_p9 = scmp.ne.s32.totalorder %s16975_s14, %s16617_s16  ;;  %p16619_p12 = pneg %p16981_p11 }
  0x68   : > { %p16623_p4 = scmp.lt.u32.totalorder %s16975_s14, %s22015_s0  ;;  %p16624_p2 = scmp.lt.u32.totalorder %s16622_s12, %s16617_s16 }
  0x69   : > { %p16620_p0 = pnand %p16619_p12, %p16618_p9  ;;  %p16626_p13 = scmp.lt.u32.totalorder %s16617_s16, %s16975_s14 }
  0x6a   : > { %p16625_p8 = por %p16624_p2, %p16623_p4 }
  0x6b   : > { %p16621_p1 = pneg %p16620_p0 }
  0x6c   : > { %p16627_p6 = por %p16626_p13, %p16625_p8 }
  0x6e   : > { %p16628_p3 = pnand %p16627_p6, %p16621_p1 }
  0x70   : > { %16631 = shalt.err (!%p16628_p3)
}
  0x71   : > { %s16632_s27 = scalar_lea.vmem %s16977_s19, 4096  ;;  %s16744_s25 = smov [#allocation2]  }
  0x72   : > { %p16633_p5 = scmp.ne.s32.totalorder %s16977_s19, %s16632_s27  ;;  %s16637_s30 = sshll.u32 %s16744_s25, 4  ;;  %s16638_s30 = int_to_ptr.vmem [resolvable:$false] %s16637_s30 }
  0x73   : > { %s16639_s24 = scalar_lea.vmem %s16638_s30, 8192  ;;  %p16640_p0 = scmp.lt.s32.totalorder %s16977_s19, %s16638_s30 }
  0x74   : > { %p16635_p7 = pnand %p16633_p5, %p16619_p12  ;;  %p16641_p4 = scmp.lt.s32.totalorder %s16639_s24, %s16632_s27 }
  0x76   : > { %p16636_p9 = pneg %p16635_p7  ;;  %p16642_p2 = por %p16641_p4, %p16640_p0 }
  0x78   : > { %p16643_p8 = pnand %p16642_p2, %p16636_p9 }
  0x7a   : > { %16646 = shalt.err (!%p16643_p8)
}
  0x7b   : > { %15244 = dma.hbm_to_vmem [thread:$0]  (!%p16981_p11), %s16975_s14, 4096, %s16977_s19, %s16985_s7, %s16742_s26, %s16742_s26, %s16743_s11  }
  0x7c   : > { %p22302_p12 = scmp.ne.s32.totalorder %s22296_s17, 0 }
  0x7e   : > { %345 = sbr.rel (%p22302_p12) target bundleno = 3450 (0xd7a), region = 52 }
  0x85   : > { %s17019_s16 = sand.u32 1, %s16721_s28   ;;  %p22303_p1 = scmp.ne.s32.totalorder %s22293_s15, 0 }
  0x86   : > { %s12077_s12 = sshll.u32 %s17019_s16, 8  ;;  %s348_s21 = scalar_lea.sflag [#allocation3], %s17019_s16 }
  0x87   : > { %s17025_s22 = scalar_lea.vmem [#allocation2], %s12077_s12 }
  0x88   : > { %16700 = dma.done.wait (%p22303_p1), %s348_s21, 4096  }
  0x89   : > { %16702 = vsyncadd (%p22303_p1), %s348_s21, 4294963200  ;;  %p22304_p11 = scmp.ne.s32.totalorder %s22291_s13, 0 }
  0x8b   : > { %16704 = dma.done.wait (%p22304_p11), [#allocation6], 16896  }
  0x8c   : > { %16706 = vsyncadd (%p22304_p11), [#allocation6], 4294950400 }
  0x8d   : > { %16708 = dma.done.wait (%p22304_p11), [#allocation9], 512  }
  0x8e   : > { %16710 = vsyncadd (%p22304_p11), [#allocation9], 4294966784  ;;  %vm431_vm0 = vcmask 261120   ;;  %v17040_v0 = vld [vmem:[%s17025_s22 + $0x10] sm:$0xff]  ;;  %v17043_v1 = vld [vmem:[%s17025_s22] sm:$0xff]  ;;  %s16745_s19 = smov 112  }
  0x8f   : > { %v17046_v2 = vld [vmem:[%s17025_s22 + $0x18] sm:$0xff]  ;;  %v438_v3 = vsel %vm431_vm0, %v17040_v0, 0.0  ;;  %v432_v4 = vsel %vm431_vm0, %v17043_v1, 0.0  ;;  %v17053_v5 = vld [vmem:[%s17025_s22 + $0x8] sm:$0xff]  ;;  %v17063_v9 = vld [vmem:[%s17025_s22 + $0x20] sm:$0xff]  ;;  %s16746_s7 = smov 120  }
  0x90   : > { %439 = vadd.xlane.f32.xlu1 %v438_v3  ;;  %433 = vadd.xlane.f32.xlu0 %v432_v4  ;;  %v441_v6 = vsel %vm431_vm0, %v17046_v2, 0.0  ;;  %v435_v7 = vsel %vm431_vm0, %v17053_v5, 0.0  ;;  %v17060_v8 = vld [vmem:[%s17025_s22 + $0x28] sm:$0xff]  ;;  %v444_v11 = vsel %vm431_vm0, %v17063_v9, 0.0  ;;  %v17070_v12 = vld [vmem:[%s17025_s22 + $0x38] sm:$0xff]  ;;  %v17073_v13 = vld [vmem:[%s17025_s22 + $0x30] sm:$0xff] }
  0x91   : > { %v447_v10 = vsel %vm431_vm0, %v17060_v8, 0.0  ;;  %v453_v14 = vsel %vm431_vm0, %v17070_v12, 0.0  ;;  %v450_v15 = vsel %vm431_vm0, %v17073_v13, 0.0  ;;  %v17080_v16 = vld [vmem:[%s17025_s22 + $0x48] sm:$0xff]  ;;  %v17083_v17 = vld [vmem:[%s17025_s22 + $0x40] sm:$0xff]  ;;  %v17090_v20 = vld [vmem:[%s17025_s22 + $0x58] sm:$0xff] }
  0x92   : > { %v459_v18 = vsel %vm431_vm0, %v17080_v16, 0.0  ;;  %v456_v19 = vsel %vm431_vm0, %v17083_v17, 0.0  ;;  %v17093_v21 = vld [vmem:[%s17025_s22 + $0x50] sm:$0xff]  ;;  %v465_v22 = vsel %vm431_vm0, %v17090_v20, 0.0  ;;  %v17100_v24 = vld [vmem:[%s17025_s22 + $0x68] sm:$0xff]  ;;  %v17103_v25 = vld [vmem:[%s17025_s22 + $0x60] sm:$0xff] }
  0x93   : > { %v462_v23 = vsel %vm431_vm0, %v17093_v21, 0.0  ;;  %v471_v26 = vsel %vm431_vm0, %v17100_v24, 0.0  ;;  %v468_v27 = vsel %vm431_vm0, %v17103_v25, 0.0  ;;  %v17110_v28 = vld [vmem:[%s17025_s22 + $0x78] sm:$0xff]  ;;  %v17113_v29 = vld [vmem:[%s17025_s22 + $0x70] sm:$0xff]  ;;  %v17120_v32 = vld [vmem:[%s17025_s22 + $0x88] sm:$0xff] }
  0x94   : > { %442 = vadd.xlane.f32.xlu1 %v441_v6  ;;  %436 = vadd.xlane.f32.xlu0 %v435_v7  ;;  %v477_v30 = vsel %vm431_vm0, %v17110_v28, 0.0  ;;  %v474_v31 = vsel %vm431_vm0, %v17113_v29, 0.0  ;;  %v17123_v33 = vld [vmem:[%s17025_s22 + $0x80] sm:$0xff]  ;;  %v483_v34 = vsel %vm431_vm0, %v17120_v32, 0.0  ;;  %v17130_v36 = vld [vmem:[%s17025_s22 + $0x98] sm:$0xff]  ;;  %v17133_v37 = vld [vmem:[%s17025_s22 + $0x90] sm:$0xff] }
  0x95   : > { %v480_v35 = vsel %vm431_vm0, %v17123_v33, 0.0  ;;  %v489_v38 = vsel %vm431_vm0, %v17130_v36, 0.0  ;;  %v486_v39 = vsel %vm431_vm0, %v17133_v37, 0.0  ;;  %v17140_v40 = vld [vmem:[%s17025_s22 + $0xa8] sm:$0xff]  ;;  %v17143_v41 = vld [vmem:[%s17025_s22 + $0xa0] sm:$0xff]  ;;  %v17150_v44 = vld [vmem:[%s17025_s22 + $0xb8] sm:$0xff] }
  0x96   : > { %v495_v42 = vsel %vm431_vm0, %v17140_v40, 0.0  ;;  %v492_v43 = vsel %vm431_vm0, %v17143_v41, 0.0  ;;  %v17153_v45 = vld [vmem:[%s17025_s22 + $0xb0] sm:$0xff]  ;;  %v501_v46 = vsel %vm431_vm0, %v17150_v44, 0.0  ;;  %v17160_v48 = vld [vmem:[%s17025_s22 + $0xc8] sm:$0xff]  ;;  %v17163_v49 = vld [vmem:[%s17025_s22 + $0xc0] sm:$0xff] }
  0x97   : > { %v498_v47 = vsel %vm431_vm0, %v17153_v45, 0.0  ;;  %v507_v50 = vsel %vm431_vm0, %v17160_v48, 0.0  ;;  %v504_v51 = vsel %vm431_vm0, %v17163_v49, 0.0  ;;  %v17170_v52 = vld [vmem:[%s17025_s22 + $0xd8] sm:$0xff]  ;;  %v17173_v53 = vld [vmem:[%s17025_s22 + $0xd0] sm:$0xff]  ;;  %v17180_v56 = vld [vmem:[%s17025_s22 + $0xe0] sm:$0xff] }
  0x98   : > { %448 = vadd.xlane.f32.xlu1 %v447_v10  ;;  %445 = vadd.xlane.f32.xlu0 %v444_v11  ;;  %v513_v54 = vsel %vm431_vm0, %v17170_v52, 0.0  ;;  %v510_v55 = vsel %vm431_vm0, %v17173_v53, 0.0  ;;  %v516_v57 = vsel %vm431_vm0, %v17180_v56, 0.0  ;;  %v17185_v58 = vld [vmem:[%s17025_s22 + $0xe8] sm:$0xff]  ;;  %v17190_v60 = vld [vmem:[%s17025_s22 + $0xf0] sm:$0xff]  ;;  %v17195_v62 = vld [vmem:[%s17025_s22 + $0xf8] sm:$0xff] }
  0x99   : > { %v519_v59 = vsel %vm431_vm0, %v17185_v58, 0.0  ;;  %v522_v61 = vsel %vm431_vm0, %v17190_v60, 0.0  ;;  %v525_v63 = vsel %vm431_vm0, %v17195_v62, 0.0  ;;  %vm1715_vm1 = vcmask 64512   ;;  %s16747_s23 = smov 104   ;;  %s16748_s27 = smov 96  }
  0x9a   : > { %s16749_s25 = smov 64   ;;  %vm17745_vm2 = vmpackc.low %vm1715_vm1, %vm1715_vm1  ;;  %s23098_s21 = sld [smem:[#allocation183_spill]] }
  0x9b   : > { %s21861_s22 = scalar_lea.vmem [#allocation10], %s12077_s12  ;;  %s23099_s12 = sld [smem:[#allocation16_spill]] }
  0x9c   : > { %454 = vadd.xlane.f32.xlu1 %v453_v14  ;;  %451 = vadd.xlane.f32.xlu0 %v450_v15  ;;  %s11948_s15 = sshll.u32 %s21861_s22, 4  ;;  %s23100_s11 = sld [smem:[#allocation184_spill]]  ;;  %s21961_s15 = int_to_ptr.vmem [resolvable:$true] %s11948_s15 }
  0xa0   : > { %460 = vadd.xlane.f32.xlu1 %v459_v18  ;;  %457 = vadd.xlane.f32.xlu0 %v456_v19 }
  0xa1   : > { %s12636_s13 = sshll.u32 %s23099_s12, 12 }
  0xa2   : > { %s21959_s14 = scalar_lea.hbm %s23100_s11, %s12636_s13 }
  0xa4   : > { %466 = vadd.xlane.f32.xlu1 %v465_v22  ;;  %463 = vadd.xlane.f32.xlu0 %v462_v23 }
  0xa8   : > { %472 = vadd.xlane.f32.xlu1 %v471_v26  ;;  %469 = vadd.xlane.f32.xlu0 %v468_v27 }
  0xac   : > { %478 = vadd.xlane.f32.xlu1 %v477_v30  ;;  %475 = vadd.xlane.f32.xlu0 %v474_v31 }
  0xb0   : > { %484 = vadd.xlane.f32.xlu1 %v483_v34  ;;  %481 = vadd.xlane.f32.xlu0 %v480_v35 }
  0xb4   : > { %490 = vadd.xlane.f32.xlu1 %v489_v38  ;;  %487 = vadd.xlane.f32.xlu0 %v486_v39 }
  0xb8   : > { %496 = vadd.xlane.f32.xlu1 %v495_v42  ;;  %493 = vadd.xlane.f32.xlu0 %v492_v43 }
  0xbc   : > { %502 = vadd.xlane.f32.xlu1 %v501_v46  ;;  %499 = vadd.xlane.f32.xlu0 %v498_v47 }
  0xc0   : > { %508 = vadd.xlane.f32.xlu1 %v507_v50  ;;  %505 = vadd.xlane.f32.xlu0 %v504_v51 }
  0xc4   : > { %514 = vadd.xlane.f32.xlu1 %v513_v54  ;;  %511 = vadd.xlane.f32.xlu0 %v510_v55 }
  0xc8   : > { %517 = vadd.xlane.f32.xlu1 %v516_v57 }
  0xcc   : > { %520 = vadd.xlane.f32.xlu1 %v519_v59 }
  0xd0   : > { %523 = vadd.xlane.f32.xlu1 %v522_v61 }
  0xd4   : > { %526 = vadd.xlane.f32.xlu1 %v525_v63 }
 0x11d   : > { %v440_v3 = vpop.xlane.xlu1 %439  ;;  %v434_v4 = vpop.xlane.xlu0 %433 }
 0x11e   : > { %v531_v6 = vmul.f32 0.03125, %v440_v3  ;;  %v529_v7 = vmul.f32 0.03125, %v434_v4 }
 0x120   : > { %v17200_v10 = vsub.f32 %v17043_v1, %v529_v7  ;;  %v17203_v15 = vsub.f32 %v17040_v0, %v531_v6 }
 0x121   : > { %v443_v11 = vpop.xlane.xlu1 %442  ;;  %v437_v14 = vpop.xlane.xlu0 %436 }
 0x122   : > { %v532_v18 = vmul.f32 0.03125, %v443_v11  ;;  %v530_v19 = vmul.f32 0.03125, %v437_v14  ;;  %v593_v22 = vmul.f32 %v17200_v10, %v17200_v10  ;;  %v595_v34 = vmul.f32 %v17203_v15, %v17203_v15 }
 0x124   : > { %v17208_v23 = vsub.f32 %v17053_v5, %v530_v19  ;;  %v625_v26 = vsel %vm431_vm0, %v593_v22, 0.0  ;;  %v17212_v27 = vsub.f32 %v17046_v2, %v532_v18  ;;  %v631_v50 = vsel %vm431_vm0, %v595_v34, 0.0 }
 0x125   : > { %v449_v1 = vpop.xlane.xlu1 %448  ;;  %626 = vadd.xlane.f32.xlu0 %v625_v26  ;;  %v446_v30 = vpop.xlane.xlu0 %445 }
 0x126   : > { %v534_v31 = vmul.f32 0.03125, %v449_v1  ;;  %v594_v0 = vmul.f32 %v17208_v23, %v17208_v23  ;;  %v533_v35 = vmul.f32 0.03125, %v446_v30  ;;  %v596_v42 = vmul.f32 %v17212_v27, %v17212_v27 }
 0x128   : > { %v17219_v38 = vsub.f32 %v17060_v8, %v534_v31  ;;  %v628_v5 = vsel %vm431_vm0, %v594_v0, 0.0  ;;  %v17223_v2 = vsub.f32 %v17063_v9, %v533_v35  ;;  %v634_v9 = vsel %vm431_vm0, %v596_v42, 0.0 }
 0x129   : > { %v455_v39 = vpop.xlane.xlu1 %454  ;;  %629 = vadd.xlane.f32.xlu0 %v628_v5  ;;  %v452_v43 = vpop.xlane.xlu0 %451 }
 0x12a   : > { %v536_v46 = vmul.f32 0.03125, %v455_v39  ;;  %v598_v47 = vmul.f32 %v17219_v38, %v17219_v38  ;;  %v535_v51 = vmul.f32 0.03125, %v452_v43  ;;  %v597_v57 = vmul.f32 %v17223_v2, %v17223_v2 }
 0x12c   : > { %v17231_v8 = vsub.f32 %v17070_v12, %v536_v46  ;;  %v640_v54 = vsel %vm431_vm0, %v598_v47, 0.0  ;;  %v17240_v3 = vsub.f32 %v17073_v13, %v535_v51  ;;  %v637_v11 = vsel %vm431_vm0, %v597_v57, 0.0 }
 0x12d   : > { %641 = vadd.xlane.f32.xlu1 %v640_v54  ;;  %v461_v55 = vpop.xlane.xlu1 %460  ;;  %632 = vadd.xlane.f32.xlu0 %v631_v50  ;;  %v458_v59 = vpop.xlane.xlu0 %457 }
 0x12e   : > { %v538_v61 = vmul.f32 0.03125, %v461_v55  ;;  %v600_v63 = vmul.f32 %v17231_v8, %v17231_v8  ;;  %v537_v12 = vmul.f32 0.03125, %v458_v59  ;;  %v599_v22 = vmul.f32 %v17240_v3, %v17240_v3 }
 0x130   : > { %v17243_v4 = vsub.f32 %v17080_v16, %v538_v61  ;;  %v646_v6 = vsel %vm431_vm0, %v600_v63, 0.0  ;;  %v17248_v14 = vsub.f32 %v17083_v17, %v537_v12  ;;  %v643_v5 = vsel %vm431_vm0, %v599_v22, 0.0 }
 0x131   : > { %647 = vadd.xlane.f32.xlu1 %v646_v6  ;;  %v467_v7 = vpop.xlane.xlu1 %466  ;;  %635 = vadd.xlane.f32.xlu0 %v634_v9  ;;  %v464_v18 = vpop.xlane.xlu0 %463 }
 0x132   : > { %v540_v19 = vmul.f32 0.03125, %v467_v7  ;;  %v602_v13 = vmul.f32 %v17243_v4, %v17243_v4  ;;  %v539_v16 = vmul.f32 0.03125, %v464_v18  ;;  %v601_v31 = vmul.f32 %v17248_v14, %v17248_v14 }
 0x134   : > { %v17255_v26 = vsub.f32 %v17090_v20, %v540_v19  ;;  %v652_v1 = vsel %vm431_vm0, %v602_v13, 0.0  ;;  %v17259_v17 = vsub.f32 %v17093_v21, %v539_v16  ;;  %v649_v21 = vsel %vm431_vm0, %v601_v31, 0.0  ;;  %v928_v31 = vld [vmem:[#allocation5 + $0x8] sm:$0xff] }
 0x135   : > { %653 = vadd.xlane.f32.xlu1 %v652_v1  ;;  %v473_v30 = vpop.xlane.xlu1 %472  ;;  %638 = vadd.xlane.f32.xlu0 %v637_v11  ;;  %v470_v0 = vpop.xlane.xlu0 %469 }
 0x136   : > { %v542_v34 = vmul.f32 0.03125, %v473_v30  ;;  %v604_v35 = vmul.f32 %v17255_v26, %v17255_v26  ;;  %v541_v20 = vmul.f32 0.03125, %v470_v0  ;;  %v603_v46 = vmul.f32 %v17259_v17, %v17259_v17  ;;  %v927_v30 = vld [vmem:[#allocation5] sm:$0xff] }
 0x137   : > { %v14469_v0 = vpack.c.bf16 %v928_v31, %v927_v30 }
 0x138   : > { %v17267_v39 = vsub.f32 %v17100_v24, %v542_v34  ;;  %v658_v42 = vsel %vm431_vm0, %v604_v35, 0.0  ;;  %v17276_v54 = vsub.f32 %v17103_v25, %v541_v20  ;;  %v655_v59 = vsel %vm431_vm0, %v603_v46, 0.0 }
 0x139   : > { %659 = vadd.xlane.f32.xlu1 %v658_v42  ;;  %v479_v43 = vpop.xlane.xlu1 %478  ;;  %644 = vadd.xlane.f32.xlu0 %v643_v5  ;;  %v476_v47 = vpop.xlane.xlu0 %475 }
 0x13a   : > { %v544_v50 = vmul.f32 0.03125, %v479_v43  ;;  %v606_v51 = vmul.f32 %v17267_v39, %v17267_v39  ;;  %v543_v24 = vmul.f32 0.03125, %v476_v47  ;;  %v605_v6 = vmul.f32 %v17276_v54, %v17276_v54  ;;  %14470 = vmatprep.subr.bf16.mxu0 %v14469_v0  ;;  %v929_v47 = vld [vmem:[#allocation5 + $0x10] sm:$0xff] }
 0x13b   : > { %14472 = vmatpush3.bf16.msra.mxu0 %v14469_v0 }
 0x13c   : > { %v17279_v55 = vsub.f32 %v17110_v28, %v544_v50  ;;  %v664_v9 = vsel %vm431_vm0, %v606_v51, 0.0  ;;  %v17284_v61 = vsub.f32 %v17113_v29, %v543_v24  ;;  %v661_v1 = vsel %vm431_vm0, %v605_v6, 0.0  ;;  %v930_v50 = vld [vmem:[#allocation5 + $0x18] sm:$0xff] }
 0x13d   : > { %665 = vadd.xlane.f32.xlu1 %v664_v9  ;;  %v485_v57 = vpop.xlane.xlu1 %484  ;;  %650 = vadd.xlane.f32.xlu0 %v649_v21  ;;  %v482_v63 = vpop.xlane.xlu0 %481  ;;  %v14473_v51 = vpack.c.bf16 %v930_v50, %v929_v47 }
 0x13e   : > { %v546_v12 = vmul.f32 0.03125, %v485_v57  ;;  %v608_v25 = vmul.f32 %v17279_v55, %v17279_v55  ;;  %v545_v28 = vmul.f32 0.03125, %v482_v63  ;;  %v607_v19 = vmul.f32 %v17284_v61, %v17284_v61 }
 0x13f   : > { %14474 = vmatprep.subr.bf16.mxu0 %v14473_v51 }
 0x140   : > { %v17291_v7 = vsub.f32 %v17120_v32, %v546_v12  ;;  %v670_v11 = vsel %vm431_vm0, %v608_v25, 0.0  ;;  %v17295_v29 = vsub.f32 %v17123_v33, %v545_v28  ;;  %v667_v5 = vsel %vm431_vm0, %v607_v19, 0.0  ;;  %14476 = vmatpush3.bf16.msra.mxu0 %v14473_v51 }
 0x141   : > { %671 = vadd.xlane.f32.xlu1 %v670_v11  ;;  %v491_v18 = vpop.xlane.xlu1 %490  ;;  %656 = vadd.xlane.f32.xlu0 %v655_v59  ;;  %v488_v13 = vpop.xlane.xlu0 %487 }
 0x142   : > { %v548_v22 = vmul.f32 0.03125, %v491_v18  ;;  %v610_v16 = vmul.f32 %v17291_v7, %v17291_v7  ;;  %v547_v32 = vmul.f32 0.03125, %v488_v13  ;;  %v609_v20 = vmul.f32 %v17295_v29, %v17295_v29 }
 0x144   : > { %v17303_v34 = vsub.f32 %v17130_v36, %v548_v22  ;;  %v676_v33 = vsel %vm431_vm0, %v610_v16, 0.0  ;;  %v17312_v46 = vsub.f32 %v17133_v37, %v547_v32  ;;  %v673_v59 = vsel %vm431_vm0, %v609_v20, 0.0 }
 0x145   : > { %677 = vadd.xlane.f32.xlu1 %v676_v33  ;;  %v497_v35 = vpop.xlane.xlu1 %496  ;;  %662 = vadd.xlane.f32.xlu0 %v661_v1  ;;  %v494_v42 = vpop.xlane.xlu0 %493 }
 0x146   : > { %v550_v43 = vmul.f32 0.03125, %v497_v35  ;;  %v612_v21 = vmul.f32 %v17303_v34, %v17303_v34  ;;  %v549_v36 = vmul.f32 0.03125, %v494_v42  ;;  %v611_v6 = vmul.f32 %v17312_v46, %v17312_v46 }
 0x148   : > { %v17315_v24 = vsub.f32 %v17140_v40, %v550_v43  ;;  %v682_v9 = vsel %vm431_vm0, %v612_v21, 0.0  ;;  %v17320_v63 = vsub.f32 %v17143_v41, %v549_v36  ;;  %v679_v1 = vsel %vm431_vm0, %v611_v6, 0.0 }
 0x149   : > { %683 = vadd.xlane.f32.xlu1 %v682_v9  ;;  %v503_v57 = vpop.xlane.xlu1 %502  ;;  %668 = vadd.xlane.f32.xlu0 %v667_v5  ;;  %v500_v37 = vpop.xlane.xlu0 %499 }
 0x14a   : > { %v552_v12 = vmul.f32 0.03125, %v503_v57  ;;  %v614_v25 = vmul.f32 %v17315_v24, %v17315_v24  ;;  %v551_v40 = vmul.f32 0.03125, %v500_v37  ;;  %v613_v19 = vmul.f32 %v17320_v63, %v17320_v63 }
 0x14c   : > { %v17327_v28 = vsub.f32 %v17150_v44, %v552_v12  ;;  %v688_v11 = vsel %vm431_vm0, %v614_v25, 0.0  ;;  %v17331_v41 = vsub.f32 %v17153_v45, %v551_v40  ;;  %v685_v45 = vsel %vm431_vm0, %v613_v19, 0.0 }
 0x14d   : > { %689 = vadd.xlane.f32.xlu1 %v688_v11  ;;  %v509_v18 = vpop.xlane.xlu1 %508  ;;  %674 = vadd.xlane.f32.xlu0 %v673_v59  ;;  %v506_v13 = vpop.xlane.xlu0 %505 }
 0x14e   : > { %v554_v22 = vmul.f32 0.03125, %v509_v18  ;;  %v616_v16 = vmul.f32 %v17327_v28, %v17327_v28  ;;  %v553_v44 = vmul.f32 0.03125, %v506_v13  ;;  %v615_v0 = vmul.f32 %v17331_v41, %v17331_v41 }
 0x150   : > { %v17339_v32 = vsub.f32 %v17160_v48, %v554_v22  ;;  %v694_v30 = vsel %vm431_vm0, %v616_v16, 0.0  ;;  %v17348_v20 = vsub.f32 %v17163_v49, %v553_v44  ;;  %v691_v36 = vsel %vm431_vm0, %v615_v0, 0.0 }
 0x151   : > { %695 = vadd.xlane.f32.xlu1 %v694_v30  ;;  %v515_v31 = vpop.xlane.xlu1 %514  ;;  %680 = vadd.xlane.f32.xlu0 %v679_v1  ;;  %v512_v33 = vpop.xlane.xlu0 %511 }
 0x152   : > { %v556_v35 = vmul.f32 0.03125, %v515_v31  ;;  %v618_v5 = vmul.f32 %v17339_v32, %v17339_v32  ;;  %v555_v48 = vmul.f32 0.03125, %v512_v33  ;;  %v617_v49 = vmul.f32 %v17348_v20, %v17348_v20 }
 0x154   : > { %v17351_v42 = vsub.f32 %v17170_v52, %v556_v35  ;;  %v700_v43 = vsel %vm431_vm0, %v618_v5, 0.0  ;;  %v17358_v51 = vsub.f32 %v17173_v53, %v555_v48  ;;  %v697_v37 = vsel %vm431_vm0, %v617_v49, 0.0 }
 0x155   : > { %701 = vadd.xlane.f32.xlu1 %v700_v43  ;;  %v518_v21 = vpop.xlane.xlu1 %517  ;;  %686 = vadd.xlane.f32.xlu0 %v685_v45 }
 0x156   : > { %v557_v47 = vmul.f32 0.03125, %v518_v21  ;;  %v620_v50 = vmul.f32 %v17351_v42, %v17351_v42  ;;  %v619_v12 = vmul.f32 %v17358_v51, %v17358_v51 }
 0x158   : > { %v706_v52 = vsel %vm431_vm0, %v620_v50, 0.0  ;;  %v17364_v57 = vsub.f32 %v17180_v56, %v557_v47  ;;  %v703_v11 = vsel %vm431_vm0, %v619_v12, 0.0  ;;  %v17394_v12 = vld [vmem:[%s22016_s1] ss:$0 sm:$0xff] }
 0x159   : > { %707 = vadd.xlane.f32.xlu1 %v706_v52  ;;  %v521_v9 = vpop.xlane.xlu1 %520  ;;  %692 = vadd.xlane.f32.xlu0 %v691_v36 }
 0x15a   : > { %v558_v59 = vmul.f32 0.03125, %v521_v9  ;;  %v621_v56 = vmul.f32 %v17364_v57, %v17364_v57 }
 0x15c   : > { %v17370_v53 = vsub.f32 %v17185_v58, %v558_v59  ;;  %v709_v22 = vsel %vm431_vm0, %v621_v56, 0.0 }
 0x15d   : > { %v524_v25 = vpop.xlane.xlu1 %523  ;;  %698 = vadd.xlane.f32.xlu0 %v697_v37 }
 0x15e   : > { %v559_v6 = vmul.f32 0.03125, %v524_v25  ;;  %v622_v40 = vmul.f32 %v17370_v53, %v17370_v53 }
 0x160   : > { %v17378_v18 = vsub.f32 %v17190_v60, %v559_v6  ;;  %v712_v19 = vsel %vm431_vm0, %v622_v40, 0.0 }
 0x161   : > { %713 = vadd.xlane.f32.xlu1 %v712_v19  ;;  %v527_v13 = vpop.xlane.xlu1 %526  ;;  %704 = vadd.xlane.f32.xlu0 %v703_v11 }
 0x162   : > { %v560_v58 = vmul.f32 0.03125, %v527_v13  ;;  %v623_v16 = vmul.f32 %v17378_v18, %v17378_v18  ;;  %v17400_v13 = vld [vmem:[%s22017_s2] ss:$0 sm:$0xff] }
 0x164   : > { %v17385_v1 = vsub.f32 %v17195_v62, %v560_v58  ;;  %v715_v60 = vsel %vm431_vm0, %v623_v16, 0.0 }
 0x165   : > { %710 = vadd.xlane.f32.xlu0 %v709_v22 }
 0x166   : > { %v624_v44 = vmul.f32 %v17385_v1, %v17385_v1 }
 0x168   : > { %v718_v30 = vsel %vm431_vm0, %v624_v44, 0.0 }
 0x169   : > { %719 = vadd.xlane.f32.xlu1 %v718_v30  ;;  %716 = vadd.xlane.f32.xlu0 %v715_v60 }
 0x1b2   : > { %v627_v31 = vpop.xlane.xlu0 %626 }
 0x1b3   : > { %v721_v45 = vmul.f32 0.03125, %v627_v31 }
 0x1b5   : > { %v753_v0 = vadd.f32 1e-05, %v721_v45 }
 0x1b6   : > { %v630_v33 = vpop.xlane.xlu0 %629 }
 0x1b7   : > { %15957 = vrsqrt.f32 %v753_v0  ;;  %v722_v35 = vmul.f32 0.03125, %v630_v33 }
 0x1b9   : > { %v754_v5 = vadd.f32 1e-05, %v722_v35 }
 0x1ba   : > { %v642_v48 = vpop.xlane.xlu1 %641  ;;  %v633_v62 = vpop.xlane.xlu0 %632 }
 0x1bb   : > { %15959 = vrsqrt.f32 %v754_v5  ;;  %v726_v43 = vmul.f32 0.03125, %v642_v48  ;;  %v723_v21 = vmul.f32 0.03125, %v633_v62 }
 0x1bd   : > { %v755_v36 = vadd.f32 1e-05, %v723_v21  ;;  %v758_v49 = vadd.f32 1e-05, %v726_v43 }
 0x1be   : > { %v648_v47 = vpop.xlane.xlu1 %647  ;;  %v636_v50 = vpop.xlane.xlu0 %635 }
 0x1bf   : > { %v728_v52 = vmul.f32 0.03125, %v648_v47  ;;  %v724_v9 = vmul.f32 0.03125, %v636_v50  ;;  %15961 = vrsqrt.f32 %v755_v36 }
 0x1c0   : > { %15963 = vrsqrt.f32 %v758_v49 }
 0x1c1   : > { %v15958_v59 = vpop.eup %15957  ;;  %v756_v37 = vadd.f32 1e-05, %v724_v9  ;;  %v760_v11 = vadd.f32 1e-05, %v728_v52 }
 0x1c2   : > { %v654_v25 = vpop.xlane.xlu1 %653  ;;  %v639_v6 = vpop.xlane.xlu0 %638  ;;  %v817_v40 = vmul.f32 %v15958_v59, %v17200_v10 }
 0x1c3   : > { %v730_v56 = vmul.f32 0.03125, %v654_v25  ;;  %v725_v19 = vmul.f32 0.03125, %v639_v6  ;;  %15965 = vrsqrt.f32 %v756_v37 }
 0x1c4   : > { %v856_v58 = vmul.f32 %v17394_v12, %v817_v40  ;;  %15967 = vrsqrt.f32 %v760_v11 }
 0x1c5   : > { %v15960_v22 = vpop.eup %15959  ;;  %v757_v16 = vadd.f32 1e-05, %v725_v19  ;;  %v762_v44 = vadd.f32 1e-05, %v730_v56 }
 0x1c6   : > { %v660_v60 = vpop.xlane.xlu1 %659  ;;  %v645_v30 = vpop.xlane.xlu0 %644  ;;  %v895_v31 = vadd.f32 %v17400_v13, %v856_v58  ;;  %v818_v10 = vmul.f32 %v15960_v22, %v17208_v23 }
 0x1c7   : > { %v732_v45 = vmul.f32 0.03125, %v660_v60  ;;  %v727_v0 = vmul.f32 0.03125, %v645_v30  ;;  %15969 = vrsqrt.f32 %v757_v16 }
 0x1c8   : > { %13325 = vmatprep.mubr.msk.f32.mxu0 %vm431_vm0, %v895_v31  ;;  %v857_v33 = vmul.f32 %v17394_v12, %v818_v10  ;;  %15971 = vrsqrt.f32 %v762_v44 }
 0x1c9   : > { %v759_v35 = vadd.f32 1e-05, %v727_v0  ;;  %v15962_v5 = vpop.eup %15961  ;;  %v764_v21 = vadd.f32 1e-05, %v732_v45 }
 0x1ca   : > { %v666_v48 = vpop.xlane.xlu1 %665  ;;  %v651_v62 = vpop.xlane.xlu0 %650  ;;  %v896_v43 = vadd.f32 %v17400_v13, %v857_v33  ;;  %v819_v23 = vmul.f32 %v15962_v5, %v17203_v15 }
 0x1cb   : > { %v734_v36 = vmul.f32 0.03125, %v666_v48  ;;  %v729_v47 = vmul.f32 0.03125, %v651_v62  ;;  %15973 = vrsqrt.f32 %v759_v35  ;;  %v15964_v50 = vpop.eup %15963 }
 0x1cc   : > { %13326 = vmatmul.mubr.msk.f32.vlgmr.msra.gmra.mrb[0].mxu0 %vm431_vm0, %v896_v43  ;;  %v858_v52 = vmul.f32 %v17394_v12, %v819_v23  ;;  %15975 = vrsqrt.f32 %v764_v21  ;;  %v822_v15 = vmul.f32 %v15964_v50, %v17219_v38 }
 0x1cd   : > { %v761_v49 = vadd.f32 1e-05, %v729_v47  ;;  %v15966_v9 = vpop.eup %15965  ;;  %v766_v59 = vadd.f32 1e-05, %v734_v36 }
 0x1ce   : > { %v672_v37 = vpop.xlane.xlu1 %671  ;;  %v657_v25 = vpop.xlane.xlu0 %656  ;;  %v897_v11 = vadd.f32 %v17400_v13, %v858_v52  ;;  %v820_v56 = vmul.f32 %v15966_v9, %v17212_v27  ;;  %v861_v38 = vmul.f32 %v17394_v12, %v822_v15 }
 0x1cf   : > { %v736_v6 = vmul.f32 0.03125, %v672_v37  ;;  %v731_v40 = vmul.f32 0.03125, %v657_v25  ;;  %15977 = vrsqrt.f32 %v761_v49  ;;  %v15968_v19 = vpop.eup %15967 }
 0x1d0   : > { %13328 = vmatprep.mubr.msk.f32.mxu0 %vm431_vm0, %v897_v11  ;;  %15979 = vrsqrt.f32 %v766_v59  ;;  %v859_v60 = vmul.f32 %v17394_v12, %v820_v56  ;;  %v824_v33 = vmul.f32 %v15968_v19, %v17231_v8  ;;  %v900_v23 = vadd.f32 %v17400_v13, %v861_v38 }
 0x1d1   : > { %v763_v58 = vadd.f32 1e-05, %v731_v40  ;;  %v15970_v22 = vpop.eup %15969  ;;  %v768_v30 = vadd.f32 1e-05, %v736_v6 }
 0x1d2   : > { %v678_v16 = vpop.xlane.xlu1 %677  ;;  %v663_v44 = vpop.xlane.xlu0 %662  ;;  %v821_v45 = vmul.f32 %v15970_v22, %v17223_v2  ;;  %v898_v27 = vadd.f32 %v17400_v13, %v859_v60  ;;  %v863_v8 = vmul.f32 %v17394_v12, %v824_v33 }
 0x1d3   : > { %v738_v31 = vmul.f32 0.03125, %v678_v16  ;;  %v733_v10 = vmul.f32 0.03125, %v663_v44  ;;  %v15972_v0 = vpop.eup %15971  ;;  %15981 = vrsqrt.f32 %v763_v58 }
 0x1d4   : > { %v860_v5 = vmul.f32 %v17394_v12, %v821_v45  ;;  %13329 = vmatmul.mubr.msk.f32.gmra.mrb[2].mxu0 %vm431_vm0, %v898_v27  ;;  %15983 = vrsqrt.f32 %v768_v30  ;;  %v826_v9 = vmul.f32 %v15972_v0, %v17243_v4  ;;  %v902_v58 = vadd.f32 %v17400_v13, %v863_v8 }
 0x1d5   : > { %v765_v35 = vadd.f32 1e-05, %v733_v10  ;;  %v15974_v48 = vpop.eup %15973  ;;  %v770_v62 = vadd.f32 1e-05, %v738_v31 }
 0x1d6   : > { %v684_v43 = vpop.xlane.xlu1 %683  ;;  %v669_v21 = vpop.xlane.xlu0 %668  ;;  %v899_v47 = vadd.f32 %v17400_v13, %v860_v5  ;;  %v823_v50 = vmul.f32 %v15974_v48, %v17240_v3  ;;  %v865_v16 = vmul.f32 %v17394_v12, %v826_v9 }
 0x1d7   : > { %v740_v36 = vmul.f32 0.03125, %v684_v43  ;;  %v735_v2 = vmul.f32 0.03125, %v669_v21  ;;  %15985 = vrsqrt.f32 %v765_v35  ;;  %v15976_v49 = vpop.eup %15975 }
 0x1d8   : > { %13331 = vmatprep.mubr.msk.f32.mxu0 %vm431_vm0, %v899_v47  ;;  %15987 = vrsqrt.f32 %v770_v62  ;;  %v862_v6 = vmul.f32 %v17394_v12, %v823_v50  ;;  %v828_v44 = vmul.f32 %v15976_v49, %v17255_v26  ;;  %v904_v26 = vadd.f32 %v17400_v13, %v865_v16 }
 0x1d9   : > { %v767_v52 = vadd.f32 1e-05, %v735_v2  ;;  %v15978_v59 = vpop.eup %15977  ;;  %13332 = vmatmul.mubr.msk.f32.gmra.mrb[4].mxu0 %vm431_vm0, %v900_v23  ;;  %v772_v40 = vadd.f32 1e-05, %v740_v36 }
 0x1da   : > { %v690_v37 = vpop.xlane.xlu1 %689  ;;  %v675_v25 = vpop.xlane.xlu0 %674  ;;  %v825_v3 = vmul.f32 %v15978_v59, %v17248_v14  ;;  %v901_v19 = vadd.f32 %v17400_v13, %v862_v6  ;;  %v867_v35 = vmul.f32 %v17394_v12, %v828_v44 }
 0x1db   : > { %v742_v11 = vmul.f32 0.03125, %v690_v37  ;;  %v737_v56 = vmul.f32 0.03125, %v675_v25  ;;  %v15980_v15 = vpop.eup %15979  ;;  %15989 = vrsqrt.f32 %v767_v52 }
 0x1dc   : > { %v864_v22 = vmul.f32 %v17394_v12, %v825_v3  ;;  %13334 = vmatprep.mubr.msk.f32.mxu0 %vm431_vm0, %v901_v19  ;;  %15991 = vrsqrt.f32 %v772_v40  ;;  %v830_v5 = vmul.f32 %v15980_v15, %v17267_v39  ;;  %v906_v49 = vadd.f32 %v17400_v13, %v867_v35 }
 0x1dd   : > { %v769_v4 = vadd.f32 1e-05, %v737_v56  ;;  %v15982_v60 = vpop.eup %15981  ;;  %v774_v30 = vadd.f32 1e-05, %v742_v11  ;;  %13335 = vmatmul.mubr.msk.f32.gmra.mrb[6].mxu0 %vm431_vm0, %v902_v58 }
 0x1de   : > { %v696_v31 = vpop.xlane.xlu1 %695  ;;  %v681_v10 = vpop.xlane.xlu0 %680  ;;  %v903_v0 = vadd.f32 %v17400_v13, %v864_v22  ;;  %v827_v27 = vmul.f32 %v15982_v60, %v17259_v17  ;;  %v869_v9 = vmul.f32 %v17394_v12, %v830_v5 }
 0x1df   : > { %v744_v14 = vmul.f32 0.03125, %v696_v31  ;;  %v739_v45 = vmul.f32 0.03125, %v681_v10  ;;  %15993 = vrsqrt.f32 %v769_v4  ;;  %v15984_v38 = vpop.eup %15983 }
 0x1e0   : > { %13337 = vmatprep.mubr.msk.f32.mxu0 %vm431_vm0, %v903_v0  ;;  %15995 = vrsqrt.f32 %v774_v30  ;;  %v866_v21 = vmul.f32 %v17394_v12, %v827_v27  ;;  %v832_v8 = vmul.f32 %v15984_v38, %v17279_v55  ;;  %v908_v19 = vadd.f32 %v17400_v13, %v869_v9 }
 0x1e1   : > { %v771_v33 = vadd.f32 1e-05, %v739_v45  ;;  %v15986_v48 = vpop.eup %15985  ;;  %v776_v36 = vadd.f32 1e-05, %v744_v14  ;;  %13338 = vmatmul.mubr.msk.f32.gmra.mrb[8].mxu0 %vm431_vm0, %v904_v26 }
 0x1e2   : > { %v702_v62 = vpop.xlane.xlu1 %701  ;;  %v687_v43 = vpop.xlane.xlu0 %686  ;;  %v829_v47 = vmul.f32 %v15986_v48, %v17276_v54  ;;  %v905_v50 = vadd.f32 %v17400_v13, %v866_v21  ;;  %v871_v56 = vmul.f32 %v17394_v12, %v832_v8 }
 0x1e3   : > { %v746_v17 = vmul.f32 0.03125, %v702_v62  ;;  %v741_v2 = vmul.f32 0.03125, %v687_v43  ;;  %v15988_v23 = vpop.eup %15987  ;;  %15997 = vrsqrt.f32 %v771_v33 }
 0x1e4   : > { %v868_v52 = vmul.f32 %v17394_v12, %v829_v47  ;;  %13340 = vmatprep.mubr.msk.f32.mxu0 %vm431_vm0, %v905_v50  ;;  %15999 = vrsqrt.f32 %v776_v36  ;;  %v834_v58 = vmul.f32 %v15988_v23, %v17291_v7  ;;  %v910_v10 = vadd.f32 %v17400_v13, %v871_v56 }
 0x1e5   : > { %v773_v39 = vadd.f32 1e-05, %v741_v2  ;;  %v15990_v59 = vpop.eup %15989  ;;  %v778_v54 = vadd.f32 1e-05, %v746_v17  ;;  %13341 = vmatmul.mubr.msk.f32.gmra.mrb[10].mxu0 %vm431_vm0, %v906_v49 }
 0x1e6   : > { %v708_v37 = vpop.xlane.xlu1 %707  ;;  %v693_v25 = vpop.xlane.xlu0 %692  ;;  %v907_v40 = vadd.f32 %v17400_v13, %v868_v52  ;;  %v831_v11 = vmul.f32 %v15990_v59, %v17284_v61  ;;  %v873_v45 = vmul.f32 %v17394_v12, %v834_v58 }
 0x1e7   : > { %v743_v6 = vmul.f32 0.03125, %v693_v25  ;;  %16001 = vrsqrt.f32 %v773_v39  ;;  %v748_v55 = vmul.f32 0.03125, %v708_v37  ;;  %v15992_v3 = vpop.eup %15991 }
 0x1e8   : > { %13343 = vmatprep.mubr.msk.f32.mxu0 %vm431_vm0, %v907_v40  ;;  %v870_v16 = vmul.f32 %v17394_v12, %v831_v11  ;;  %16003 = vrsqrt.f32 %v778_v54  ;;  %v836_v0 = vmul.f32 %v15992_v3, %v17303_v34  ;;  %v912_v21 = vadd.f32 %v17400_v13, %v873_v45 }
 0x1e9   : > { %v775_v15 = vadd.f32 1e-05, %v743_v6  ;;  %v15994_v4 = vpop.eup %15993  ;;  %13344 = vmatmul.mubr.msk.f32.gmra.mrb[12].mxu0 %vm431_vm0, %v908_v19  ;;  %v780_v30 = vadd.f32 1e-05, %v748_v55 }
 0x1ea   : > { %v699_v22 = vpop.xlane.xlu0 %698  ;;  %v833_v61 = vmul.f32 %v15994_v4, %v17295_v29  ;;  %v15996_v60 = vpop.eup %15995  ;;  %v909_v31 = vadd.f32 %v17400_v13, %v870_v16  ;;  %v875_v36 = vmul.f32 %v17394_v12, %v836_v0 }
 0x1eb   : > { %v745_v44 = vmul.f32 0.03125, %v699_v22  ;;  %16005 = vrsqrt.f32 %v775_v15  ;;  %v838_v48 = vmul.f32 %v15996_v60, %v17315_v24 }
 0x1ec   : > { %v872_v7 = vmul.f32 %v17394_v12, %v833_v61  ;;  %13346 = vmatprep.mubr.msk.f32.mxu0 %vm431_vm0, %v909_v31  ;;  %v914_v49 = vadd.f32 %v17400_v13, %v875_v36 }
 0x1ed   : > { %v777_v14 = vadd.f32 1e-05, %v745_v44  ;;  %v15998_v27 = vpop.eup %15997  ;;  %13347 = vmatmul.mubr.msk.f32.gmra.mrb[14].mxu0 %vm431_vm0, %v910_v10  ;;  %v877_v50 = vmul.f32 %v17394_v12, %v838_v48 }
 0x1ee   : > { %v714_v38 = vpop.xlane.xlu1 %713  ;;  %v705_v33 = vpop.xlane.xlu0 %704  ;;  %v911_v35 = vadd.f32 %v17400_v13, %v872_v7  ;;  %v835_v5 = vmul.f32 %v15998_v27, %v17312_v46 }
 0x1ef   : > { %16007 = vrsqrt.f32 %v777_v14  ;;  %v750_v29 = vmul.f32 0.03125, %v714_v38  ;;  %v747_v26 = vmul.f32 0.03125, %v705_v33  ;;  %v16000_v62 = vpop.eup %15999  ;;  %v916_v40 = vadd.f32 %v17400_v13, %v877_v50 }
 0x1f0   : > { %16009 = vrsqrt.f32 %v780_v30  ;;  %13349 = vmatprep.mubr.msk.f32.mxu0 %vm431_vm0, %v911_v35  ;;  %v874_v47 = vmul.f32 %v17394_v12, %v835_v5  ;;  %v840_v9 = vmul.f32 %v16000_v62, %v17327_v28 }
 0x1f1   : > { %v782_v43 = vadd.f32 1e-05, %v750_v29  ;;  %v779_v34 = vadd.f32 1e-05, %v747_v26  ;;  %v16002_v17 = vpop.eup %16001  ;;  %13350 = vmatmul.mubr.msk.f32.gmra.mrb[16].mxu0 %vm431_vm0, %v912_v21 }
 0x1f2   : > { %v711_v2 = vpop.xlane.xlu0 %710  ;;  %v837_v46 = vmul.f32 %v16002_v17, %v17320_v63  ;;  %v913_v24 = vadd.f32 %v17400_v13, %v874_v47  ;;  %v16004_v8 = vpop.eup %16003  ;;  %v879_v28 = vmul.f32 %v17394_v12, %v840_v9 }
 0x1f3   : > { %16011 = vrsqrt.f32 %v782_v43  ;;  %v749_v23 = vmul.f32 0.03125, %v711_v2  ;;  %v842_v15 = vmul.f32 %v16004_v8, %v17339_v32 }
 0x1f4   : > { %16013 = vrsqrt.f32 %v779_v34  ;;  %v876_v52 = vmul.f32 %v17394_v12, %v837_v46  ;;  %13352 = vmatprep.mubr.msk.f32.mxu0 %vm431_vm0, %v913_v24  ;;  %v918_v44 = vadd.f32 %v17400_v13, %v879_v28 }
 0x1f5   : > { %v781_v39 = vadd.f32 1e-05, %v749_v23  ;;  %v16006_v59 = vpop.eup %16005  ;;  %13353 = vmatmul.mubr.msk.f32.gmra.mrb[18].mxu0 %vm431_vm0, %v914_v49  ;;  %v881_v61 = vmul.f32 %v17394_v12, %v842_v15 }
 0x1f6   : > { %v720_v37 = vpop.xlane.xlu1 %719  ;;  %v717_v25 = vpop.xlane.xlu0 %716  ;;  %v915_v6 = vadd.f32 %v17400_v13, %v876_v52  ;;  %v839_v55 = vmul.f32 %v16006_v59, %v17331_v41 }
 0x1f7   : > { %16015 = vrsqrt.f32 %v781_v39  ;;  %v752_v63 = vmul.f32 0.03125, %v720_v37  ;;  %v751_v54 = vmul.f32 0.03125, %v717_v25  ;;  %v920_v10 = vadd.f32 %v17400_v13, %v881_v61 }
 0x1f8   : > { %13355 = vmatprep.mubr.msk.f32.mxu0 %vm431_vm0, %v915_v6  ;;  %v878_v58 = vmul.f32 %v17394_v12, %v839_v55 }
 0x1f9   : > { %v16008_v11 = vpop.eup %16007  ;;  %v784_v56 = vadd.f32 1e-05, %v752_v63  ;;  %v783_v3 = vadd.f32 1e-05, %v751_v54  ;;  %13356 = vmatmul.mubr.msk.f32.gmra.mrb[20].mxu0 %vm431_vm0, %v916_v40 }
 0x1fa   : > { %v16010_v19 = vpop.eup %16009  ;;  %v841_v4 = vmul.f32 %v16008_v11, %v17348_v20  ;;  %v917_v41 = vadd.f32 %v17400_v13, %v878_v58 }
 0x1fb   : > { %16017 = vrsqrt.f32 %v784_v56  ;;  %v844_v32 = vmul.f32 %v16010_v19, %v17351_v42 }
 0x1fc   : > { %16019 = vrsqrt.f32 %v783_v3  ;;  %v880_v22 = vmul.f32 %v17394_v12, %v841_v4  ;;  %13358 = vmatprep.mubr.msk.f32.mxu0 %vm431_vm0, %v917_v41 }
 0x1fd   : > { %v16012_v16 = vpop.eup %16011  ;;  %13359 = vmatmul.mubr.msk.f32.gmra.mrb[22].mxu0 %vm431_vm0, %v918_v44  ;;  %v883_v7 = vmul.f32 %v17394_v12, %v844_v32 }
 0x1fe   : > { %v16014_v60 = vpop.eup %16013  ;;  %v919_v20 = vadd.f32 %v17400_v13, %v880_v22  ;;  %v846_v42 = vmul.f32 %v16012_v16, %v17370_v53 }
 0x1ff   : > { %v843_v30 = vmul.f32 %v16014_v60, %v17358_v51  ;;  %v922_v38 = vadd.f32 %v17400_v13, %v883_v7 }
 0x200   : > { %13361 = vmatprep.mubr.msk.f32.mxu0 %vm431_vm0, %v919_v20  ;;  %v885_v33 = vmul.f32 %v17394_v12, %v846_v42 }
 0x201   : > { %v16016_v31 = vpop.eup %16015  ;;  %v882_v14 = vmul.f32 %v17394_v12, %v843_v30  ;;  %13362 = vmatmul.mubr.msk.f32.gmra.mrb[24].mxu0 %vm431_vm0, %v920_v10 }
 0x202   : > { %v845_v45 = vmul.f32 %v16016_v31, %v17364_v57  ;;  %v924_v5 = vadd.f32 %v17400_v13, %v885_v33 }
 0x203   : > { %v921_v0 = vadd.f32 %v17400_v13, %v882_v14 }
 0x204   : > { %v884_v27 = vmul.f32 %v17394_v12, %v845_v45 }
 0x205   : > { %v16018_v51 = vpop.eup %16017  ;;  %13364 = vmatprep.mubr.msk.f32.mxu0 %vm431_vm0, %v921_v0 }
 0x206   : > { %v16020_v29 = vpop.eup %16019  ;;  %v923_v26 = vadd.f32 %v17400_v13, %v884_v27  ;;  %v848_v53 = vmul.f32 %v16018_v51, %v17385_v1  ;;  %13365 = vmatmul.mubr.msk.f32.gmra.mrb[26].mxu0 %vm431_vm0, %v922_v38 }
 0x207   : > { %v847_v57 = vmul.f32 %v16020_v29, %v17378_v18  ;;  %v17532_v18 = vld [vmem:[%s22019_s4] ss:$0 sm:$0xff] }
 0x208   : > { %13367 = vmatprep.mubr.msk.f32.mxu0 %vm431_vm0, %v923_v26  ;;  %v887_v35 = vmul.f32 %v17394_v12, %v848_v53 }
 0x209   : > { %v886_v48 = vmul.f32 %v17394_v12, %v847_v57 }
 0x20a   : > { %13368 = vmatmul.mubr.msk.f32.gmra.mrb[28].mxu0 %vm431_vm0, %v924_v5  ;;  %v926_v43 = vadd.f32 %v17400_v13, %v887_v35 }
 0x20b   : > { %v925_v62 = vadd.f32 %v17400_v13, %v886_v48 }
 0x20d   : > { %13370 = vmatprep.mubr.msk.f32.mxu0 %vm431_vm0, %v925_v62 }
 0x20e   : > { %13371 = vmatmul.mubr.msk.f32.gmra.mrb[30].mxu0 %vm431_vm0, %v926_v43 }
 0x29f   : > { %v13327_v1 = vpop.f32.mrb[0].mxu0 }
 0x2a0   : > { %v17535_v34 = vadd.f32 %v13327_v1, %v17532_v18  ;;  %v1100_v12 = vpop.f32.mrb[1].mxu0 }
 0x2a1   : > { %v1101_v21 = vadd.f32 %v17532_v18, %v1100_v12 }
 0x2a2   : > { %1389 = vrot.lane.b32.xlu0 %v17535_v34, %s16745_s19  ;;  %1293 = vrot.lane.b32.xlu1 %v17535_v34, %s16746_s7 }
 0x2a3   : > { %v1579_v13 = vmul.f32 0.35355338, %v1101_v21  ;;  %v15317_v36 = vpack.i.bf16 %v17535_v34, %v1101_v21 }
 0x2a5   : > { %13381 = vmatprep.mubr.msk.f32.mxu1 %vm1715_vm1, %v1579_v13 }
 0x2a6   : > { %1485 = vrot.lane.b32.xlu0 %v17535_v34, %s16747_s23  ;;  %15318 = vrot.lane.b32.xlu1 %v15317_v36, %s16748_s27 }
 0x2a7   : > { %v13330_v17 = vpop.f32.mrb[2].mxu0 }
 0x2a8   : > { %v17548_v2 = vadd.f32 %v13330_v17, %v17532_v18  ;;  %v1110_v47 = vpop.f32.mrb[3].mxu0 }
 0x2a9   : > { %v17553_v23 = vadd.f32 %v17532_v18, %v1110_v47 }
 0x2aa   : > { %1483 = vrot.lane.b32.xlu1 %v1101_v21, %s16747_s23  ;;  %1291 = vrot.lane.b32.xlu0 %v1101_v21, %s16746_s7 }
 0x2ab   : > { %v15327_v24 = vpack.i.bf16 %v17548_v2, %v17553_v23 }
 0x2ac   : > { %v13333_v46 = vpop.f32.mrb[4].mxu0 }
 0x2ad   : > { %v17558_v50 = vadd.f32 %v13333_v46, %v17532_v18  ;;  %v1120_v8 = vpop.f32.mrb[5].mxu0 }
 0x2ae   : > { %1387 = vrot.lane.b32.xlu0 %v1101_v21, %s16745_s19  ;;  %1297 = vrot.lane.b32.xlu1 %v17548_v2, %s16746_s7  ;;  %v17564_v39 = vadd.f32 %v17532_v18, %v1120_v8 }
 0x2b0   : > { %v15337_v49 = vpack.i.bf16 %v17558_v50, %v17564_v39  ;;  %v13336_v52 = vpop.f32.mrb[6].mxu0 }
 0x2b1   : > { %v17572_v9 = vadd.f32 %v13336_v52, %v17532_v18  ;;  %v1130_v59 = vpop.f32.mrb[7].mxu0 }
 0x2b2   : > { %15323 = vrot.lane.b32.xlu0 %v15317_v36, %s16749_s25  ;;  %1393 = vrot.lane.b32.xlu1 %v17548_v2, %s16745_s19  ;;  %v17575_v37 = vadd.f32 %v17532_v18, %v1130_v59 }
 0x2b4   : > { %v13339_v25 = vpop.f32.mrb[8].mxu0  ;;  %v15347_v63 = vpack.i.bf16 %v17572_v9, %v17575_v37 }
 0x2b5   : > { %v17584_v54 = vadd.f32 %v13339_v25, %v17532_v18  ;;  %v1140_v6 = vpop.f32.mrb[9].mxu0 }
 0x2b6   : > { %1489 = vrot.lane.b32.xlu0 %v17548_v2, %s16747_s23  ;;  %1295 = vrot.lane.b32.xlu1 %v17553_v23, %s16746_s7  ;;  %v17587_v40 = vadd.f32 %v17532_v18, %v1140_v6 }
 0x2b8   : > { %v13342_v55 = vpop.f32.mrb[10].mxu0  ;;  %v15357_v11 = vpack.i.bf16 %v17584_v54, %v17587_v40 }
 0x2b9   : > { %v17595_v56 = vadd.f32 %v13342_v55, %v17532_v18  ;;  %v1150_v3 = vpop.f32.mrb[11].mxu0 }
 0x2ba   : > { %15328 = vrot.lane.b32.xlu0 %v15327_v24, %s16748_s27  ;;  %1391 = vrot.lane.b32.xlu1 %v17553_v23, %s16745_s19  ;;  %v17598_v28 = vadd.f32 %v17532_v18, %v1150_v3 }
 0x2bc   : > { %v13345_v15 = vpop.f32.mrb[12].mxu0  ;;  %v15367_v19 = vpack.i.bf16 %v17595_v56, %v17598_v28 }
 0x2bd   : > { %v1160_v58 = vpop.f32.mrb[13].mxu0  ;;  %v17697_v33 = vadd.f32 %v13345_v15, %v17532_v18 }
 0x2be   : > { %15333 = vrot.lane.b32.xlu0 %v15327_v24, %s16749_s25  ;;  %1487 = vrot.lane.b32.xlu1 %v17553_v23, %s16747_s23  ;;  %v17700_v29 = vadd.f32 %v17532_v18, %v1160_v58 }
 0x2c0   : > { %v13348_v4 = vpop.f32.mrb[14].mxu0  ;;  %v15377_v26 = vpack.i.bf16 %v17697_v33, %v17700_v29 }
 0x2c1   : > { %v1170_v41 = vpop.f32.mrb[15].mxu0  ;;  %v17716_v53 = vadd.f32 %v13348_v4, %v17532_v18 }
 0x2c2   : > { %1397 = vrot.lane.b32.xlu0 %v17558_v50, %s16745_s19  ;;  %1301 = vrot.lane.b32.xlu1 %v17558_v50, %s16746_s7  ;;  %v17723_v57 = vadd.f32 %v17532_v18, %v1170_v41 }
 0x2c4   : > { %v17609_v22 = vpop.f32.mrb[16].mxu0  ;;  %v15392_v43 = vpack.i.bf16 %v17716_v53, %v17723_v57 }
 0x2c5   : > { %v1180_v16 = vpop.f32.mrb[17].mxu0  ;;  %v17755_v47 = vadd.f32 %v17609_v22, %v17532_v18 }
 0x2c6   : > { %1493 = vrot.lane.b32.xlu0 %v17558_v50, %s16747_s23  ;;  %15338 = vrot.lane.b32.xlu1 %v15337_v49, %s16748_s27  ;;  %v17615_v44 = vadd.f32 %v17532_v18, %v1180_v16 }
 0x2c8   : > { %v17617_v61 = vpop.f32.mrb[18].mxu0  ;;  %v1595_v32 = vmul.f32 0.35355338, %v17615_v44  ;;  %v15397_v8 = vpack.i.bf16 %v17755_v47, %v17615_v44 }
 0x2c9   : > { %v17624_v60 = vpop.f32.mrb[19].mxu0  ;;  %v17793_v55 = vadd.f32 %v17617_v61, %v17532_v18  ;;  %v1580_v61 = vmul.f32 0.35355338, %v17535_v34 }
 0x2ca   : > { %1491 = vrot.lane.b32.xlu1 %v17564_v39, %s16747_s23  ;;  %1299 = vrot.lane.b32.xlu0 %v17564_v39, %s16746_s7  ;;  %v17805_v4 = vadd.f32 %v17532_v18, %v17624_v60 }
 0x2cb   : > { %13437 = vmatprep.mubr.msk.f32.mxu0 %vm1715_vm1, %v1595_v32  ;;  %v1581_v32 = vmul.f32 0.35355338, %v17553_v23 }
 0x2cc   : > { %v17627_v20 = vpop.f32.mrb[20].mxu0 }
 0x2cd   : > { %v17632_v30 = vpop.f32.mrb[21].mxu0  ;;  %v17828_v60 = vadd.f32 %v17627_v20, %v17532_v18  ;;  %v1582_v20 = vmul.f32 0.35355338, %v17548_v2 }
 0x2ce   : > { %15343 = vrot.lane.b32.xlu1 %v15337_v49, %s16749_s25  ;;  %1395 = vrot.lane.b32.xlu0 %v17564_v39, %s16745_s19 }
 0x2cf   : > { %22316 = vst [vmem:[#allocation27_spill] sm:$0xff] %v17828_v60 }
 0x2d0   : > { %v17634_v31 = vpop.f32.mrb[22].mxu0 }
 0x2d1   : > { %v17640_v10 = vpop.f32.mrb[23].mxu0 }
 0x2d2   : > { %1497 = vrot.lane.b32.xlu0 %v17572_v9, %s16747_s23  ;;  %1305 = vrot.lane.b32.xlu1 %v17572_v9, %s16746_s7 }
 0x2d4   : > { %v17642_v14 = vpop.f32.mrb[24].mxu0 }
 0x2d5   : > { %v17648_v7 = vpop.f32.mrb[25].mxu0 }
 0x2d6   : > { %1401 = vrot.lane.b32.xlu1 %v17572_v9, %s16745_s19  ;;  %1303 = vrot.lane.b32.xlu0 %v17575_v37, %s16746_s7 }
 0x2d9   : > { %v17650_v42 = vpop.f32.mrb[26].mxu0 }
 0x2da   : > { %1399 = vrot.lane.b32.xlu1 %v17575_v37, %s16745_s19  ;;  %15348 = vrot.lane.b32.xlu0 %v15347_v63, %s16748_s27  ;;  %v17655_v45 = vpop.f32.mrb[27].mxu0 }
 0x2dd   : > { %v17657_v0 = vpop.f32.mrb[28].mxu0 }
 0x2de   : > { %1495 = vrot.lane.b32.xlu1 %v17575_v37, %s16747_s23  ;;  %15353 = vrot.lane.b32.xlu0 %v15347_v63, %s16749_s25  ;;  %v17662_v27 = vpop.f32.mrb[29].mxu0 }
 0x2e1   : > { %v17664_v51 = vpop.f32.mrb[30].mxu0 }
 0x2e2   : > { %1405 = vrot.lane.b32.xlu0 %v17584_v54, %s16745_s19  ;;  %1309 = vrot.lane.b32.xlu1 %v17584_v54, %s16746_s7  ;;  %v17670_v38 = vpop.f32.mrb[31].mxu0 }
 0x2e6   : > { %1501 = vrot.lane.b32.xlu0 %v17584_v54, %s16747_s23  ;;  %15358 = vrot.lane.b32.xlu1 %v15357_v11, %s16748_s27 }
 0x2ea   : > { %1499 = vrot.lane.b32.xlu1 %v17587_v40, %s16747_s23  ;;  %1307 = vrot.lane.b32.xlu0 %v17587_v40, %s16746_s7 }
 0x2ee   : > { %15363 = vrot.lane.b32.xlu1 %v15357_v11, %s16749_s25  ;;  %1403 = vrot.lane.b32.xlu0 %v17587_v40, %s16745_s19 }
 0x2f2   : > { %1505 = vrot.lane.b32.xlu0 %v17595_v56, %s16747_s23  ;;  %1313 = vrot.lane.b32.xlu1 %v17595_v56, %s16746_s7 }
 0x2f6   : > { %1409 = vrot.lane.b32.xlu1 %v17595_v56, %s16745_s19  ;;  %1311 = vrot.lane.b32.xlu0 %v17598_v28, %s16746_s7 }
 0x2fa   : > { %1407 = vrot.lane.b32.xlu1 %v17598_v28, %s16745_s19  ;;  %15368 = vrot.lane.b32.xlu0 %v15367_v19, %s16748_s27 }
 0x2fe   : > { %1503 = vrot.lane.b32.xlu1 %v17598_v28, %s16747_s23  ;;  %15373 = vrot.lane.b32.xlu0 %v15367_v19, %s16749_s25 }
 0x302   : > { %1413 = vrot.lane.b32.xlu0 %v17697_v33, %s16745_s19  ;;  %1317 = vrot.lane.b32.xlu1 %v17697_v33, %s16746_s7 }
 0x306   : > { %1509 = vrot.lane.b32.xlu0 %v17697_v33, %s16747_s23  ;;  %15378 = vrot.lane.b32.xlu1 %v15377_v26, %s16748_s27 }
 0x30a   : > { %1507 = vrot.lane.b32.xlu1 %v17700_v29, %s16747_s23  ;;  %1315 = vrot.lane.b32.xlu0 %v17700_v29, %s16746_s7 }
 0x30e   : > { %1411 = vrot.lane.b32.xlu0 %v17700_v29, %s16745_s19  ;;  %1321 = vrot.lane.b32.xlu1 %v17716_v53, %s16746_s7 }
 0x312   : > { %15383 = vrot.lane.b32.xlu0 %v15377_v26, %s16749_s25  ;;  %1415 = vrot.lane.b32.xlu1 %v17723_v57, %s16745_s19  ;;  %v17832_v26 = vadd.f32 %v17532_v18, %v17632_v30 }
 0x314   : > { %v17728_v35 = vpop.permute.xlu1 %1293  ;;  %v17730_v5 = vpop.permute.xlu0 %1389  ;;  %v15417_v30 = vpack.i.bf16 %v17828_v60, %v17832_v26 }
 0x315   : > { %22305 = vst [vmem:[#allocation18_spill] sm:$0xff] %v17728_v35 }
 0x316   : > { %1417 = vrot.lane.b32.xlu0 %v17716_v53, %s16745_s19  ;;  %1511 = vrot.lane.b32.xlu1 %v17723_v57, %s16747_s23 }
 0x318   : > { %v15319_v48 = vpop.permute.xlu1 %15318  ;;  %v17736_v62 = vpop.permute.xlu0 %1485 }
 0x319   : > { %22306 = vst [vmem:[#allocation19_spill] sm:$0xff] %v17736_v62  ;;  %v15321_v1 = vunpack.i.h.bf16 %v15319_v48  ;;  %v15320_v12 = vunpack.i.l.bf16 %v15319_v48 }
 0x31a   : > { %1513 = vrot.lane.b32.xlu0 %v17716_v53, %s16747_s23  ;;  %15393 = vrot.lane.b32.xlu1 %v15392_v43, %s16749_s25 }
 0x31b   : > { %v14477_v13 = vpack.c.bf16 %v15321_v1, %v15320_v12  ;;  %v1583_v12 = vmul.f32 0.35355338, %v17564_v39 }
 0x31c   : > { %v17749_v36 = vpop.permute.xlu1 %1483  ;;  %v17751_v17 = vpop.permute.xlu0 %1291 }
 0x31d   : > { %22309 = vst [vmem:[#allocation20_spill] sm:$0xff] %v17749_v36  ;;  %14479 = vmatprep.subr.msk.bf16.mxu1 %vm17745_vm2, %v14477_v13 }
 0x31e   : > { %14482 = vmatpush3.bf16.xpose.msk.msra.mxu1 %vm17745_vm2, %v14477_v13  ;;  %1319 = vrot.lane.b32.xlu0 %v17723_v57, %s16746_s7 }
 0x31f   : > { %1325 = vrot.lane.b32.xlu1 %v17755_v47, %s16746_s7 }
 0x320   : > { %v17765_v46 = vpop.permute.xlu1 %1297  ;;  %v17767_v24 = vpop.permute.xlu0 %1387 }
 0x322   : > { %15388 = vrot.lane.b32.xlu0 %v15392_v43, %s16748_s27 }
 0x323   : > { %15398 = vrot.lane.b32.xlu1 %v15397_v8, %s16748_s27 }
 0x324   : > { %v17773_v49 = vpop.permute.xlu1 %1393  ;;  %v17775_v52 = vpop.permute.xlu0 %15323 }
 0x325   : > { %22310 = vst [vmem:[#allocation21_spill] sm:$0xff] %v17773_v49  ;;  %22311 = vst [vmem:[#allocation22_spill] sm:$0xff] %v17775_v52  ;;  %v17932_v52 = vadd.f32 %v17642_v14, %v17532_v18 }
 0x326   : > { %1421 = vrot.lane.b32.xlu0 %v17755_v47, %s16745_s19 }
 0x327   : > { %1419 = vrot.lane.b32.xlu1 %v17615_v44, %s16745_s19  ;;  %22328 = vst [vmem:[#allocation39_spill] sm:$0xff] %v17932_v52 }
 0x328   : > { %v17781_v59 = vpop.permute.xlu1 %1295  ;;  %v17783_v25 = vpop.permute.xlu0 %1489 }
 0x329   : > { %22312 = vst [vmem:[#allocation23_spill] sm:$0xff] %v17783_v25 }
 0x32a   : > { %1517 = vrot.lane.b32.xlu0 %v17755_v47, %s16747_s23 }
 0x32b   : > { %1515 = vrot.lane.b32.xlu1 %v17615_v44, %s16747_s23 }
 0x32c   : > { %v17789_v63 = vpop.permute.xlu1 %1391  ;;  %v15329_v6 = vpop.permute.xlu0 %15328 }
 0x32d   : > { %v15331_v11 = vunpack.i.h.bf16 %v15329_v6  ;;  %v15330_v3 = vunpack.i.l.bf16 %v15329_v6 }
 0x32e   : > { %1323 = vrot.lane.b32.xlu0 %v17615_v44, %s16746_s7 }
 0x32f   : > { %1329 = vrot.lane.b32.xlu1 %v17793_v55, %s16746_s7  ;;  %v14483_v15 = vpack.c.bf16 %v15331_v11, %v15330_v3 }
 0x330   : > { %v17799_v19 = vpop.permute.xlu1 %1487  ;;  %v17801_v58 = vpop.permute.xlu0 %15333 }
 0x331   : > { %22313 = vst [vmem:[#allocation24_spill] sm:$0xff] %v17799_v19  ;;  %22314 = vst [vmem:[#allocation25_spill] sm:$0xff] %v17801_v58  ;;  %14485 = vmatprep.subr.msk.bf16.mxu1 %vm17745_vm2, %v14483_v15 }
 0x332   : > { %15403 = vrot.lane.b32.xlu0 %v15397_v8, %s16749_s25  ;;  %14488 = vmatpush3.bf16.xpose.msk.msra.mxu1 %vm17745_vm2, %v14483_v15  ;;  %v15407_v8 = vpack.i.bf16 %v17793_v55, %v17805_v4 }
 0x333   : > { %1423 = vrot.lane.b32.xlu1 %v17805_v4, %s16745_s19 }
 0x334   : > { %v17814_v41 = vpop.permute.xlu1 %1301  ;;  %v17816_v22 = vpop.permute.xlu0 %1397 }
 0x336   : > { %1425 = vrot.lane.b32.xlu0 %v17793_v55, %s16745_s19 }
 0x337   : > { %1519 = vrot.lane.b32.xlu1 %v17805_v4, %s16747_s23 }
 0x338   : > { %v15339_v16 = vpop.permute.xlu1 %15338  ;;  %v17822_v44 = vpop.permute.xlu0 %1493 }
 0x339   : > { %22315 = vst [vmem:[#allocation26_spill] sm:$0xff] %v17822_v44  ;;  %v15341_v48 = vunpack.i.h.bf16 %v15339_v16  ;;  %v15340_v43 = vunpack.i.l.bf16 %v15339_v16  ;;  %13382 = vmatmul.mubr.msk.f32.vlgmr.msra.gmra.mrb[0].mxu1 %vm1715_vm1, %v1580_v61  ;;  %v17884_v61 = vadd.f32 %v17634_v31, %v17532_v18 }
 0x33a   : > { %1521 = vrot.lane.b32.xlu0 %v17793_v55, %s16747_s23  ;;  %13384 = vmatprep.mubr.msk.f32.mxu1 %vm1715_vm1, %v1581_v32 }
 0x33b   : > { %v14489_v1 = vpack.c.bf16 %v15341_v48, %v15340_v43  ;;  %1333 = vrot.lane.b32.xlu1 %v17828_v60, %s16746_s7  ;;  %22322 = vst [vmem:[#allocation33_spill] sm:$0xff] %v17884_v61 }
 0x33c   : > { %v17840_v34 = vpop.permute.xlu1 %1491  ;;  %v17842_v23 = vpop.permute.xlu0 %1299 }
 0x33d   : > { %22317 = vst [vmem:[#allocation28_spill] sm:$0xff] %v17840_v34  ;;  %14491 = vmatprep.subr.msk.bf16.mxu1 %vm17745_vm2, %v14489_v1  ;;  %13385 = vmatmul.mubr.msk.f32.gmra.mrb[2].mxu1 %vm1715_vm1, %v1582_v20 }
 0x33e   : > { %1327 = vrot.lane.b32.xlu0 %v17805_v4, %s16746_s7  ;;  %14494 = vmatpush3.bf16.xpose.msk.msra.mxu1 %vm17745_vm2, %v14489_v1 }
 0x33f   : > { %15418 = vrot.lane.b32.xlu1 %v15417_v30, %s16748_s27  ;;  %13395 = vmatprep.mubr.msk.f32.mxu1 %vm1715_vm1, %v1583_v12 }
 0x340   : > { %v17857_v2 = vpop.permute.xlu1 %15343  ;;  %v17859_v13 = vpop.permute.xlu0 %1395 }
 0x341   : > { %22318 = vst [vmem:[#allocation29_spill] sm:$0xff] %v17857_v2 }
 0x342   : > { %15408 = vrot.lane.b32.xlu0 %v15407_v8, %s16748_s27 }
 0x343   : > { %1427 = vrot.lane.b32.xlu1 %v17832_v26, %s16745_s19 }
 0x344   : > { %v17866_v39 = vpop.permute.xlu1 %1305  ;;  %v17868_v6 = vpop.permute.xlu0 %1497 }
 0x345   : > { %22319 = vst [vmem:[#allocation30_spill] sm:$0xff] %v17868_v6 }
 0x346   : > { %15413 = vrot.lane.b32.xlu0 %v15407_v8, %s16749_s25 }
 0x347   : > { %1523 = vrot.lane.b32.xlu1 %v17832_v26, %s16747_s23 }
 0x348   : > { %v17873_v11 = vpop.permute.xlu1 %1401  ;;  %v17875_v3 = vpop.permute.xlu0 %1303 }
 0x349   : > { %22320 = vst [vmem:[#allocation31_spill] sm:$0xff] %v17873_v11 }
 0x34a   : > { %1429 = vrot.lane.b32.xlu0 %v17828_v60, %s16745_s19 }
 0x34b   : > { %15423 = vrot.lane.b32.xlu1 %v15417_v30, %s16749_s25  ;;  %v17896_v30 = vadd.f32 %v17532_v18, %v17640_v10 }
 0x34c   : > { %v17880_v15 = vpop.permute.xlu1 %1399  ;;  %v15349_v16 = vpop.permute.xlu0 %15348 }
 0x34d   : > { %22321 = vst [vmem:[#allocation32_spill] sm:$0xff] %v17880_v15  ;;  %v15351_v32 = vunpack.i.h.bf16 %v15349_v16  ;;  %v15350_v48 = vunpack.i.l.bf16 %v15349_v16  ;;  %22325 = vst [vmem:[#allocation36_spill] sm:$0xff] %v17896_v30  ;;  %v1584_v16 = vmul.f32 0.35355338, %v17558_v50 }
 0x34e   : > { %1525 = vrot.lane.b32.xlu0 %v17828_v60, %s16747_s23  ;;  %v17989_v60 = vadd.f32 %v17532_v18, %v17655_v45 }
 0x34f   : > { %1337 = vrot.lane.b32.xlu1 %v17884_v61, %s16746_s7  ;;  %v14495_v43 = vpack.c.bf16 %v15351_v32, %v15350_v48 }
 0x350   : > { %v17890_v1 = vpop.permute.xlu1 %1495  ;;  %v17892_v20 = vpop.permute.xlu0 %15353  ;;  %22335 = vst [vmem:[#allocation46_spill] sm:$0xff] %v17989_v60 }
 0x351   : > { %22323 = vst [vmem:[#allocation34_spill] sm:$0xff] %v17890_v1  ;;  %22324 = vst [vmem:[#allocation35_spill] sm:$0xff] %v17892_v20  ;;  %14497 = vmatprep.subr.msk.bf16.mxu1 %vm17745_vm2, %v14495_v43  ;;  %v1585_v20 = vmul.f32 0.35355338, %v17575_v37  ;;  %v17936_v37 = vadd.f32 %v17532_v18, %v17648_v7 }
 0x352   : > { %1331 = vrot.lane.b32.xlu0 %v17832_v26, %s16746_s7  ;;  %14500 = vmatpush3.bf16.xpose.msk.msra.mxu1 %vm17745_vm2, %v14495_v43  ;;  %v15432_v43 = vpack.i.bf16 %v17884_v61, %v17896_v30 }
 0x353   : > { %1431 = vrot.lane.b32.xlu1 %v17896_v30, %s16745_s19  ;;  %22329 = vst [vmem:[#allocation40_spill] sm:$0xff] %v17936_v37  ;;  %v15437_v7 = vpack.i.bf16 %v17932_v52, %v17936_v37 }
 0x354   : > { %v17906_v31 = vpop.permute.xlu1 %1309  ;;  %v17908_v12 = vpop.permute.xlu0 %1405 }
 0x356   : > { %1433 = vrot.lane.b32.xlu0 %v17884_v61, %s16745_s19 }
 0x357   : > { %1527 = vrot.lane.b32.xlu1 %v17896_v30, %s16747_s23 }
 0x358   : > { %v15359_v10 = vpop.permute.xlu1 %15358  ;;  %v17914_v8 = vpop.permute.xlu0 %1501 }
 0x359   : > { %22326 = vst [vmem:[#allocation37_spill] sm:$0xff] %v17914_v8  ;;  %v15361_v32 = vunpack.i.h.bf16 %v15359_v10  ;;  %v15360_v48 = vunpack.i.l.bf16 %v15359_v10  ;;  %13396 = vmatmul.mubr.msk.f32.vlgmr.msra.gmra.mrb[4].mxu1 %vm1715_vm1, %v1584_v16  ;;  %v1586_v10 = vmul.f32 0.35355338, %v17572_v9 }
 0x35a   : > { %1529 = vrot.lane.b32.xlu0 %v17884_v61, %s16747_s23  ;;  %13398 = vmatprep.mubr.msk.f32.mxu1 %vm1715_vm1, %v1585_v20  ;;  %v1587_v20 = vmul.f32 0.35355338, %v17587_v40 }
 0x35b   : > { %v14501_v2 = vpack.c.bf16 %v15361_v32, %v15360_v48  ;;  %15433 = vrot.lane.b32.xlu1 %v15432_v43, %s16749_s25 }
 0x35c   : > { %v17925_v58 = vpop.permute.xlu1 %1499  ;;  %v17927_v50 = vpop.permute.xlu0 %1307 }
 0x35d   : > { %22327 = vst [vmem:[#allocation38_spill] sm:$0xff] %v17925_v58  ;;  %14503 = vmatprep.subr.msk.bf16.mxu1 %vm17745_vm2, %v14501_v2  ;;  %13399 = vmatmul.mubr.msk.f32.gmra.mrb[6].mxu1 %vm1715_vm1, %v1586_v10  ;;  %v17977_v10 = vadd.f32 %v17650_v42, %v17532_v18 }
 0x35e   : > { %1335 = vrot.lane.b32.xlu0 %v17896_v30, %s16746_s7  ;;  %14506 = vmatpush3.bf16.xpose.msk.msra.mxu1 %vm17745_vm2, %v14501_v2 }
 0x35f   : > { %1341 = vrot.lane.b32.xlu1 %v17932_v52, %s16746_s7  ;;  %13409 = vmatprep.mubr.msk.f32.mxu1 %vm1715_vm1, %v1587_v20  ;;  %22332 = vst [vmem:[#allocation43_spill] sm:$0xff] %v17977_v10 }
 0x360   : > { %v17949_v9 = vpop.permute.xlu1 %15363  ;;  %v17951_v14 = vpop.permute.xlu0 %1403 }
 0x361   : > { %22330 = vst [vmem:[#allocation41_spill] sm:$0xff] %v17949_v9 }
 0x362   : > { %15428 = vrot.lane.b32.xlu0 %v15432_v43, %s16748_s27 }
 0x363   : > { %15438 = vrot.lane.b32.xlu1 %v15437_v7, %s16748_s27 }
 0x364   : > { %v17957_v40 = vpop.permute.xlu1 %1313  ;;  %v17959_v16 = vpop.permute.xlu0 %1505 }
 0x365   : > { %22331 = vst [vmem:[#allocation42_spill] sm:$0xff] %v17959_v16 }
 0x366   : > { %1437 = vrot.lane.b32.xlu0 %v17932_v52, %s16745_s19 }
 0x367   : > { %1435 = vrot.lane.b32.xlu1 %v17936_v37, %s16745_s19 }
 0x368   : > { %v17965_v2 = vpop.permute.xlu1 %1409  ;;  %v17967_v32 = vpop.permute.xlu0 %1311 }
 0x36a   : > { %1533 = vrot.lane.b32.xlu0 %v17932_v52, %s16747_s23 }
 0x36b   : > { %1531 = vrot.lane.b32.xlu1 %v17936_v37, %s16747_s23 }
 0x36c   : > { %v17973_v48 = vpop.permute.xlu1 %1407  ;;  %v15369_v43 = vpop.permute.xlu0 %15368 }
 0x36d   : > { %v15371_v20 = vunpack.i.h.bf16 %v15369_v43  ;;  %v15370_v9 = vunpack.i.l.bf16 %v15369_v43 }
 0x36e   : > { %1339 = vrot.lane.b32.xlu0 %v17936_v37, %s16746_s7 }
 0x36f   : > { %1345 = vrot.lane.b32.xlu1 %v17977_v10, %s16746_s7  ;;  %v14507_v61 = vpack.c.bf16 %v15371_v20, %v15370_v9  ;;  %v1589_v20 = vmul.f32 0.35355338, %v17598_v28 }
 0x370   : > { %v17983_v52 = vpop.permute.xlu1 %1503  ;;  %v17985_v30 = vpop.permute.xlu0 %15373 }
 0x371   : > { %22333 = vst [vmem:[#allocation44_spill] sm:$0xff] %v17983_v52  ;;  %22334 = vst [vmem:[#allocation45_spill] sm:$0xff] %v17985_v30  ;;  %14509 = vmatprep.subr.msk.bf16.mxu1 %vm17745_vm2, %v14507_v61  ;;  %v18016_v30 = vadd.f32 %v17532_v18, %v17662_v27 }
 0x372   : > { %15443 = vrot.lane.b32.xlu0 %v15437_v7, %s16749_s25  ;;  %14512 = vmatpush3.bf16.xpose.msk.msra.mxu1 %vm17745_vm2, %v14507_v61  ;;  %v1588_v7 = vmul.f32 0.35355338, %v17584_v54  ;;  %v18012_v61 = vadd.f32 %v17657_v0, %v17532_v18  ;;  %v1590_v0 = vmul.f32 0.35355338, %v17595_v56 }
 0x373   : > { %1439 = vrot.lane.b32.xlu1 %v17989_v60, %s16745_s19  ;;  %22339 = vst [vmem:[#allocation50_spill] sm:$0xff] %v18016_v30 }
 0x374   : > { %v17998_v42 = vpop.permute.xlu1 %1317  ;;  %v18000_v9 = vpop.permute.xlu0 %1413  ;;  %22338 = vst [vmem:[#allocation49_spill] sm:$0xff] %v18012_v61  ;;  %v15457_v27 = vpack.i.bf16 %v18012_v61, %v18016_v30 }
 0x375   : > { %22336 = vst [vmem:[#allocation47_spill] sm:$0xff] %v18000_v9 }
 0x376   : > { %1441 = vrot.lane.b32.xlu0 %v17977_v10, %s16745_s19 }
 0x377   : > { %1535 = vrot.lane.b32.xlu1 %v17989_v60, %s16747_s23 }
 0x378   : > { %v15379_v45 = vpop.permute.xlu1 %15378  ;;  %v18006_v43 = vpop.permute.xlu0 %1509 }
 0x379   : > { %22337 = vst [vmem:[#allocation48_spill] sm:$0xff] %v18006_v43  ;;  %v15381_v9 = vunpack.i.h.bf16 %v15379_v45  ;;  %v15380_v37 = vunpack.i.l.bf16 %v15379_v45  ;;  %13410 = vmatmul.mubr.msk.f32.vlgmr.msra.gmra.mrb[8].mxu1 %vm1715_vm1, %v1588_v7  ;;  %v15447_v45 = vpack.i.bf16 %v17977_v10, %v17989_v60 }
 0x37a   : > { %1537 = vrot.lane.b32.xlu0 %v17977_v10, %s16747_s23  ;;  %13412 = vmatprep.mubr.msk.f32.mxu1 %vm1715_vm1, %v1589_v20  ;;  %v18080_v10 = vadd.f32 %v17532_v18, %v17670_v38 }
 0x37b   : > { %v14513_v43 = vpack.c.bf16 %v15381_v9, %v15380_v37  ;;  %1349 = vrot.lane.b32.xlu1 %v18012_v61, %s16746_s7  ;;  %v1591_v37 = vmul.f32 0.35355338, %v17700_v29 }
 0x37c   : > { %v18024_v54 = vpop.permute.xlu1 %1507  ;;  %v18026_v28 = vpop.permute.xlu0 %1315 }
 0x37d   : > { %22340 = vst [vmem:[#allocation51_spill] sm:$0xff] %v18024_v54  ;;  %14515 = vmatprep.subr.msk.bf16.mxu1 %vm17745_vm2, %v14513_v43  ;;  %13413 = vmatmul.mubr.msk.f32.gmra.mrb[10].mxu1 %vm1715_vm1, %v1590_v0 }
 0x37e   : > { %1343 = vrot.lane.b32.xlu0 %v17989_v60, %s16746_s7  ;;  %14518 = vmatpush3.bf16.xpose.msk.msra.mxu1 %vm17745_vm2, %v14513_v43 }
 0x37f   : > { %15458 = vrot.lane.b32.xlu1 %v15457_v27, %s16748_s27  ;;  %13423 = vmatprep.mubr.msk.f32.mxu1 %vm1715_vm1, %v1591_v37 }
 0x380   : > { %v18041_v56 = vpop.permute.xlu1 %1321  ;;  %v18043_v9 = vpop.permute.xlu0 %1411 }
 0x381   : > { %22341 = vst [vmem:[#allocation52_spill] sm:$0xff] %v18041_v56  ;;  %22342 = vst [vmem:[#allocation53_spill] sm:$0xff] %v18043_v9 }
 0x382   : > { %15448 = vrot.lane.b32.xlu0 %v15447_v45, %s16748_s27 }
 0x383   : > { %1443 = vrot.lane.b32.xlu1 %v18016_v30, %s16745_s19 }
 0x384   : > { %v18050_v29 = vpop.permute.xlu1 %1415  ;;  %v18052_v7 = vpop.permute.xlu0 %15383 }
 0x385   : > { %22343 = vst [vmem:[#allocation54_spill] sm:$0xff] %v18050_v29  ;;  %22344 = vst [vmem:[#allocation55_spill] sm:$0xff] %v18052_v7  ;;  %v18070_v7 = vadd.f32 %v17664_v51, %v17532_v18 }
 0x386   : > { %15453 = vrot.lane.b32.xlu0 %v15447_v45, %s16749_s25 }
 0x387   : > { %1539 = vrot.lane.b32.xlu1 %v18016_v30, %s16747_s23 }
 0x388   : > { %v18057_v43 = vpop.permute.xlu1 %1511  ;;  %v18059_v20 = vpop.permute.xlu0 %1417 }
 0x389   : > { %22345 = vst [vmem:[#allocation56_spill] sm:$0xff] %v18057_v43  ;;  %22346 = vst [vmem:[#allocation57_spill] sm:$0xff] %v18059_v20 }
 0x38a   : > { %1445 = vrot.lane.b32.xlu0 %v18012_v61, %s16745_s19 }
 0x38b   : > { %15463 = vrot.lane.b32.xlu1 %v15457_v27, %s16749_s25 }
 0x38c   : > { %v18064_v0 = vpop.permute.xlu1 %15393  ;;  %v18066_v37 = vpop.permute.xlu0 %1513 }
 0x38d   : > { %22347 = vst [vmem:[#allocation58_spill] sm:$0xff] %v18064_v0  ;;  %22348 = vst [vmem:[#allocation59_spill] sm:$0xff] %v18066_v37 }
 0x38e   : > { %1541 = vrot.lane.b32.xlu0 %v18012_v61, %s16747_s23 }
 0x38f   : > { %1353 = vrot.lane.b32.xlu1 %v18070_v7, %s16746_s7 }
 0x390   : > { %v18076_v45 = vpop.permute.xlu0 %1319 }
 0x391   : > { %22349 = vst [vmem:[#allocation60_spill] sm:$0xff] %v18076_v45  ;;  %v18082_v27 = vpop.permute.xlu1 %1325 }
 0x392   : > { %1347 = vrot.lane.b32.xlu0 %v18016_v30, %s16746_s7 }
 0x393   : > { %1447 = vrot.lane.b32.xlu1 %v18080_v10, %s16745_s19 }
 0x394   : > { %v15389_v51 = vpop.permute.xlu0 %15388 }
 0x395   : > { %v15399_v0 = vpop.permute.xlu1 %15398  ;;  %v15391_v61 = vunpack.i.h.bf16 %v15389_v51  ;;  %v15390_v60 = vunpack.i.l.bf16 %v15389_v51  ;;  %v15472_v51 = vpack.i.bf16 %v18070_v7, %v18080_v10 }
 0x396   : > { %v15401_v56 = vunpack.i.h.bf16 %v15399_v0  ;;  %v15400_v54 = vunpack.i.l.bf16 %v15399_v0  ;;  %1449 = vrot.lane.b32.xlu0 %v18070_v7, %s16745_s19  ;;  %v18125_v0 = vpack.i.bf16 %v17773_v49, %v17789_v63  ;;  %s11932_s19 = scalar_lea.sflag [#allocation4], %s17019_s16 }
 0x397   : > { %v14519_v45 = vpack.c.bf16 %v15391_v61, %v15390_v60  ;;  %1543 = vrot.lane.b32.xlu1 %v18080_v10, %s16747_s23  ;;  %v18113_v61 = vpack.i.bf16 %v17728_v35, %v17751_v17  ;;  %v1593_v35 = vmul.f32 0.35355338, %v17723_v57  ;;  %v1594_v57 = vmul.f32 0.35355338, %v17716_v53 }
 0x398   : > { %v14525_v18 = vpack.c.bf16 %v15401_v56, %v15400_v54  ;;  %v18092_v38 = vpop.permute.xlu0 %1421  ;;  %22354 = vst [vmem:[#allocation65_spill] sm:$0xff] %v18125_v0  ;;  %v18164_v53 = vpack.i.bf16 %v17814_v41, %v17842_v23 }
 0x399   : > { %22350 = vst [vmem:[#allocation61_spill] sm:$0xff] %v18092_v38  ;;  %v18094_v30 = vpop.permute.xlu1 %1419  ;;  %14521 = vmatprep.subr.msk.bf16.mxu1 %vm17745_vm2, %v14519_v45  ;;  %22352 = vst [vmem:[#allocation63_spill] sm:$0xff] %v18113_v61 }
 0x39a   : > { %14527 = vmatprep.subr.msk.bf16.mxu0 %vm17745_vm2, %v14525_v18  ;;  %1545 = vrot.lane.b32.xlu0 %v18070_v7, %s16747_s23  ;;  %22361 = vst [vmem:[#allocation72_spill] sm:$0xff] %v18164_v53  ;;  %s16750_s23 = smov [#allocation10]  }
 0x39b   : > { %14530 = vmatpush3.bf16.xpose.msk.msra.mxu0 %vm17745_vm2, %v14525_v18  ;;  %15473 = vrot.lane.b32.xlu1 %v15472_v51, %s16749_s25  ;;  %v1592_v18 = vmul.f32 0.35355338, %v17697_v33  ;;  %v18144_v33 = vpack.i.bf16 %v17783_v25, %v17799_v19 }
 0x39c   : > { %14524 = vmatpush3.bf16.xpose.msk.msra.mxu1 %vm17745_vm2, %v14519_v45  ;;  %v18109_v60 = vpop.permute.xlu0 %1517 }
 0x39d   : > { %22351 = vst [vmem:[#allocation62_spill] sm:$0xff] %v18109_v60  ;;  %v18115_v54 = vpop.permute.xlu1 %1515  ;;  %22357 = vst [vmem:[#allocation68_spill] sm:$0xff] %v18144_v33 }
 0x39e   : > { %22353 = vst [vmem:[#allocation64_spill] sm:$0xff] %v18115_v54  ;;  %1351 = vrot.lane.b32.xlu0 %v18080_v10, %s16746_s7  ;;  %s16647_s7 = scalar_lea.vmem %s21961_s15, 4096 }
 0x39f   : > { %15478 = vrot.lane.b32.xlu1 %v18113_v61, %s16748_s27  ;;  %v18137_v61 = vpack.i.bf16 %v17730_v5, %v17767_v24  ;;  %p16648_p13 = scmp.ne.s32.totalorder %s21961_s15, %s16647_s7 }
 0x3a0   : > { %v18121_v56 = vpop.permute.xlu0 %1323 }
 0x3a1   : > { %v18127_v45 = vpop.permute.xlu1 %1329  ;;  %22355 = vst [vmem:[#allocation66_spill] sm:$0xff] %v18137_v61  ;;  %p16649_p6 = pnand %p16648_p13, %p16958_p10 }
 0x3a2   : > { %15468 = vrot.lane.b32.xlu0 %v15472_v51, %s16748_s27 }
 0x3a3   : > { %13424 = vmatmul.mubr.msk.f32.vlgmr.msra.gmra.mrb[12].mxu1 %vm1715_vm1, %v1592_v18  ;;  %15498 = vrot.lane.b32.xlu1 %v18125_v0, %s16748_s27  ;;  %v1599_v18 = vmul.f32 0.35355338, %v17832_v26  ;;  %v18174_v26 = vpack.i.bf16 %v17765_v46, %v17781_v59  ;;  %p16650_p3 = pneg %p16649_p6 }
 0x3a4   : > { %13426 = vmatprep.mubr.msk.f32.mxu1 %vm1715_vm1, %v1593_v35  ;;  %v18140_v49 = vpop.permute.xlu0 %15403  ;;  %v18157_v35 = vpack.i.bf16 %v17736_v62, %v17749_v36 }
 0x3a5   : > { %22356 = vst [vmem:[#allocation67_spill] sm:$0xff] %v18140_v49  ;;  %v18146_v51 = vpop.permute.xlu1 %1423  ;;  %22363 = vst [vmem:[#allocation74_spill] sm:$0xff] %v18174_v26  ;;  %v18196_v49 = vpack.i.bf16 %v17868_v6, %v17890_v1 }
 0x3a6   : > { %22358 = vst [vmem:[#allocation69_spill] sm:$0xff] %v18146_v51  ;;  %15483 = vrot.lane.b32.xlu0 %v18137_v61, %s16748_s27  ;;  %22359 = vst [vmem:[#allocation70_spill] sm:$0xff] %v18157_v35 }
 0x3a7   : > { %13427 = vmatmul.mubr.msk.f32.gmra.mrb[14].mxu1 %vm1715_vm1, %v1594_v57  ;;  %15503 = vrot.lane.b32.xlu1 %v18144_v33, %s16748_s27  ;;  %22367 = vst [vmem:[#allocation78_spill] sm:$0xff] %v18196_v49 }
 0x3a8   : > { %13451 = vmatprep.mubr.msk.f32.mxu1 %vm1715_vm1, %v1599_v18  ;;  %v18160_v0 = vpop.permute.xlu0 %1425  ;;  %v18180_v18 = vpack.i.bf16 %v17873_v11, %v17880_v15  ;;  %v18208_v11 = vpack.i.bf16 %v17906_v31, %v17927_v50 }
 0x3a9   : > { %22360 = vst [vmem:[#allocation71_spill] sm:$0xff] %v18160_v0  ;;  %v18166_v61 = vpop.permute.xlu1 %1519 }
 0x3aa   : > { %22362 = vst [vmem:[#allocation73_spill] sm:$0xff] %v18166_v61  ;;  %15488 = vrot.lane.b32.xlu0 %v18157_v35, %s16748_s27  ;;  %22365 = vst [vmem:[#allocation76_spill] sm:$0xff] %v18180_v18  ;;  %v18190_v35 = vpack.i.bf16 %v17816_v22, %v17859_v13 }
 0x3ab   : > { %15508 = vrot.lane.b32.xlu1 %v18164_v53, %s16748_s27  ;;  %22369 = vst [vmem:[#allocation80_spill] sm:$0xff] %v18208_v11 }
 0x3ac   : > { %v18176_v57 = vpop.permute.xlu0 %1521  ;;  %22366 = vst [vmem:[#allocation77_spill] sm:$0xff] %v18190_v35 }
 0x3ad   : > { %22364 = vst [vmem:[#allocation75_spill] sm:$0xff] %v18176_v57  ;;  %v18182_v33 = vpop.permute.xlu1 %1333 }
 0x3ae   : > { %15493 = vrot.lane.b32.xlu0 %v18174_v26, %s16748_s27 }
 0x3af   : > { %15528 = vrot.lane.b32.xlu1 %v18180_v18, %s16748_s27  ;;  %v18204_v18 = vpack.i.bf16 %v17822_v44, %v17840_v34  ;;  %v18320_v34 = vpack.i.bf16 %v18082_v27, %v18121_v56 }
 0x3b0   : > { %v18192_v53 = vpop.permute.xlu0 %1327 }
 0x3b1   : > { %v15419_v25 = vpop.permute.xlu1 %15418  ;;  %22368 = vst [vmem:[#allocation79_spill] sm:$0xff] %v18204_v18  ;;  %22395 = vst [vmem:[#allocation101_spill] sm:$0xff] %v18320_v34 }
 0x3b2   : > { %v15421_v19 = vunpack.i.h.bf16 %v15419_v25  ;;  %v15420_v62 = vunpack.i.l.bf16 %v15419_v25  ;;  %15513 = vrot.lane.b32.xlu0 %v18190_v35, %s16748_s27 }
 0x3b3   : > { %15533 = vrot.lane.b32.xlu1 %v18196_v49, %s16748_s27 }
 0x3b4   : > { %v14537_v26 = vpack.c.bf16 %v15421_v19, %v15420_v62  ;;  %v15409_v36 = vpop.permute.xlu0 %15408  ;;  %v18222_v62 = vpack.i.bf16 %v17866_v39, %v17875_v3 }
 0x3b5   : > { %v18210_v6 = vpop.permute.xlu1 %1427  ;;  %v15411_v1 = vunpack.i.h.bf16 %v15409_v36  ;;  %v15410_v25 = vunpack.i.l.bf16 %v15409_v36  ;;  %v18228_v36 = vpack.i.bf16 %v17965_v2, %v17973_v48 }
 0x3b6   : > { %22370 = vst [vmem:[#allocation81_spill] sm:$0xff] %v18210_v6  ;;  %14539 = vmatprep.subr.msk.bf16.mxu1 %vm17745_vm2, %v14537_v26  ;;  %15518 = vrot.lane.b32.xlu0 %v18204_v18, %s16748_s27  ;;  %22371 = vst [vmem:[#allocation82_spill] sm:$0xff] %v18222_v62 }
 0x3b7   : > { %v14531_v49 = vpack.c.bf16 %v15411_v1, %v15410_v25  ;;  %15538 = vrot.lane.b32.xlu1 %v18208_v11, %s16748_s27  ;;  %14542 = vmatpush3.bf16.xpose.msk.msra.mxu1 %vm17745_vm2, %v14537_v26  ;;  %22373 = vst [vmem:[#allocation84_spill] sm:$0xff] %v18228_v36  ;;  %v18242_v1 = vpack.i.bf16 %v17908_v12, %v17951_v14 }
 0x3b8   : > { %v18224_v19 = vpop.permute.xlu0 %15413  ;;  %v18248_v25 = vpack.i.bf16 %v17959_v16, %v17983_v52 }
 0x3b9   : > { %22372 = vst [vmem:[#allocation83_spill] sm:$0xff] %v18224_v19  ;;  %v18230_v35 = vpop.permute.xlu1 %1523  ;;  %14533 = vmatprep.subr.msk.bf16.mxu0 %vm17745_vm2, %v14531_v49  ;;  %22375 = vst [vmem:[#allocation86_spill] sm:$0xff] %v18242_v1  ;;  %v18266_v19 = vpack.i.bf16 %v17998_v42, %v18026_v28 }
 0x3ba   : > { %22374 = vst [vmem:[#allocation85_spill] sm:$0xff] %v18230_v35  ;;  %15523 = vrot.lane.b32.xlu0 %v18222_v62, %s16748_s27  ;;  %14536 = vmatpush3.bf16.xpose.msk.msra.mxu0 %vm17745_vm2, %v14531_v49  ;;  %22377 = vst [vmem:[#allocation88_spill] sm:$0xff] %v18248_v25  ;;  %v1596_v49 = vmul.f32 0.35355338, %v17755_v47  ;;  %v1597_v62 = vmul.f32 0.35355338, %v17805_v4  ;;  %v18279_v4 = vpack.i.bf16 %v17957_v40, %v17967_v32 }
 0x3bb   : > { %15558 = vrot.lane.b32.xlu1 %v18228_v36, %s16748_s27  ;;  %v18259_v36 = vpack.i.bf16 %v17914_v8, %v17925_v58  ;;  %22381 = vst [vmem:[#allocation92_spill] sm:$0xff] %v18266_v19  ;;  %v1598_v47 = vmul.f32 0.35355338, %v17793_v55  ;;  %v22386_v55 = vld [vmem:[#allocation47_spill] sm:$0xff] }
 0x3bc   : > { %v18244_v26 = vpop.permute.xlu0 %1429  ;;  %22382 = vst [vmem:[#allocation93_spill] sm:$0xff] %v18279_v4 }
 0x3bd   : > { %22376 = vst [vmem:[#allocation87_spill] sm:$0xff] %v18244_v26  ;;  %v18250_v18 = vpop.permute.xlu1 %15423  ;;  %22379 = vst [vmem:[#allocation90_spill] sm:$0xff] %v18259_v36 }
 0x3be   : > { %22378 = vst [vmem:[#allocation89_spill] sm:$0xff] %v18250_v18  ;;  %15543 = vrot.lane.b32.xlu0 %v18242_v1, %s16748_s27  ;;  %v22383_v1 = vld [vmem:[#allocation40_spill] sm:$0xff] }
 0x3bf   : > { %15563 = vrot.lane.b32.xlu1 %v18248_v25, %s16748_s27  ;;  %v1603_v44 = vmul.f32 0.35355338, %v22383_v1 }
 0x3c0   : > { %v18261_v11 = vpop.permute.xlu0 %1525 }
 0x3c1   : > { %22380 = vst [vmem:[#allocation91_spill] sm:$0xff] %v18261_v11  ;;  %v18268_v18 = vpop.permute.xlu1 %1337  ;;  %13438 = vmatmul.mubr.msk.f32.vlgmr.msra.gmra.mrb[32].mxu0 %vm1715_vm1, %v1596_v49  ;;  %v18286_v49 = vpack.i.bf16 %v18059_v20, %v18050_v29 }
 0x3c2   : > { %15548 = vrot.lane.b32.xlu0 %v18259_v36, %s16748_s27  ;;  %13440 = vmatprep.mubr.msk.f32.mxu0 %vm1715_vm1, %v1597_v62  ;;  %v18298_v62 = vpack.i.bf16 %v22386_v55, %v18043_v9 }
 0x3c3   : > { %15568 = vrot.lane.b32.xlu1 %v18266_v19, %s16748_s27  ;;  %22384 = vst [vmem:[#allocation40_spill] sm:$0xff] %v18286_v49  ;;  %v18304_v19 = vpack.i.bf16 %v18066_v37, %v18057_v43 }
 0x3c4   : > { %v18281_v25 = vpop.permute.xlu0 %1331  ;;  %22387 = vst [vmem:[#allocation95_spill] sm:$0xff] %v18298_v62 }
 0x3c5   : > { %v18288_v36 = vpop.permute.xlu1 %1431  ;;  %13441 = vmatmul.mubr.msk.f32.gmra.mrb[34].mxu0 %vm1715_vm1, %v1598_v47  ;;  %22389 = vst [vmem:[#allocation97_spill] sm:$0xff] %v18304_v19  ;;  %v22392_v47 = vld [vmem:[#allocation48_spill] sm:$0xff] }
 0x3c6   : > { %22385 = vst [vmem:[#allocation94_spill] sm:$0xff] %v18288_v36  ;;  %15553 = vrot.lane.b32.xlu0 %v18279_v4, %s16748_s27  ;;  %13465 = vmatprep.mubr.msk.f32.mxu0 %vm1715_vm1, %v1603_v44  ;;  %v22391_v44 = vld [vmem:[#allocation51_spill] sm:$0xff] }
 0x3c7   : > { %15588 = vrot.lane.b32.xlu1 %v18286_v49, %s16748_s27  ;;  %v18314_v49 = vpack.i.bf16 %v22392_v47, %v22391_v44  ;;  %v18336_v44 = vpack.i.bf16 %v18127_v45, %v18192_v53 }
 0x3c8   : > { %v18300_v1 = vpop.permute.xlu0 %1433 }
 0x3c9   : > { %22388 = vst [vmem:[#allocation96_spill] sm:$0xff] %v18300_v1  ;;  %v18306_v16 = vpop.permute.xlu1 %1527  ;;  %22393 = vst [vmem:[#allocation99_spill] sm:$0xff] %v18314_v49 }
 0x3ca   : > { %22390 = vst [vmem:[#allocation98_spill] sm:$0xff] %v18306_v16  ;;  %15573 = vrot.lane.b32.xlu0 %v18298_v62, %s16748_s27  ;;  %v22397_v62 = vld [vmem:[#allocation60_spill] sm:$0xff] }
 0x3cb   : > { %15593 = vrot.lane.b32.xlu1 %v18304_v19, %s16748_s27  ;;  %v22398_v19 = vld [vmem:[#allocation52_spill] sm:$0xff] }
 0x3cc   : > { %v18316_v4 = vpop.permute.xlu0 %1529  ;;  %v18330_v43 = vpack.i.bf16 %v22398_v19, %v22397_v62  ;;  %22400 = vst [vmem:[#allocation52_spill] sm:$0xff] %v18336_v44 }
 0x3cd   : > { %22394 = vst [vmem:[#allocation100_spill] sm:$0xff] %v18316_v4  ;;  %v18322_v37 = vpop.permute.xlu1 %15433 }
 0x3ce   : > { %22396 = vst [vmem:[#allocation102_spill] sm:$0xff] %v18322_v37  ;;  %15578 = vrot.lane.b32.xlu0 %v18314_v49, %s16748_s27  ;;  %22399 = vst [vmem:[#allocation60_spill] sm:$0xff] %v18330_v43  ;;  %v18346_v49 = vpack.i.bf16 %v18092_v38, %v18094_v30  ;;  %v18350_v37 = vpack.i.bf16 %v18160_v0, %v18146_v51  ;;  %v18364_v0 = vpack.i.bf16 %v18176_v57, %v18166_v61 }
 0x3cf   : > { %15598 = vrot.lane.b32.xlu1 %v18320_v34, %s16748_s27 }
 0x3d0   : > { %v18332_v47 = vpop.permute.xlu0 %1335  ;;  %22401 = vst [vmem:[#allocation103_spill] sm:$0xff] %v18346_v49  ;;  %22402 = vst [vmem:[#allocation104_spill] sm:$0xff] %v18350_v37 }
 0x3d1   : > { %v18338_v52 = vpop.permute.xlu1 %1341  ;;  %22405 = vst [vmem:[#allocation107_spill] sm:$0xff] %v18364_v0 }
 0x3d2   : > { %15583 = vrot.lane.b32.xlu0 %v18330_v43, %s16748_s27 }
 0x3d3   : > { %15613 = vrot.lane.b32.xlu1 %v18336_v44, %s16748_s27  ;;  %v18358_v44 = vpack.i.bf16 %v18109_v60, %v18115_v54 }
 0x3d4   : > { %v15429_v34 = vpop.permute.xlu0 %15428 }
 0x3d5   : > { %v15439_v8 = vpop.permute.xlu1 %15438  ;;  %v15431_v58 = vunpack.i.h.bf16 %v15429_v34  ;;  %v15430_v20 = vunpack.i.l.bf16 %v15429_v34  ;;  %22403 = vst [vmem:[#allocation105_spill] sm:$0xff] %v18358_v44 }
 0x3d6   : > { %v15441_v29 = vunpack.i.h.bf16 %v15439_v8  ;;  %v15440_v55 = vunpack.i.l.bf16 %v15439_v8  ;;  %15603 = vrot.lane.b32.xlu0 %v18346_v49, %s16748_s27  ;;  %v22414_v49 = vld [vmem:[#allocation36_spill] sm:$0xff] }
 0x3d7   : > { %v14543_v43 = vpack.c.bf16 %v15431_v58, %v15430_v20  ;;  %15618 = vrot.lane.b32.xlu1 %v18350_v37, %s16748_s27  ;;  %v18380_v58 = vpack.i.bf16 %v18182_v33, %v18281_v25  ;;  %v1601_v57 = vmul.f32 0.35355338, %v22414_v49  ;;  %v18425_v49 = vpack.i.bf16 %v18316_v4, %v18306_v16 }
 0x3d8   : > { %v14549_v9 = vpack.c.bf16 %v15441_v29, %v15440_v55  ;;  %v18360_v38 = vpop.permute.xlu0 %1437  ;;  %v18388_v29 = vpack.i.bf16 %v18268_v18, %v18332_v47 }
 0x3d9   : > { %22404 = vst [vmem:[#allocation106_spill] sm:$0xff] %v18360_v38  ;;  %v18366_v34 = vpop.permute.xlu1 %1435  ;;  %14545 = vmatprep.subr.msk.bf16.mxu1 %vm17745_vm2, %v14543_v43  ;;  %22407 = vst [vmem:[#allocation109_spill] sm:$0xff] %v18380_v58 }
 0x3da   : > { %22406 = vst [vmem:[#allocation108_spill] sm:$0xff] %v18366_v34  ;;  %14551 = vmatprep.subr.msk.bf16.mxu0 %vm17745_vm2, %v14549_v9  ;;  %15608 = vrot.lane.b32.xlu0 %v18358_v44, %s16748_s27  ;;  %22409 = vst [vmem:[#allocation111_spill] sm:$0xff] %v18388_v29  ;;  %v18405_v44 = vpack.i.bf16 %v18300_v1, %v18288_v36 }
 0x3db   : > { %15623 = vrot.lane.b32.xlu1 %v18364_v0, %s16748_s27  ;;  %14548 = vmatpush3.bf16.xpose.msk.msra.mxu1 %vm17745_vm2, %v14543_v43  ;;  %v18398_v43 = vpack.i.bf16 %v18244_v26, %v18210_v6 }
 0x3dc   : > { %14554 = vmatpush3.bf16.xpose.msk.msra.mxu0 %vm17745_vm2, %v14549_v9  ;;  %v18384_v8 = vpop.permute.xlu0 %1533  ;;  %v22412_v9 = vld [vmem:[#allocation27_spill] sm:$0xff] }
 0x3dd   : > { %22408 = vst [vmem:[#allocation110_spill] sm:$0xff] %v18384_v8  ;;  %v18390_v20 = vpop.permute.xlu1 %1531  ;;  %22411 = vst [vmem:[#allocation113_spill] sm:$0xff] %v18398_v43  ;;  %v1600_v0 = vmul.f32 0.35355338, %v22412_v9  ;;  %v18418_v9 = vpack.i.bf16 %v18261_v11, %v18230_v35 }
 0x3de   : > { %22410 = vst [vmem:[#allocation112_spill] sm:$0xff] %v18390_v20  ;;  %15628 = vrot.lane.b32.xlu0 %v18380_v58, %s16748_s27  ;;  %22413 = vst [vmem:[#allocation27_spill] sm:$0xff] %v18405_v44  ;;  %v22417_v58 = vld [vmem:[#allocation33_spill] sm:$0xff] }
 0x3df   : > { %15643 = vrot.lane.b32.xlu1 %v18388_v29, %s16748_s27  ;;  %22415 = vst [vmem:[#allocation36_spill] sm:$0xff] %v18418_v9  ;;  %v1602_v61 = vmul.f32 0.35355338, %v22417_v58  ;;  %22418 = vst [vmem:[#allocation33_spill] sm:$0xff] %v18425_v49 }
 0x3e0   : > { %v18400_v55 = vpop.permute.xlu0 %1339 }
 0x3e1   : > { %v18407_v37 = vpop.permute.xlu1 %1345 }
 0x3e2   : > { %13452 = vmatmul.mubr.msk.f32.vlgmr.msra.gmra.mrb[16].mxu1 %vm1715_vm1, %v1600_v0  ;;  %15633 = vrot.lane.b32.xlu0 %v18398_v43, %s16748_s27  ;;  %v22420_v43 = vld [vmem:[#allocation50_spill] sm:$0xff] }
 0x3e3   : > { %15648 = vrot.lane.b32.xlu1 %v18405_v44, %s16748_s27  ;;  %13454 = vmatprep.mubr.msk.f32.mxu1 %vm1715_vm1, %v1601_v57  ;;  %v1607_v60 = vmul.f32 0.35355338, %v22420_v43  ;;  %v18438_v57 = vpack.i.bf16 %v18338_v52, %v18400_v55 }
 0x3e4   : > { %v18420_v29 = vpop.permute.xlu0 %15443 }
 0x3e5   : > { %22416 = vst [vmem:[#allocation114_spill] sm:$0xff] %v18420_v29  ;;  %v18427_v0 = vpop.permute.xlu1 %1439  ;;  %22421 = vst [vmem:[#allocation50_spill] sm:$0xff] %v18438_v57 }
 0x3e6   : > { %22419 = vst [vmem:[#allocation115_spill] sm:$0xff] %v18427_v0  ;;  %13455 = vmatmul.mubr.msk.f32.gmra.mrb[18].mxu1 %vm1715_vm1, %v1602_v61  ;;  %15638 = vrot.lane.b32.xlu0 %v18418_v9, %s16748_s27  ;;  %v18448_v61 = vpack.i.bf16 %v18360_v38, %v18366_v34 }
 0x3e7   : > { %15653 = vrot.lane.b32.xlu1 %v18425_v49, %s16748_s27  ;;  %13479 = vmatprep.mubr.msk.f32.mxu1 %vm1715_vm1, %v1607_v60  ;;  %v18458_v60 = vpack.i.bf16 %v18384_v8, %v18390_v20 }
 0x3e8   : > { %v18440_v58 = vpop.permute.xlu0 %1441  ;;  %22424 = vst [vmem:[#allocation118_spill] sm:$0xff] %v18448_v61 }
 0x3e9   : > { %22422 = vst [vmem:[#allocation116_spill] sm:$0xff] %v18440_v58  ;;  %v18442_v44 = vpop.permute.xlu1 %1535  ;;  %22426 = vst [vmem:[#allocation120_spill] sm:$0xff] %v18458_v60  ;;  %v18472_v35 = vpack.i.bf16 %v18440_v58, %v18427_v0 }
 0x3ea   : > { %22423 = vst [vmem:[#allocation117_spill] sm:$0xff] %v18442_v44  ;;  %15658 = vrot.lane.b32.xlu0 %v18438_v57, %s16748_s27 }
 0x3eb   : > { %22428 = vst [vmem:[#allocation122_spill] sm:$0xff] %v18472_v35 }
 0x3ec   : > { %v18450_v43 = vpop.permute.xlu0 %1537 }
 0x3ed   : > { %22425 = vst [vmem:[#allocation119_spill] sm:$0xff] %v18450_v43  ;;  %v18452_v49 = vpop.permute.xlu1 %1349 }
 0x3ee   : > { %15663 = vrot.lane.b32.xlu0 %v18448_v61, %s16748_s27 }
 0x3f0   : > { %v18460_v9 = vpop.permute.xlu0 %1343 }
 0x3f1   : > { %v15459_v29 = vpop.permute.xlu1 %15458  ;;  %v18464_v57 = vpack.i.bf16 %v18407_v37, %v18460_v9 }
 0x3f2   : > { %v15461_v4 = vunpack.i.h.bf16 %v15459_v29  ;;  %v15460_v16 = vunpack.i.l.bf16 %v15459_v29  ;;  %15668 = vrot.lane.b32.xlu0 %v18458_v60, %s16748_s27 }
 0x3f3   : > { %22427 = vst [vmem:[#allocation121_spill] sm:$0xff] %v18464_v57  ;;  %15673 = vrot.lane.b32.xlu1 %v18464_v57, %s16748_s27  ;;  %v22437_v57 = vld [vmem:[#allocation46_spill] sm:$0xff] }
 0x3f4   : > { %v14561_v61 = vpack.c.bf16 %v15461_v4, %v15460_v16  ;;  %v15449_v11 = vpop.permute.xlu0 %15448  ;;  %v18486_v4 = vpack.i.bf16 %v18450_v43, %v18442_v44 }
 0x3f5   : > { %v18474_v8 = vpop.permute.xlu1 %1443  ;;  %v15451_v20 = vunpack.i.h.bf16 %v15449_v11  ;;  %v15450_v54 = vunpack.i.l.bf16 %v15449_v11 }
 0x3f6   : > { %22429 = vst [vmem:[#allocation123_spill] sm:$0xff] %v18474_v8  ;;  %14563 = vmatprep.subr.msk.bf16.mxu1 %vm17745_vm2, %v14561_v61  ;;  %22431 = vst [vmem:[#allocation125_spill] sm:$0xff] %v18486_v4 }
 0x3f7   : > { %v14555_v29 = vpack.c.bf16 %v15451_v20, %v15450_v54  ;;  %14566 = vmatpush3.bf16.xpose.msk.msra.mxu1 %vm17745_vm2, %v14561_v61  ;;  %15678 = vrot.lane.b32.xlu1 %v18472_v35, %s16748_s27  ;;  %v22435_v20 = vld [vmem:[#allocation39_spill] sm:$0xff] }
 0x3f8   : > { %v18482_v16 = vpop.permute.xlu0 %15453  ;;  %v1604_v61 = vmul.f32 0.35355338, %v22435_v20 }
 0x3f9   : > { %22430 = vst [vmem:[#allocation124_spill] sm:$0xff] %v18482_v16  ;;  %v18488_v60 = vpop.permute.xlu1 %1539  ;;  %14557 = vmatprep.subr.msk.bf16.mxu0 %vm17745_vm2, %v14555_v29  ;;  %v1605_v16 = vmul.f32 0.35355338, %v22437_v57 }
 0x3fa   : > { %22432 = vst [vmem:[#allocation126_spill] sm:$0xff] %v18488_v60  ;;  %14560 = vmatpush3.bf16.xpose.msk.msra.mxu0 %vm17745_vm2, %v14555_v29  ;;  %v22438_v29 = vld [vmem:[#allocation43_spill] sm:$0xff] }
 0x3fb   : > { %15683 = vrot.lane.b32.xlu1 %v18486_v4, %s16748_s27  ;;  %v1606_v44 = vmul.f32 0.35355338, %v22438_v29  ;;  %v1611_v4 = vmul.f32 0.35355338, %v17751_v17 }
 0x3fc   : > { %v18496_v11 = vpop.permute.xlu0 %1445 }
 0x3fd   : > { %22433 = vst [vmem:[#allocation127_spill] sm:$0xff] %v18496_v11  ;;  %v18498_v54 = vpop.permute.xlu1 %15463  ;;  %v18526_v17 = vpack.i.bf16 %v18496_v11, %v18474_v8 }
 0x3fe   : > { %22434 = vst [vmem:[#allocation128_spill] sm:$0xff] %v18498_v54 }
 0x3ff   : > { %22442 = vst [vmem:[#allocation130_spill] sm:$0xff] %v18526_v17 }
 0x400   : > { %v18501_v35 = vpop.permute.xlu0 %1541 }
 0x401   : > { %22436 = vst [vmem:[#allocation39_spill] sm:$0xff] %v18501_v35  ;;  %v18504_v43 = vpop.permute.xlu1 %1353  ;;  %13466 = vmatmul.mubr.msk.f32.vlgmr.msra.gmra.mrb[36].mxu0 %vm1715_vm1, %v1604_v61 }
 0x402   : > { %13468 = vmatprep.mubr.msk.f32.mxu0 %vm1715_vm1, %v1605_v16 }
 0x404   : > { %v18510_v1 = vpop.permute.xlu0 %1347 }
 0x405   : > { %v18512_v36 = vpop.permute.xlu1 %1447  ;;  %v18516_v20 = vpack.i.bf16 %v18452_v49, %v18510_v1  ;;  %13469 = vmatmul.mubr.msk.f32.gmra.mrb[38].mxu0 %vm1715_vm1, %v1606_v44  ;;  %v18536_v44 = vpack.i.bf16 %v18501_v35, %v18488_v60 }
 0x406   : > { %22439 = vst [vmem:[#allocation46_spill] sm:$0xff] %v18512_v36  ;;  %13493 = vmatprep.mubr.msk.f32.mxu0 %vm1715_vm1, %v1611_v4 }
 0x407   : > { %22440 = vst [vmem:[#allocation43_spill] sm:$0xff] %v18516_v20  ;;  %15688 = vrot.lane.b32.xlu0 %v18516_v20, %s16748_s27  ;;  %22445 = vst [vmem:[#allocation133_spill] sm:$0xff] %v18536_v44 }
 0x408   : > { %v18522_v57 = vpop.permute.xlu0 %1449 }
 0x409   : > { %22441 = vst [vmem:[#allocation129_spill] sm:$0xff] %v18522_v57  ;;  %v18528_v16 = vpop.permute.xlu1 %1543 }
 0x40a   : > { %22443 = vst [vmem:[#allocation131_spill] sm:$0xff] %v18528_v16 }
 0x40b   : > { %15693 = vrot.lane.b32.xlu0 %v18526_v17, %s16748_s27 }
 0x40c   : > { %v18532_v61 = vpop.permute.xlu0 %1545  ;;  %v18540_v29 = vpop.f32.mrb[0].mxu1 }
 0x40d   : > { %22444 = vst [vmem:[#allocation132_spill] sm:$0xff] %v18532_v61  ;;  %v18538_v4 = vpop.permute.xlu1 %15473  ;;  %v1802_v20 = vpop.f32.mrb[1].mxu1 }
 0x40e   : > { %22446 = vst [vmem:[#allocation134_spill] sm:$0xff] %v18538_v4 }
 0x40f   : > { %15698 = vrot.lane.b32.xlu0 %v18536_v44, %s16748_s27  ;;  %v18556_v44 = vpack.i.bf16 %v18522_v57, %v18512_v36  ;;  %v1609_v57 = vmul.f32 0.35355338, %v18080_v10 }
 0x410   : > { %v18544_v54 = vpop.permute.xlu0 %1351  ;;  %v13386_v8 = vpop.f32.mrb[2].mxu1 }
 0x411   : > { %v15479_v11 = vpop.permute.xlu1 %15478  ;;  %v18548_v17 = vpack.i.bf16 %v18504_v43, %v18544_v54  ;;  %v18550_v35 = vpop.f32.mrb[3].mxu1  ;;  %22448 = vst [vmem:[#allocation136_spill] sm:$0xff] %v18556_v44 }
 0x412   : > { %v15481_v26 = vunpack.i.h.bf16 %v15479_v11  ;;  %v15480_v58 = vunpack.i.l.bf16 %v15479_v11 }
 0x413   : > { %22447 = vst [vmem:[#allocation135_spill] sm:$0xff] %v18548_v17  ;;  %15703 = vrot.lane.b32.xlu1 %v18548_v17, %s16748_s27 }
 0x414   : > { %v14573_v4 = vpack.c.bf16 %v15481_v26, %v15480_v58  ;;  %v15469_v60 = vpop.permute.xlu0 %15468  ;;  %v18570_v58 = vpack.i.bf16 %v18532_v61, %v18528_v16 }
 0x415   : > { %v18558_v6 = vpop.permute.xlu1 %15498  ;;  %v15471_v0 = vunpack.i.h.bf16 %v15469_v60  ;;  %v15470_v38 = vunpack.i.l.bf16 %v15469_v60 }
 0x416   : > { %14575 = vmatprep.subr.msk.bf16.mxu0 %vm17745_vm2, %v14573_v4  ;;  %22449 = vst [vmem:[#allocation137_spill] sm:$0xff] %v18570_v58 }
 0x417   : > { %v14567_v34 = vpack.c.bf16 %v15471_v0, %v15470_v38  ;;  %14578 = vmatpush3.bf16.xpose.msk.msra.mxu0 %vm17745_vm2, %v14573_v4  ;;  %15708 = vrot.lane.b32.xlu1 %v18556_v44, %s16748_s27  ;;  %v22452_v44 = vld [vmem:[#allocation49_spill] sm:$0xff] }
 0x418   : > { %v18566_v26 = vpop.permute.xlu0 %15483  ;;  %v1608_v17 = vmul.f32 0.35355338, %v22452_v44  ;;  %v1610_v44 = vmul.f32 0.35355338, %v18070_v7 }
 0x419   : > { %v18572_v11 = vpop.permute.xlu1 %15503  ;;  %14569 = vmatprep.subr.msk.bf16.mxu1 %vm17745_vm2, %v14567_v34 }
 0x41a   : > { %22450 = vst [vmem:[#allocation138_spill] sm:$0xff] %v18572_v11  ;;  %14572 = vmatpush3.bf16.xpose.msk.msra.mxu1 %vm17745_vm2, %v14567_v34 }
 0x41b   : > { %15713 = vrot.lane.b32.xlu1 %v18570_v58, %s16748_s27  ;;  %s16651_s27 = sshll.u32 %s16750_s23, 4  ;;  %s16652_s27 = int_to_ptr.vmem [resolvable:$false] %s16651_s27 }
 0x41c   : > { %v18580_v38 = vpop.permute.xlu0 %15488  ;;  %p16654_p5 = scmp.lt.s32.totalorder %s21961_s15, %s16652_s27 }
 0x41d   : > { %22451 = vst [vmem:[#allocation139_spill] sm:$0xff] %v18580_v38  ;;  %v15509_v0 = vpop.permute.xlu1 %15508 }
 0x41e   : > { %v15511_v60 = vunpack.i.h.bf16 %v15509_v0  ;;  %v15510_v4 = vunpack.i.l.bf16 %v15509_v0  ;;  %v1615_v0 = vmul.f32 0.35355338, %v17842_v23 }
 0x420   : > { %v14585_v61 = vpack.c.bf16 %v15511_v60, %v15510_v4  ;;  %v15494_v16 = vpop.permute.xlu0 %15493  ;;  %v5327_v4 = vld [vmem:[#allocation7 + $0x18] sm:$0xff] }
 0x421   : > { %v18584_v36 = vpop.permute.xlu1 %15528  ;;  %v15496_v11 = vunpack.i.h.bf16 %v15494_v16  ;;  %v15495_v51 = vunpack.i.l.bf16 %v15494_v16  ;;  %13480 = vmatmul.mubr.msk.f32.vlgmr.msra.gmra.mrb[20].mxu1 %vm1715_vm1, %v1608_v17 }
 0x422   : > { %14587 = vmatprep.subr.msk.bf16.mxu1 %vm17745_vm2, %v14585_v61  ;;  %13482 = vmatprep.mubr.msk.f32.mxu1 %vm1715_vm1, %v1609_v57 }
 0x423   : > { %v14579_v34 = vpack.c.bf16 %v15496_v11, %v15495_v51  ;;  %14590 = vmatpush3.bf16.xpose.msk.msra.mxu1 %vm17745_vm2, %v14585_v61  ;;  %v5324_v51 = vld [vmem:[#allocation7] sm:$0xff] }
 0x424   : > { %v18594_v10 = vpop.permute.xlu0 %15513  ;;  %v18606_v17 = vadd.f32 %v5324_v51, %v1802_v20  ;;  %v22456_v61 = vld [vmem:[#allocation18_spill] sm:$0xff]  ;;  %v1614_v51 = vmul.f32 0.35355338, %v17765_v46 }
 0x425   : > { %v18596_v60 = vpop.permute.xlu1 %15533  ;;  %13483 = vmatmul.mubr.msk.f32.gmra.mrb[22].mxu1 %vm1715_vm1, %v1610_v44  ;;  %14581 = vmatprep.subr.msk.bf16.mxu0 %vm17745_vm2, %v14579_v34  ;;  %v1612_v11 = vmul.f32 0.35355338, %v22456_v61  ;;  %v1613_v44 = vmul.f32 0.35355338, %v17781_v59 }
 0x426   : > { %22453 = vst [vmem:[#allocation49_spill] sm:$0xff] %v18596_v60  ;;  %14584 = vmatpush3.bf16.xpose.msk.msra.mxu0 %vm17745_vm2, %v14579_v34  ;;  %13507 = vmatprep.mubr.msk.f32.mxu1 %vm1715_vm1, %v1615_v0  ;;  %22455 = vst [vmem:[#allocation141_spill] sm:$0xff] %v18606_v17  ;;  %v5580_v59 = vsel %vm431_vm0, %v18606_v17, -inf }
 0x428   : > { %v18604_v57 = vpop.permute.xlu0 %15518 }
 0x429   : > { %22454 = vst [vmem:[#allocation140_spill] sm:$0xff] %v18604_v57  ;;  %v15539_v7 = vpop.permute.xlu1 %15538  ;;  %v18613_v57 = vadd.f32 %v13386_v8, %v5327_v4  ;;  %v1619_v8 = vmul.f32 0.35355338, %v17927_v50 }
 0x42a   : > { %v15541_v23 = vunpack.i.h.bf16 %v15539_v7  ;;  %v15540_v16 = vunpack.i.l.bf16 %v15539_v7  ;;  %v5326_v7 = vld [vmem:[#allocation7 + $0x10] sm:$0xff] }
 0x42b   : > { %22457 = vst [vmem:[#allocation18_spill] sm:$0xff] %v18613_v57  ;;  %v18632_v46 = vadd.f32 %v5326_v7, %v18550_v35  ;;  %v5589_v50 = vsel %vm431_vm0, %v18613_v57, -inf  ;;  %v5325_v7 = vld [vmem:[#allocation7 + $0x8] sm:$0xff] }
 0x42c   : > { %v14597_v58 = vpack.c.bf16 %v15541_v23, %v15540_v16  ;;  %v15524_v60 = vpop.permute.xlu0 %15523  ;;  %v13397_v0 = vpop.f32.mrb[4].mxu1 }
 0x42d   : > { %v18610_v38 = vpop.permute.xlu1 %15558  ;;  %v15526_v34 = vunpack.i.h.bf16 %v15524_v60  ;;  %v15525_v15 = vunpack.i.l.bf16 %v15524_v60  ;;  %13494 = vmatmul.mubr.msk.f32.vlgmr.msra.gmra.mrb[40].mxu0 %vm1715_vm1, %v1612_v11  ;;  %v1915_v20 = vpop.f32.mrb[5].mxu1  ;;  %v5586_v35 = vsel %vm431_vm0, %v18632_v46, -inf }
 0x42e   : > { %14599 = vmatprep.subr.msk.bf16.mxu0 %vm17745_vm2, %v14597_v58  ;;  %13496 = vmatprep.mubr.msk.f32.mxu0 %vm1715_vm1, %v1613_v44 }
 0x42f   : > { %v14591_v23 = vpack.c.bf16 %v15526_v34, %v15525_v15  ;;  %14602 = vmatpush3.bf16.xpose.msk.msra.mxu0 %vm17745_vm2, %v14597_v58  ;;  %5581 = vmax.xlane.f32.xlu0 %v5580_v59  ;;  %v5328_v58 = vld [vmem:[#allocation7 + $0x20] sm:$0xff] }
 0x430   : > { %v18624_v60 = vpop.permute.xlu0 %15543  ;;  %v13400_v61 = vpop.f32.mrb[6].mxu1  ;;  %v18641_v44 = vadd.f32 %v5328_v58, %v1915_v20  ;;  %v18651_v20 = vadd.f32 %v18540_v29, %v5325_v7  ;;  %v1623_v29 = vmul.f32 0.35355338, %v18026_v28 }
 0x431   : > { %v18626_v16 = vpop.permute.xlu1 %15563  ;;  %13497 = vmatmul.mubr.msk.f32.gmra.mrb[42].mxu0 %vm1715_vm1, %v1614_v51  ;;  %14593 = vmatprep.subr.msk.bf16.mxu1 %vm17745_vm2, %v14591_v23  ;;  %v1925_v15 = vpop.f32.mrb[7].mxu1  ;;  %v1616_v51 = vmul.f32 0.35355338, %v17814_v41 }
 0x432   : > { %22458 = vst [vmem:[#allocation142_spill] sm:$0xff] %v18626_v16  ;;  %14596 = vmatpush3.bf16.xpose.msk.msra.mxu1 %vm17745_vm2, %v14591_v23  ;;  %13521 = vmatprep.mubr.msk.f32.mxu0 %vm1715_vm1, %v1619_v8  ;;  %v5330_v23 = vld [vmem:[#allocation7 + $0x30] sm:$0xff]  ;;  %v1617_v8 = vmul.f32 0.35355338, %v17875_v3  ;;  %v5592_v41 = vsel %vm431_vm0, %v18641_v44, -inf  ;;  %v5583_v28 = vsel %vm431_vm0, %v18651_v20, -inf }
 0x433   : > { %5590 = vmax.xlane.f32.xlu0 %v5589_v50  ;;  %v18653_v58 = vadd.f32 %v5330_v23, %v1925_v15  ;;  %v1618_v3 = vmul.f32 0.35355338, %v17866_v39  ;;  %v1620_v23 = vmul.f32 0.35355338, %v17906_v31 }
 0x434   : > { %v18639_v11 = vpop.permute.xlu0 %15548 }
 0x435   : > { %22459 = vst [vmem:[#allocation143_spill] sm:$0xff] %v18639_v11  ;;  %v15569_v4 = vpop.permute.xlu1 %15568  ;;  %v5598_v39 = vsel %vm431_vm0, %v18653_v58, -inf }
 0x436   : > { %v15571_v34 = vunpack.i.h.bf16 %v15569_v4  ;;  %v15570_v59 = vunpack.i.l.bf16 %v15569_v4  ;;  %v5329_v4 = vld [vmem:[#allocation7 + $0x28] sm:$0xff] }
 0x437   : > { %5587 = vmax.xlane.f32.xlu0 %v5586_v35 }
 0x438   : > { %v14609_v57 = vpack.c.bf16 %v15571_v34, %v15570_v59  ;;  %v15554_v17 = vpop.permute.xlu0 %15553  ;;  %v18671_v59 = vadd.f32 %v13397_v0, %v5329_v4 }
 0x439   : > { %v18647_v50 = vpop.permute.xlu1 %15588  ;;  %v15556_v16 = vunpack.i.h.bf16 %v15554_v17  ;;  %v15555_v11 = vunpack.i.l.bf16 %v15554_v17  ;;  %13508 = vmatmul.mubr.msk.f32.vlgmr.msra.gmra.mrb[24].mxu1 %vm1715_vm1, %v1616_v51 }
 0x43a   : > { %14611 = vmatprep.subr.msk.bf16.mxu1 %vm17745_vm2, %v14609_v57  ;;  %13510 = vmatprep.mubr.msk.f32.mxu1 %vm1715_vm1, %v1617_v8  ;;  %v5595_v7 = vsel %vm431_vm0, %v18671_v59, -inf  ;;  %v1621_v8 = vmul.f32 0.35355338, %v17967_v32 }
 0x43b   : > { %v14603_v34 = vpack.c.bf16 %v15556_v16, %v15555_v11  ;;  %14614 = vmatpush3.bf16.xpose.msk.msra.mxu1 %vm17745_vm2, %v14609_v57  ;;  %5593 = vmax.xlane.f32.xlu0 %v5592_v41  ;;  %v5331_v57 = vld [vmem:[#allocation7 + $0x38] sm:$0xff] }
 0x43c   : > { %v18664_v17 = vpop.permute.xlu0 %15573  ;;  %v18682_v35 = vadd.f32 %v13400_v61, %v5331_v57 }
 0x43d   : > { %v18666_v15 = vpop.permute.xlu1 %15593  ;;  %13511 = vmatmul.mubr.msk.f32.gmra.mrb[26].mxu1 %vm1715_vm1, %v1618_v3  ;;  %14605 = vmatprep.subr.msk.bf16.mxu0 %vm17745_vm2, %v14603_v34 }
 0x43e   : > { %14608 = vmatpush3.bf16.xpose.msk.msra.mxu0 %vm17745_vm2, %v14603_v34  ;;  %13535 = vmatprep.mubr.msk.f32.mxu1 %vm1715_vm1, %v1623_v29  ;;  %v5601_v31 = vsel %vm431_vm0, %v18682_v35, -inf }
 0x43f   : > { %5599 = vmax.xlane.f32.xlu0 %v5598_v39  ;;  %5584 = vmax.xlane.f32.xlu1 %v5583_v28  ;;  %v1622_v28 = vmul.f32 0.35355338, %v17957_v40  ;;  %v5333_v40 = vld [vmem:[#allocation7 + $0x48] sm:$0xff] }
 0x440   : > { %v18680_v16 = vpop.permute.xlu0 %15578 }
 0x441   : > { %v15599_v11 = vpop.permute.xlu1 %15598 }
 0x442   : > { %v15601_v0 = vunpack.i.h.bf16 %v15599_v11  ;;  %v15600_v51 = vunpack.i.l.bf16 %v15599_v11 }
 0x443   : > { %5596 = vmax.xlane.f32.xlu1 %v5595_v7 }
 0x444   : > { %v14621_v41 = vpack.c.bf16 %v15601_v0, %v15600_v51  ;;  %v15584_v3 = vpop.permute.xlu0 %15583  ;;  %v1627_v0 = vmul.f32 0.35355338, %v18121_v56 }
 0x445   : > { %v15614_v4 = vpop.permute.xlu1 %15613  ;;  %v15586_v34 = vunpack.i.h.bf16 %v15584_v3  ;;  %v15585_v29 = vunpack.i.l.bf16 %v15584_v3  ;;  %13522 = vmatmul.mubr.msk.f32.vlgmr.msra.gmra.mrb[44].mxu0 %vm1715_vm1, %v1620_v23  ;;  %v1624_v3 = vmul.f32 0.35355338, %v17998_v42 }
 0x446   : > { %v15616_v39 = vunpack.i.h.bf16 %v15614_v4  ;;  %v15615_v61 = vunpack.i.l.bf16 %v15614_v4  ;;  %14623 = vmatprep.subr.msk.bf16.mxu0 %vm17745_vm2, %v14621_v41  ;;  %13524 = vmatprep.mubr.msk.f32.mxu0 %vm1715_vm1, %v1621_v8  ;;  %v1625_v4 = vmul.f32 0.35355338, %v22397_v62  ;;  %v1626_v62 = vmul.f32 0.35355338, %v22398_v19 }
 0x447   : > { %v14615_v32 = vpack.c.bf16 %v15586_v34, %v15585_v29  ;;  %14626 = vmatpush3.bf16.xpose.msk.msra.mxu0 %vm17745_vm2, %v14621_v41  ;;  %5602 = vmax.xlane.f32.xlu1 %v5601_v31  ;;  %v1635_v19 = vmul.f32 0.35355338, %v18400_v55  ;;  %v1632_v55 = vmul.f32 0.35355338, %v18182_v33 }
 0x448   : > { %v14627_v57 = vpack.c.bf16 %v15616_v39, %v15615_v61  ;;  %v18697_v11 = vpop.permute.xlu0 %15603 }
 0x449   : > { %v18700_v51 = vpop.permute.xlu1 %15618  ;;  %13525 = vmatmul.mubr.msk.f32.gmra.mrb[46].mxu0 %vm1715_vm1, %v1622_v28  ;;  %14617 = vmatprep.subr.msk.bf16.mxu1 %vm17745_vm2, %v14615_v32 }
 0x44a   : > { %14629 = vmatprep.subr.msk.bf16.mxu0 %vm17745_vm2, %v14627_v57  ;;  %14620 = vmatpush3.bf16.xpose.msk.msra.mxu1 %vm17745_vm2, %v14615_v32 }
 0x44b   : > { %13549 = vmatprep.mubr.msk.f32.mxu0 %vm1715_vm1, %v1627_v0 }
 0x44c   : > { %v18710_v7 = vpop.permute.xlu0 %15608  ;;  %v13411_v56 = vpop.f32.mrb[8].mxu1 }
 0x44d   : > { %v18712_v23 = vpop.permute.xlu1 %15623  ;;  %v18714_v8 = vadd.f32 %v13411_v56, %v5333_v40  ;;  %v18716_v41 = vpop.f32.mrb[9].mxu1  ;;  %v1628_v40 = vmul.f32 0.35355338, %v18082_v27  ;;  %v1630_v27 = vmul.f32 0.35355338, %v18127_v45 }
 0x44f   : > { %14632 = vmatpush3.bf16.xpose.msk.msra.mxu0 %vm17745_vm2, %v14627_v57  ;;  %v5607_v29 = vsel %vm431_vm0, %v18714_v8, -inf }
 0x450   : > { %v15629_v34 = vpop.permute.xlu0 %15628  ;;  %5608 = vmax.xlane.f32.xlu0 %v5607_v29  ;;  %v18724_v28 = vpop.f32.mrb[10].mxu1  ;;  %v1631_v29 = vmul.f32 0.35355338, %v18281_v25 }
 0x451   : > { %v15644_v39 = vpop.permute.xlu1 %15643  ;;  %v15631_v61 = vunpack.i.h.bf16 %v15629_v34  ;;  %v15630_v31 = vunpack.i.l.bf16 %v15629_v34  ;;  %13536 = vmatmul.mubr.msk.f32.vlgmr.msra.gmra.mrb[28].mxu1 %vm1715_vm1, %v1624_v3  ;;  %v18727_v42 = vpop.f32.mrb[11].mxu1  ;;  %v1629_v34 = vmul.f32 0.35355338, %v18192_v53 }
 0x452   : > { %v15646_v32 = vunpack.i.h.bf16 %v15644_v39  ;;  %v15645_v0 = vunpack.i.l.bf16 %v15644_v39  ;;  %13538 = vmatprep.mubr.msk.f32.mxu1 %vm1715_vm1, %v1625_v4 }
 0x453   : > { %v14633_v57 = vpack.c.bf16 %v15631_v61, %v15630_v31 }
 0x454   : > { %v18732_v56 = vpop.permute.xlu0 %15633  ;;  %v14639_v3 = vpack.c.bf16 %v15646_v32, %v15645_v0  ;;  %v1633_v32 = vmul.f32 0.35355338, %v18332_v47  ;;  %v15501_v47 = vunpack.i.h.bf16 %v18558_v6 }
 0x455   : > { %13539 = vmatmul.mubr.msk.f32.gmra.mrb[30].mxu1 %vm1715_vm1, %v1626_v62  ;;  %14635 = vmatprep.subr.msk.bf16.mxu1 %vm17745_vm2, %v14633_v57  ;;  %v18751_v25 = vpop.permute.xlu1 %15648  ;;  %v15486_v62 = vunpack.i.h.bf16 %v18566_v26 }
 0x456   : > { %13550 = vmatmul.mubr.msk.f32.vlgmr.msra.gmra.mrb[48].mxu0 %vm1715_vm1, %v1628_v40  ;;  %14638 = vmatpush3.bf16.xpose.msk.msra.mxu1 %vm17745_vm2, %v14633_v57  ;;  %v15485_v57 = vunpack.i.l.bf16 %v18566_v26  ;;  %v1636_v26 = vmul.f32 0.35355338, %v18338_v52  ;;  %v15546_v52 = vunpack.i.h.bf16 %v18624_v60 }
 0x457   : > { %13552 = vmatprep.mubr.msk.f32.mxu0 %vm1715_vm1, %v1629_v34  ;;  %13563 = vmatprep.mubr.msk.f32.mxu1 %vm1715_vm1, %v1631_v29  ;;  %v1634_v29 = vmul.f32 0.35355338, %v18268_v18  ;;  %v15500_v18 = vunpack.i.l.bf16 %v18558_v6  ;;  %v1643_v6 = vmul.f32 0.35355338, %v17767_v24 }
 0x458   : > { %14641 = vmatprep.subr.msk.bf16.mxu1 %vm17745_vm2, %v14639_v3  ;;  %v18747_v53 = vpop.permute.xlu0 %15638  ;;  %v14669_v33 = vpack.c.bf16 %v15486_v62, %v15485_v57 }
 0x459   : > { %v18756_v31 = vpop.permute.xlu1 %15653 }
 0x45a   : > { %13553 = vmatmul.mubr.msk.f32.gmra.mrb[50].mxu0 %vm1715_vm1, %v1630_v27 }
 0x45b   : > { %13577 = vmatprep.mubr.msk.f32.mxu0 %vm1715_vm1, %v1635_v19  ;;  %v1637_v19 = vmul.f32 0.35355338, %v18460_v9  ;;  %v15545_v9 = vunpack.i.l.bf16 %v18624_v60 }
 0x45c   : > { %v15659_v4 = vpop.permute.xlu0 %15658 }
 0x45d   : > { %v15661_v39 = vunpack.i.h.bf16 %v15659_v4  ;;  %v15660_v61 = vunpack.i.l.bf16 %v15659_v4  ;;  %v14675_v4 = vpack.c.bf16 %v15501_v47, %v15500_v18 }
 0x45e   : > { %14644 = vmatpush3.bf16.xpose.msk.msra.mxu1 %vm17745_vm2, %v14639_v3  ;;  %v1639_v3 = vmul.f32 0.35355338, %v18510_v1 }
 0x45f   : > { %v14645_v45 = vpack.c.bf16 %v15661_v39, %v15660_v61  ;;  %v1638_v39 = vmul.f32 0.35355338, %v18407_v37  ;;  %v5337_v61 = vld [vmem:[#allocation7 + $0x68] sm:$0xff] }
 0x460   : > { %v18780_v1 = vpop.permute.xlu0 %15663 }
 0x461   : > { %14647 = vmatprep.subr.msk.bf16.mxu0 %vm17745_vm2, %v14645_v45 }
 0x462   : > { %14650 = vmatpush3.bf16.xpose.msk.msra.mxu0 %vm17745_vm2, %v14645_v45 }
 0x464   : > { %v18792_v45 = vpop.permute.xlu0 %15668 }
 0x465   : > { %v15674_v0 = vpop.permute.xlu1 %15673  ;;  %13564 = vmatmul.mubr.msk.f32.vlgmr.msra.gmra.mrb[32].mxu1 %vm1715_vm1, %v1632_v55 }
 0x466   : > { %v15676_v40 = vunpack.i.h.bf16 %v15674_v0  ;;  %v15675_v34 = vunpack.i.l.bf16 %v15674_v0  ;;  %13566 = vmatprep.mubr.msk.f32.mxu1 %vm1715_vm1, %v1633_v32  ;;  %v5336_v32 = vld [vmem:[#allocation7 + $0x60] sm:$0xff] }
 0x468   : > { %v14651_v27 = vpack.c.bf16 %v15676_v40, %v15675_v34  ;;  %v14693_v40 = vpack.c.bf16 %v15546_v52, %v15545_v9 }
 0x469   : > { %13567 = vmatmul.mubr.msk.f32.gmra.mrb[34].mxu1 %vm1715_vm1, %v1634_v29  ;;  %v5339_v29 = vld [vmem:[#allocation7 + $0x78] sm:$0xff] }
 0x46a   : > { %14653 = vmatprep.subr.msk.bf16.mxu0 %vm17745_vm2, %v14651_v27  ;;  %13591 = vmatprep.mubr.msk.f32.mxu1 %vm1715_vm1, %v1639_v3 }
 0x46b   : > { %14656 = vmatpush3.bf16.xpose.msk.msra.mxu0 %vm17745_vm2, %v14651_v27  ;;  %v18804_v27 = vpop.permute.xlu1 %15678 }
 0x46c   : > { %14671 = vmatprep.subr.msk.bf16.mxu0 %vm17745_vm2, %v14669_v33 }
 0x46f   : > { %v18822_v52 = vpop.permute.xlu1 %15683 }
 0x472   : > { %13578 = vmatmul.mubr.msk.f32.vlgmr.msra.gmra.mrb[52].mxu0 %vm1715_vm1, %v1636_v26 }
 0x473   : > { %13580 = vmatprep.mubr.msk.f32.mxu0 %vm1715_vm1, %v1637_v19  ;;  %14674 = vmatpush3.bf16.xpose.msk.msra.mxu0 %vm17745_vm2, %v14669_v33  ;;  %v15561_v19 = vunpack.i.h.bf16 %v18610_v38 }
 0x474   : > { %14677 = vmatprep.subr.msk.bf16.mxu0 %vm17745_vm2, %v14675_v4 }
 0x476   : > { %v13425_v55 = vpop.f32.mrb[12].mxu1  ;;  %13581 = vmatmul.mubr.msk.f32.gmra.mrb[54].mxu0 %vm1715_vm1, %v1638_v39  ;;  %v15560_v39 = vunpack.i.l.bf16 %v18610_v38 }
 0x477   : > { %v18797_v0 = vadd.f32 %v13425_v55, %v5337_v61  ;;  %v2141_v62 = vpop.f32.mrb[13].mxu1  ;;  %13605 = vmatprep.mubr.msk.f32.mxu0 %vm1715_vm1, %v1643_v6  ;;  %v5338_v61 = vld [vmem:[#allocation7 + $0x70] sm:$0xff]  ;;  %v1645_v6 = vmul.f32 0.35355338, %v17789_v63  ;;  %v1651_v63 = vmul.f32 0.35355338, %v17951_v14 }
 0x478   : > { %v18800_v37 = vadd.f32 %v5336_v32, %v2141_v62  ;;  %v14699_v38 = vpack.c.bf16 %v15561_v19, %v15560_v39  ;;  %v22460_v32 = vld [vmem:[#allocation21_spill] sm:$0xff]  ;;  %v15516_v62 = vunpack.i.h.bf16 %v18594_v10  ;;  %v15620_v19 = vunpack.i.l.bf16 %v18700_v51 }
 0x479   : > { %v5619_v24 = vsel %vm431_vm0, %v18797_v0, -inf  ;;  %v15689_v57 = vpop.permute.xlu0 %15688  ;;  %v1652_v39 = vmul.f32 0.35355338, %v17908_v12  ;;  %v1654_v12 = vmul.f32 0.35355338, %v17965_v2 }
 0x47a   : > { %5620 = vmax.xlane.f32.xlu1 %v5619_v24  ;;  %v13428_v34 = vpop.f32.mrb[14].mxu1  ;;  %v15691_v60 = vunpack.i.h.bf16 %v15689_v57  ;;  %v15690_v3 = vunpack.i.l.bf16 %v15689_v57  ;;  %v5616_v26 = vsel %vm431_vm0, %v18800_v37, -inf  ;;  %v15515_v24 = vunpack.i.l.bf16 %v18594_v10 }
 0x47b   : > { %v2151_v33 = vpop.f32.mrb[15].mxu1  ;;  %14680 = vmatpush3.bf16.xpose.msk.msra.mxu0 %vm17745_vm2, %v14675_v4  ;;  %v18810_v18 = vadd.f32 %v13428_v34, %v5339_v29  ;;  %v1644_v4 = vmul.f32 0.35355338, %v17730_v5  ;;  %v1646_v5 = vmul.f32 0.35355338, %v22460_v32  ;;  %v15606_v29 = vunpack.i.h.bf16 %v18697_v11 }
 0x47c   : > { %v14657_v47 = vpack.c.bf16 %v15691_v60, %v15690_v3  ;;  %14695 = vmatprep.subr.msk.bf16.mxu0 %vm17745_vm2, %v14693_v40  ;;  %v18824_v9 = vadd.f32 %v5338_v61, %v2151_v33  ;;  %v15605_v60 = vunpack.i.l.bf16 %v18697_v11  ;;  %v14681_v33 = vpack.c.bf16 %v15516_v62, %v15515_v24 }
 0x47d   : > { %v5625_v55 = vsel %vm431_vm0, %v18810_v18, -inf  ;;  %v15531_v10 = vunpack.i.h.bf16 %v18584_v36  ;;  %v15530_v11 = vunpack.i.l.bf16 %v18584_v36  ;;  %v1640_v61 = vmul.f32 0.35355338, %v18452_v49 }
 0x47e   : > { %5617 = vmax.xlane.f32.xlu1 %v5616_v26  ;;  %14659 = vmatprep.subr.msk.bf16.mxu1 %vm17745_vm2, %v14657_v47  ;;  %v5622_v57 = vsel %vm431_vm0, %v18824_v9, -inf  ;;  %v15621_v26 = vunpack.i.h.bf16 %v18700_v51  ;;  %v1642_v36 = vmul.f32 0.35355338, %v18504_v43  ;;  %v1647_v49 = vmul.f32 0.35355338, %v17859_v13  ;;  %v5332_v51 = vld [vmem:[#allocation7 + $0x40] sm:$0xff] }
 0x47f   : > { %14662 = vmatpush3.bf16.xpose.msk.msra.mxu1 %vm17745_vm2, %v14657_v47  ;;  %v14717_v47 = vpack.c.bf16 %v15606_v29, %v15605_v60  ;;  %v15576_v43 = vunpack.i.h.bf16 %v18664_v17  ;;  %v15666_v13 = vunpack.i.h.bf16 %v18780_v1  ;;  %v18891_v24 = vadd.f32 %v5332_v51, %v18716_v41  ;;  %v22467_v51 = vld [vmem:[#allocation108_spill] sm:$0xff] }
 0x480   : > { %v14723_v32 = vpack.c.bf16 %v15621_v26, %v15620_v19  ;;  %v22461_v26 = vld [vmem:[#allocation32_spill] sm:$0xff] }
 0x481   : > { %v5604_v41 = vsel %vm431_vm0, %v18891_v24, -inf  ;;  %v1649_v19 = vmul.f32 0.35355338, %v22461_v26 }
 0x482   : > { %5626 = vmax.xlane.f32.xlu1 %v5625_v55  ;;  %13606 = vmatmul.mubr.msk.f32.vlgmr.msra.gmra.mrb[56].mxu0 %vm1715_vm1, %v1644_v4  ;;  %v1641_v4 = vmul.f32 0.35355338, %v18544_v54  ;;  %v5341_v55 = vld [vmem:[#allocation7 + $0x88] sm:$0xff]  ;;  %v1659_v54 = vmul.f32 0.35355338, %v18094_v30  ;;  %v15665_v30 = vunpack.i.l.bf16 %v18780_v1 }
 0x483   : > { %13608 = vmatprep.mubr.msk.f32.mxu0 %vm1715_vm1, %v1645_v6  ;;  %14698 = vmatpush3.bf16.xpose.msk.msra.mxu0 %vm17745_vm2, %v14693_v40  ;;  %v1653_v6 = vmul.f32 0.35355338, %v17973_v48 }
 0x484   : > { %14701 = vmatprep.subr.msk.bf16.mxu0 %vm17745_vm2, %v14699_v38  ;;  %v14741_v60 = vpack.c.bf16 %v15666_v13, %v15665_v30  ;;  %v15635_v13 = vunpack.i.l.bf16 %v18732_v56  ;;  %v22468_v30 = vld [vmem:[#allocation139_spill] sm:$0xff] }
 0x485   : > { %v15704_v34 = vpop.permute.xlu1 %15703 }
 0x486   : > { %5623 = vmax.xlane.f32.xlu1 %v5622_v57  ;;  %v15706_v40 = vunpack.i.h.bf16 %v15704_v34  ;;  %v15705_v3 = vunpack.i.l.bf16 %v15704_v34  ;;  %13609 = vmatmul.mubr.msk.f32.gmra.mrb[58].mxu0 %vm1715_vm1, %v1646_v5 }
 0x487   : > { %13633 = vmatprep.mubr.msk.f32.mxu0 %vm1715_vm1, %v1651_v63  ;;  %v15575_v63 = vunpack.i.l.bf16 %v18664_v17  ;;  %v5340_v17 = vld [vmem:[#allocation7 + $0x80] sm:$0xff] }
 0x488   : > { %v14663_v14 = vpack.c.bf16 %v15706_v40, %v15705_v3  ;;  %v5335_v40 = vld [vmem:[#allocation7 + $0x58] sm:$0xff]  ;;  %v15591_v3 = vunpack.i.h.bf16 %v18647_v50 }
 0x489   : > { %v14705_v29 = vpack.c.bf16 %v15576_v43, %v15575_v63  ;;  %v5334_v43 = vld [vmem:[#allocation7 + $0x50] sm:$0xff]  ;;  %v15636_v63 = vunpack.i.h.bf16 %v18732_v56 }
 0x48a   : > { %14665 = vmatprep.subr.msk.bf16.mxu1 %vm17745_vm2, %v14663_v14 }
 0x48b   : > { %14668 = vmatpush3.bf16.xpose.msk.msra.mxu1 %vm17745_vm2, %v14663_v14  ;;  %14704 = vmatpush3.bf16.xpose.msk.msra.mxu0 %vm17745_vm2, %v14699_v38  ;;  %v14687_v38 = vpack.c.bf16 %v15531_v10, %v15530_v11  ;;  %v15590_v14 = vunpack.i.l.bf16 %v18647_v50  ;;  %v15680_v10 = vunpack.i.l.bf16 %v18804_v27  ;;  %v5343_v50 = vld [vmem:[#allocation7 + $0x98] sm:$0xff]  ;;  %v14729_v56 = vpack.c.bf16 %v15636_v63, %v15635_v13  ;;  %v22477_v13 = vld [vmem:[#allocation20_spill] sm:$0xff] }
 0x48c   : > { %14683 = vmatprep.subr.msk.bf16.mxu1 %vm17745_vm2, %v14681_v33  ;;  %14719 = vmatprep.subr.msk.bf16.mxu0 %vm17745_vm2, %v14717_v47 }
 0x492   : > { %13592 = vmatmul.mubr.msk.f32.vlgmr.msra.gmra.mrb[36].mxu1 %vm1715_vm1, %v1640_v61  ;;  %13634 = vmatmul.mubr.msk.f32.vlgmr.msra.gmra.mrb[60].mxu0 %vm1715_vm1, %v1652_v39  ;;  %v22462_v39 = vld [vmem:[#allocation61_spill] sm:$0xff] }
 0x493   : > { %13594 = vmatprep.mubr.msk.f32.mxu1 %vm1715_vm1, %v1641_v4  ;;  %14686 = vmatpush3.bf16.xpose.msk.msra.mxu1 %vm17745_vm2, %v14681_v33  ;;  %v1648_v33 = vmul.f32 0.35355338, %v17816_v22  ;;  %v1660_v61 = vmul.f32 0.35355338, %v22462_v39  ;;  %v18915_v4 = vadd.f32 %v18724_v28, %v5335_v40  ;;  %v14711_v22 = vpack.c.bf16 %v15591_v3, %v15590_v14 }
 0x494   : > { %13636 = vmatprep.mubr.msk.f32.mxu0 %vm1715_vm1, %v1653_v6  ;;  %14722 = vmatpush3.bf16.xpose.msk.msra.mxu0 %vm17745_vm2, %v14717_v47  ;;  %v13439_v48 = vpop.f32.mrb[32].mxu0  ;;  %v15681_v47 = vunpack.i.h.bf16 %v18804_v27  ;;  %v22463_v6 = vld [vmem:[#allocation69_spill] sm:$0xff]  ;;  %v15651_v3 = vunpack.i.h.bf16 %v18751_v25  ;;  %v15650_v14 = vunpack.i.l.bf16 %v18751_v25 }
 0x495   : > { %v18874_v5 = vadd.f32 %v13439_v48, %v5341_v55  ;;  %14689 = vmatprep.subr.msk.bf16.mxu1 %vm17745_vm2, %v14687_v38  ;;  %14725 = vmatprep.subr.msk.bf16.mxu0 %vm17745_vm2, %v14723_v32  ;;  %v2254_v2 = vpop.f32.mrb[33].mxu0  ;;  %v1661_v55 = vmul.f32 0.35355338, %v22463_v6  ;;  %v5613_v48 = vsel %vm431_vm0, %v18915_v4, -inf }
 0x496   : > { %13595 = vmatmul.mubr.msk.f32.gmra.mrb[38].mxu1 %vm1715_vm1, %v1642_v36  ;;  %13637 = vmatmul.mubr.msk.f32.gmra.mrb[62].mxu0 %vm1715_vm1, %v1654_v12  ;;  %v18895_v1 = vadd.f32 %v5340_v17, %v2254_v2  ;;  %v14747_v27 = vpack.c.bf16 %v15681_v47, %v15680_v10  ;;  %v1667_v2 = vmul.f32 0.35355338, %v22467_v51  ;;  %v18947_v17 = vadd.f32 %v5334_v43, %v18727_v42  ;;  %v22470_v47 = vld [vmem:[#allocation138_spill] sm:$0xff]  ;;  %v22476_v51 = vld [vmem:[#allocation116_spill] sm:$0xff] }
 0x497   : > { %13619 = vmatprep.mubr.msk.f32.mxu1 %vm1715_vm1, %v1647_v49  ;;  %13661 = vmatprep.mubr.msk.f32.mxu0 %vm1715_vm1, %v1659_v54  ;;  %v5631_v62 = vsel %vm431_vm0, %v18874_v5, -inf  ;;  %v22466_v49 = vld [vmem:[#allocation53_spill] sm:$0xff]  ;;  %v15506_v10 = vunpack.i.h.bf16 %v22470_v47  ;;  %v14735_v25 = vpack.c.bf16 %v15651_v3, %v15650_v14 }
 0x498   : > { %v13442_v57 = vpop.f32.mrb[34].mxu0  ;;  %5632 = vmax.xlane.f32.xlu0 %v5631_v62  ;;  %v5628_v11 = vsel %vm431_vm0, %v18895_v1, -inf  ;;  %v1655_v54 = vmul.f32 0.35355338, %v22466_v49  ;;  %v15491_v62 = vunpack.i.h.bf16 %v22468_v30  ;;  %v5610_v42 = vsel %vm431_vm0, %v18947_v17, -inf  ;;  %v22475_v49 = vld [vmem:[#allocation81_spill] sm:$0xff] }
 0x499   : > { %v2264_v34 = vpop.f32.mrb[35].mxu0  ;;  %v18926_v36 = vadd.f32 %v13442_v57, %v5343_v50  ;;  %v15490_v57 = vunpack.i.l.bf16 %v22468_v30  ;;  %v1675_v30 = vmul.f32 0.35355338, %v22477_v13  ;;  %v5347_v14 = vld [vmem:[#allocation7 + $0xb8] sm:$0xff] }
 0x49b   : > { %14692 = vmatpush3.bf16.xpose.msk.msra.mxu1 %vm17745_vm2, %v14687_v38  ;;  %v22464_v38 = vld [vmem:[#allocation31_spill] sm:$0xff] }
 0x49c   : > { %14728 = vmatpush3.bf16.xpose.msk.msra.mxu0 %vm17745_vm2, %v14723_v32  ;;  %14707 = vmatprep.subr.msk.bf16.mxu1 %vm17745_vm2, %v14705_v29  ;;  %v1650_v28 = vmul.f32 0.35355338, %v22464_v38  ;;  %v22465_v32 = vld [vmem:[#allocation71_spill] sm:$0xff] }
 0x49d   : > { %14743 = vmatprep.subr.msk.bf16.mxu0 %vm17745_vm2, %v14741_v60  ;;  %5605 = vmax.xlane.f32.xlu0 %v5604_v41  ;;  %v1662_v12 = vmul.f32 0.35355338, %v22465_v32  ;;  %v14765_v41 = vpack.c.bf16 %v15491_v62, %v15490_v57  ;;  %v15694_v32 = vpop.permute.xlu0 %15693 }
 0x49e   : > { %v15696_v62 = vunpack.i.h.bf16 %v15694_v32  ;;  %v15695_v57 = vunpack.i.l.bf16 %v15694_v32  ;;  %v22482_v32 = vld [vmem:[#allocation94_spill] sm:$0xff] }
 0x4a1   : > { %5629 = vmax.xlane.f32.xlu0 %v5628_v11  ;;  %v15505_v11 = vunpack.i.l.bf16 %v22470_v47 }
 0x4a2   : > { %13620 = vmatmul.mubr.msk.f32.vlgmr.msra.gmra.mrb[40].mxu1 %vm1715_vm1, %v1648_v33  ;;  %v22469_v33 = vld [vmem:[#allocation47_spill] sm:$0xff] }
 0x4a3   : > { %13662 = vmatmul.mubr.msk.f32.vlgmr.msra.gmra.mrb[64].mxu0 %vm1715_vm1, %v1660_v61  ;;  %13622 = vmatprep.mubr.msk.f32.mxu1 %vm1715_vm1, %v1649_v19  ;;  %v22471_v19 = vld [vmem:[#allocation54_spill] sm:$0xff] }
 0x4a4   : > { %14710 = vmatpush3.bf16.xpose.msk.msra.mxu1 %vm17745_vm2, %v14705_v29  ;;  %13664 = vmatprep.mubr.msk.f32.mxu0 %vm1715_vm1, %v1661_v55  ;;  %v5637_v29 = vsel %vm431_vm0, %v18926_v36, -inf  ;;  %v1657_v39 = vmul.f32 0.35355338, %v22471_v19  ;;  %v22472_v61 = vld [vmem:[#allocation106_spill] sm:$0xff]  ;;  %v22473_v55 = vld [vmem:[#allocation115_spill] sm:$0xff]  ;;  %v5346_v19 = vld [vmem:[#allocation7 + $0xb0] sm:$0xff] }
 0x4a5   : > { %14746 = vmatpush3.bf16.xpose.msk.msra.mxu0 %vm17745_vm2, %v14741_v60  ;;  %14713 = vmatprep.subr.msk.bf16.mxu1 %vm17745_vm2, %v14711_v22  ;;  %v5342_v60 = vld [vmem:[#allocation7 + $0x90] sm:$0xff]  ;;  %v1668_v6 = vmul.f32 0.35355338, %v22472_v61  ;;  %v1669_v50 = vmul.f32 0.35355338, %v22473_v55  ;;  %v22479_v55 = vld [vmem:[#allocation87_spill] sm:$0xff] }
 0x4a6   : > { %14749 = vmatprep.subr.msk.bf16.mxu0 %vm17745_vm2, %v14747_v27  ;;  %5614 = vmax.xlane.f32.xlu0 %v5613_v48  ;;  %v18953_v40 = vadd.f32 %v5342_v60, %v2264_v34  ;;  %v1656_v34 = vmul.f32 0.35355338, %v22469_v33  ;;  %v5344_v48 = vld [vmem:[#allocation7 + $0xa0] sm:$0xff] }
 0x4a7   : > { %13623 = vmatmul.mubr.msk.f32.gmra.mrb[42].mxu1 %vm1715_vm1, %v1650_v28  ;;  %13665 = vmatmul.mubr.msk.f32.gmra.mrb[66].mxu0 %vm1715_vm1, %v1662_v12  ;;  %v14771_v28 = vpack.c.bf16 %v15506_v10, %v15505_v11 }
 0x4a8   : > { %13647 = vmatprep.mubr.msk.f32.mxu1 %vm1715_vm1, %v1655_v54  ;;  %13689 = vmatprep.mubr.msk.f32.mxu0 %vm1715_vm1, %v1667_v2  ;;  %v5634_v26 = vsel %vm431_vm0, %v18953_v40, -inf  ;;  %v1663_v54 = vmul.f32 0.35355338, %v22475_v49  ;;  %v1670_v2 = vmul.f32 0.35355338, %v22476_v51  ;;  %v22483_v49 = vld [vmem:[#allocation24_spill] sm:$0xff] }
 0x4aa   : > { %5638 = vmax.xlane.f32.xlu0 %v5637_v29 }
 0x4ac   : > { %14716 = vmatpush3.bf16.xpose.msk.msra.mxu1 %vm17745_vm2, %v14711_v22  ;;  %v5345_v22 = vld [vmem:[#allocation7 + $0xa8] sm:$0xff] }
 0x4ad   : > { %14752 = vmatpush3.bf16.xpose.msk.msra.mxu0 %vm17745_vm2, %v14747_v27  ;;  %14731 = vmatprep.subr.msk.bf16.mxu1 %vm17745_vm2, %v14729_v56  ;;  %v22474_v27 = vld [vmem:[#allocation57_spill] sm:$0xff] }
 0x4ae   : > { %14767 = vmatprep.subr.msk.bf16.mxu0 %vm17745_vm2, %v14765_v41  ;;  %5611 = vmax.xlane.f32.xlu0 %v5610_v42  ;;  %v1658_v38 = vmul.f32 0.35355338, %v22474_v27 }
 0x4b2   : > { %5635 = vmax.xlane.f32.xlu0 %v5634_v26  ;;  %v15709_v26 = vpop.permute.xlu1 %15708 }
 0x4b3   : > { %13648 = vmatmul.mubr.msk.f32.vlgmr.msra.gmra.mrb[44].mxu1 %vm1715_vm1, %v1656_v34  ;;  %v14753_v34 = vpack.c.bf16 %v15696_v62, %v15695_v57  ;;  %v15711_v61 = vunpack.i.h.bf16 %v15709_v26 }
 0x4b4   : > { %13690 = vmatmul.mubr.msk.f32.vlgmr.msra.gmra.mrb[68].mxu0 %vm1715_vm1, %v1668_v6  ;;  %13650 = vmatprep.mubr.msk.f32.mxu1 %vm1715_vm1, %v1657_v39  ;;  %v15710_v6 = vunpack.i.l.bf16 %v15709_v26 }
 0x4b5   : > { %14734 = vmatpush3.bf16.xpose.msk.msra.mxu1 %vm17745_vm2, %v14729_v56  ;;  %13692 = vmatprep.mubr.msk.f32.mxu0 %vm1715_vm1, %v1669_v50  ;;  %v13453_v12 = vpop.f32.mrb[16].mxu1  ;;  %v22478_v56 = vld [vmem:[#allocation143_spill] sm:$0xff]  ;;  %v1664_v50 = vmul.f32 0.35355338, %v22479_v55 }
 0x4b6   : > { %14770 = vmatpush3.bf16.xpose.msk.msra.mxu0 %vm17745_vm2, %v14765_v41  ;;  %v18984_v43 = vadd.f32 %v13453_v12, %v5345_v22  ;;  %14737 = vmatprep.subr.msk.bf16.mxu1 %vm17745_vm2, %v14735_v25  ;;  %v2367_v63 = vpop.f32.mrb[17].mxu1  ;;  %v15551_v41 = vunpack.i.h.bf16 %v22478_v56  ;;  %v15550_v42 = vunpack.i.l.bf16 %v22478_v56  ;;  %v22480_v22 = vld [vmem:[#allocation142_spill] sm:$0xff]  ;;  %v1665_v12 = vmul.f32 0.35355338, %v22482_v32 }
 0x4b7   : > { %14773 = vmatprep.subr.msk.bf16.mxu0 %vm17745_vm2, %v14771_v28  ;;  %13651 = vmatmul.mubr.msk.f32.gmra.mrb[46].mxu1 %vm1715_vm1, %v1658_v38  ;;  %v18992_v29 = vadd.f32 %v5344_v48, %v2367_v63  ;;  %v15565_v27 = vunpack.i.l.bf16 %v22480_v22  ;;  %v22481_v38 = vld [vmem:[#allocation19_spill] sm:$0xff]  ;;  %v14759_v51 = vpack.c.bf16 %v15711_v61, %v15710_v6 }
 0x4b8   : > { %13693 = vmatmul.mubr.msk.f32.gmra.mrb[70].mxu0 %vm1715_vm1, %v1670_v2  ;;  %13675 = vmatprep.mubr.msk.f32.mxu1 %vm1715_vm1, %v1663_v54  ;;  %v5643_v60 = vsel %vm431_vm0, %v18984_v43, -inf  ;;  %v14789_v11 = vpack.c.bf16 %v15551_v41, %v15550_v42  ;;  %v1677_v54 = vmul.f32 0.35355338, %v22483_v49  ;;  %v22484_v63 = vld [vmem:[#allocation23_spill] sm:$0xff] }
 0x4b9   : > { %13717 = vmatprep.mubr.msk.f32.mxu0 %vm1715_vm1, %v1675_v30  ;;  %5644 = vmax.xlane.f32.xlu1 %v5643_v60  ;;  %v13456_v3 = vpop.f32.mrb[18].mxu1  ;;  %v5640_v10 = vsel %vm431_vm0, %v18992_v29, -inf  ;;  %v1678_v13 = vmul.f32 0.35355338, %v22484_v63  ;;  %v22485_v30 = vld [vmem:[#allocation96_spill] sm:$0xff]  ;;  %v22486_v60 = vld [vmem:[#allocation38_spill] sm:$0xff] }
 0x4ba   : > { %v2377_v33 = vpop.f32.mrb[19].mxu1  ;;  %v19001_v47 = vadd.f32 %v13456_v3, %v5347_v14  ;;  %v1666_v62 = vmul.f32 0.35355338, %v22485_v30  ;;  %v1683_v56 = vmul.f32 0.35355338, %v22486_v60  ;;  %v22487_v41 = vld [vmem:[#allocation123_spill] sm:$0xff] }
 0x4bb   : > { %v19020_v48 = vadd.f32 %v5346_v19, %v2377_v33  ;;  %v1671_v42 = vmul.f32 0.35355338, %v22487_v41  ;;  %v22488_v3 = vld [vmem:[#allocation140_spill] sm:$0xff]  ;;  %v22489_v19 = vld [vmem:[#allocation49_spill] sm:$0xff]  ;;  %v5349_v61 = vld [vmem:[#allocation7 + $0xc8] sm:$0xff] }
 0x4bc   : > { %v5649_v39 = vsel %vm431_vm0, %v19001_v47, -inf  ;;  %v15521_v14 = vunpack.i.h.bf16 %v22488_v3  ;;  %v15520_v33 = vunpack.i.l.bf16 %v22488_v3  ;;  %v22490_v6 = vld [vmem:[#allocation127_spill] sm:$0xff]  ;;  %v22494_v63 = vld [vmem:[#allocation129_spill] sm:$0xff]  ;;  %v5348_v30 = vld [vmem:[#allocation7 + $0xc0] sm:$0xff] }
 0x4bd   : > { %14740 = vmatpush3.bf16.xpose.msk.msra.mxu1 %vm17745_vm2, %v14735_v25  ;;  %5641 = vmax.xlane.f32.xlu1 %v5640_v10  ;;  %v15566_v25 = vunpack.i.h.bf16 %v22480_v22  ;;  %v5646_v57 = vsel %vm431_vm0, %v19020_v48, -inf  ;;  %v15610_v10 = vunpack.i.l.bf16 %v18710_v7  ;;  %v1672_v55 = vmul.f32 0.35355338, %v22490_v6  ;;  %v22496_v60 = vld [vmem:[#allocation42_spill] sm:$0xff]  ;;  %v22497_v3 = vld [vmem:[#allocation64_spill] sm:$0xff] }
 0x4be   : > { %14776 = vmatpush3.bf16.xpose.msk.msra.mxu0 %vm17745_vm2, %v14771_v28  ;;  %14755 = vmatprep.subr.msk.bf16.mxu1 %vm17745_vm2, %v14753_v34  ;;  %v1676_v28 = vmul.f32 0.35355338, %v22481_v38  ;;  %v15625_v22 = vunpack.i.l.bf16 %v18712_v23  ;;  %v22492_v38 = vld [vmem:[#allocation46_spill] sm:$0xff] }
 0x4bf   : > { %14791 = vmatprep.subr.msk.bf16.mxu0 %vm17745_vm2, %v14789_v11  ;;  %v14795_v2 = vpack.c.bf16 %v15566_v25, %v15565_v27  ;;  %v22491_v25 = vld [vmem:[#allocation37_spill] sm:$0xff] }
 0x4c0   : > { %v1684_v27 = vmul.f32 0.35355338, %v22491_v25  ;;  %v22498_v25 = vld [vmem:[#allocation26_spill] sm:$0xff] }
 0x4c1   : > { %5650 = vmax.xlane.f32.xlu1 %v5649_v39  ;;  %v15535_v39 = vunpack.i.l.bf16 %v22489_v19 }
 0x4c4   : > { %13676 = vmatmul.mubr.msk.f32.vlgmr.msra.gmra.mrb[48].mxu1 %vm1715_vm1, %v1664_v50  ;;  %v15626_v50 = vunpack.i.h.bf16 %v18712_v23 }
 0x4c5   : > { %13718 = vmatmul.mubr.msk.f32.vlgmr.msra.gmra.mrb[72].mxu0 %vm1715_vm1, %v1676_v28  ;;  %13678 = vmatprep.mubr.msk.f32.mxu1 %vm1715_vm1, %v1665_v12  ;;  %v1673_v28 = vmul.f32 0.35355338, %v22492_v38  ;;  %v22493_v12 = vld [vmem:[#allocation44_spill] sm:$0xff]  ;;  %v15686_v38 = vunpack.i.h.bf16 %v18822_v52 }
 0x4c6   : > { %14758 = vmatpush3.bf16.xpose.msk.msra.mxu1 %vm17745_vm2, %v14753_v34  ;;  %13720 = vmatprep.mubr.msk.f32.mxu0 %vm1715_vm1, %v1677_v54  ;;  %v15611_v34 = vunpack.i.h.bf16 %v18710_v7  ;;  %v15536_v7 = vunpack.i.h.bf16 %v22489_v19  ;;  %v1685_v49 = vmul.f32 0.35355338, %v22493_v12  ;;  %v14819_v23 = vpack.c.bf16 %v15626_v50, %v15625_v22 }
 0x4c7   : > { %14794 = vmatpush3.bf16.xpose.msk.msra.mxu0 %vm17745_vm2, %v14789_v11  ;;  %14761 = vmatprep.subr.msk.bf16.mxu1 %vm17745_vm2, %v14759_v51  ;;  %v14777_v11 = vpack.c.bf16 %v15521_v14, %v15520_v33  ;;  %v1691_v14 = vmul.f32 0.35355338, %v22497_v3  ;;  %v15670_v19 = vunpack.i.l.bf16 %v18792_v45  ;;  %v15596_v50 = vunpack.i.h.bf16 %v18666_v15 }
 0x4c8   : > { %14797 = vmatprep.subr.msk.bf16.mxu0 %vm17745_vm2, %v14795_v2  ;;  %5647 = vmax.xlane.f32.xlu1 %v5646_v57  ;;  %v14813_v26 = vpack.c.bf16 %v15611_v34, %v15610_v10  ;;  %v15581_v34 = vunpack.i.h.bf16 %v18680_v16  ;;  %v15580_v10 = vunpack.i.l.bf16 %v18680_v16  ;;  %v15595_v22 = vunpack.i.l.bf16 %v18666_v15 }
 0x4c9   : > { %13679 = vmatmul.mubr.msk.f32.gmra.mrb[50].mxu1 %vm1715_vm1, %v1666_v62  ;;  %13721 = vmatmul.mubr.msk.f32.gmra.mrb[74].mxu0 %vm1715_vm1, %v1678_v13  ;;  %v1674_v13 = vmul.f32 0.35355338, %v22494_v63  ;;  %v22495_v62 = vld [vmem:[#allocation28_spill] sm:$0xff]  ;;  %v22501_v63 = vld [vmem:[#allocation73_spill] sm:$0xff] }
 0x4ca   : > { %13703 = vmatprep.mubr.msk.f32.mxu1 %vm1715_vm1, %v1671_v42  ;;  %13745 = vmatprep.mubr.msk.f32.mxu0 %vm1715_vm1, %v1683_v56  ;;  %v1679_v57 = vmul.f32 0.35355338, %v22495_v62  ;;  %v1686_v56 = vmul.f32 0.35355338, %v22496_v60  ;;  %v22503_v62 = vld [vmem:[#allocation75_spill] sm:$0xff] }
 0x4ce   : > { %14764 = vmatpush3.bf16.xpose.msk.msra.mxu1 %vm17745_vm2, %v14759_v51 }
 0x4cf   : > { %14800 = vmatpush3.bf16.xpose.msk.msra.mxu0 %vm17745_vm2, %v14795_v2  ;;  %14779 = vmatprep.subr.msk.bf16.mxu1 %vm17745_vm2, %v14777_v11  ;;  %v14783_v2 = vpack.c.bf16 %v15536_v7, %v15535_v39  ;;  %v5351_v7 = vld [vmem:[#allocation7 + $0xd8] sm:$0xff]  ;;  %v14801_v39 = vpack.c.bf16 %v15581_v34, %v15580_v10  ;;  %v22506_v34 = vld [vmem:[#allocation22_spill] sm:$0xff] }
 0x4d0   : > { %14815 = vmatprep.subr.msk.bf16.mxu0 %vm17745_vm2, %v14813_v26  ;;  %v15326_v10 = vunpack.i.h.bf16 %v22506_v34 }
 0x4d4   : > { %v13467_v32 = vpop.f32.mrb[36].mxu0 }
 0x4d5   : > { %13704 = vmatmul.mubr.msk.f32.vlgmr.msra.gmra.mrb[52].mxu1 %vm1715_vm1, %v1672_v55  ;;  %v19066_v54 = vadd.f32 %v13467_v32, %v5349_v61  ;;  %v2480_v51 = vpop.f32.mrb[37].mxu0  ;;  %v22499_v32 = vld [vmem:[#allocation34_spill] sm:$0xff] }
 0x4d6   : > { %13746 = vmatmul.mubr.msk.f32.vlgmr.msra.gmra.mrb[76].mxu0 %vm1715_vm1, %v1684_v27  ;;  %13706 = vmatprep.mubr.msk.f32.mxu1 %vm1715_vm1, %v1673_v28  ;;  %v1680_v27 = vmul.f32 0.35355338, %v22498_v25  ;;  %v15685_v28 = vunpack.i.l.bf16 %v18822_v52  ;;  %v1681_v12 = vmul.f32 0.35355338, %v22499_v32  ;;  %v22502_v52 = vld [vmem:[#allocation30_spill] sm:$0xff] }
 0x4d7   : > { %14782 = vmatpush3.bf16.xpose.msk.msra.mxu1 %vm17745_vm2, %v14777_v11  ;;  %13748 = vmatprep.mubr.msk.f32.mxu0 %vm1715_vm1, %v1685_v49  ;;  %v5655_v42 = vsel %vm431_vm0, %v19066_v54, -inf  ;;  %v19088_v11 = vadd.f32 %v5348_v30, %v2480_v51  ;;  %v22500_v49 = vld [vmem:[#allocation62_spill] sm:$0xff]  ;;  %v1682_v30 = vmul.f32 0.35355338, %v22502_v52 }
 0x4d8   : > { %14818 = vmatpush3.bf16.xpose.msk.msra.mxu0 %vm17745_vm2, %v14813_v26  ;;  %14785 = vmatprep.subr.msk.bf16.mxu1 %vm17745_vm2, %v14783_v2  ;;  %v13470_v41 = vpop.f32.mrb[38].mxu0  ;;  %v15671_v26 = vunpack.i.h.bf16 %v18792_v45  ;;  %v5350_v45 = vld [vmem:[#allocation7 + $0xd0] sm:$0xff]  ;;  %v1692_v51 = vmul.f32 0.35355338, %v22500_v49  ;;  %v14843_v15 = vpack.c.bf16 %v15686_v38, %v15685_v28  ;;  %v22510_v32 = vld [vmem:[#allocation110_spill] sm:$0xff] }
 0x4d9   : > { %14821 = vmatprep.subr.msk.bf16.mxu0 %vm17745_vm2, %v14819_v23  ;;  %13707 = vmatmul.mubr.msk.f32.gmra.mrb[54].mxu1 %vm1715_vm1, %v1674_v13  ;;  %v2490_v33 = vpop.f32.mrb[39].mxu0  ;;  %v19095_v61 = vadd.f32 %v13470_v41, %v5351_v7  ;;  %v5652_v16 = vsel %vm431_vm0, %v19088_v11, -inf  ;;  %v1693_v13 = vmul.f32 0.35355338, %v22501_v63  ;;  %v22509_v38 = vld [vmem:[#allocation56_spill] sm:$0xff] }
 0x4da   : > { %13749 = vmatmul.mubr.msk.f32.gmra.mrb[78].mxu0 %vm1715_vm1, %v1686_v56  ;;  %13731 = vmatprep.mubr.msk.f32.mxu1 %vm1715_vm1, %v1679_v57  ;;  %v14837_v6 = vpack.c.bf16 %v15671_v26, %v15670_v19  ;;  %v1694_v57 = vmul.f32 0.35355338, %v22503_v62  ;;  %v22504_v56 = vld [vmem:[#allocation51_spill] sm:$0xff]  ;;  %v15325_v26 = vunpack.i.l.bf16 %v22506_v34  ;;  %v1689_v28 = vmul.f32 0.35355338, %v22509_v38  ;;  %v5354_v38 = vld [vmem:[#allocation7 + $0xf0] sm:$0xff] }
 0x4db   : > { %13773 = vmatprep.mubr.msk.f32.mxu0 %vm1715_vm1, %v1691_v14  ;;  %5656 = vmax.xlane.f32.xlu0 %v5655_v42  ;;  %v5661_v55 = vsel %vm431_vm0, %v19095_v61, -inf  ;;  %v1687_v41 = vmul.f32 0.35355338, %v22504_v56  ;;  %v22505_v42 = vld [vmem:[#allocation112_spill] sm:$0xff]  ;;  %v15641_v14 = vunpack.i.h.bf16 %v18747_v53  ;;  %v5352_v56 = vld [vmem:[#allocation7 + $0xe0] sm:$0xff] }
 0x4dc   : > { %v1699_v3 = vmul.f32 0.35355338, %v22505_v42  ;;  %v14861_v7 = vpack.c.bf16 %v15326_v10, %v15325_v26  ;;  %v22514_v42 = vld [vmem:[#allocation85_spill] sm:$0xff] }
 0x4df   : > { %14788 = vmatpush3.bf16.xpose.msk.msra.mxu1 %vm17745_vm2, %v14783_v2  ;;  %5653 = vmax.xlane.f32.xlu0 %v5652_v16  ;;  %v19116_v2 = vadd.f32 %v5350_v45, %v2490_v33  ;;  %v15640_v33 = vunpack.i.l.bf16 %v18747_v53  ;;  %v5353_v53 = vld [vmem:[#allocation7 + $0xe8] sm:$0xff]  ;;  %v15655_v16 = vunpack.i.l.bf16 %v18756_v31  ;;  %v22507_v45 = vld [vmem:[#allocation25_spill] sm:$0xff] }
 0x4e0   : > { %14824 = vmatpush3.bf16.xpose.msk.msra.mxu0 %vm17745_vm2, %v14819_v23  ;;  %14803 = vmatprep.subr.msk.bf16.mxu1 %vm17745_vm2, %v14801_v39  ;;  %v14807_v23 = vpack.c.bf16 %v15596_v50, %v15595_v22  ;;  %v15335_v50 = vunpack.i.l.bf16 %v22507_v45  ;;  %v22508_v22 = vld [vmem:[#allocation48_spill] sm:$0xff] }
 0x4e1   : > { %14839 = vmatprep.subr.msk.bf16.mxu0 %vm17745_vm2, %v14837_v6  ;;  %v5658_v60 = vsel %vm431_vm0, %v19116_v2, -inf  ;;  %v14825_v19 = vpack.c.bf16 %v15641_v14, %v15640_v33  ;;  %v1688_v25 = vmul.f32 0.35355338, %v22508_v22  ;;  %v22515_v14 = vld [vmem:[#allocation119_spill] sm:$0xff]  ;;  %v15714_v22 = vpop.permute.xlu1 %15713 }
 0x4e2   : > { %v1702_v33 = vmul.f32 0.35355338, %v22515_v14  ;;  %v22519_v14 = vld [vmem:[#allocation100_spill] sm:$0xff] }
 0x4e3   : > { %5662 = vmax.xlane.f32.xlu0 %v5661_v55  ;;  %v15336_v55 = vunpack.i.h.bf16 %v22507_v45 }
 0x4e6   : > { %13732 = vmatmul.mubr.msk.f32.vlgmr.msra.gmra.mrb[56].mxu1 %vm1715_vm1, %v1680_v27 }
 0x4e7   : > { %13774 = vmatmul.mubr.msk.f32.vlgmr.msra.gmra.mrb[80].mxu0 %vm1715_vm1, %v1692_v51  ;;  %13734 = vmatprep.mubr.msk.f32.mxu1 %vm1715_vm1, %v1681_v12  ;;  %v1700_v12 = vmul.f32 0.35355338, %v22510_v32  ;;  %v22511_v51 = vld [vmem:[#allocation117_spill] sm:$0xff] }
 0x4e8   : > { %14806 = vmatpush3.bf16.xpose.msk.msra.mxu1 %vm17745_vm2, %v14801_v39  ;;  %13776 = vmatprep.mubr.msk.f32.mxu0 %vm1715_vm1, %v1693_v13  ;;  %v15656_v39 = vunpack.i.h.bf16 %v18756_v31  ;;  %v1701_v63 = vmul.f32 0.35355338, %v22511_v51  ;;  %v15715_v51 = vunpack.i.l.bf16 %v15714_v22 }
 0x4e9   : > { %14842 = vmatpush3.bf16.xpose.msk.msra.mxu0 %vm17745_vm2, %v14837_v6  ;;  %14809 = vmatprep.subr.msk.bf16.mxu1 %vm17745_vm2, %v14807_v23 }
 0x4ea   : > { %14845 = vmatprep.subr.msk.bf16.mxu0 %vm17745_vm2, %v14843_v15  ;;  %5659 = vmax.xlane.f32.xlu0 %v5658_v60  ;;  %v14831_v13 = vpack.c.bf16 %v15656_v39, %v15655_v16  ;;  %v14865_v60 = vpack.c.bf16 %v15336_v55, %v15335_v50  ;;  %v5357_v39 = vld [vmem:[#allocation7 + $0x108] sm:$0xff]  ;;  %v5356_v50 = vld [vmem:[#allocation7 + $0x100] sm:$0xff] }
 0x4eb   : > { %13735 = vmatmul.mubr.msk.f32.gmra.mrb[58].mxu1 %vm1715_vm1, %v1682_v30  ;;  %13777 = vmatmul.mubr.msk.f32.gmra.mrb[82].mxu0 %vm1715_vm1, %v1694_v57  ;;  %v22513_v30 = vld [vmem:[#allocation59_spill] sm:$0xff]  ;;  %v15699_v57 = vpop.permute.xlu0 %15698 }
 0x4ec   : > { %13759 = vmatprep.mubr.msk.f32.mxu1 %vm1715_vm1, %v1687_v41  ;;  %13801 = vmatprep.mubr.msk.f32.mxu0 %vm1715_vm1, %v1699_v3  ;;  %v1690_v62 = vmul.f32 0.35355338, %v22513_v30  ;;  %v1695_v3 = vmul.f32 0.35355338, %v22514_v42  ;;  %v15701_v10 = vunpack.i.h.bf16 %v15699_v57  ;;  %v15700_v26 = vunpack.i.l.bf16 %v15699_v57 }
 0x4ee   : > { %v14849_v16 = vpack.c.bf16 %v15701_v10, %v15700_v26  ;;  %v22520_v10 = vld [vmem:[#allocation126_spill] sm:$0xff] }
 0x4ef   : > { %v1703_v26 = vmul.f32 0.35355338, %v22520_v10 }
 0x4f0   : > { %14812 = vmatpush3.bf16.xpose.msk.msra.mxu1 %vm17745_vm2, %v14807_v23  ;;  %v22512_v23 = vld [vmem:[#allocation29_spill] sm:$0xff] }
 0x4f1   : > { %14848 = vmatpush3.bf16.xpose.msk.msra.mxu0 %vm17745_vm2, %v14843_v15  ;;  %14827 = vmatprep.subr.msk.bf16.mxu1 %vm17745_vm2, %v14825_v19  ;;  %v15346_v15 = vunpack.i.h.bf16 %v22512_v23  ;;  %v15345_v52 = vunpack.i.l.bf16 %v22512_v23 }
 0x4f2   : > { %14862 = vmatprep.subr.bf16.mxu0 %v14861_v7 }
 0x4f4   : > { %v13481_v6 = vpop.f32.mrb[20].mxu1 }
 0x4f5   : > { %v2593_v27 = vpop.f32.mrb[21].mxu1  ;;  %v19158_v49 = vadd.f32 %v13481_v6, %v5353_v53  ;;  %v5355_v53 = vld [vmem:[#allocation7 + $0xf8] sm:$0xff] }
 0x4f7   : > { %13760 = vmatmul.mubr.msk.f32.vlgmr.msra.gmra.mrb[60].mxu1 %vm1715_vm1, %v1688_v25  ;;  %v5667_v34 = vsel %vm431_vm0, %v19158_v49, -inf }
 0x4f8   : > { %13802 = vmatmul.mubr.msk.f32.vlgmr.msra.gmra.mrb[84].mxu0 %vm1715_vm1, %v1700_v12  ;;  %13762 = vmatprep.mubr.msk.f32.mxu1 %vm1715_vm1, %v1689_v28  ;;  %v13484_v31 = vpop.f32.mrb[22].mxu1  ;;  %v15716_v12 = vunpack.i.h.bf16 %v15714_v22  ;;  %v5360_v22 = vld [vmem:[#allocation7 + $0x120] sm:$0xff] }
 0x4f9   : > { %14830 = vmatpush3.bf16.xpose.msk.msra.mxu1 %vm17745_vm2, %v14825_v19  ;;  %13804 = vmatprep.mubr.msk.f32.mxu0 %vm1715_vm1, %v1701_v63  ;;  %v2603_v41 = vpop.f32.mrb[23].mxu1  ;;  %v19177_v19 = vadd.f32 %v5352_v56, %v2593_v27  ;;  %v19184_v6 = vadd.f32 %v13484_v31, %v5355_v53 }
 0x4fa   : > { %14864 = vmatpush3.bf16.msra.mxu0 %v14861_v7  ;;  %14833 = vmatprep.subr.msk.bf16.mxu1 %vm17745_vm2, %v14831_v13  ;;  %v19181_v7 = vpack.c.bf16 %v15346_v15, %v15345_v52  ;;  %v19200_v23 = vadd.f32 %v5354_v38, %v2603_v41  ;;  %v22517_v52 = vld [vmem:[#allocation91_spill] sm:$0xff]  ;;  %v14855_v42 = vpack.c.bf16 %v15716_v12, %v15715_v51 }
 0x4fb   : > { %14866 = vmatprep.subr.bf16.mxu0 %v14865_v60  ;;  %13763 = vmatmul.mubr.msk.f32.gmra.mrb[62].mxu1 %vm1715_vm1, %v1690_v62  ;;  %v5664_v45 = vsel %vm431_vm0, %v19177_v19, -inf  ;;  %v5673_v63 = vsel %vm431_vm0, %v19184_v6, -inf  ;;  %v1696_v30 = vmul.f32 0.35355338, %v22517_v52  ;;  %v22518_v62 = vld [vmem:[#allocation98_spill] sm:$0xff] }
 0x4fc   : > { %13805 = vmatmul.mubr.msk.f32.gmra.mrb[86].mxu0 %vm1715_vm1, %v1702_v33  ;;  %13787 = vmatprep.mubr.msk.f32.mxu1 %vm1715_vm1, %v1695_v3  ;;  %22516 = vst [vmem:[#allocation21_spill] sm:$0xff] %v19200_v23  ;;  %v1697_v57 = vmul.f32 0.35355338, %v22518_v62  ;;  %v5358_v3 = vld [vmem:[#allocation7 + $0x110] sm:$0xff]  ;;  %v5670_v41 = vsel %vm431_vm0, %v19200_v23, -inf  ;;  %v22526_v62 = vld [vmem:[#allocation45_spill] sm:$0xff] }
 0x4fd   : > { %5668 = vmax.xlane.f32.xlu1 %v5667_v34  ;;  %v1698_v33 = vmul.f32 0.35355338, %v22519_v14  ;;  %v5361_v34 = vld [vmem:[#allocation7 + $0x128] sm:$0xff] }
 0x4fe   : > { %14868 = vmatpush3.bf16.msra.mxu0 %v14865_v60 }
 0x4ff   : > { %14870 = vmatprep.subr.bf16.mxu0 %v19181_v7 }
 0x500   : > { %v13495_v55 = vpop.f32.mrb[40].mxu0 }
 0x501   : > { %14836 = vmatpush3.bf16.xpose.msk.msra.mxu1 %vm17745_vm2, %v14831_v13  ;;  %5665 = vmax.xlane.f32.xlu1 %v5664_v45  ;;  %v19190_v25 = vadd.f32 %v13495_v55, %v5357_v39  ;;  %v2706_v27 = vpop.f32.mrb[41].mxu0  ;;  %v5359_v13 = vld [vmem:[#allocation7 + $0x118] sm:$0xff] }
 0x502   : > { %14851 = vmatprep.subr.msk.bf16.mxu1 %vm17745_vm2, %v14849_v16  ;;  %v19194_v28 = vadd.f32 %v5356_v50, %v2706_v27  ;;  %v22522_v45 = vld [vmem:[#allocation41_spill] sm:$0xff] }
 0x503   : > { %v5679_v32 = vsel %vm431_vm0, %v19190_v25, -inf  ;;  %v15366_v55 = vunpack.i.h.bf16 %v22522_v45 }
 0x504   : > { %v13498_v31 = vpop.f32.mrb[42].mxu0  ;;  %5680 = vmax.xlane.f32.xlu0 %v5679_v32  ;;  %v5676_v56 = vsel %vm431_vm0, %v19194_v28, -inf }
 0x505   : > { %5674 = vmax.xlane.f32.xlu1 %v5673_v63  ;;  %v2716_v15 = vpop.f32.mrb[43].mxu0  ;;  %v19204_v60 = vadd.f32 %v13498_v31, %v5359_v13  ;;  %v5363_v13 = vld [vmem:[#allocation7 + $0x138] sm:$0xff] }
 0x506   : > { %v19218_v53 = vadd.f32 %v5358_v3, %v2716_v15  ;;  %v5362_v3 = vld [vmem:[#allocation7 + $0x130] sm:$0xff] }
 0x507   : > { %v5685_v39 = vsel %vm431_vm0, %v19204_v60, -inf }
 0x508   : > { %13788 = vmatmul.mubr.msk.f32.vlgmr.msra.gmra.mrb[64].mxu1 %vm1715_vm1, %v1696_v30  ;;  %5677 = vmax.xlane.f32.xlu0 %v5676_v56  ;;  %22521 = vst [vmem:[#allocation32_spill] sm:$0xff] %v19218_v53  ;;  %v5682_v12 = vsel %vm431_vm0, %v19218_v53, -inf  ;;  %v15375_v56 = vunpack.i.l.bf16 %v22526_v62 }
 0x509   : > { %13790 = vmatprep.mubr.msk.f32.mxu1 %vm1715_vm1, %v1697_v57  ;;  %14854 = vmatpush3.bf16.xpose.msk.msra.mxu1 %vm17745_vm2, %v14849_v16  ;;  %v15365_v16 = vunpack.i.l.bf16 %v22522_v45  ;;  %v15376_v57 = vunpack.i.h.bf16 %v22526_v62  ;;  %v5367_v62 = vld [vmem:[#allocation7 + $0x158] sm:$0xff] }
 0x50a   : > { %14857 = vmatprep.subr.msk.bf16.mxu1 %vm17745_vm2, %v14855_v42  ;;  %5671 = vmax.xlane.f32.xlu1 %v5670_v41  ;;  %v22527_v41 = vld [vmem:[#allocation39_spill] sm:$0xff] }
 0x50b   : > { %v14877_v63 = vpack.c.bf16 %v15366_v55, %v15365_v16  ;;  %v1704_v14 = vmul.f32 0.35355338, %v22527_v41  ;;  %v14881_v55 = vpack.c.bf16 %v15376_v57, %v15375_v56  ;;  %v5366_v41 = vld [vmem:[#allocation7 + $0x150] sm:$0xff] }
 0x50c   : > { %13791 = vmatmul.mubr.msk.f32.gmra.mrb[66].mxu1 %vm1715_vm1, %v1698_v33  ;;  %5686 = vmax.xlane.f32.xlu0 %v5685_v39  ;;  %v13509_v50 = vpop.f32.mrb[24].mxu1  ;;  %v5365_v33 = vld [vmem:[#allocation7 + $0x148] sm:$0xff] }
 0x50d   : > { %13815 = vmatprep.mubr.msk.f32.mxu1 %vm1715_vm1, %v1703_v26  ;;  %v19226_v27 = vadd.f32 %v13509_v50, %v5361_v34  ;;  %v2819_v38 = vpop.f32.mrb[25].mxu1  ;;  %v22528_v34 = vld [vmem:[#allocation131_spill] sm:$0xff]  ;;  %v5364_v50 = vld [vmem:[#allocation7 + $0x140] sm:$0xff] }
 0x50e   : > { %v19228_v32 = vadd.f32 %v5360_v22, %v2819_v38  ;;  %v1705_v10 = vmul.f32 0.35355338, %v22528_v34 }
 0x50f   : > { %22523 = vst [vmem:[#allocation61_spill] sm:$0xff] %v19226_v27  ;;  %v5691_v51 = vsel %vm431_vm0, %v19226_v27, -inf }
 0x510   : > { %22524 = vst [vmem:[#allocation69_spill] sm:$0xff] %v19228_v32  ;;  %5683 = vmax.xlane.f32.xlu0 %v5682_v12  ;;  %5692 = vmax.xlane.f32.xlu1 %v5691_v51  ;;  %v13512_v31 = vpop.f32.mrb[26].mxu1  ;;  %v5688_v30 = vsel %vm431_vm0, %v19228_v32, -inf  ;;  %v22532_v12 = vld [vmem:[#allocation132_spill] sm:$0xff] }
 0x511   : > { %14860 = vmatpush3.bf16.xpose.msk.msra.mxu1 %vm17745_vm2, %v14855_v42  ;;  %v2829_v15 = vpop.f32.mrb[27].mxu1  ;;  %v19236_v52 = vadd.f32 %v13512_v31, %v5363_v13  ;;  %v22529_v42 = vld [vmem:[#allocation67_spill] sm:$0xff]  ;;  %v1706_v51 = vmul.f32 0.35355338, %v22532_v12  ;;  %v5371_v12 = vld [vmem:[#allocation7 + $0x178] sm:$0xff] }
 0x512   : > { %14878 = vmatprep.subr.bf16.mxu1 %v14877_v63  ;;  %v15406_v26 = vunpack.i.h.bf16 %v22529_v42  ;;  %v15405_v39 = vunpack.i.l.bf16 %v22529_v42  ;;  %v19248_v45 = vadd.f32 %v5362_v3, %v2829_v15 }
 0x513   : > { %22525 = vst [vmem:[#allocation31_spill] sm:$0xff] %v19236_v52  ;;  %v5697_v21 = vsel %vm431_vm0, %v19236_v52, -inf }
 0x514   : > { %5689 = vmax.xlane.f32.xlu1 %v5688_v30  ;;  %22530 = vst [vmem:[#allocation71_spill] sm:$0xff] %v19248_v45  ;;  %v19260_v15 = vpack.c.bf16 %v15406_v26, %v15405_v39 }
 0x516   : > { %22534 = vst [vmem:[#allocation139_spill] sm:$0xff] %v19260_v15 }
 0x518   : > { %13816 = vmatmul.mubr.msk.f32.vlgmr.msra.gmra.mrb[68].mxu1 %vm1715_vm1, %v1704_v14  ;;  %v13523_v16 = vpop.f32.mrb[44].mxu0  ;;  %5698 = vmax.xlane.f32.xlu1 %v5697_v21  ;;  %v5369_v14 = vld [vmem:[#allocation7 + $0x168] sm:$0xff]  ;;  %v5368_v21 = vld [vmem:[#allocation7 + $0x160] sm:$0xff] }
 0x519   : > { %13818 = vmatprep.mubr.msk.f32.mxu1 %vm1715_vm1, %v1705_v10  ;;  %14880 = vmatpush3.bf16.msra.mxu1 %v14877_v63  ;;  %v19252_v22 = vadd.f32 %v13523_v16, %v5365_v33  ;;  %v2932_v38 = vpop.f32.mrb[45].mxu0  ;;  %v5694_v63 = vsel %vm431_vm0, %v19248_v45, -inf }
 0x51a   : > { %14882 = vmatprep.subr.bf16.mxu1 %v14881_v55  ;;  %v19255_v31 = vadd.f32 %v5364_v50, %v2932_v38 }
 0x51b   : > { %22531 = vst [vmem:[#allocation53_spill] sm:$0xff] %v19252_v22  ;;  %v5703_v13 = vsel %vm431_vm0, %v19252_v22, -inf }
 0x51c   : > { %22533 = vst [vmem:[#allocation108_spill] sm:$0xff] %v19255_v31  ;;  %13819 = vmatmul.mubr.msk.f32.gmra.mrb[70].mxu1 %vm1715_vm1, %v1706_v51  ;;  %v13526_v30 = vpop.f32.mrb[46].mxu0  ;;  %5704 = vmax.xlane.f32.xlu0 %v5703_v13  ;;  %v5700_v3 = vsel %vm431_vm0, %v19255_v31, -inf  ;;  %v5372_v13 = vld [vmem:[#allocation7 + $0x180] sm:$0xff] }
 0x51d   : > { %14884 = vmatpush3.bf16.msra.mxu1 %v14881_v55  ;;  %5695 = vmax.xlane.f32.xlu1 %v5694_v63  ;;  %v2942_v57 = vpop.f32.mrb[47].mxu0  ;;  %v19265_v56 = vadd.f32 %v13526_v30, %v5367_v62  ;;  %v5373_v55 = vld [vmem:[#allocation7 + $0x188] sm:$0xff] }
 0x51e   : > { %14894 = vmatprep.subr.bf16.mxu1 %v19260_v15  ;;  %v19269_v33 = vadd.f32 %v5366_v41, %v2942_v57  ;;  %v5585_v57 = vpop.xlane.xlu1 %5584 }
 0x51f   : > { %22535 = vst [vmem:[#allocation47_spill] sm:$0xff] %v19265_v56  ;;  %v5709_v34 = vsel %vm431_vm0, %v19265_v56, -inf }
 0x520   : > { %5701 = vmax.xlane.f32.xlu0 %v5700_v3  ;;  %22536 = vst [vmem:[#allocation138_spill] sm:$0xff] %v19269_v33  ;;  %v5706_v16 = vsel %vm431_vm0, %v19269_v33, -inf }
 0x524   : > { %5710 = vmax.xlane.f32.xlu0 %v5709_v34  ;;  %v13537_v10 = vpop.f32.mrb[28].mxu1  ;;  %v5370_v34 = vld [vmem:[#allocation7 + $0x170] sm:$0xff] }
 0x525   : > { %v19273_v42 = vadd.f32 %v13537_v10, %v5369_v14  ;;  %v3045_v26 = vpop.f32.mrb[29].mxu1 }
 0x526   : > { %v19275_v39 = vadd.f32 %v5368_v21, %v3045_v26  ;;  %v5375_v26 = vld [vmem:[#allocation7 + $0x198] sm:$0xff] }
 0x527   : > { %22537 = vst [vmem:[#allocation54_spill] sm:$0xff] %v19273_v42  ;;  %v5715_v50 = vsel %vm431_vm0, %v19273_v42, -inf }
 0x528   : > { %22538 = vst [vmem:[#allocation106_spill] sm:$0xff] %v19275_v39  ;;  %5707 = vmax.xlane.f32.xlu0 %v5706_v16  ;;  %5716 = vmax.xlane.f32.xlu1 %v5715_v50  ;;  %v13540_v38 = vpop.f32.mrb[30].mxu1  ;;  %v5712_v41 = vsel %vm431_vm0, %v19275_v39, -inf }
 0x529   : > { %v13551_v51 = vpop.f32.mrb[48].mxu0  ;;  %v3055_v30 = vpop.f32.mrb[31].mxu1  ;;  %v19283_v3 = vadd.f32 %v13540_v38, %v5371_v12 }
 0x52a   : > { %v19281_v62 = vadd.f32 %v13551_v51, %v5373_v55  ;;  %v3158_v63 = vpop.f32.mrb[49].mxu0  ;;  %v5965_v55 = vsub.f32 %v18651_v20, %v5585_v57  ;;  %v19292_v50 = vadd.f32 %v5370_v34, %v3055_v30  ;;  %v22545_v57 = vld [vmem:[#allocation141_spill] sm:$0xff] }
 0x52b   : > { %22540 = vst [vmem:[#allocation57_spill] sm:$0xff] %v19283_v3  ;;  %v19287_v14 = vadd.f32 %v5372_v13, %v3158_v63  ;;  %v5721_v38 = vsel %vm431_vm0, %v19283_v3, -inf  ;;  %v5374_v13 = vld [vmem:[#allocation7 + $0x190] sm:$0xff] }
 0x52c   : > { %22539 = vst [vmem:[#allocation115_spill] sm:$0xff] %v19281_v62  ;;  %v5727_v10 = vsel %vm431_vm0, %v19281_v62, -inf  ;;  %5713 = vmax.xlane.f32.xlu1 %v5712_v41  ;;  %22542 = vst [vmem:[#allocation116_spill] sm:$0xff] %v19292_v50  ;;  %v6094_v63 = vmul.f32 1.442695, %v5965_v55  ;;  %v5582_v41 = vpop.xlane.xlu0 %5581  ;;  %v5376_v55 = vld [vmem:[#allocation7 + $0x1a0] sm:$0xff] }
 0x52d   : > { %22541 = vst [vmem:[#allocation81_spill] sm:$0xff] %v19287_v14  ;;  %v13554_v21 = vpop.f32.mrb[50].mxu0  ;;  %5728 = vmax.xlane.f32.xlu0 %v5727_v10  ;;  %v5724_v51 = vsel %vm431_vm0, %v19287_v14, -inf  ;;  %v5718_v10 = vsel %vm431_vm0, %v19292_v50, -inf  ;;  %v5964_v34 = vsub.f32 %v22545_v57, %v5582_v41 }
 0x52e   : > { %v3168_v16 = vpop.f32.mrb[51].mxu0  ;;  %v19296_v12 = vadd.f32 %v13554_v21, %v5375_v26  ;;  %16021 = vpow2.f32 %v6094_v63  ;;  %v5377_v21 = vld [vmem:[#allocation7 + $0x1a8] sm:$0xff] }
 0x52f   : > { %v19302_v20 = vadd.f32 %v5374_v13, %v3168_v16  ;;  %v6092_v13 = vmul.f32 1.442695, %v5964_v34 }
 0x530   : > { %22543 = vst [vmem:[#allocation20_spill] sm:$0xff] %v19296_v12  ;;  %5722 = vmax.xlane.f32.xlu1 %v5721_v38  ;;  %v5733_v30 = vsel %vm431_vm0, %v19296_v12, -inf }
 0x531   : > { %5725 = vmax.xlane.f32.xlu0 %v5724_v51  ;;  %22544 = vst [vmem:[#allocation143_spill] sm:$0xff] %v19302_v20  ;;  %v5730_v26 = vsel %vm431_vm0, %v19302_v20, -inf  ;;  %v5591_v51 = vpop.xlane.xlu0 %5590  ;;  %16023 = vpow2.f32 %v6092_v13 }
 0x534   : > { %5719 = vmax.xlane.f32.xlu1 %v5718_v10 }
 0x535   : > { %5734 = vmax.xlane.f32.xlu0 %v5733_v30  ;;  %v22548_v30 = vld [vmem:[#allocation18_spill] sm:$0xff]  ;;  %v5588_v15 = vpop.xlane.xlu0 %5587 }
 0x536   : > { %v5967_v57 = vsub.f32 %v22548_v30, %v5591_v51  ;;  %v5380_v51 = vld [vmem:[#allocation7 + $0x1c0] sm:$0xff] }
 0x538   : > { %v13565_v38 = vpop.f32.mrb[32].mxu1  ;;  %v6098_v34 = vmul.f32 1.442695, %v5967_v57 }
 0x539   : > { %5731 = vmax.xlane.f32.xlu0 %v5730_v26  ;;  %v19309_v3 = vadd.f32 %v13565_v38, %v5377_v21  ;;  %v3271_v16 = vpop.f32.mrb[33].mxu1  ;;  %v19318_v26 = vpop.eup %16021  ;;  %v5379_v21 = vld [vmem:[#allocation7 + $0x1b8] sm:$0xff]  ;;  %v5966_v38 = vsub.f32 %v18632_v46, %v5588_v15  ;;  %v5378_v15 = vld [vmem:[#allocation7 + $0x1b0] sm:$0xff] }
 0x53a   : > { %v19311_v42 = vadd.f32 %v5376_v55, %v3271_v16  ;;  %v6351_v16 = vsel %vm431_vm0, %v19318_v26, 0.0  ;;  %16025 = vpow2.f32 %v6098_v34  ;;  %v5383_v34 = vld [vmem:[#allocation7 + $0x1d8] sm:$0xff] }
 0x53b   : > { %22546 = vst [vmem:[#allocation87_spill] sm:$0xff] %v19309_v3  ;;  %v5739_v10 = vsel %vm431_vm0, %v19309_v3, -inf  ;;  %v6096_v30 = vmul.f32 1.442695, %v5966_v38  ;;  %v19331_v46 = vpop.eup %16023 }
 0x53c   : > { %22547 = vst [vmem:[#allocation142_spill] sm:$0xff] %v19311_v42  ;;  %5740 = vmax.xlane.f32.xlu1 %v5739_v10  ;;  %v13568_v41 = vpop.f32.mrb[34].mxu1  ;;  %v5736_v12 = vsel %vm431_vm0, %v19311_v42, -inf  ;;  %v5381_v10 = vld [vmem:[#allocation7 + $0x1c8] sm:$0xff]  ;;  %v19327_v42 = vpop.xlane.xlu0 %5593 }
 0x53d   : > { %v3281_v63 = vpop.f32.mrb[35].mxu1  ;;  %v19321_v55 = vadd.f32 %v13568_v41, %v5379_v21  ;;  %16027 = vpow2.f32 %v6096_v30 }
 0x53f   : > { %22549 = vst [vmem:[#allocation19_spill] sm:$0xff] %v19321_v55 }
 0x540   : > { %5737 = vmax.xlane.f32.xlu1 %v5736_v12  ;;  %v5745_v12 = vsel %vm431_vm0, %v19321_v55, -inf }
 0x544   : > { %6352 = vadd.xlane.f32.xlu1 %v6351_v16  ;;  %v19337_v16 = vadd.f32 %v5378_v15, %v3281_v63  ;;  %v19349_v30 = vpop.eup %16025 }
 0x545   : > { %v13579_v13 = vpop.f32.mrb[52].mxu0  ;;  %22554 = vst [vmem:[#allocation38_spill] sm:$0xff] %v19349_v30 }
 0x546   : > { %v19325_v3 = vadd.f32 %v13579_v13, %v5381_v10  ;;  %v3384_v20 = vpop.f32.mrb[53].mxu0  ;;  %22552 = vst [vmem:[#allocation23_spill] sm:$0xff] %v19337_v16  ;;  %v6348_v10 = vsel %vm431_vm0, %v19331_v46, 0.0 }
 0x547   : > { %v19333_v41 = vadd.f32 %v5380_v51, %v3384_v20  ;;  %v19345_v51 = vpop.xlane.xlu0 %5599 }
 0x548   : > { %22550 = vst [vmem:[#allocation94_spill] sm:$0xff] %v19325_v3  ;;  %5746 = vmax.xlane.f32.xlu1 %v5745_v12  ;;  %v5751_v57 = vsel %vm431_vm0, %v19325_v3, -inf  ;;  %v5382_v12 = vld [vmem:[#allocation7 + $0x1d0] sm:$0xff]  ;;  %v19357_v3 = vpop.eup %16027 }
 0x549   : > { %22551 = vst [vmem:[#allocation24_spill] sm:$0xff] %v19333_v41  ;;  %v13582_v21 = vpop.f32.mrb[54].mxu0  ;;  %5752 = vmax.xlane.f32.xlu0 %v5751_v57  ;;  %v5748_v20 = vsel %vm431_vm0, %v19333_v41, -inf  ;;  %v5742_v57 = vsel %vm431_vm0, %v19337_v16, -inf  ;;  %v5388_v41 = vld [vmem:[#allocation7 + $0x200] sm:$0xff]  ;;  %v5390_v16 = vld [vmem:[#allocation7 + $0x210] sm:$0xff] }
 0x54a   : > { %v3394_v38 = vpop.f32.mrb[55].mxu0  ;;  %v19341_v13 = vadd.f32 %v13582_v21, %v5383_v34  ;;  %v5597_v34 = vpop.xlane.xlu1 %5596 }
 0x54b   : > { %v19351_v63 = vadd.f32 %v5382_v12, %v3394_v38  ;;  %v5609_v21 = vpop.xlane.xlu0 %5608  ;;  %v5969_v62 = vsub.f32 %v18671_v59, %v5597_v34 }
 0x54c   : > { %22553 = vst [vmem:[#allocation96_spill] sm:$0xff] %v19341_v13  ;;  %6349 = vadd.xlane.f32.xlu1 %v6348_v10  ;;  %v5757_v15 = vsel %vm431_vm0, %v19341_v13, -inf  ;;  %v6357_v10 = vsel %vm431_vm0, %v19349_v30, 0.0 }
 0x54d   : > { %5749 = vmax.xlane.f32.xlu0 %v5748_v20  ;;  %22555 = vst [vmem:[#allocation123_spill] sm:$0xff] %v19351_v63  ;;  %v5754_v20 = vsel %vm431_vm0, %v19351_v63, -inf }
 0x54e   : > { %v5603_v13 = vpop.xlane.xlu1 %5602 }
 0x54f   : > { %v19361_v55 = vpop.xlane.xlu0 %5632 }
 0x550   : > { %5743 = vmax.xlane.f32.xlu1 %v5742_v57 }
 0x551   : > { %5758 = vmax.xlane.f32.xlu0 %v5757_v15  ;;  %v6354_v15 = vsel %vm431_vm0, %v19357_v3, 0.0 }
 0x553   : > { %v19374_v50 = vpop.xlane.xlu0 %5605 }
 0x554   : > { %6358 = vadd.xlane.f32.xlu1 %v6357_v10 }
 0x555   : > { %v19363_v38 = vpop.f32.mrb[56].mxu0  ;;  %5755 = vmax.xlane.f32.xlu0 %v5754_v20 }
 0x556   : > { %v3610_v12 = vpop.f32.mrb[57].mxu0 }
 0x557   : > { %v19365_v57 = vadd.f32 %v5388_v41, %v3610_v12  ;;  %v19378_v41 = vpop.xlane.xlu1 %5620  ;;  %v5630_v52 = vpop.xlane.xlu0 %5629 }
 0x558   : > { %6355 = vadd.xlane.f32.xlu1 %v6354_v15  ;;  %v6102_v15 = vmul.f32 1.442695, %v5969_v62  ;;  %v5973_v62 = vsub.f32 %v18714_v8, %v5609_v21  ;;  %v5980_v8 = vsub.f32 %v18895_v1, %v5630_v52  ;;  %v5970_v1 = vsub.f32 %v18653_v58, %v19345_v51 }
 0x559   : > { %22556 = vst [vmem:[#allocation140_spill] sm:$0xff] %v19365_v57  ;;  %v19369_v14 = vpop.f32.mrb[58].mxu0  ;;  %v5772_v10 = vsel %vm431_vm0, %v19365_v57, -inf  ;;  %v5968_v57 = vsub.f32 %v18641_v44, %v19327_v42 }
 0x55a   : > { %v3620_v63 = vpop.f32.mrb[59].mxu0  ;;  %5773 = vmax.xlane.f32.xlu0 %v5772_v10  ;;  %16029 = vpow2.f32 %v6102_v15  ;;  %v5385_v10 = vld [vmem:[#allocation7 + $0x1e8] sm:$0xff]  ;;  %v6110_v22 = vmul.f32 1.442695, %v5973_v62  ;;  %v6124_v32 = vmul.f32 1.442695, %v5980_v8 }
 0x55b   : > { %v19376_v20 = vadd.f32 %v5390_v16, %v3620_v63  ;;  %v19382_v39 = vpop.xlane.xlu1 %5617  ;;  %v5384_v16 = vld [vmem:[#allocation7 + $0x1e0] sm:$0xff] }
 0x55d   : > { %22557 = vst [vmem:[#allocation49_spill] sm:$0xff] %v19376_v20  ;;  %v5778_v12 = vsel %vm431_vm0, %v19376_v20, -inf  ;;  %v6100_v20 = vmul.f32 1.442695, %v5968_v57  ;;  %v5971_v57 = vsub.f32 %v18682_v35, %v5603_v13 }
 0x55e   : > { %5779 = vmax.xlane.f32.xlu0 %v5778_v12  ;;  %v19392_v12 = vpop.xlane.xlu0 %5614 }
 0x55f   : > { %v19395_v56 = vpop.xlane.xlu1 %5626  ;;  %16031 = vpow2.f32 %v6100_v20  ;;  %v6106_v45 = vmul.f32 1.442695, %v5971_v57 }
 0x560   : > { %16033 = vpow2.f32 %v6110_v22 }
 0x561   : > { %16035 = vpow2.f32 %v6106_v45  ;;  %v6104_v45 = vmul.f32 1.442695, %v5970_v1 }
 0x562   : > { %16037 = vpow2.f32 %v6124_v32 }
 0x563   : > { %16039 = vpow2.f32 %v6104_v45  ;;  %v5981_v45 = vsub.f32 %v18874_v5, %v19361_v55 }
 0x564   : > { %v19409_v21 = vpop.eup %16029 }
 0x565   : > { %v19386_v59 = vpop.f32.mrb[60].mxu0  ;;  %v13593_v34 = vpop.f32.mrb[36].mxu1  ;;  %22560 = vst [vmem:[#allocation46_spill] sm:$0xff] %v19409_v21  ;;  %v6363_v35 = vsel %vm431_vm0, %v19409_v21, 0.0 }
 0x566   : > { %v19388_v63 = vadd.f32 %v13593_v34, %v5385_v10  ;;  %v3497_v27 = vpop.f32.mrb[37].mxu1  ;;  %v19390_v33 = vpop.f32.mrb[61].mxu0 }
 0x567   : > { %v19397_v31 = vadd.f32 %v5384_v16, %v3497_v27  ;;  %v5639_v16 = vpop.xlane.xlu0 %5638 }
 0x568   : > { %22558 = vst [vmem:[#allocation127_spill] sm:$0xff] %v19388_v63  ;;  %v5763_v44 = vsel %vm431_vm0, %v19388_v63, -inf  ;;  %v5387_v63 = vld [vmem:[#allocation7 + $0x1f8] sm:$0xff]  ;;  %v5983_v20 = vsub.f32 %v18926_v36, %v5639_v16 }
 0x569   : > { %22559 = vst [vmem:[#allocation37_spill] sm:$0xff] %v19397_v31  ;;  %v19401_v42 = vpop.f32.mrb[62].mxu0  ;;  %5764 = vmax.xlane.f32.xlu1 %v5763_v44  ;;  %v13596_v15 = vpop.f32.mrb[38].mxu1  ;;  %v5760_v27 = vsel %vm431_vm0, %v19397_v31, -inf }
 0x56a   : > { %v3507_v10 = vpop.f32.mrb[39].mxu1  ;;  %v19403_v34 = vpop.f32.mrb[63].mxu0  ;;  %v19413_v53 = vadd.f32 %v13596_v15, %v5387_v63  ;;  %v5392_v63 = vld [vmem:[#allocation7 + $0x220] sm:$0xff]  ;;  %v5386_v15 = vld [vmem:[#allocation7 + $0x1f0] sm:$0xff]  ;;  %v6130_v32 = vmul.f32 1.442695, %v5983_v20 }
 0x56b   : > { %v19411_v44 = vpop.xlane.xlu1 %5623  ;;  %v19419_v52 = vpop.xlane.xlu0 %5611  ;;  %v19436_v36 = vadd.f32 %v5386_v15, %v3507_v10 }
 0x56c   : > { %22561 = vst [vmem:[#allocation44_spill] sm:$0xff] %v19413_v53  ;;  %v5769_v22 = vsel %vm431_vm0, %v19413_v53, -inf  ;;  %v19426_v62 = vpop.eup %16031  ;;  %16041 = vpow2.f32 %v6130_v32 }
 0x56d   : > { %5761 = vmax.xlane.f32.xlu1 %v5760_v27  ;;  %22562 = vst [vmem:[#allocation129_spill] sm:$0xff] %v19426_v62  ;;  %22564 = vst [vmem:[#allocation42_spill] sm:$0xff] %v19436_v36  ;;  %v6360_v16 = vsel %vm431_vm0, %v19426_v62, 0.0  ;;  %v19444_v31 = vpop.eup %16033 }
 0x56e   : > { %22565 = vst [vmem:[#allocation64_spill] sm:$0xff] %v19444_v31  ;;  %v6375_v21 = vsel %vm431_vm0, %v19444_v31, 0.0 }
 0x56f   : > { %v19421_v13 = vpop.xlane.xlu1 %5644 }
 0x571   : > { %6364 = vadd.xlane.f32.xlu1 %v6363_v35  ;;  %v5636_v35 = vpop.xlane.xlu0 %5635 }
 0x572   : > { %v5982_v15 = vsub.f32 %v18953_v40, %v5636_v35 }
 0x573   : > { %v19440_v53 = vpop.xlane.xlu1 %5641 }
 0x574   : > { %v6128_v32 = vmul.f32 1.442695, %v5982_v15  ;;  %v5391_v15 = vld [vmem:[#allocation7 + $0x218] sm:$0xff] }
 0x575   : > { %5770 = vmax.xlane.f32.xlu1 %v5769_v22  ;;  %v19428_v57 = vpop.f32.mrb[40].mxu1 }
 0x576   : > { %v19430_v8 = vpop.f32.mrb[64].mxu0  ;;  %v3723_v58 = vpop.f32.mrb[41].mxu1  ;;  %16043 = vpow2.f32 %v6128_v32 }
 0x577   : > { %v19432_v51 = vadd.f32 %v5392_v63, %v3723_v58  ;;  %v19434_v27 = vpop.f32.mrb[65].mxu0  ;;  %v5766_v58 = vsel %vm431_vm0, %v19436_v36, -inf  ;;  %v19463_v23 = vpop.xlane.xlu1 %5650 }
 0x579   : > { %22563 = vst [vmem:[#allocation28_spill] sm:$0xff] %v19432_v51  ;;  %6361 = vadd.xlane.f32.xlu1 %v6360_v16  ;;  %v5784_v22 = vsel %vm431_vm0, %v19432_v51, -inf  ;;  %v19455_v16 = vpop.eup %16035  ;;  %v5389_v51 = vld [vmem:[#allocation7 + $0x208] sm:$0xff] }
 0x57a   : > { %v19446_v1 = vpop.f32.mrb[66].mxu0  ;;  %v19448_v63 = vpop.f32.mrb[42].mxu1  ;;  %5785 = vmax.xlane.f32.xlu0 %v5784_v22  ;;  %22566 = vst [vmem:[#allocation26_spill] sm:$0xff] %v19455_v16  ;;  %v5394_v22 = vld [vmem:[#allocation7 + $0x230] sm:$0xff]  ;;  %v19466_v40 = vadd.f32 %v19363_v38, %v5389_v51  ;;  %v6369_v35 = vsel %vm431_vm0, %v19455_v16, 0.0 }
 0x57b   : > { %v19450_v10 = vpop.f32.mrb[67].mxu0  ;;  %v3733_v20 = vpop.f32.mrb[43].mxu1 }
 0x57c   : > { %v19459_v62 = vpop.eup %16037  ;;  %22568 = vst [vmem:[#allocation62_spill] sm:$0xff] %v19466_v40  ;;  %v5775_v5 = vsel %vm431_vm0, %v19466_v40, -inf }
 0x57d   : > { %5767 = vmax.xlane.f32.xlu1 %v5766_v58  ;;  %22567 = vst [vmem:[#allocation34_spill] sm:$0xff] %v19459_v62  ;;  %v19470_v58 = vadd.f32 %v5394_v22, %v3733_v20  ;;  %v6396_v36 = vsel %vm431_vm0, %v19459_v62, 0.0  ;;  %v19476_v55 = vpop.eup %16039  ;;  %v19482_v20 = vpop.xlane.xlu1 %5647  ;;  %v5397_v22 = vld [vmem:[#allocation7 + $0x248] sm:$0xff] }
 0x57e   : > { %6376 = vadd.xlane.f32.xlu0 %v6375_v21  ;;  %v6126_v21 = vmul.f32 1.442695, %v5981_v45  ;;  %22570 = vst [vmem:[#allocation30_spill] sm:$0xff] %v19476_v55  ;;  %v19480_v51 = vpop.eup %16041  ;;  %v6366_v40 = vsel %vm431_vm0, %v19476_v55, 0.0  ;;  %v19500_v62 = vadd.f32 %v19386_v59, %v5397_v22 }
 0x57f   : > { %22569 = vst [vmem:[#allocation73_spill] sm:$0xff] %v19470_v58  ;;  %v5790_v38 = vsel %vm431_vm0, %v19470_v58, -inf  ;;  %22571 = vst [vmem:[#allocation75_spill] sm:$0xff] %v19480_v51 }
 0x580   : > { %16045 = vpow2.f32 %v6126_v21  ;;  %22573 = vst [vmem:[#allocation112_spill] sm:$0xff] %v19500_v62  ;;  %v5393_v21 = vld [vmem:[#allocation7 + $0x228] sm:$0xff] }
 0x581   : > { %6370 = vadd.xlane.f32.xlu1 %v6369_v35  ;;  %v19515_v59 = vadd.f32 %v19428_v57, %v5393_v21 }
 0x582   : > { %6397 = vadd.xlane.f32.xlu0 %v6396_v36  ;;  %v5972_v36 = vsub.f32 %v18891_v24, %v19374_v50  ;;  %v6405_v24 = vsel %vm431_vm0, %v19480_v51, 0.0  ;;  %v5396_v51 = vld [vmem:[#allocation7 + $0x240] sm:$0xff] }
 0x583   : > { %22574 = vst [vmem:[#allocation22_spill] sm:$0xff] %v19515_v59  ;;  %v5787_v30 = vsel %vm431_vm0, %v19515_v59, -inf }
 0x585   : > { %5776 = vmax.xlane.f32.xlu1 %v5775_v5  ;;  %v19493_v5 = vadd.f32 %v19369_v14, %v5391_v15  ;;  %v6108_v14 = vmul.f32 1.442695, %v5972_v36  ;;  %v5975_v15 = vsub.f32 %v18915_v4, %v19392_v12  ;;  %v19523_v36 = vpop.eup %16043  ;;  %v5974_v12 = vsub.f32 %v18947_v17, %v19419_v52 }
 0x586   : > { %v19484_v35 = vpop.f32.mrb[44].mxu1  ;;  %5791 = vmax.xlane.f32.xlu0 %v5790_v38  ;;  %v5657_v38 = vpop.xlane.xlu0 %5656  ;;  %22575 = vst [vmem:[#allocation25_spill] sm:$0xff] %v19523_v36  ;;  %v5977_v17 = vsub.f32 %v18797_v0, %v19378_v41 }
 0x587   : > { %v19488_v45 = vpop.f32.mrb[68].mxu0  ;;  %v19490_v32 = vpop.f32.mrb[45].mxu1  ;;  %22572 = vst [vmem:[#allocation51_spill] sm:$0xff] %v19493_v5  ;;  %v5781_v22 = vsel %vm431_vm0, %v19493_v5, -inf  ;;  %16047 = vpow2.f32 %v6108_v14  ;;  %v6114_v4 = vmul.f32 1.442695, %v5975_v15  ;;  %v5989_v41 = vsub.f32 %v19066_v54, %v5657_v38 }
 0x588   : > { %v19495_v58 = vpop.f32.mrb[69].mxu0  ;;  %v6402_v14 = vsel %vm431_vm0, %v19523_v36, 0.0  ;;  %v5399_v15 = vld [vmem:[#allocation7 + $0x258] sm:$0xff]  ;;  %v6112_v52 = vmul.f32 1.442695, %v5974_v12  ;;  %v5398_v36 = vld [vmem:[#allocation7 + $0x250] sm:$0xff] }
 0x589   : > { %6367 = vadd.xlane.f32.xlu1 %v6366_v40  ;;  %16049 = vpow2.f32 %v6114_v4  ;;  %v6118_v0 = vmul.f32 1.442695, %v5977_v17  ;;  %v5401_v38 = vld [vmem:[#allocation7 + $0x268] sm:$0xff] }
 0x58a   : > { %v19504_v50 = vpop.xlane.xlu1 %5668  ;;  %v19506_v31 = vpop.f32.mrb[46].mxu1  ;;  %6406 = vadd.xlane.f32.xlu0 %v6405_v24  ;;  %v5799_v24 = vsel %vm431_vm0, %v19500_v62, -inf  ;;  %v5395_v62 = vld [vmem:[#allocation7 + $0x238] sm:$0xff]  ;;  %16051 = vpow2.f32 %v6112_v52 }
 0x58b   : > { %v19510_v16 = vpop.f32.mrb[70].mxu0  ;;  %v19512_v55 = vpop.f32.mrb[47].mxu1  ;;  %16053 = vpow2.f32 %v6118_v0  ;;  %v19586_v0 = vadd.f32 %v19484_v35, %v5401_v38 }
 0x58c   : > { %v19517_v40 = vpop.f32.mrb[71].mxu0  ;;  %v5654_v57 = vpop.xlane.xlu0 %5653 }
 0x58d   : > { %5782 = vmax.xlane.f32.xlu1 %v5781_v22  ;;  %v19531_v5 = vpop.eup %16045  ;;  %v19534_v22 = vadd.f32 %v5396_v51, %v19390_v33  ;;  %v19546_v33 = vadd.f32 %v19401_v42, %v5399_v15  ;;  %v19566_v15 = vadd.f32 %v5398_v36, %v19403_v34  ;;  %v5988_v34 = vsub.f32 %v19088_v11, %v5654_v57  ;;  %v5400_v57 = vld [vmem:[#allocation7 + $0x260] sm:$0xff] }
 0x58e   : > { %5800 = vmax.xlane.f32.xlu0 %v5799_v24  ;;  %v19527_v21 = vpop.xlane.xlu1 %5665  ;;  %22576 = vst [vmem:[#allocation48_spill] sm:$0xff] %v19531_v5  ;;  %v19541_v24 = vadd.f32 %v19448_v63, %v5395_v62  ;;  %v6399_v59 = vsel %vm431_vm0, %v19531_v5, 0.0  ;;  %v5976_v63 = vsub.f32 %v18800_v37, %v19382_v39  ;;  %v5979_v37 = vsub.f32 %v18810_v18, %v19395_v56 }
 0x58f   : > { %22577 = vst [vmem:[#allocation56_spill] sm:$0xff] %v19534_v22  ;;  %22579 = vst [vmem:[#allocation117_spill] sm:$0xff] %v19546_v33  ;;  %v5805_v54 = vsel %vm431_vm0, %v19546_v33, -inf  ;;  %v6142_v39 = vmul.f32 1.442695, %v5989_v41  ;;  %v5802_v11 = vsel %vm431_vm0, %v19566_v15, -inf }
 0x590   : > { %22578 = vst [vmem:[#allocation110_spill] sm:$0xff] %v19541_v24  ;;  %22581 = vst [vmem:[#allocation59_spill] sm:$0xff] %v19566_v15  ;;  %v6122_v41 = vmul.f32 1.442695, %v5979_v37  ;;  %v6140_v5 = vmul.f32 1.442695, %v5988_v34 }
 0x591   : > { %5788 = vmax.xlane.f32.xlu1 %v5787_v30  ;;  %v5663_v30 = vpop.xlane.xlu0 %5662  ;;  %v19563_v12 = vpop.eup %16047  ;;  %22583 = vst [vmem:[#allocation119_spill] sm:$0xff] %v19586_v0  ;;  %16055 = vpow2.f32 %v6142_v39  ;;  %v5811_v37 = vsel %vm431_vm0, %v19586_v0, -inf  ;;  %v5403_v39 = vld [vmem:[#allocation7 + $0x278] sm:$0xff] }
 0x592   : > { %6403 = vadd.xlane.f32.xlu0 %v6402_v14  ;;  %v19548_v51 = vpop.xlane.xlu1 %5674  ;;  %v5796_v14 = vsel %vm431_vm0, %v19534_v22, -inf  ;;  %22580 = vst [vmem:[#allocation29_spill] sm:$0xff] %v19563_v12  ;;  %v6116_v22 = vmul.f32 1.442695, %v5976_v63  ;;  %v5991_v63 = vsub.f32 %v19095_v61, %v5663_v30 }
 0x593   : > { %v19583_v33 = vpop.eup %16049 }
 0x594   : > { %22582 = vst [vmem:[#allocation85_spill] sm:$0xff] %v19583_v33  ;;  %16057 = vpow2.f32 %v6116_v22  ;;  %v6381_v38 = vsel %vm431_vm0, %v19583_v33, 0.0  ;;  %v6146_v61 = vmul.f32 1.442695, %v5991_v63 }
 0x595   : > { %6400 = vadd.xlane.f32.xlu1 %v6399_v59  ;;  %v5793_v59 = vsel %vm431_vm0, %v19541_v24, -inf  ;;  %v5660_v52 = vpop.xlane.xlu0 %5659  ;;  %16059 = vpow2.f32 %v6122_v41 }
 0x596   : > { %5797 = vmax.xlane.f32.xlu0 %v5796_v14  ;;  %16061 = vpow2.f32 %v6140_v5  ;;  %v5990_v22 = vsub.f32 %v19116_v2, %v5660_v52  ;;  %v5978_v2 = vsub.f32 %v18824_v9, %v19411_v44 }
 0x597   : > { %v19553_v62 = vpop.f32.mrb[48].mxu1  ;;  %v19574_v14 = vpop.xlane.xlu1 %5671  ;;  %16063 = vpow2.f32 %v6146_v61 }
 0x598   : > { %v19557_v42 = vpop.f32.mrb[72].mxu0  ;;  %v19559_v4 = vpop.f32.mrb[49].mxu1  ;;  %v6144_v5 = vmul.f32 1.442695, %v5990_v22  ;;  %v6120_v44 = vmul.f32 1.442695, %v5978_v2 }
 0x599   : > { %v19568_v17 = vpop.f32.mrb[73].mxu0  ;;  %5794 = vmax.xlane.f32.xlu1 %v5793_v59  ;;  %v6372_v59 = vsel %vm431_vm0, %v19563_v12, 0.0  ;;  %v19597_v35 = vpop.xlane.xlu0 %5680 }
 0x59a   : > { %5806 = vmax.xlane.f32.xlu0 %v5805_v54  ;;  %v19601_v12 = vpop.eup %16051  ;;  %16065 = vpow2.f32 %v6144_v5  ;;  %v5402_v5 = vld [vmem:[#allocation7 + $0x270] sm:$0xff] }
 0x59b   : > { %22584 = vst [vmem:[#allocation91_spill] sm:$0xff] %v19601_v12  ;;  %v6378_v30 = vsel %vm431_vm0, %v19601_v12, 0.0  ;;  %v19611_v34 = vpop.eup %16053  ;;  %16067 = vpow2.f32 %v6120_v44  ;;  %v5987_v44 = vsub.f32 %v19001_v47, %v19463_v23 }
 0x59c   : > { %v19577_v36 = vpop.f32.mrb[74].mxu0  ;;  %v19579_v24 = vpop.f32.mrb[50].mxu1  ;;  %22586 = vst [vmem:[#allocation100_spill] sm:$0xff] %v19611_v34 }
 0x59d   : > { %v19588_v18 = vpop.f32.mrb[75].mxu0  ;;  %v19590_v56 = vpop.f32.mrb[51].mxu1  ;;  %6373 = vadd.xlane.f32.xlu1 %v6372_v59  ;;  %v19604_v59 = vadd.f32 %v5400_v57, %v19490_v32 }
 0x59e   : > { %5803 = vmax.xlane.f32.xlu0 %v5802_v11  ;;  %v19595_v54 = vpop.xlane.xlu1 %5692  ;;  %v19614_v11 = vadd.f32 %v19506_v31, %v5403_v39  ;;  %v6387_v31 = vsel %vm431_vm0, %v19611_v34, 0.0  ;;  %v19628_v41 = vpop.eup %16055 }
 0x59f   : > { %22585 = vst [vmem:[#allocation98_spill] sm:$0xff] %v19604_v59  ;;  %v5808_v57 = vsel %vm431_vm0, %v19604_v59, -inf  ;;  %22588 = vst [vmem:[#allocation41_spill] sm:$0xff] %v19628_v41  ;;  %v6423_v59 = vsel %vm431_vm0, %v19628_v41, 0.0  ;;  %v5405_v41 = vld [vmem:[#allocation7 + $0x288] sm:$0xff] }
 0x5a0   : > { %22587 = vst [vmem:[#allocation126_spill] sm:$0xff] %v19614_v11  ;;  %v5817_v39 = vsel %vm431_vm0, %v19614_v11, -inf }
 0x5a1   : > { %6382 = vadd.xlane.f32.xlu1 %v6381_v38  ;;  %v19620_v38 = vpop.xlane.xlu0 %5677 }
 0x5a2   : > { %5812 = vmax.xlane.f32.xlu0 %v5811_v37  ;;  %v19616_v32 = vpop.xlane.xlu1 %5689 }
 0x5a5   : > { %6379 = vadd.xlane.f32.xlu1 %v6378_v30  ;;  %v19636_v30 = vpop.eup %16057  ;;  %v19642_v22 = vpop.xlane.xlu0 %5686 }
 0x5a6   : > { %5809 = vmax.xlane.f32.xlu0 %v5808_v57  ;;  %22590 = vst [vmem:[#allocation39_spill] sm:$0xff] %v19636_v30  ;;  %v19640_v61 = vpop.xlane.xlu1 %5698  ;;  %v6384_v2 = vsel %vm431_vm0, %v19636_v30, 0.0 }
 0x5a8   : > { %v19624_v52 = vpop.f32.mrb[52].mxu1 }
 0x5a9   : > { %v19630_v63 = vpop.f32.mrb[76].mxu0  ;;  %v19632_v37 = vpop.f32.mrb[53].mxu1  ;;  %6388 = vadd.xlane.f32.xlu1 %v6387_v31 }
 0x5aa   : > { %22589 = vst [vmem:[#allocation45_spill] sm:$0xff] %v19630_v63  ;;  %v19638_v9 = vpop.f32.mrb[77].mxu0  ;;  %5818 = vmax.xlane.f32.xlu0 %v5817_v39  ;;  %v19648_v31 = vpop.eup %16059 }
 0x5ab   : > { %22591 = vst [vmem:[#allocation131_spill] sm:$0xff] %v19638_v9  ;;  %22592 = vst [vmem:[#allocation67_spill] sm:$0xff] %v19648_v31  ;;  %v19656_v39 = vpop.eup %16061  ;;  %v6393_v63 = vsel %vm431_vm0, %v19648_v31, 0.0  ;;  %v19671_v30 = vpop.xlane.xlu0 %5683  ;;  %v5404_v31 = vld [vmem:[#allocation7 + $0x280] sm:$0xff] }
 0x5ac   : > { %v19644_v57 = vpop.f32.mrb[54].mxu1  ;;  %22594 = vst [vmem:[#allocation141_spill] sm:$0xff] %v19656_v39  ;;  %v19662_v9 = vpop.eup %16063  ;;  %v6420_v34 = vsel %vm431_vm0, %v19656_v39, 0.0 }
 0x5ad   : > { %v19650_v0 = vpop.f32.mrb[78].mxu0  ;;  %v19652_v11 = vpop.f32.mrb[55].mxu1  ;;  %6424 = vadd.xlane.f32.xlu1 %v6423_v59  ;;  %22596 = vst [vmem:[#allocation144_spill] sm:$0xff] %v19662_v9 }
 0x5ae   : > { %22593 = vst [vmem:[#allocation132_spill] sm:$0xff] %v19650_v0  ;;  %v19658_v15 = vpop.f32.mrb[79].mxu0  ;;  %6385 = vadd.xlane.f32.xlu0 %v6384_v2  ;;  %v19665_v0 = vadd.f32 %v5402_v5, %v19512_v55  ;;  %v19667_v59 = vpop.xlane.xlu1 %5695  ;;  %v19676_v2 = vadd.f32 %v19430_v8, %v5405_v41  ;;  %v19693_v8 = vadd.f32 %v5404_v31, %v19434_v27  ;;  %v5407_v41 = vld [vmem:[#allocation7 + $0x298] sm:$0xff] }
 0x5af   : > { %22595 = vst [vmem:[#allocation18_spill] sm:$0xff] %v19658_v15  ;;  %v6429_v15 = vsel %vm431_vm0, %v19662_v9, 0.0  ;;  %v19684_v5 = vpop.eup %16065  ;;  %v19686_v39 = vpop.xlane.xlu0 %5704  ;;  %v19710_v31 = vadd.f32 %v19446_v1, %v5407_v41  ;;  %v5984_v41 = vsub.f32 %v18992_v29, %v19440_v53  ;;  %v5986_v53 = vsub.f32 %v19020_v48, %v19482_v20 }
 0x5b0   : > { %22597 = vst [vmem:[#allocation145_spill] sm:$0xff] %v19665_v0  ;;  %22598 = vst [vmem:[#allocation146_spill] sm:$0xff] %v19676_v2  ;;  %v5823_v47 = vsel %vm431_vm0, %v19676_v2, -inf  ;;  %v19690_v23 = vpop.eup %16067  ;;  %v5985_v2 = vsub.f32 %v18984_v43, %v19421_v13  ;;  %v5820_v43 = vsel %vm431_vm0, %v19693_v8, -inf  ;;  %v5410_v13 = vld [vmem:[#allocation7 + $0x2b0] sm:$0xff] }
 0x5b1   : > { %6394 = vadd.xlane.f32.xlu1 %v6393_v63  ;;  %v5814_v63 = vsel %vm431_vm0, %v19665_v0, -inf  ;;  %22600 = vst [vmem:[#allocation148_spill] sm:$0xff] %v19684_v5  ;;  %22601 = vst [vmem:[#allocation149_spill] sm:$0xff] %v19693_v8  ;;  %v6426_v0 = vsel %vm431_vm0, %v19684_v5, 0.0  ;;  %v5406_v5 = vld [vmem:[#allocation7 + $0x290] sm:$0xff]  ;;  %v5409_v8 = vld [vmem:[#allocation7 + $0x2a8] sm:$0xff] }
 0x5b2   : > { %6421 = vadd.xlane.f32.xlu0 %v6420_v34  ;;  %v6138_v34 = vmul.f32 1.442695, %v5987_v44  ;;  %22604 = vst [vmem:[#allocation152_spill] sm:$0xff] %v19710_v31  ;;  %v6132_v29 = vmul.f32 1.442695, %v5984_v41 }
 0x5b3   : > { %v19712_v33 = vpop.xlane.xlu0 %5701 }
 0x5b4   : > { %16069 = vpow2.f32 %v6138_v34  ;;  %v6134_v34 = vmul.f32 1.442695, %v5985_v2 }
 0x5b5   : > { %v19680_v55 = vpop.xlane.xlu1 %5716  ;;  %6430 = vadd.xlane.f32.xlu1 %v6429_v15 }
 0x5b6   : > { %22599 = vst [vmem:[#allocation147_spill] sm:$0xff] %v19680_v55  ;;  %5815 = vmax.xlane.f32.xlu0 %v5814_v63  ;;  %v5411_v55 = vld [vmem:[#allocation7 + $0x2b8] sm:$0xff]  ;;  %16071 = vpow2.f32 %v6134_v34  ;;  %v6136_v34 = vmul.f32 1.442695, %v5986_v53 }
 0x5b7   : > { %16073 = vpow2.f32 %v6132_v29 }
 0x5b8   : > { %16075 = vpow2.f32 %v6136_v34 }
 0x5b9   : > { %v19695_v15 = vpop.f32.mrb[56].mxu1  ;;  %v19697_v9 = vpop.xlane.xlu1 %5713  ;;  %5824 = vmax.xlane.f32.xlu1 %v5823_v47  ;;  %v6390_v47 = vsel %vm431_vm0, %v19690_v23, 0.0 }
 0x5ba   : > { %v19701_v63 = vpop.f32.mrb[80].mxu0  ;;  %v19703_v44 = vpop.f32.mrb[57].mxu1  ;;  %6427 = vadd.xlane.f32.xlu0 %v6426_v0 }
 0x5bb   : > { %22602 = vst [vmem:[#allocation150_spill] sm:$0xff] %v19701_v63  ;;  %v19707_v27 = vpop.f32.mrb[81].mxu0  ;;  %v19717_v63 = vadd.f32 %v19579_v24, %v5411_v55  ;;  %v19734_v55 = vadd.f32 %v5406_v5, %v19450_v10  ;;  %v19748_v10 = vadd.f32 %v19553_v62, %v5409_v8 }
 0x5bc   : > { %22603 = vst [vmem:[#allocation151_spill] sm:$0xff] %v19707_v27 }
 0x5bd   : > { %22605 = vst [vmem:[#allocation153_spill] sm:$0xff] %v19717_v63  ;;  %v19719_v12 = vpop.xlane.xlu1 %5722  ;;  %6391 = vadd.xlane.f32.xlu1 %v6390_v47  ;;  %22608 = vst [vmem:[#allocation156_spill] sm:$0xff] %v19734_v55  ;;  %v5829_v47 = vsel %vm431_vm0, %v19710_v31, -inf  ;;  %v5841_v2 = vsel %vm431_vm0, %v19717_v63, -inf  ;;  %v5826_v5 = vsel %vm431_vm0, %v19734_v55, -inf  ;;  %v5835_v62 = vsel %vm431_vm0, %v19748_v10, -inf }
 0x5be   : > { %v19723_v0 = vpop.f32.mrb[82].mxu0  ;;  %v19725_v1 = vpop.f32.mrb[58].mxu1  ;;  %5821 = vmax.xlane.f32.xlu0 %v5820_v43  ;;  %22610 = vst [vmem:[#allocation158_spill] sm:$0xff] %v19748_v10 }
 0x5bf   : > { %22606 = vst [vmem:[#allocation154_spill] sm:$0xff] %v19723_v0  ;;  %v19729_v27 = vpop.f32.mrb[83].mxu0  ;;  %v19731_v24 = vpop.f32.mrb[59].mxu1  ;;  %v19739_v0 = vadd.f32 %v5410_v13, %v19590_v56  ;;  %v5408_v56 = vld [vmem:[#allocation7 + $0x2a0] sm:$0xff] }
 0x5c0   : > { %22607 = vst [vmem:[#allocation155_spill] sm:$0xff] %v19729_v27  ;;  %v19743_v43 = vpop.xlane.xlu0 %5710  ;;  %v19756_v63 = vpop.eup %16069  ;;  %v19759_v48 = vadd.f32 %v5408_v56, %v19559_v4 }
 0x5c1   : > { %22609 = vst [vmem:[#allocation157_spill] sm:$0xff] %v19739_v0  ;;  %5830 = vmax.xlane.f32.xlu1 %v5829_v47  ;;  %v19752_v13 = vpop.xlane.xlu1 %5719  ;;  %v5838_v47 = vsel %vm431_vm0, %v19739_v0, -inf  ;;  %22611 = vst [vmem:[#allocation159_spill] sm:$0xff] %v19756_v63  ;;  %v6417_v41 = vsel %vm431_vm0, %v19756_v63, 0.0  ;;  %v19779_v56 = vpop.eup %16071 }
 0x5c2   : > { %5842 = vmax.xlane.f32.xlu0 %v5841_v2  ;;  %22612 = vst [vmem:[#allocation160_spill] sm:$0xff] %v19759_v48  ;;  %22617 = vst [vmem:[#allocation165_spill] sm:$0xff] %v19779_v56  ;;  %v6411_v10 = vsel %vm431_vm0, %v19779_v56, 0.0  ;;  %v19795_v31 = vpop.eup %16073 }
 0x5c3   : > { %22622 = vst [vmem:[#allocation170_spill] sm:$0xff] %v19795_v31 }
 0x5c4   : > { %v19761_v20 = vpop.xlane.xlu0 %5707 }
 0x5c5   : > { %5827 = vmax.xlane.f32.xlu1 %v5826_v5  ;;  %v5832_v5 = vsel %vm431_vm0, %v19759_v48, -inf }
 0x5c6   : > { %5839 = vmax.xlane.f32.xlu0 %v5838_v47 }
 0x5c9   : > { %v19765_v8 = vpop.xlane.xlu1 %5740  ;;  %5836 = vmax.xlane.f32.xlu1 %v5835_v62  ;;  %v19783_v62 = vpop.xlane.xlu0 %5728 }
 0x5ca   : > { %v19769_v2 = vpop.f32.mrb[60].mxu1  ;;  %6418 = vadd.xlane.f32.xlu0 %v6417_v41 }
 0x5cb   : > { %22613 = vst [vmem:[#allocation161_spill] sm:$0xff] %v19769_v2  ;;  %v19771_v29 = vpop.f32.mrb[84].mxu0  ;;  %v19773_v53 = vpop.f32.mrb[61].mxu1 }
 0x5cc   : > { %22614 = vst [vmem:[#allocation162_spill] sm:$0xff] %v19771_v29  ;;  %22615 = vst [vmem:[#allocation163_spill] sm:$0xff] %v19773_v53  ;;  %v19775_v4 = vpop.f32.mrb[85].mxu0  ;;  %v19799_v29 = vpop.eup %16075 }
 0x5cd   : > { %22616 = vst [vmem:[#allocation164_spill] sm:$0xff] %v19775_v4  ;;  %v19781_v47 = vpop.xlane.xlu1 %5737  ;;  %5833 = vmax.xlane.f32.xlu1 %v5832_v5  ;;  %v6408_v5 = vsel %vm431_vm0, %v19795_v31, 0.0  ;;  %22623 = vst [vmem:[#allocation171_spill] sm:$0xff] %v19799_v29  ;;  %v5413_v4 = vld [vmem:[#allocation7 + $0x2c8] sm:$0xff]  ;;  %v19801_v27 = vpop.xlane.xlu0 %5725 }
 0x5ce   : > { %v19785_v0 = vpop.f32.mrb[62].mxu1  ;;  %v22633_v31 = vld [vmem:[#allocation35_spill] sm:$0xff] }
 0x5cf   : > { %22618 = vst [vmem:[#allocation166_spill] sm:$0xff] %v19785_v0  ;;  %v19787_v41 = vpop.f32.mrb[86].mxu0  ;;  %v19789_v34 = vpop.f32.mrb[63].mxu1  ;;  %v5412_v0 = vld [vmem:[#allocation7 + $0x2c0] sm:$0xff] }
 0x5d0   : > { %22619 = vst [vmem:[#allocation167_spill] sm:$0xff] %v19787_v41  ;;  %22620 = vst [vmem:[#allocation168_spill] sm:$0xff] %v19789_v34  ;;  %v19791_v55 = vpop.f32.mrb[87].mxu0  ;;  %v6414_v34 = vsel %vm431_vm0, %v19799_v29, 0.0  ;;  %v19815_v63 = vadd.f32 %v5412_v0, %v19495_v58  ;;  %v22631_v0 = vld [vmem:[#allocation63_spill] sm:$0xff] }
 0x5d1   : > { %22621 = vst [vmem:[#allocation169_spill] sm:$0xff] %v19791_v55  ;;  %v6353_v48 = vpop.xlane.xlu1 %6352  ;;  %6412 = vadd.xlane.f32.xlu1 %v6411_v10  ;;  %v19806_v55 = vadd.f32 %v19488_v45, %v5413_v4  ;;  %v19810_v10 = vpop.xlane.xlu0 %5734  ;;  %v5415_v4 = vld [vmem:[#allocation7 + $0x2d8] sm:$0xff] }
 0x5d2   : > { %16077 = vrcp.f32 %v6353_v48  ;;  %22626 = vst [vmem:[#allocation174_spill] sm:$0xff] %v19815_v63  ;;  %v19828_v48 = vadd.f32 %v19510_v16, %v5415_v4 }
 0x5d3   : > { %22624 = vst [vmem:[#allocation172_spill] sm:$0xff] %v19806_v55  ;;  %v5847_v45 = vsel %vm431_vm0, %v19806_v55, -inf  ;;  %v5414_v55 = vld [vmem:[#allocation7 + $0x2d0] sm:$0xff] }
 0x5d4   : > { %22629 = vst [vmem:[#allocation177_spill] sm:$0xff] %v19828_v48  ;;  %v19841_v16 = vadd.f32 %v5414_v55, %v19517_v40 }
 0x5d5   : > { %v19803_v41 = vpop.xlane.xlu1 %5746  ;;  %6409 = vadd.xlane.f32.xlu1 %v6408_v5 }
 0x5d6   : > { %22632 = vst [vmem:[#allocation63_spill] sm:$0xff] %v19841_v16 }
 0x5d9   : > { %v6350_v53 = vpop.xlane.xlu1 %6349  ;;  %6415 = vadd.xlane.f32.xlu1 %v6414_v34  ;;  %v5993_v34 = vsub.f32 %v19158_v49, %v19504_v50  ;;  %v5992_v49 = vsub.f32 %v19177_v19, %v19527_v21  ;;  %v5853_v50 = vsel %vm431_vm0, %v19828_v48, -inf  ;;  %v5416_v48 = vld [vmem:[#allocation7 + $0x2e0] sm:$0xff] }
 0x5da   : > { %16079 = vrcp.f32 %v6350_v53  ;;  %v5844_v53 = vsel %vm431_vm0, %v19815_v63, -inf }
 0x5db   : > { %v19812_v2 = vpop.f32.mrb[64].mxu1  ;;  %v6148_v19 = vmul.f32 1.442695, %v5992_v49 }
 0x5dc   : > { %22625 = vst [vmem:[#allocation173_spill] sm:$0xff] %v19812_v2  ;;  %v19817_v56 = vpop.f32.mrb[65].mxu1  ;;  %v6150_v2 = vmul.f32 1.442695, %v5993_v34  ;;  %v16078_v4 = vpop.eup %16077  ;;  %v15355_v34 = vunpack.i.l.bf16 %v22633_v31 }
 0x5dd   : > { %22627 = vst [vmem:[#allocation175_spill] sm:$0xff] %v19817_v56  ;;  %v19821_v5 = vpop.xlane.xlu1 %5743  ;;  %5848 = vmax.xlane.f32.xlu1 %v5847_v45  ;;  %v19836_v56 = vpop.xlane.xlu0 %5731  ;;  %v6861_v55 = vmul.f32 %v16078_v4, %v19318_v26  ;;  %v5996_v4 = vsub.f32 %v19194_v28, %v19620_v38  ;;  %v5999_v38 = vsub.f32 %v19204_v60, %v19642_v22  ;;  %v22643_v22 = vld [vmem:[#allocation32_spill] sm:$0xff] }
 0x5df   : > { %v19825_v29 = vpop.f32.mrb[66].mxu1  ;;  %v6156_v28 = vmul.f32 1.442695, %v5996_v4  ;;  %v6162_v60 = vmul.f32 1.442695, %v5999_v38 }
 0x5e0   : > { %22628 = vst [vmem:[#allocation176_spill] sm:$0xff] %v19825_v29  ;;  %v19830_v58 = vpop.f32.mrb[67].mxu1  ;;  %15718 = vrot.lane.b32.xlu0 %v22631_v0, %s16749_s25  ;;  %v5417_v0 = vld [vmem:[#allocation7 + $0x2e8] sm:$0xff] }
 0x5e1   : > { %22630 = vst [vmem:[#allocation178_spill] sm:$0xff] %v19830_v58  ;;  %v6359_v45 = vpop.xlane.xlu1 %6358  ;;  %5845 = vmax.xlane.f32.xlu1 %v5844_v53  ;;  %v19845_v29 = vpop.xlane.xlu0 %5752  ;;  %v15356_v53 = vunpack.i.h.bf16 %v22633_v31  ;;  %v19851_v21 = vadd.f32 %v19624_v52, %v5417_v0 }
 0x5e2   : > { %16081 = vrcp.f32 %v6359_v45  ;;  %v5850_v45 = vsel %vm431_vm0, %v19841_v16, -inf }
 0x5e3   : > { %22634 = vst [vmem:[#allocation35_spill] sm:$0xff] %v19851_v21 }
 0x5e4   : > { %v16080_v58 = vpop.eup %16079 }
 0x5e5   : > { %v6356_v63 = vpop.xlane.xlu1 %6355  ;;  %5854 = vmax.xlane.f32.xlu1 %v5853_v50  ;;  %v6860_v40 = vmul.f32 %v16080_v58, %v19331_v46  ;;  %v5997_v50 = vsub.f32 %v19190_v25, %v19597_v35  ;;  %v14873_v46 = vpack.c.bf16 %v15356_v53, %v15355_v34  ;;  %v19862_v52 = vpop.xlane.xlu0 %5749  ;;  %v19868_v25 = vadd.f32 %v5416_v48, %v19632_v37 }
 0x5e6   : > { %16083 = vrcp.f32 %v6356_v63  ;;  %v22635_v63 = vld [vmem:[#allocation55_spill] sm:$0xff]  ;;  %v5859_v58 = vsel %vm431_vm0, %v19851_v21, -inf }
 0x5e7   : > { %16085 = vpow2.f32 %v6150_v2  ;;  %13829 = vmatprep.mubr.msk.f32.mxu0 %vm431_vm0, %v6860_v40  ;;  %v15386_v31 = vunpack.i.h.bf16 %v22635_v63  ;;  %v15385_v2 = vunpack.i.l.bf16 %v22635_v63  ;;  %22637 = vst [vmem:[#allocation179_spill] sm:$0xff] %v19868_v25  ;;  %v6158_v49 = vmul.f32 1.442695, %v5997_v50  ;;  %v22642_v63 = vld [vmem:[#allocation21_spill] sm:$0xff] }
 0x5e8   : > { %13830 = vmatmul.mubr.msk.f32.vlgmr.msra.gmra.mrb[88].mxu0 %vm431_vm0, %v6861_v55  ;;  %16087 = vpow2.f32 %v6148_v19  ;;  %v5856_v19 = vsel %vm431_vm0, %v19868_v25, -inf }
 0x5e9   : > { %5851 = vmax.xlane.f32.xlu1 %v5850_v45  ;;  %14872 = vmatpush3.bf16.msra.mxu0 %v19181_v7  ;;  %v19876_v0 = vpack.c.bf16 %v15386_v31, %v15385_v2  ;;  %v5995_v7 = vsub.f32 %v19184_v6, %v19548_v51  ;;  %16089 = vpow2.f32 %v6158_v49  ;;  %v19891_v55 = vpop.xlane.xlu0 %5758  ;;  %v22641_v51 = vld [vmem:[#allocation38_spill] sm:$0xff]  ;;  %v5994_v31 = vsub.f32 %v22642_v63, %v19574_v14 }
 0x5ea   : > { %14874 = vmatprep.subr.bf16.mxu0 %v14873_v46  ;;  %16091 = vpow2.f32 %v6156_v28 }
 0x5eb   : > { %v19864_v26 = vpop.f32.mrb[68].mxu1  ;;  %v6154_v50 = vmul.f32 1.442695, %v5995_v7  ;;  %v6152_v14 = vmul.f32 1.442695, %v5994_v31 }
 0x5ec   : > { %22636 = vst [vmem:[#allocation55_spill] sm:$0xff] %v19864_v26  ;;  %v19870_v35 = vpop.f32.mrb[69].mxu1  ;;  %v16082_v53 = vpop.eup %16081 }
 0x5ed   : > { %22638 = vst [vmem:[#allocation180_spill] sm:$0xff] %v19870_v35  ;;  %5860 = vmax.xlane.f32.xlu1 %v5859_v58  ;;  %14876 = vmatpush3.bf16.msra.mxu0 %v14873_v46  ;;  %v6863_v45 = vmul.f32 %v16082_v53, %v22641_v51  ;;  %v5419_v58 = vld [vmem:[#allocation7 + $0x2f8] sm:$0xff]  ;;  %16093 = vpow2.f32 %v6154_v50  ;;  %v19907_v4 = vpop.xlane.xlu0 %5755  ;;  %v22647_v50 = vld [vmem:[#allocation71_spill] sm:$0xff] }
 0x5ee   : > { %14886 = vmatprep.subr.bf16.mxu0 %v19876_v0  ;;  %v19910_v53 = vadd.f32 %v19644_v57, %v5419_v58  ;;  %16095 = vpow2.f32 %v6162_v60  ;;  %v6002_v63 = vsub.f32 %v22647_v50, %v19667_v59 }
 0x5ef   : > { %v19880_v34 = vpop.f32.mrb[70].mxu1  ;;  %16097 = vpow2.f32 %v6152_v14 }
 0x5f0   : > { %22639 = vst [vmem:[#allocation181_spill] sm:$0xff] %v19880_v34  ;;  %v16084_v37 = vpop.eup %16083  ;;  %v19882_v48 = vpop.f32.mrb[71].mxu1  ;;  %22644 = vst [vmem:[#allocation38_spill] sm:$0xff] %v19910_v53  ;;  %v5865_v57 = vsel %vm431_vm0, %v19910_v53, -inf  ;;  %v6168_v59 = vmul.f32 1.442695, %v6002_v63 }
 0x5f1   : > { %22640 = vst [vmem:[#allocation182_spill] sm:$0xff] %v19882_v48  ;;  %v19887_v40 = vpop.eup %16085  ;;  %5857 = vmax.xlane.f32.xlu1 %v5856_v19  ;;  %v6862_v6 = vmul.f32 %v16084_v37, %v19357_v3  ;;  %v5998_v3 = vsub.f32 %v22643_v22, %v19671_v30  ;;  %v22645_v19 = vld [vmem:[#allocation69_spill] sm:$0xff]  ;;  %v5418_v30 = vld [vmem:[#allocation7 + $0x2f0] sm:$0xff]  ;;  %v19927_v31 = vpop.xlane.xlu0 %5773 }
 0x5f2   : > { %v6435_v2 = vsel %vm431_vm0, %v19887_v40, 0.0  ;;  %v19901_v46 = vpop.eup %16087  ;;  %v6000_v28 = vsub.f32 %v22645_v19, %v19616_v32  ;;  %v19921_v51 = vadd.f32 %v5418_v30, %v19652_v11 }
 0x5f3   : > { %13832 = vmatprep.mubr.msk.f32.mxu0 %vm431_vm0, %v6862_v6  ;;  %v6432_v7 = vsel %vm431_vm0, %v19901_v46, 0.0  ;;  %v6160_v37 = vmul.f32 1.442695, %v5998_v3  ;;  %v19918_v6 = vpop.eup %16089  ;;  %v22648_v3 = vld [vmem:[#allocation53_spill] sm:$0xff] }
 0x5f4   : > { %13833 = vmatmul.mubr.msk.f32.gmra.mrb[90].mxu0 %vm431_vm0, %v6863_v45  ;;  %22646 = vst [vmem:[#allocation21_spill] sm:$0xff] %v19921_v51  ;;  %v6164_v45 = vmul.f32 1.442695, %v6000_v28  ;;  %v19931_v60 = vpop.eup %16091  ;;  %v5862_v11 = vsel %vm431_vm0, %v19921_v51, -inf  ;;  %v6005_v58 = vsub.f32 %v22648_v3, %v19686_v39  ;;  %v22650_v39 = vld [vmem:[#allocation108_spill] sm:$0xff] }
 0x5f5   : > { %6436 = vadd.xlane.f32.xlu1 %v6435_v2  ;;  %16099 = vpow2.f32 %v6160_v37  ;;  %v6447_v2 = vsel %vm431_vm0, %v19918_v6, 0.0  ;;  %v19945_v19 = vpop.xlane.xlu0 %5779  ;;  %v6004_v50 = vsub.f32 %v22650_v39, %v19712_v33 }
 0x5f6   : > { %v19905_v49 = vpop.xlane.xlu1 %5764  ;;  %16101 = vpow2.f32 %v6164_v45  ;;  %22649 = vst [vmem:[#allocation32_spill] sm:$0xff] %v19945_v19  ;;  %v6174_v45 = vmul.f32 1.442695, %v6005_v58  ;;  %v22665_v19 = vld [vmem:[#allocation116_spill] sm:$0xff] }
 0x5f7   : > { %v19935_v22 = vpop.eup %16093  ;;  %16103 = vpow2.f32 %v6168_v59  ;;  %v5420_v59 = vld [vmem:[#allocation7 + $0x300] sm:$0xff]  ;;  %v6172_v33 = vmul.f32 1.442695, %v6004_v50  ;;  %v5423_v50 = vld [vmem:[#allocation7 + $0x318] sm:$0xff] }
 0x5f8   : > { %v19943_v37 = vpop.eup %16095  ;;  %v6441_v28 = vsel %vm431_vm0, %v19935_v22, 0.0 }
 0x5f9   : > { %6433 = vadd.xlane.f32.xlu1 %v6432_v7  ;;  %v6444_v7 = vsel %vm431_vm0, %v19931_v60, 0.0  ;;  %v19949_v30 = vpop.eup %16097 }
 0x5fa   : > { %v19916_v38 = vpop.xlane.xlu1 %5761  ;;  %v6438_v58 = vsel %vm431_vm0, %v19949_v30, 0.0 }
 0x5fd   : > { %5866 = vmax.xlane.f32.xlu1 %v5865_v57  ;;  %v5421_v57 = vld [vmem:[#allocation7 + $0x308] sm:$0xff] }
 0x5fe   : > { %v6365_v32 = vpop.xlane.xlu1 %6364 }
 0x5ff   : > { %6448 = vadd.xlane.f32.xlu0 %v6447_v2  ;;  %v6453_v2 = vsel %vm431_vm0, %v19943_v37, 0.0  ;;  %16105 = vrcp.f32 %v6365_v32 }
 0x601   : > { %5863 = vmax.xlane.f32.xlu1 %v5862_v11  ;;  %v19955_v11 = vpop.eup %16099 }
 0x602   : > { %v19939_v14 = vpop.xlane.xlu1 %5770  ;;  %v6450_v32 = vsel %vm431_vm0, %v19955_v11, 0.0 }
 0x603   : > { %6445 = vadd.xlane.f32.xlu0 %v6444_v7  ;;  %v19960_v7 = vadd.f32 %v19557_v42, %v5421_v57  ;;  %v19975_v57 = vadd.f32 %v5420_v59, %v19568_v17  ;;  %v22657_v17 = vld [vmem:[#allocation106_spill] sm:$0xff] }
 0x604   : > { %v6008_v59 = vsub.f32 %v22657_v17, %v19697_v9 }
 0x605   : > { %6442 = vadd.xlane.f32.xlu1 %v6441_v28  ;;  %22652 = vst [vmem:[#allocation71_spill] sm:$0xff] %v19960_v7  ;;  %v22653_v28 = vld [vmem:[#allocation47_spill] sm:$0xff]  ;;  %22654 = vst [vmem:[#allocation53_spill] sm:$0xff] %v19975_v57 }
 0x606   : > { %v6362_v63 = vpop.xlane.xlu1 %6361  ;;  %v6007_v39 = vsub.f32 %v22653_v28, %v19743_v43  ;;  %v22656_v28 = vld [vmem:[#allocation61_spill] sm:$0xff]  ;;  %v6180_v48 = vmul.f32 1.442695, %v6008_v59 }
 0x607   : > { %v19957_v3 = vpop.xlane.xlu0 %5785  ;;  %6454 = vadd.xlane.f32.xlu0 %v6453_v2  ;;  %16107 = vrcp.f32 %v6362_v63  ;;  %v19970_v2 = vpop.eup %16101  ;;  %v22655_v63 = vld [vmem:[#allocation138_spill] sm:$0xff]  ;;  %v6001_v25 = vsub.f32 %v22656_v28, %v19595_v54  ;;  %v5422_v28 = vld [vmem:[#allocation7 + $0x310] sm:$0xff]  ;;  %v22666_v59 = vld [vmem:[#allocation89_spill] sm:$0xff] }
 0x608   : > { %22651 = vst [vmem:[#allocation69_spill] sm:$0xff] %v19957_v3  ;;  %16109 = vpow2.f32 %v6174_v45  ;;  %v5871_v45 = vsel %vm431_vm0, %v19960_v7, -inf  ;;  %v6178_v43 = vmul.f32 1.442695, %v6007_v39  ;;  %v19985_v16 = vpop.eup %16103  ;;  %v22659_v54 = vld [vmem:[#allocation58_spill] sm:$0xff] }
 0x609   : > { %6439 = vadd.xlane.f32.xlu1 %v6438_v58  ;;  %16111 = vpow2.f32 %v6172_v33  ;;  %v6006_v58 = vsub.f32 %v22655_v63, %v19761_v20  ;;  %v19992_v33 = vadd.f32 %v19577_v36, %v5423_v50  ;;  %v5868_v20 = vsel %vm431_vm0, %v19975_v57, -inf  ;;  %v16106_v39 = vpop.eup %16105  ;;  %v5424_v3 = vld [vmem:[#allocation7 + $0x320] sm:$0xff] }
 0x60a   : > { %v19966_v51 = vpop.xlane.xlu1 %5767  ;;  %v15395_v63 = vunpack.i.l.bf16 %v22659_v54  ;;  %16113 = vpow2.f32 %v6178_v43  ;;  %v6166_v9 = vmul.f32 1.442695, %v6001_v25  ;;  %v6462_v36 = vsel %vm431_vm0, %v19985_v16, 0.0  ;;  %v22664_v25 = vld [vmem:[#allocation46_spill] sm:$0xff] }
 0x60b   : > { %v19972_v42 = vpop.xlane.xlu0 %6376  ;;  %6451 = vadd.xlane.f32.xlu0 %v6450_v32  ;;  %v6456_v32 = vsel %vm431_vm0, %v19970_v2, 0.0  ;;  %22658 = vst [vmem:[#allocation108_spill] sm:$0xff] %v19992_v33  ;;  %v6176_v21 = vmul.f32 1.442695, %v6006_v58  ;;  %v20010_v58 = vadd.f32 %v5422_v28, %v19588_v18  ;;  %v5877_v26 = vsel %vm431_vm0, %v19992_v33, -inf }
 0x60d   : > { %5872 = vmax.xlane.f32.xlu1 %v5871_v45  ;;  %v15396_v45 = vunpack.i.h.bf16 %v22659_v54  ;;  %v22662_v54 = vld [vmem:[#allocation129_spill] sm:$0xff]  ;;  %22663 = vst [vmem:[#allocation138_spill] sm:$0xff] %v20010_v58  ;;  %16115 = vpow2.f32 %v6176_v21 }
 0x60e   : > { %v6371_v53 = vpop.xlane.xlu1 %6370  ;;  %16117 = vpow2.f32 %v6166_v9 }
 0x60f   : > { %v19989_v7 = vpop.xlane.xlu0 %6397  ;;  %6457 = vadd.xlane.f32.xlu0 %v6456_v32  ;;  %v22661_v32 = vld [vmem:[#allocation31_spill] sm:$0xff]  ;;  %16119 = vpow2.f32 %v6180_v48 }
 0x610   : > { %v6003_v57 = vsub.f32 %v22661_v32, %v19640_v61  ;;  %v14889_v61 = vpack.c.bf16 %v15396_v45, %v15395_v63  ;;  %16121 = vrcp.f32 %v6371_v53  ;;  %v5425_v45 = vld [vmem:[#allocation7 + $0x328] sm:$0xff] }
 0x611   : > { %5869 = vmax.xlane.f32.xlu1 %v5868_v20  ;;  %v16108_v34 = vpop.eup %16107  ;;  %v6865_v20 = vmul.f32 %v16106_v39, %v22664_v25  ;;  %v22668_v63 = vld [vmem:[#allocation115_spill] sm:$0xff] }
 0x612   : > { %v19998_v17 = vpop.xlane.xlu1 %5776  ;;  %v20002_v50 = vpop.eup %16109  ;;  %v6864_v43 = vmul.f32 %v16108_v34, %v22662_v54  ;;  %v15425_v34 = vunpack.i.l.bf16 %v22666_v59  ;;  %v6170_v28 = vmul.f32 1.442695, %v6003_v57  ;;  %v6013_v9 = vsub.f32 %v22668_v63, %v19783_v62  ;;  %v22671_v54 = vld [vmem:[#allocation81_spill] sm:$0xff] }
 0x613   : > { %22660 = vst [vmem:[#allocation47_spill] sm:$0xff] %v19998_v17  ;;  %v20006_v35 = vpop.xlane.xlu0 %5791  ;;  %6463 = vadd.xlane.f32.xlu0 %v6462_v36  ;;  %v6010_v17 = vsub.f32 %v22665_v19, %v19752_v13  ;;  %v15426_v36 = vunpack.i.h.bf16 %v22666_v59  ;;  %v6471_v39 = vsel %vm431_vm0, %v20002_v50, 0.0  ;;  %v20023_v21 = vpop.eup %16111  ;;  %v5874_v19 = vsel %vm431_vm0, %v20010_v58, -inf }
 0x614   : > { %13843 = vmatprep.mubr.msk.f32.mxu0 %vm431_vm0, %v6864_v43  ;;  %v20046_v57 = vadd.f32 %v19695_v15, %v5425_v45  ;;  %v6012_v43 = vsub.f32 %v22671_v54, %v19801_v27 }
 0x615   : > { %5878 = vmax.xlane.f32.xlu1 %v5877_v26  ;;  %13844 = vmatmul.mubr.msk.f32.vlgmr.msra.gmra.mrb[92].mxu0 %vm431_vm0, %v6865_v20  ;;  %v20029_v26 = vadd.f32 %v5424_v3, %v19703_v44  ;;  %v6184_v32 = vmul.f32 1.442695, %v6010_v17  ;;  %v6468_v44 = vsel %vm431_vm0, %v20023_v21, 0.0  ;;  %v20041_v3 = vpop.eup %16113  ;;  %v6190_v17 = vmul.f32 1.442695, %v6013_v9  ;;  %v22673_v9 = vld [vmem:[#allocation143_spill] sm:$0xff] }
 0x616   : > { %v6368_v18 = vpop.xlane.xlu1 %6367  ;;  %14888 = vmatpush3.bf16.msra.mxu0 %v19876_v0  ;;  %v20037_v0 = vpack.c.bf16 %v15426_v36, %v15425_v34  ;;  %22670 = vst [vmem:[#allocation58_spill] sm:$0xff] %v20046_v57  ;;  %v6477_v20 = vsel %vm431_vm0, %v20041_v3, 0.0  ;;  %v5883_v36 = vsel %vm431_vm0, %v20046_v57, -inf  ;;  %v6188_v27 = vmul.f32 1.442695, %v6012_v43  ;;  %v22687_v57 = vld [vmem:[#allocation64_spill] sm:$0xff] }
 0x617   : > { %v20026_v13 = vpop.xlane.xlu0 %6406  ;;  %6472 = vadd.xlane.f32.xlu0 %v6471_v39  ;;  %22667 = vst [vmem:[#allocation61_spill] sm:$0xff] %v20029_v26  ;;  %14890 = vmatprep.subr.bf16.mxu0 %v14889_v61  ;;  %16123 = vrcp.f32 %v6368_v18  ;;  %v5880_v62 = vsel %vm431_vm0, %v20029_v26, -inf  ;;  %v22672_v18 = vld [vmem:[#allocation142_spill] sm:$0xff] }
 0x618   : > { %16125 = vpow2.f32 %v6170_v28  ;;  %v6016_v39 = vsub.f32 %v22672_v18, %v19781_v47 }
 0x619   : > { %5875 = vmax.xlane.f32.xlu1 %v5874_v19  ;;  %16127 = vpow2.f32 %v6184_v32  ;;  %v6014_v32 = vsub.f32 %v22673_v9, %v19836_v56 }
 0x61a   : > { %v20035_v48 = vpop.xlane.xlu1 %5782  ;;  %14892 = vmatpush3.bf16.msra.mxu0 %v14889_v61  ;;  %v20057_v61 = vpop.eup %16115  ;;  %16129 = vpow2.f32 %v6190_v17  ;;  %v6196_v47 = vmul.f32 1.442695, %v6016_v39 }
 0x61b   : > { %v20043_v53 = vpop.xlane.xlu0 %5800  ;;  %6469 = vadd.xlane.f32.xlu0 %v6468_v44  ;;  %14902 = vmatprep.subr.bf16.mxu0 %v20037_v0  ;;  %v20061_v59 = vpop.eup %16117  ;;  %v6474_v45 = vsel %vm431_vm0, %v20057_v61, 0.0  ;;  %16131 = vpow2.f32 %v6188_v27  ;;  %v22677_v27 = vld [vmem:[#allocation23_spill] sm:$0xff] }
 0x61c   : > { %22669 = vst [vmem:[#allocation106_spill] sm:$0xff] %v20043_v53  ;;  %v20065_v34 = vpop.eup %16119  ;;  %v6459_v17 = vsel %vm431_vm0, %v20061_v59, 0.0  ;;  %v6018_v39 = vsub.f32 %v22677_v27, %v19821_v5  ;;  %16133 = vpow2.f32 %v6196_v47  ;;  %v22680_v5 = vld [vmem:[#allocation20_spill] sm:$0xff] }
 0x61d   : > { %5881 = vmax.xlane.f32.xlu1 %v5880_v62  ;;  %v16122_v28 = vpop.eup %16121  ;;  %v22674_v62 = vld [vmem:[#allocation30_spill] sm:$0xff]  ;;  %v6480_v56 = vsel %vm431_vm0, %v20065_v34, 0.0 }
 0x61e   : > { %v20053_v25 = vpop.xlane.xlu1 %5788 }
 0x61f   : > { %v20059_v15 = vpop.xlane.xlu0 %6403  ;;  %6478 = vadd.xlane.f32.xlu0 %v6477_v20  ;;  %v22675_v20 = vld [vmem:[#allocation26_spill] sm:$0xff] }
 0x621   : > { %5884 = vmax.xlane.f32.xlu1 %v5883_v36  ;;  %v16124_v63 = vpop.eup %16123  ;;  %v6867_v36 = vmul.f32 %v16122_v28, %v22675_v20  ;;  %v6200_v20 = vmul.f32 1.442695, %v6018_v39 }
 0x622   : > { %v6401_v19 = vpop.xlane.xlu1 %6400  ;;  %v6866_v54 = vmul.f32 %v16124_v63, %v22674_v62  ;;  %v20078_v43 = vpop.eup %16125  ;;  %v6192_v63 = vmul.f32 1.442695, %v6014_v32 }
 0x623   : > { %v20073_v44 = vpop.xlane.xlu0 %5797  ;;  %6475 = vadd.xlane.f32.xlu0 %v6474_v45  ;;  %v20086_v45 = vpop.eup %16127  ;;  %v6465_v28 = vsel %vm431_vm0, %v20078_v43, 0.0 }
 0x624   : > { %13846 = vmatprep.mubr.msk.f32.mxu0 %vm431_vm0, %v6866_v54  ;;  %v6486_v54 = vsel %vm431_vm0, %v20086_v45, 0.0  ;;  %16135 = vpow2.f32 %v6192_v63 }
 0x625   : > { %6460 = vadd.xlane.f32.xlu1 %v6459_v17  ;;  %13847 = vmatmul.mubr.msk.f32.gmra.mrb[94].mxu0 %vm431_vm0, %v6867_v36  ;;  %v20097_v17 = vpop.eup %16129  ;;  %16137 = vrcp.f32 %v19972_v42  ;;  %v6015_v36 = vsub.f32 %v22680_v5, %v19810_v10 }
 0x626   : > { %v20082_v18 = vpop.xlane.xlu1 %5794  ;;  %22678 = vst [vmem:[#allocation129_spill] sm:$0xff] %v20097_v17  ;;  %v6495_v47 = vsel %vm431_vm0, %v20097_v17, 0.0  ;;  %v20106_v27 = vpop.eup %16131 }
 0x627   : > { %v20089_v9 = vpop.xlane.xlu0 %5806  ;;  %6481 = vadd.xlane.f32.xlu0 %v6480_v56  ;;  %v6194_v63 = vmul.f32 1.442695, %v6015_v36  ;;  %v6492_v42 = vsel %vm431_vm0, %v20106_v27, 0.0  ;;  %v20113_v10 = vpop.eup %16133 }
 0x628   : > { %22676 = vst [vmem:[#allocation31_spill] sm:$0xff] %v20089_v9 }
 0x629   : > { %6466 = vadd.xlane.f32.xlu1 %v6465_v28 }
 0x62a   : > { %v6374_v62 = vpop.xlane.xlu1 %6373 }
 0x62b   : > { %v20099_v32 = vpop.xlane.xlu0 %5803  ;;  %6487 = vadd.xlane.f32.xlu0 %v6486_v54  ;;  %16139 = vrcp.f32 %v6374_v62 }
 0x62c   : > { %22679 = vst [vmem:[#allocation46_spill] sm:$0xff] %v20099_v32  ;;  %16141 = vpow2.f32 %v6200_v20 }
 0x62d   : > { %16143 = vrcp.f32 %v19989_v7  ;;  %v6504_v7 = vsel %vm431_vm0, %v20113_v10, 0.0 }
 0x62e   : > { %v6383_v56 = vpop.xlane.xlu1 %6382  ;;  %v20117_v54 = vpop.eup %16135 }
 0x62f   : > { %v20108_v28 = vpop.xlane.xlu0 %5812  ;;  %6496 = vadd.xlane.f32.xlu0 %v6495_v47  ;;  %16145 = vrcp.f32 %v6383_v56  ;;  %22683 = vst [vmem:[#allocation115_spill] sm:$0xff] %v20117_v54  ;;  %v16138_v5 = vpop.eup %16137  ;;  %v22684_v56 = vld [vmem:[#allocation83_spill] sm:$0xff] }
 0x630   : > { %22681 = vst [vmem:[#allocation116_spill] sm:$0xff] %v20108_v28  ;;  %v15416_v47 = vunpack.i.h.bf16 %v22684_v56  ;;  %v15415_v26 = vunpack.i.l.bf16 %v22684_v56  ;;  %v22692_v28 = vld [vmem:[#allocation91_spill] sm:$0xff] }
 0x632   : > { %v6380_v39 = vpop.xlane.xlu1 %6379 }
 0x633   : > { %16147 = vrcp.f32 %v6380_v39  ;;  %v20115_v62 = vpop.xlane.xlu0 %5809  ;;  %6493 = vadd.xlane.f32.xlu0 %v6492_v42  ;;  %v22686_v42 = vld [vmem:[#allocation29_spill] sm:$0xff] }
 0x634   : > { %22682 = vst [vmem:[#allocation89_spill] sm:$0xff] %v20115_v62  ;;  %16149 = vpow2.f32 %v6194_v63  ;;  %v6869_v63 = vmul.f32 %v16138_v5, %v22687_v57  ;;  %v22689_v62 = vld [vmem:[#allocation72_spill] sm:$0xff]  ;;  %v14897_v57 = vpack.c.bf16 %v15416_v47, %v15415_v26  ;;  %v22694_v47 = vld [vmem:[#allocation85_spill] sm:$0xff] }
 0x635   : > { %16151 = vrcp.f32 %v6401_v19  ;;  %v16140_v36 = vpop.eup %16139 }
 0x636   : > { %v6389_v20 = vpop.xlane.xlu1 %6388  ;;  %16153 = vrcp.f32 %v20059_v15  ;;  %v6868_v58 = vmul.f32 %v16140_v36, %v22686_v42  ;;  %v20128_v33 = vpop.eup %16141  ;;  %v6498_v15 = vsel %vm431_vm0, %v20117_v54, 0.0  ;;  %v22696_v54 = vld [vmem:[#allocation124_spill] sm:$0xff] }
 0x637   : > { %v20124_v39 = vpop.xlane.xlu0 %5818  ;;  %6505 = vadd.xlane.f32.xlu0 %v6504_v7  ;;  %22688 = vst [vmem:[#allocation142_spill] sm:$0xff] %v20128_v33  ;;  %16155 = vrcp.f32 %v20026_v13  ;;  %v16144_v56 = vpop.eup %16143  ;;  %v6510_v9 = vsel %vm431_vm0, %v20128_v33, 0.0  ;;  %v15456_v33 = vunpack.i.h.bf16 %v22696_v54 }
 0x638   : > { %22685 = vst [vmem:[#allocation81_spill] sm:$0xff] %v20124_v39  ;;  %13857 = vmatprep.mubr.msk.f32.mxu1 %vm431_vm0, %v6868_v58  ;;  %v22690_v39 = vld [vmem:[#allocation114_spill] sm:$0xff]  ;;  %16157 = vrcp.f32 %v6389_v20  ;;  %v22691_v58 = vld [vmem:[#allocation139_spill] sm:$0xff] }
 0x639   : > { %v15446_v7 = vunpack.i.h.bf16 %v22690_v39  ;;  %v15445_v36 = vunpack.i.l.bf16 %v22690_v39  ;;  %13858 = vmatmul.mubr.msk.f32.vlgmr.msra.gmra.mrb[72].mxu1 %vm431_vm0, %v6869_v63  ;;  %v16146_v13 = vpop.eup %16145 }
 0x63a   : > { %v6425_v19 = vpop.xlane.xlu1 %6424  ;;  %15723 = vrot.lane.b32.xlu1 %v22689_v62, %s16749_s25  ;;  %14896 = vmatpush3.bf16.msra.mxu1 %v22691_v58  ;;  %v6871_v63 = vmul.f32 %v16146_v13, %v22694_v47 }
 0x63b   : > { %v6386_v5 = vpop.xlane.xlu0 %6385  ;;  %6499 = vadd.xlane.f32.xlu0 %v6498_v15  ;;  %14898 = vmatprep.subr.bf16.mxu1 %v14897_v57  ;;  %v14909_v39 = vpack.c.bf16 %v15446_v7, %v15445_v36  ;;  %v22695_v15 = vld [vmem:[#allocation34_spill] sm:$0xff]  ;;  %v22697_v7 = vld [vmem:[#allocation48_spill] sm:$0xff] }
 0x63c   : > { %16159 = vrcp.f32 %v6386_v5  ;;  %v6876_v5 = vmul.f32 %v16144_v56, %v22695_v15  ;;  %v22699_v56 = vld [vmem:[#allocation25_spill] sm:$0xff] }
 0x63d   : > { %v16148_v42 = vpop.eup %16147  ;;  %16161 = vrcp.f32 %v6425_v19 }
 0x63e   : > { %v6395_v62 = vpop.xlane.xlu1 %6394  ;;  %v6870_v32 = vmul.f32 %v16148_v42, %v22692_v28  ;;  %v20143_v53 = vpop.eup %16149  ;;  %14900 = vmatpush3.bf16.msra.mxu1 %v14897_v57  ;;  %v15455_v28 = vunpack.i.l.bf16 %v22696_v54 }
 0x63f   : > { %22693 = vst [vmem:[#allocation143_spill] sm:$0xff] %v20143_v53  ;;  %v6422_v26 = vpop.xlane.xlu0 %6421  ;;  %6511 = vadd.xlane.f32.xlu0 %v6510_v9  ;;  %v16152_v20 = vpop.eup %16151  ;;  %14910 = vmatprep.subr.bf16.mxu1 %v14909_v39  ;;  %v6501_v19 = vsel %vm431_vm0, %v20143_v53, 0.0  ;;  %v22706_v53 = vld [vmem:[#allocation100_spill] sm:$0xff] }
 0x640   : > { %16163 = vrcp.f32 %v6422_v26  ;;  %13860 = vmatprep.mubr.msk.f32.mxu1 %vm431_vm0, %v6870_v32  ;;  %v16154_v58 = vpop.eup %16153  ;;  %v6877_v36 = vmul.f32 %v16152_v20, %v22697_v7  ;;  %v14913_v54 = vpack.c.bf16 %v15456_v33, %v15455_v28  ;;  %v22700_v26 = vld [vmem:[#allocation102_spill] sm:$0xff]  ;;  %v22705_v33 = vld [vmem:[#allocation39_spill] sm:$0xff] }
 0x641   : > { %13861 = vmatmul.mubr.msk.f32.gmra.mrb[74].mxu1 %vm431_vm0, %v6871_v63  ;;  %v16156_v32 = vpop.eup %16155  ;;  %v6878_v13 = vmul.f32 %v16154_v58, %v22699_v56  ;;  %v15436_v47 = vunpack.i.h.bf16 %v22700_v26  ;;  %v15435_v63 = vunpack.i.l.bf16 %v22700_v26  ;;  %v22704_v58 = vld [vmem:[#allocation54_spill] sm:$0xff] }
 0x642   : > { %13885 = vmatprep.mubr.msk.f32.mxu1 %vm431_vm0, %v6876_v5  ;;  %v6431_v9 = vpop.xlane.xlu1 %6430  ;;  %v16158_v42 = vpop.eup %16157 }
 0x643   : > { %v20155_v57 = vpop.xlane.xlu0 %5815  ;;  %6502 = vadd.xlane.f32.xlu0 %v6501_v19  ;;  %v22702_v19 = vld [vmem:[#allocation75_spill] sm:$0xff]  ;;  %16165 = vrcp.f32 %v6431_v9  ;;  %v6873_v17 = vmul.f32 %v16158_v42, %v22706_v53  ;;  %v14905_v26 = vpack.c.bf16 %v15436_v47, %v15435_v63 }
 0x644   : > { %22698 = vst [vmem:[#allocation30_spill] sm:$0xff] %v20155_v57  ;;  %v6879_v7 = vmul.f32 %v16156_v32, %v22702_v19  ;;  %v22703_v57 = vld [vmem:[#allocation147_spill] sm:$0xff] }
 0x645   : > { %13886 = vmatmul.mubr.msk.f32.vlgmr.msra.gmra.mrb[76].mxu1 %vm431_vm0, %v6877_v36  ;;  %v6009_v56 = vsub.f32 %v22704_v58, %v22703_v57  ;;  %v22708_v57 = vld [vmem:[#allocation141_spill] sm:$0xff] }
 0x646   : > { %14912 = vmatpush3.bf16.msra.mxu1 %v14909_v39  ;;  %v20161_v15 = vpop.xlane.xlu1 %5824  ;;  %13888 = vmatprep.mubr.msk.f32.mxu1 %vm431_vm0, %v6878_v13  ;;  %v16160_v20 = vpop.eup %16159 }
 0x647   : > { %22701 = vst [vmem:[#allocation26_spill] sm:$0xff] %v20161_v15  ;;  %14914 = vmatprep.subr.bf16.mxu1 %v14913_v54  ;;  %v6428_v5 = vpop.xlane.xlu0 %6427  ;;  %v6872_v28 = vmul.f32 %v16160_v20, %v22705_v33  ;;  %v16162_v36 = vpop.eup %16161  ;;  %v22707_v15 = vld [vmem:[#allocation128_spill] sm:$0xff]  ;;  %v6182_v42 = vmul.f32 1.442695, %v6009_v56  ;;  %v22709_v20 = vld [vmem:[#allocation57_spill] sm:$0xff] }
 0x648   : > { %16167 = vrcp.f32 %v6428_v5  ;;  %v15466_v32 = vunpack.i.h.bf16 %v22707_v15  ;;  %v15465_v19 = vunpack.i.l.bf16 %v22707_v15  ;;  %v6011_v5 = vsub.f32 %v22709_v20, %v19719_v12  ;;  %v22712_v12 = vld [vmem:[#allocation87_spill] sm:$0xff] }
 0x649   : > { %13889 = vmatmul.mubr.msk.f32.gmra.mrb[78].mxu1 %vm431_vm0, %v6879_v7  ;;  %13871 = vmatprep.mubr.msk.f32.mxu0 %vm431_vm0, %v6872_v28  ;;  %16169 = vrcp.f32 %v6395_v62  ;;  %v22710_v7 = vld [vmem:[#allocation41_spill] sm:$0xff]  ;;  %v6017_v63 = vsub.f32 %v22712_v12, %v19765_v8  ;;  %v22721_v12 = vld [vmem:[#allocation19_spill] sm:$0xff] }
 0x64a   : > { %v16164_v39 = vpop.eup %16163  ;;  %14916 = vmatpush3.bf16.msra.mxu1 %v14913_v54  ;;  %v6392_v13 = vpop.xlane.xlu1 %6391  ;;  %13872 = vmatmul.mubr.msk.f32.vlgmr.msra.gmra.mrb[96].mxu0 %vm431_vm0, %v6873_v17  ;;  %v6885_v58 = vmul.f32 %v16162_v36, %v22710_v7  ;;  %v20187_v62 = vpack.c.bf16 %v15466_v32, %v15465_v19  ;;  %v6186_v47 = vmul.f32 1.442695, %v6011_v5  ;;  %v22715_v36 = vld [vmem:[#allocation148_spill] sm:$0xff]  ;;  %v22719_v5 = vld [vmem:[#allocation74_spill] sm:$0xff] }
 0x64b   : > { %v20174_v9 = vpop.xlane.xlu0 %5821  ;;  %v6884_v53 = vmul.f32 %v16164_v39, %v22708_v57  ;;  %16171 = vrcp.f32 %v6392_v13  ;;  %14904 = vmatpush3.bf16.msra.mxu0 %v20037_v0  ;;  %v6198_v28 = vmul.f32 1.442695, %v6017_v63  ;;  %v22716_v32 = vld [vmem:[#allocation144_spill] sm:$0xff]  ;;  %v6019_v63 = vsub.f32 %v22721_v12, %v19803_v41 }
 0x64c   : > { %14906 = vmatprep.subr.bf16.mxu0 %v14905_v26  ;;  %16173 = vpow2.f32 %v6182_v42  ;;  %v22718_v42 = vld [vmem:[#allocation67_spill] sm:$0xff]  ;;  %v22722_v41 = vld [vmem:[#allocation24_spill] sm:$0xff] }
 0x64d   : > { %13913 = vmatprep.mubr.msk.f32.mxu1 %vm431_vm0, %v6884_v53  ;;  %v16166_v0 = vpop.eup %16165  ;;  %16175 = vpow2.f32 %v6186_v47 }
 0x64e   : > { %v20182_v54 = vpop.xlane.xlu1 %5830  ;;  %13914 = vmatmul.mubr.msk.f32.vlgmr.msra.gmra.mrb[80].mxu1 %vm431_vm0, %v6885_v58  ;;  %v6887_v19 = vmul.f32 %v16166_v0, %v22716_v32  ;;  %16177 = vpow2.f32 %v6198_v28 }
 0x64f   : > { %v20185_v17 = vpop.xlane.xlu0 %5842  ;;  %14908 = vmatpush3.bf16.msra.mxu0 %v14905_v26 }
 0x650   : > { %22711 = vst [vmem:[#allocation23_spill] sm:$0xff] %v20185_v17  ;;  %14918 = vmatprep.subr.bf16.mxu0 %v20187_v62 }
 0x652   : > { %v20192_v15 = vpop.xlane.xlu1 %5827  ;;  %v16168_v56 = vpop.eup %16167 }
 0x653   : > { %22713 = vst [vmem:[#allocation20_spill] sm:$0xff] %v20192_v15  ;;  %v20194_v33 = vpop.xlane.xlu0 %5839  ;;  %v6886_v39 = vmul.f32 %v16168_v56, %v22715_v36  ;;  %v16170_v13 = vpop.eup %16169 }
 0x654   : > { %22714 = vst [vmem:[#allocation83_spill] sm:$0xff] %v20194_v33  ;;  %v6875_v20 = vmul.f32 %v16170_v13, %v22718_v42  ;;  %v6202_v13 = vmul.f32 1.442695, %v6019_v63  ;;  %v22724_v63 = vld [vmem:[#allocation37_spill] sm:$0xff] }
 0x655   : > { %v16172_v57 = vpop.eup %16171  ;;  %13916 = vmatprep.mubr.msk.f32.mxu1 %vm431_vm0, %v6886_v39 }
 0x656   : > { %v20199_v8 = vpop.xlane.xlu1 %5836  ;;  %13917 = vmatmul.mubr.msk.f32.gmra.mrb[82].mxu1 %vm431_vm0, %v6887_v19  ;;  %v6874_v53 = vmul.f32 %v16172_v57, %v19690_v23  ;;  %v20207_v7 = vpop.eup %16173  ;;  %v5426_v57 = vld [vmem:[#allocation7 + $0x330] sm:$0xff] }
 0x657   : > { %22717 = vst [vmem:[#allocation29_spill] sm:$0xff] %v20199_v8  ;;  %v6419_v26 = vpop.xlane.xlu0 %6418  ;;  %v6483_v56 = vsel %vm431_vm0, %v20207_v7, 0.0  ;;  %v20216_v28 = vpop.eup %16175 }
 0x658   : > { %13874 = vmatprep.mubr.msk.f32.mxu0 %vm431_vm0, %v6874_v53  ;;  %v6489_v32 = vsel %vm431_vm0, %v20216_v28, 0.0  ;;  %v20220_v19 = vpop.eup %16177  ;;  %v6020_v53 = vsub.f32 %v22722_v41, %v19862_v52 }
 0x659   : > { %15728 = vrot.lane.b32.xlu0 %v22719_v5, %s16749_s25  ;;  %13875 = vmatmul.mubr.msk.f32.gmra.mrb[98].mxu0 %vm431_vm0, %v6875_v20  ;;  %v20225_v20 = vadd.f32 %v5426_v57, %v19731_v24  ;;  %v6507_v5 = vsel %vm431_vm0, %v20220_v19, 0.0  ;;  %v22726_v24 = vld [vmem:[#allocation94_spill] sm:$0xff] }
 0x65a   : > { %v20210_v58 = vpop.xlane.xlu1 %5833  ;;  %v6204_v12 = vmul.f32 1.442695, %v6020_v53 }
 0x65b   : > { %22720 = vst [vmem:[#allocation64_spill] sm:$0xff] %v20210_v58  ;;  %v15719_v47 = vpop.permute.xlu0 %15718  ;;  %22723 = vst [vmem:[#allocation72_spill] sm:$0xff] %v20225_v20 }
 0x65c   : > { %v15721_v0 = vunpack.i.h.bf16 %v15719_v47  ;;  %v15720_v23 = vunpack.i.l.bf16 %v15719_v47  ;;  %v5427_v47 = vld [vmem:[#allocation7 + $0x338] sm:$0xff] }
 0x65d   : > { %v20232_v52 = vadd.f32 %v19725_v1, %v5427_v47 }
 0x65e   : > { %v6413_v36 = vpop.xlane.xlu1 %6412  ;;  %6484 = vadd.xlane.f32.xlu1 %v6483_v56  ;;  %v14925_v39 = vpack.c.bf16 %v15721_v0, %v15720_v23  ;;  %v6024_v0 = vsub.f32 %v22724_v63, %v19916_v38  ;;  %v5886_v56 = vsel %vm431_vm0, %v20225_v20, -inf }
 0x65f   : > { %16179 = vrcp.f32 %v6413_v36  ;;  %22725 = vst [vmem:[#allocation114_spill] sm:$0xff] %v20232_v52  ;;  %v6021_v36 = vsub.f32 %v22726_v24, %v19845_v29  ;;  %v5889_v1 = vsel %vm431_vm0, %v20232_v52, -inf  ;;  %v22730_v29 = vld [vmem:[#allocation170_spill] sm:$0xff] }
 0x660   : > { %14926 = vmatprep.subr.bf16.mxu1 %v14925_v39 }
 0x661   : > { %14928 = vmatpush3.bf16.msra.mxu1 %v14925_v39  ;;  %v6212_v39 = vmul.f32 1.442695, %v6024_v0 }
 0x662   : > { %v6410_v42 = vpop.xlane.xlu1 %6409  ;;  %6490 = vadd.xlane.f32.xlu1 %v6489_v32 }
 0x663   : > { %16181 = vrcp.f32 %v6410_v42  ;;  %v6206_v42 = vmul.f32 1.442695, %v6021_v36 }
 0x664   : > { %16183 = vpow2.f32 %v6202_v13 }
 0x665   : > { %16185 = vrcp.f32 %v6419_v26  ;;  %v22728_v26 = vld [vmem:[#allocation134_spill] sm:$0xff] }
 0x666   : > { %v6416_v23 = vpop.xlane.xlu1 %6415  ;;  %6508 = vadd.xlane.f32.xlu1 %v6507_v5  ;;  %v15476_v57 = vunpack.i.h.bf16 %v22728_v26  ;;  %v15475_v41 = vunpack.i.l.bf16 %v22728_v26 }
 0x667   : > { %16187 = vrcp.f32 %v6416_v23 }
 0x668   : > { %16189 = vpow2.f32 %v6204_v12  ;;  %v22731_v12 = vld [vmem:[#allocation165_spill] sm:$0xff]  ;;  %v14921_v24 = vpack.c.bf16 %v15476_v57, %v15475_v41 }
 0x669   : > { %v16180_v32 = vpop.eup %16179  ;;  %16191 = vpow2.f32 %v6212_v39  ;;  %v22733_v39 = vld [vmem:[#allocation171_spill] sm:$0xff] }
 0x66a   : > { %v20238_v13 = vpop.xlane.xlu1 %5848  ;;  %5887 = vmax.xlane.f32.xlu1 %v5886_v56  ;;  %v6881_v63 = vmul.f32 %v16180_v32, %v22731_v12  ;;  %16193 = vpow2.f32 %v6206_v42  ;;  %v22734_v32 = vld [vmem:[#allocation159_spill] sm:$0xff] }
 0x66b   : > { %22727 = vst [vmem:[#allocation139_spill] sm:$0xff] %v20238_v13 }
 0x66d   : > { %v16182_v38 = vpop.eup %16181 }
 0x66e   : > { %v20244_v53 = vpop.eup %16183  ;;  %v20246_v5 = vpop.xlane.xlu1 %5845  ;;  %5890 = vmax.xlane.f32.xlu1 %v5889_v1  ;;  %v6880_v47 = vmul.f32 %v16182_v38, %v22730_v29 }
 0x66f   : > { %22729 = vst [vmem:[#allocation91_spill] sm:$0xff] %v20246_v5  ;;  %v16186_v0 = vpop.eup %16185  ;;  %v6513_v56 = vsel %vm431_vm0, %v20244_v53, 0.0 }
 0x670   : > { %13899 = vmatprep.mubr.msk.f32.mxu0 %vm431_vm0, %v6880_v47  ;;  %v6883_v26 = vmul.f32 %v16186_v0, %v22734_v32 }
 0x671   : > { %v16188_v23 = vpop.eup %16187  ;;  %13900 = vmatmul.mubr.msk.f32.vlgmr.msra.gmra.mrb[100].mxu0 %vm431_vm0, %v6881_v63 }
 0x672   : > { %14920 = vmatpush3.bf16.msra.mxu0 %v20187_v62  ;;  %v20255_v36 = vpop.xlane.xlu1 %5854  ;;  %6514 = vadd.xlane.f32.xlu1 %v6513_v56  ;;  %v6882_v38 = vmul.f32 %v16188_v23, %v22733_v39  ;;  %v20259_v1 = vpop.eup %16189  ;;  %v22738_v23 = vld [vmem:[#allocation82_spill] sm:$0xff] }
 0x673   : > { %22732 = vst [vmem:[#allocation85_spill] sm:$0xff] %v20255_v36  ;;  %14922 = vmatprep.subr.bf16.mxu0 %v14921_v24  ;;  %v6516_v62 = vsel %vm431_vm0, %v20259_v1, 0.0  ;;  %v20267_v57 = vpop.eup %16191 }
 0x674   : > { %13902 = vmatprep.mubr.msk.f32.mxu0 %vm431_vm0, %v6882_v38  ;;  %v6528_v42 = vsel %vm431_vm0, %v20267_v57, 0.0  ;;  %v20273_v47 = vpop.eup %16193 }
 0x675   : > { %13903 = vmatmul.mubr.msk.f32.gmra.mrb[102].mxu0 %vm431_vm0, %v6883_v26  ;;  %v6519_v63 = vsel %vm431_vm0, %v20273_v47, 0.0 }
 0x676   : > { %14924 = vmatpush3.bf16.msra.mxu0 %v14921_v24  ;;  %v20263_v29 = vpop.xlane.xlu1 %5851 }
 0x677   : > { %22735 = vst [vmem:[#allocation34_spill] sm:$0xff] %v20263_v29 }
 0x678   : > { %6517 = vadd.xlane.f32.xlu0 %v6516_v62 }
 0x67a   : > { %v20269_v41 = vpop.xlane.xlu1 %5860 }
 0x67b   : > { %22736 = vst [vmem:[#allocation124_spill] sm:$0xff] %v20269_v41  ;;  %v22758_v41 = vld [vmem:[#allocation92_spill] sm:$0xff] }
 0x67c   : > { %6529 = vadd.xlane.f32.xlu0 %v6528_v42 }
 0x67e   : > { %v20275_v12 = vpop.xlane.xlu1 %5857 }
 0x67f   : > { %22737 = vst [vmem:[#allocation48_spill] sm:$0xff] %v20275_v12 }
 0x680   : > { %6520 = vadd.xlane.f32.xlu0 %v6519_v63 }
 0x682   : > { %v6437_v0 = vpop.xlane.xlu1 %6436 }
 0x683   : > { %15733 = vrot.lane.b32.xlu1 %v22738_v23, %s16749_s25  ;;  %16195 = vrcp.f32 %v6437_v0  ;;  %v22741_v0 = vld [vmem:[#allocation80_spill] sm:$0xff] }
 0x686   : > { %v6434_v56 = vpop.xlane.xlu1 %6433 }
 0x687   : > { %16197 = vrcp.f32 %v6434_v56 }
 0x68a   : > { %v20281_v24 = vpop.xlane.xlu1 %5866 }
 0x68b   : > { %22739 = vst [vmem:[#allocation25_spill] sm:$0xff] %v20281_v24 }
 0x68c   : > { %v20283_v39 = vpop.xlane.xlu0 %6448 }
 0x68d   : > { %v16196_v32 = vpop.eup %16195 }
 0x68e   : > { %v20285_v38 = vpop.xlane.xlu1 %5863  ;;  %v6889_v20 = vmul.f32 %v16196_v32, %v19887_v40 }
 0x68f   : > { %22740 = vst [vmem:[#allocation102_spill] sm:$0xff] %v20285_v38 }
 0x690   : > { %v6446_v26 = vpop.xlane.xlu0 %6445 }
 0x691   : > { %v16198_v62 = vpop.eup %16197  ;;  %16199 = vrcp.f32 %v6446_v26  ;;  %v22742_v26 = vld [vmem:[#allocation127_spill] sm:$0xff] }
 0x692   : > { %v6443_v42 = vpop.xlane.xlu1 %6442  ;;  %v6888_v63 = vmul.f32 %v16198_v62, %v19901_v46  ;;  %v6025_v38 = vsub.f32 %v22742_v26, %v19905_v49  ;;  %v22746_v26 = vld [vmem:[#allocation131_spill] sm:$0xff] }
 0x693   : > { %16201 = vrcp.f32 %v6443_v42  ;;  %v5428_v42 = vld [vmem:[#allocation7 + $0x340] sm:$0xff] }
 0x694   : > { %v20289_v52 = vpop.xlane.xlu0 %6454  ;;  %13927 = vmatprep.mubr.msk.f32.mxu0 %vm431_vm0, %v6888_v63  ;;  %v6214_v63 = vmul.f32 1.442695, %v6025_v38  ;;  %v5429_v38 = vld [vmem:[#allocation7 + $0x348] sm:$0xff] }
 0x695   : > { %13928 = vmatmul.mubr.msk.f32.vlgmr.msra.gmra.mrb[104].mxu0 %vm431_vm0, %v6889_v20 }
 0x696   : > { %15738 = vrot.lane.b32.xlu0 %v22741_v0, %s16749_s25  ;;  %v6440_v23 = vpop.xlane.xlu1 %6439  ;;  %v22745_v0 = vld [vmem:[#allocation123_spill] sm:$0xff] }
 0x697   : > { %16203 = vrcp.f32 %v6440_v23  ;;  %v6022_v23 = vsub.f32 %v22745_v0, %v19907_v4 }
 0x698   : > { %v20295_v56 = vpop.xlane.xlu0 %6451 }
 0x69a   : > { %v20299_v46 = vpop.xlane.xlu1 %5872 }
 0x69b   : > { %22743 = vst [vmem:[#allocation75_spill] sm:$0xff] %v20299_v46  ;;  %v16200_v40 = vpop.eup %16199  ;;  %v20310_v46 = vadd.f32 %v5428_v42, %v22746_v26 }
 0x69c   : > { %v6458_v32 = vpop.xlane.xlu0 %6457  ;;  %v6892_v62 = vmul.f32 %v16200_v40, %v19931_v60  ;;  %v6208_v40 = vmul.f32 1.442695, %v6022_v23 }
 0x69d   : > { %16205 = vrcp.f32 %v6458_v32  ;;  %v16202_v12 = vpop.eup %16201  ;;  %22747 = vst [vmem:[#allocation54_spill] sm:$0xff] %v20310_v46  ;;  %v22749_v32 = vld [vmem:[#allocation42_spill] sm:$0xff] }
 0x69e   : > { %13941 = vmatprep.mubr.msk.f32.mxu1 %vm431_vm0, %v6892_v62  ;;  %v20303_v20 = vpop.xlane.xlu1 %5869  ;;  %16207 = vpow2.f32 %v6214_v63  ;;  %v6026_v62 = vsub.f32 %v22749_v32, %v19966_v51  ;;  %v22750_v63 = vld [vmem:[#allocation45_spill] sm:$0xff] }
 0x69f   : > { %22744 = vst [vmem:[#allocation147_spill] sm:$0xff] %v20303_v20  ;;  %v6891_v20 = vmul.f32 %v16202_v12, %v19935_v22  ;;  %v20323_v42 = vadd.f32 %v22750_v63, %v5429_v38  ;;  %16209 = vpow2.f32 %v6208_v40 }
 0x6a0   : > { %v20307_v24 = vpop.xlane.xlu0 %6463  ;;  %v6216_v22 = vmul.f32 1.442695, %v6026_v62 }
 0x6a1   : > { %v16204_v49 = vpop.eup %16203  ;;  %22751 = vst [vmem:[#allocation100_spill] sm:$0xff] %v20323_v42 }
 0x6a2   : > { %v20312_v29 = vpop.xlane.xlu1 %5878  ;;  %v6890_v60 = vmul.f32 %v16204_v49, %v19949_v30  ;;  %v5892_v30 = vsel %vm431_vm0, %v20310_v46, -inf  ;;  %v22753_v49 = vld [vmem:[#allocation96_spill] sm:$0xff]  ;;  %16211 = vpow2.f32 %v6216_v22 }
 0x6a3   : > { %22748 = vst [vmem:[#allocation39_spill] sm:$0xff] %v20312_v29  ;;  %v6023_v51 = vsub.f32 %v22753_v49, %v19891_v55 }
 0x6a4   : > { %v20318_v4 = vpop.xlane.xlu0 %6472  ;;  %13930 = vmatprep.mubr.msk.f32.mxu0 %vm431_vm0, %v6890_v60 }
 0x6a5   : > { %13931 = vmatmul.mubr.msk.f32.gmra.mrb[106].mxu0 %vm431_vm0, %v6891_v20  ;;  %v5895_v20 = vsel %vm431_vm0, %v20323_v42, -inf  ;;  %v6210_v32 = vmul.f32 1.442695, %v6023_v51 }
 0x6a6   : > { %v20325_v0 = vpop.xlane.xlu1 %5875 }
 0x6a7   : > { %22752 = vst [vmem:[#allocation128_spill] sm:$0xff] %v20325_v0  ;;  %v16206_v23 = vpop.eup %16205  ;;  %5893 = vmax.xlane.f32.xlu1 %v5892_v30  ;;  %16213 = vpow2.f32 %v6210_v32 }
 0x6a8   : > { %v6470_v12 = vpop.xlane.xlu0 %6469  ;;  %v6896_v26 = vmul.f32 %v16206_v23, %v19970_v2  ;;  %v20337_v38 = vpop.eup %16207  ;;  %16215 = vrcp.f32 %v20283_v39 }
 0x6a9   : > { %v6531_v40 = vsel %vm431_vm0, %v20337_v38, 0.0  ;;  %v20347_v62 = vpop.eup %16209  ;;  %16217 = vrcp.f32 %v20295_v56 }
 0x6aa   : > { %v20332_v60 = vpop.xlane.xlu1 %5881  ;;  %13955 = vmatprep.mubr.msk.f32.mxu0 %vm431_vm0, %v6896_v26  ;;  %v6522_v49 = vsel %vm431_vm0, %v20347_v62, 0.0  ;;  %16219 = vrcp.f32 %v20289_v52  ;;  %v5430_v52 = vld [vmem:[#allocation7 + $0x350] sm:$0xff] }
 0x6ab   : > { %22754 = vst [vmem:[#allocation141_spill] sm:$0xff] %v20332_v60  ;;  %5896 = vmax.xlane.f32.xlu1 %v5895_v20  ;;  %16221 = vrcp.f32 %v6470_v12  ;;  %v22763_v12 = vld [vmem:[#allocation140_spill] sm:$0xff] }
 0x6ac   : > { %v20339_v63 = vpop.xlane.xlu0 %6478  ;;  %v20355_v51 = vpop.eup %16211  ;;  %v6028_v15 = vsub.f32 %v22763_v12, %v19927_v31  ;;  %v22766_v31 = vld [vmem:[#allocation132_spill] sm:$0xff] }
 0x6ad   : > { %v6534_v20 = vsel %vm431_vm0, %v20355_v51, 0.0 }
 0x6ae   : > { %v20341_v55 = vpop.xlane.xlu1 %5884 }
 0x6af   : > { %22755 = vst [vmem:[#allocation57_spill] sm:$0xff] %v20341_v55  ;;  %6532 = vadd.xlane.f32.xlu1 %v6531_v40 }
 0x6b0   : > { %v20345_v2 = vpop.xlane.xlu0 %6475 }
 0x6b1   : > { %v20363_v32 = vpop.eup %16213 }
 0x6b2   : > { %v20349_v30 = vpop.xlane.xlu1 %6460  ;;  %v6525_v0 = vsel %vm431_vm0, %v20363_v32, 0.0  ;;  %v16216_v58 = vpop.eup %16215 }
 0x6b3   : > { %v16218_v13 = vpop.eup %16217  ;;  %v6893_v56 = vmul.f32 %v16216_v58, %v19918_v6  ;;  %v6220_v6 = vmul.f32 1.442695, %v6028_v15 }
 0x6b4   : > { %v20351_v23 = vpop.xlane.xlu0 %6481  ;;  %v16220_v17 = vpop.eup %16219 }
 0x6b5   : > { %6523 = vadd.xlane.f32.xlu0 %v6522_v49  ;;  %v16222_v8 = vpop.eup %16221 }
 0x6b6   : > { %v20357_v22 = vpop.xlane.xlu1 %6466  ;;  %v6900_v58 = vmul.f32 %v16222_v8, %v20023_v21 }
 0x6b8   : > { %v20359_v26 = vpop.xlane.xlu0 %6487 }
 0x6b9   : > { %6535 = vadd.xlane.f32.xlu0 %v6534_v20 }
 0x6ba   : > { %v15724_v40 = vpop.permute.xlu1 %15723 }
 0x6bb   : > { %v15726_v46 = vunpack.i.h.bf16 %v15724_v40  ;;  %v15725_v60 = vunpack.i.l.bf16 %v15724_v40  ;;  %v20369_v55 = vpop.f32.mrb[88].mxu0 }
 0x6bc   : > { %v20365_v42 = vpop.xlane.xlu0 %6496  ;;  %22756 = vst [vmem:[#allocation41_spill] sm:$0xff] %v20369_v55  ;;  %v20371_v29 = vpop.f32.mrb[89].mxu0 }
 0x6bd   : > { %6526 = vadd.xlane.f32.xlu0 %v6525_v0  ;;  %v14933_v49 = vpack.c.bf16 %v15726_v46, %v15725_v60  ;;  %22757 = vst [vmem:[#allocation87_spill] sm:$0xff] %v20371_v29 }
 0x6bf   : > { %14934 = vmatprep.subr.bf16.mxu0 %v14933_v49 }
 0x6c0   : > { %v20373_v5 = vpop.xlane.xlu0 %6493  ;;  %15743 = vrot.lane.b32.xlu1 %v22758_v41, %s16749_s25  ;;  %14936 = vmatpush3.bf16.msra.mxu0 %v14933_v49  ;;  %v22761_v41 = vld [vmem:[#allocation93_spill] sm:$0xff] }
 0x6c4   : > { %v20377_v20 = vpop.xlane.xlu0 %6505 }
 0x6c7   : > { %v20379_v40 = vpop.f32.mrb[90].mxu0 }
 0x6c8   : > { %22759 = vst [vmem:[#allocation148_spill] sm:$0xff] %v20379_v40  ;;  %v20381_v36 = vpop.xlane.xlu0 %6499  ;;  %v20383_v33 = vpop.f32.mrb[91].mxu0  ;;  %v22762_v40 = vld [vmem:[#allocation44_spill] sm:$0xff] }
 0x6c9   : > { %22760 = vst [vmem:[#allocation144_spill] sm:$0xff] %v20383_v33  ;;  %v6027_v33 = vsub.f32 %v22762_v40, %v19939_v14  ;;  %v22764_v14 = vld [vmem:[#allocation18_spill] sm:$0xff] }
 0x6ca   : > { %v20403_v40 = vadd.f32 %v5430_v52, %v22764_v14 }
 0x6cb   : > { %v6218_v39 = vmul.f32 1.442695, %v6027_v33  ;;  %v6895_v33 = vmul.f32 %v16220_v17, %v19943_v37 }
 0x6cc   : > { %v20385_v55 = vpop.xlane.xlu0 %6511  ;;  %22765 = vst [vmem:[#allocation67_spill] sm:$0xff] %v20403_v40 }
 0x6cd   : > { %16223 = vpow2.f32 %v6218_v39 }
 0x6ce   : > { %16225 = vpow2.f32 %v6220_v6 }
 0x6cf   : > { %16227 = vrcp.f32 %v20349_v30 }
 0x6d0   : > { %v20389_v46 = vpop.xlane.xlu0 %6502  ;;  %16229 = vrcp.f32 %v20307_v24 }
 0x6d1   : > { %16231 = vrcp.f32 %v20357_v22 }
 0x6d2   : > { %16233 = vrcp.f32 %v20351_v23  ;;  %v22774_v23 = vld [vmem:[#allocation101_spill] sm:$0xff] }
 0x6d3   : > { %15748 = vrot.lane.b32.xlu0 %v22761_v41, %s16749_s25  ;;  %v6894_v41 = vmul.f32 %v16218_v13, %v19955_v11  ;;  %v5898_v13 = vsel %vm431_vm0, %v20403_v40, -inf  ;;  %v22780_v40 = vld [vmem:[#allocation32_spill] sm:$0xff] }
 0x6d4   : > { %v15729_v0 = vpop.permute.xlu0 %15728 }
 0x6d5   : > { %v15731_v60 = vunpack.i.h.bf16 %v15729_v0  ;;  %v15730_v49 = vunpack.i.l.bf16 %v15729_v0 }
 0x6d7   : > { %v14929_v29 = vpack.c.bf16 %v15731_v60, %v15730_v49  ;;  %v20416_v37 = vpop.eup %16223  ;;  %v5433_v49 = vld [vmem:[#allocation7 + $0x368] sm:$0xff] }
 0x6d8   : > { %v6537_v8 = vsel %vm431_vm0, %v20416_v37, 0.0  ;;  %v20426_v60 = vpop.eup %16225 }
 0x6d9   : > { %14930 = vmatprep.subr.bf16.mxu1 %v14929_v29  ;;  %v6540_v12 = vsel %vm431_vm0, %v20426_v60, 0.0 }
 0x6da   : > { %14932 = vmatpush3.bf16.msra.mxu1 %v14929_v29  ;;  %v5431_v29 = vld [vmem:[#allocation7 + $0x358] sm:$0xff] }
 0x6db   : > { %v20410_v11 = vadd.f32 %v22766_v31, %v5431_v29  ;;  %v22773_v31 = vld [vmem:[#allocation60_spill] sm:$0xff] }
 0x6dd   : > { %13942 = vmatmul.mubr.msk.f32.vlgmr.msra.gmra.mrb[84].mxu1 %vm431_vm0, %v6893_v56  ;;  %v5901_v0 = vsel %vm431_vm0, %v20410_v11, -inf  ;;  %v22769_v56 = vld [vmem:[#allocation161_spill] sm:$0xff] }
 0x6de   : > { %13944 = vmatprep.mubr.msk.f32.mxu1 %vm431_vm0, %v6894_v41  ;;  %v20431_v52 = vadd.f32 %v22769_v56, %v5433_v49 }
 0x6e0   : > { %22770 = vst [vmem:[#allocation24_spill] sm:$0xff] %v20431_v52  ;;  %v5907_v14 = vsel %vm431_vm0, %v20431_v52, -inf }
 0x6e1   : > { %13945 = vmatmul.mubr.msk.f32.gmra.mrb[86].mxu1 %vm431_vm0, %v6895_v33 }
 0x6e2   : > { %13969 = vmatprep.mubr.msk.f32.mxu1 %vm431_vm0, %v6900_v58 }
 0x6e4   : > { %5899 = vmax.xlane.f32.xlu1 %v5898_v13 }
 0x6e8   : > { %5902 = vmax.xlane.f32.xlu1 %v5901_v0  ;;  %v20418_v17 = vpop.f32.mrb[92].mxu0 }
 0x6e9   : > { %22767 = vst [vmem:[#allocation74_spill] sm:$0xff] %v20418_v17  ;;  %v20420_v21 = vpop.f32.mrb[93].mxu0  ;;  %v22777_v17 = vld [vmem:[#allocation62_spill] sm:$0xff] }
 0x6ea   : > { %22768 = vst [vmem:[#allocation19_spill] sm:$0xff] %v20420_v21 }
 0x6eb   : > { %v20422_v15 = vpop.xlane.xlu1 %6484 }
 0x6ec   : > { %6538 = vadd.xlane.f32.xlu1 %v6537_v8 }
 0x6ef   : > { %v20428_v39 = vpop.xlane.xlu1 %6490 }
 0x6f2   : > { %6541 = vadd.xlane.f32.xlu0 %v6540_v12 }
 0x6f3   : > { %v20435_v41 = vpop.xlane.xlu1 %6508 }
 0x6f6   : > { %5908 = vmax.xlane.f32.xlu0 %v5907_v14  ;;  %v16228_v14 = vpop.eup %16227 }
 0x6f7   : > { %v20439_v33 = vpop.xlane.xlu1 %5887  ;;  %v6897_v24 = vmul.f32 %v16228_v14, %v20061_v59 }
 0x6f8   : > { %v20441_v29 = vpop.f32.mrb[94].mxu0 }
 0x6f9   : > { %22771 = vst [vmem:[#allocation37_spill] sm:$0xff] %v20441_v29  ;;  %v20443_v6 = vpop.f32.mrb[95].mxu0  ;;  %v16230_v29 = vpop.eup %16229 }
 0x6fa   : > { %22772 = vst [vmem:[#allocation94_spill] sm:$0xff] %v20443_v6  ;;  %v6898_v6 = vmul.f32 %v16230_v29, %v19985_v16 }
 0x6fb   : > { %v20445_v58 = vpop.xlane.xlu1 %5890 }
 0x6fd   : > { %15753 = vrot.lane.b32.xlu1 %v22773_v31, %s16749_s25  ;;  %v16232_v31 = vpop.eup %16231 }
 0x6fe   : > { %v16234_v22 = vpop.eup %16233 }
 0x6ff   : > { %v20451_v13 = vpop.xlane.xlu1 %6514  ;;  %v6904_v16 = vmul.f32 %v16234_v22, %v20065_v34 }
 0x703   : > { %v15734_v0 = vpop.permute.xlu1 %15733 }
 0x704   : > { %v15736_v8 = vunpack.i.h.bf16 %v15734_v0  ;;  %v15735_v49 = vunpack.i.l.bf16 %v15734_v0 }
 0x705   : > { %v20455_v56 = vpop.xlane.xlu0 %6517 }
 0x706   : > { %v14937_v12 = vpack.c.bf16 %v15736_v8, %v15735_v49  ;;  %v6899_v49 = vmul.f32 %v16232_v31, %v20078_v43  ;;  %v22781_v43 = vld [vmem:[#allocation49_spill] sm:$0xff] }
 0x707   : > { %v6030_v31 = vsub.f32 %v22781_v43, %v22780_v40 }
 0x708   : > { %14938 = vmatprep.subr.bf16.mxu0 %v14937_v12 }
 0x709   : > { %v20457_v30 = vpop.xlane.xlu0 %6529  ;;  %14940 = vmatpush3.bf16.msra.mxu0 %v14937_v12  ;;  %v22776_v12 = vld [vmem:[#allocation47_spill] sm:$0xff]  ;;  %v6224_v22 = vmul.f32 1.442695, %v6030_v31 }
 0x70a   : > { %v6029_v59 = vsub.f32 %v22777_v17, %v22776_v12  ;;  %v5432_v17 = vld [vmem:[#allocation7 + $0x360] sm:$0xff]  ;;  %v22785_v12 = vld [vmem:[#allocation163_spill] sm:$0xff] }
 0x70c   : > { %15758 = vrot.lane.b32.xlu0 %v22774_v23, %s16749_s25  ;;  %13956 = vmatmul.mubr.msk.f32.vlgmr.msra.gmra.mrb[108].mxu0 %vm431_vm0, %v6897_v24  ;;  %v20467_v8 = vpop.f32.mrb[72].mxu1  ;;  %v6222_v21 = vmul.f32 1.442695, %v6029_v59 }
 0x70d   : > { %v20464_v0 = vpop.xlane.xlu0 %6520  ;;  %13958 = vmatprep.mubr.msk.f32.mxu0 %vm431_vm0, %v6898_v6  ;;  %22775 = vst [vmem:[#allocation134_spill] sm:$0xff] %v20467_v8  ;;  %v20472_v14 = vpop.f32.mrb[73].mxu1 }
 0x70e   : > { %22778 = vst [vmem:[#allocation170_spill] sm:$0xff] %v20472_v14  ;;  %16235 = vpow2.f32 %v6222_v21 }
 0x70f   : > { %16237 = vpow2.f32 %v6224_v22  ;;  %v5435_v22 = vld [vmem:[#allocation7 + $0x378] sm:$0xff] }
 0x710   : > { %13959 = vmatmul.mubr.msk.f32.gmra.mrb[110].mxu0 %vm431_vm0, %v6899_v49  ;;  %16239 = vrcp.f32 %v20318_v4 }
 0x711   : > { %v15739_v29 = vpop.permute.xlu0 %15738  ;;  %13983 = vmatprep.mubr.msk.f32.mxu0 %vm431_vm0, %v6904_v16  ;;  %v20488_v16 = vadd.f32 %v5432_v17, %v22785_v12  ;;  %v22793_v12 = vld [vmem:[#allocation166_spill] sm:$0xff]  ;;  %16241 = vrcp.f32 %v20345_v2 }
 0x712   : > { %v15741_v24 = vunpack.i.h.bf16 %v15739_v29  ;;  %v15740_v23 = vunpack.i.l.bf16 %v15739_v29  ;;  %16243 = vrcp.f32 %v20339_v63 }
 0x713   : > { %22786 = vst [vmem:[#allocation80_spill] sm:$0xff] %v20488_v16  ;;  %v5904_v21 = vsel %vm431_vm0, %v20488_v16, -inf  ;;  %16245 = vrcp.f32 %v20373_v5 }
 0x714   : > { %v20477_v6 = vpop.f32.mrb[74].mxu1  ;;  %v14941_v8 = vpack.c.bf16 %v15741_v24, %v15740_v23 }
 0x715   : > { %22779 = vst [vmem:[#allocation165_spill] sm:$0xff] %v20477_v6  ;;  %v20481_v52 = vpop.f32.mrb[75].mxu1  ;;  %v22802_v6 = vld [vmem:[#allocation52_spill] sm:$0xff] }
 0x716   : > { %22782 = vst [vmem:[#allocation171_spill] sm:$0xff] %v20481_v52  ;;  %14942 = vmatprep.subr.bf16.mxu1 %v14941_v8 }
 0x717   : > { %14944 = vmatpush3.bf16.msra.mxu1 %v14941_v8 }
 0x718   : > { %v20483_v34 = vpop.f32.mrb[76].mxu1  ;;  %v20500_v8 = vpop.eup %16235 }
 0x719   : > { %22783 = vst [vmem:[#allocation159_spill] sm:$0xff] %v20483_v34  ;;  %v20485_v49 = vpop.f32.mrb[77].mxu1  ;;  %v6543_v31 = vsel %vm431_vm0, %v20500_v8, 0.0  ;;  %v20508_v17 = vpop.eup %16237 }
 0x71a   : > { %22784 = vst [vmem:[#allocation82_spill] sm:$0xff] %v20485_v49  ;;  %v6546_v34 = vsel %vm431_vm0, %v20508_v17, 0.0 }
 0x71c   : > { %v20490_v59 = vpop.f32.mrb[78].mxu1 }
 0x71d   : > { %22787 = vst [vmem:[#allocation127_spill] sm:$0xff] %v20490_v59  ;;  %v20492_v29 = vpop.f32.mrb[79].mxu1  ;;  %v20494_v40 = vpop.f32.mrb[96].mxu0  ;;  %v20511_v59 = vadd.f32 %v22793_v12, %v5435_v22  ;;  %v22800_v22 = vld [vmem:[#allocation109_spill] sm:$0xff] }
 0x71e   : > { %22788 = vst [vmem:[#allocation123_spill] sm:$0xff] %v20492_v29  ;;  %22789 = vst [vmem:[#allocation131_spill] sm:$0xff] %v20494_v40  ;;  %v20496_v24 = vpop.f32.mrb[97].mxu0 }
 0x71f   : > { %22790 = vst [vmem:[#allocation42_spill] sm:$0xff] %v20496_v24  ;;  %22794 = vst [vmem:[#allocation92_spill] sm:$0xff] %v20511_v59 }
 0x721   : > { %5905 = vmax.xlane.f32.xlu1 %v5904_v21  ;;  %v20502_v23 = vpop.f32.mrb[80].mxu1 }
 0x722   : > { %22791 = vst [vmem:[#allocation45_spill] sm:$0xff] %v20502_v23  ;;  %v20504_v43 = vpop.f32.mrb[81].mxu1 }
 0x723   : > { %22792 = vst [vmem:[#allocation96_spill] sm:$0xff] %v20504_v43 }
 0x725   : > { %6544 = vadd.xlane.f32.xlu1 %v6543_v31  ;;  %v5913_v31 = vsel %vm431_vm0, %v20511_v59, -inf  ;;  %v5434_v59 = vld [vmem:[#allocation7 + $0x370] sm:$0xff] }
 0x729   : > { %v20513_v29 = vpop.f32.mrb[82].mxu1 }
 0x72a   : > { %22795 = vst [vmem:[#allocation93_spill] sm:$0xff] %v20513_v29  ;;  %v20517_v21 = vpop.f32.mrb[83].mxu1 }
 0x72b   : > { %22796 = vst [vmem:[#allocation44_spill] sm:$0xff] %v20517_v21  ;;  %6547 = vadd.xlane.f32.xlu0 %v6546_v34 }
 0x72c   : > { %v20519_v23 = vpop.f32.mrb[98].mxu0 }
 0x72d   : > { %22797 = vst [vmem:[#allocation140_spill] sm:$0xff] %v20519_v23  ;;  %v20521_v43 = vpop.f32.mrb[99].mxu0 }
 0x72e   : > { %22798 = vst [vmem:[#allocation18_spill] sm:$0xff] %v20521_v43 }
 0x72f   : > { %5914 = vmax.xlane.f32.xlu0 %v5913_v31 }
 0x734   : > { %v20525_v49 = vpop.xlane.xlu1 %5893 }
 0x735   : > { %22799 = vst [vmem:[#allocation132_spill] sm:$0xff] %v20525_v49 }
 0x736   : > { %15763 = vrot.lane.b32.xlu1 %v22800_v22, %s16749_s25  ;;  %v22804_v22 = vld [vmem:[#allocation51_spill] sm:$0xff] }
 0x737   : > { %v6031_v14 = vsub.f32 %v22804_v22, %v20035_v48 }
 0x738   : > { %v20529_v12 = vpop.xlane.xlu1 %5896 }
 0x73c   : > { %v20531_v29 = vpop.xlane.xlu1 %6532 }
 0x740   : > { %v15744_v40 = vpop.permute.xlu1 %15743 }
 0x741   : > { %v15746_v21 = vunpack.i.h.bf16 %v15744_v40  ;;  %v15745_v34 = vunpack.i.l.bf16 %v15744_v40 }
 0x742   : > { %v20533_v24 = vpop.xlane.xlu0 %6523 }
 0x743   : > { %v14949_v23 = vpack.c.bf16 %v15746_v21, %v15745_v34 }
 0x744   : > { %v20535_v43 = vpop.f32.mrb[100].mxu0 }
 0x745   : > { %22801 = vst [vmem:[#allocation161_spill] sm:$0xff] %v20535_v43  ;;  %15768 = vrot.lane.b32.xlu0 %v22802_v6, %s16749_s25  ;;  %v20539_v31 = vpop.f32.mrb[101].mxu0  ;;  %14950 = vmatprep.subr.bf16.mxu0 %v14949_v23  ;;  %v6226_v6 = vmul.f32 1.442695, %v6031_v14  ;;  %v22807_v43 = vld [vmem:[#allocation69_spill] sm:$0xff] }
 0x746   : > { %22803 = vst [vmem:[#allocation60_spill] sm:$0xff] %v20539_v31  ;;  %v20541_v52 = vpop.xlane.xlu0 %6535  ;;  %14952 = vmatpush3.bf16.msra.mxu0 %v14949_v23  ;;  %v22808_v23 = vld [vmem:[#allocation28_spill] sm:$0xff] }
 0x747   : > { %v6032_v31 = vsub.f32 %v22808_v23, %v22807_v43  ;;  %16247 = vpow2.f32 %v6226_v6 }
 0x748   : > { %v20546_v40 = vpop.f32.mrb[102].mxu0 }
 0x749   : > { %22805 = vst [vmem:[#allocation101_spill] sm:$0xff] %v20546_v40  ;;  %v20549_v21 = vpop.f32.mrb[103].mxu0  ;;  %v16240_v40 = vpop.eup %16239  ;;  %v6228_v2 = vmul.f32 1.442695, %v6032_v31 }
 0x74a   : > { %22806 = vst [vmem:[#allocation47_spill] sm:$0xff] %v20549_v21  ;;  %v20551_v34 = vpop.xlane.xlu0 %6526  ;;  %v16242_v49 = vpop.eup %16241  ;;  %v22809_v21 = vld [vmem:[#allocation168_spill] sm:$0xff]  ;;  %v6901_v63 = vmul.f32 %v16240_v40, %v20002_v50  ;;  %v22810_v40 = vld [vmem:[#allocation150_spill] sm:$0xff] }
 0x74b   : > { %v20558_v14 = vadd.f32 %v5434_v59, %v22809_v21  ;;  %v16244_v5 = vpop.eup %16243  ;;  %16249 = vpow2.f32 %v6228_v2  ;;  %v6902_v43 = vmul.f32 %v16242_v49, %v20057_v61  ;;  %v5437_v49 = vld [vmem:[#allocation7 + $0x388] sm:$0xff] }
 0x74c   : > { %v16246_v23 = vpop.eup %16245  ;;  %v6903_v31 = vmul.f32 %v16244_v5, %v20041_v3  ;;  %v20577_v21 = vadd.f32 %v22810_v40, %v5437_v49  ;;  %16251 = vrcp.f32 %v20422_v15  ;;  %v22817_v40 = vld [vmem:[#allocation22_spill] sm:$0xff] }
 0x74d   : > { %v6908_v59 = vmul.f32 %v16246_v23, %v20106_v27  ;;  %16253 = vrcp.f32 %v20359_v26 }
 0x74e   : > { %v15749_v16 = vpop.permute.xlu0 %15748  ;;  %v5919_v27 = vsel %vm431_vm0, %v20577_v21, -inf  ;;  %16255 = vrcp.f32 %v20428_v39 }
 0x74f   : > { %v15751_v48 = vunpack.i.h.bf16 %v15749_v16  ;;  %v15750_v22 = vunpack.i.l.bf16 %v15749_v16  ;;  %v5910_v16 = vsel %vm431_vm0, %v20558_v14, -inf  ;;  %16257 = vrcp.f32 %v20377_v20 }
 0x751   : > { %v14945_v4 = vpack.c.bf16 %v15751_v48, %v15750_v22  ;;  %v20567_v6 = vpop.eup %16247 }
 0x752   : > { %v6549_v50 = vsel %vm431_vm0, %v20567_v6, 0.0 }
 0x753   : > { %14946 = vmatprep.subr.bf16.mxu1 %v14945_v4 }
 0x754   : > { %14948 = vmatpush3.bf16.msra.mxu1 %v14945_v4  ;;  %v22813_v4 = vld [vmem:[#allocation111_spill] sm:$0xff] }
 0x755   : > { %v20574_v61 = vpop.eup %16249 }
 0x756   : > { %v6552_v3 = vsel %vm431_vm0, %v20574_v61, 0.0  ;;  %v16252_v26 = vpop.eup %16251 }
 0x757   : > { %13970 = vmatmul.mubr.msk.f32.vlgmr.msra.gmra.mrb[88].mxu1 %vm431_vm0, %v6901_v63  ;;  %v6905_v20 = vmul.f32 %v16252_v26, %v20207_v7 }
 0x758   : > { %13972 = vmatprep.mubr.msk.f32.mxu1 %vm431_vm0, %v6902_v43 }
 0x75a   : > { %5911 = vmax.xlane.f32.xlu1 %v5910_v16 }
 0x75b   : > { %13973 = vmatmul.mubr.msk.f32.gmra.mrb[90].mxu1 %vm431_vm0, %v6903_v31 }
 0x75c   : > { %13997 = vmatprep.mubr.msk.f32.mxu1 %vm431_vm0, %v6908_v59 }
 0x75e   : > { %6550 = vadd.xlane.f32.xlu1 %v6549_v50  ;;  %v22816_v50 = vld [vmem:[#allocation50_spill] sm:$0xff] }
 0x764   : > { %6553 = vadd.xlane.f32.xlu0 %v6552_v3  ;;  %v6033_v3 = vsub.f32 %v22817_v40, %v20053_v25 }
 0x768   : > { %5920 = vmax.xlane.f32.xlu0 %v5919_v27  ;;  %v20583_v48 = vpop.f32.mrb[104].mxu0  ;;  %v16254_v27 = vpop.eup %16253 }
 0x769   : > { %22811 = vst [vmem:[#allocation62_spill] sm:$0xff] %v20583_v48  ;;  %v20585_v22 = vpop.f32.mrb[105].mxu0  ;;  %v16256_v39 = vpop.eup %16255 }
 0x76a   : > { %22812 = vst [vmem:[#allocation32_spill] sm:$0xff] %v20585_v22  ;;  %v6907_v48 = vmul.f32 %v16256_v39, %v20216_v28  ;;  %v22846_v22 = vld [vmem:[#allocation59_spill] sm:$0xff] }
 0x76f   : > { %15773 = vrot.lane.b32.xlu1 %v22813_v4, %s16749_s25 }
 0x771   : > { %v20589_v2 = vpop.xlane.xlu1 %5899 }
 0x775   : > { %v20591_v63 = vpop.xlane.xlu1 %5902 }
 0x778   : > { %v20595_v5 = vpop.f32.mrb[106].mxu0 }
 0x779   : > { %22814 = vst [vmem:[#allocation49_spill] sm:$0xff] %v20595_v5  ;;  %v20597_v43 = vpop.xlane.xlu1 %6538  ;;  %v20599_v23 = vpop.f32.mrb[107].mxu0  ;;  %v6230_v5 = vmul.f32 1.442695, %v6033_v3 }
 0x77a   : > { %22815 = vst [vmem:[#allocation163_spill] sm:$0xff] %v20599_v23  ;;  %v16258_v23 = vpop.eup %16257 }
 0x77b   : > { %16259 = vpow2.f32 %v6230_v5  ;;  %v6912_v7 = vmul.f32 %v16258_v23, %v20113_v10  ;;  %v5439_v5 = vld [vmem:[#allocation7 + $0x398] sm:$0xff]  ;;  %v22821_v23 = vld [vmem:[#allocation154_spill] sm:$0xff] }
 0x77d   : > { %v15754_v16 = vpop.permute.xlu1 %15753 }
 0x77e   : > { %v15756_v31 = vunpack.i.h.bf16 %v15754_v16  ;;  %v15755_v59 = vunpack.i.l.bf16 %v15754_v16  ;;  %15778 = vrot.lane.b32.xlu0 %v22816_v50, %s16749_s25  ;;  %v6906_v16 = vmul.f32 %v16254_v27, %v20086_v45  ;;  %v5436_v45 = vld [vmem:[#allocation7 + $0x380] sm:$0xff] }
 0x77f   : > { %v20605_v49 = vpop.xlane.xlu0 %6541 }
 0x780   : > { %v14953_v15 = vpack.c.bf16 %v15756_v31, %v15755_v59  ;;  %v22818_v31 = vld [vmem:[#allocation73_spill] sm:$0xff] }
 0x781   : > { %v6034_v59 = vsub.f32 %v22818_v31, %v20006_v35  ;;  %v22819_v35 = vld [vmem:[#allocation151_spill] sm:$0xff] }
 0x782   : > { %14954 = vmatprep.subr.bf16.mxu0 %v14953_v15  ;;  %v20622_v3 = vadd.f32 %v5436_v45, %v22819_v35  ;;  %v22822_v31 = vld [vmem:[#allocation43_spill] sm:$0xff] }
 0x783   : > { %v20609_v4 = vpop.xlane.xlu0 %5908  ;;  %14956 = vmatpush3.bf16.msra.mxu0 %v14953_v15  ;;  %v6232_v26 = vmul.f32 1.442695, %v6034_v59 }
 0x784   : > { %22820 = vst [vmem:[#allocation166_spill] sm:$0xff] %v20622_v3  ;;  %v5916_v27 = vsel %vm431_vm0, %v20622_v3, -inf }
 0x785   : > { %16261 = vpow2.f32 %v6232_v26  ;;  %v20626_v28 = vpop.eup %16259 }
 0x786   : > { %13984 = vmatmul.mubr.msk.f32.vlgmr.msra.gmra.mrb[112].mxu0 %vm431_vm0, %v6905_v20  ;;  %v6555_v10 = vsel %vm431_vm0, %v20626_v28, 0.0  ;;  %v20633_v20 = vadd.f32 %v22821_v23, %v5439_v5  ;;  %v22828_v23 = vld [vmem:[#allocation110_spill] sm:$0xff]  ;;  %16263 = vrcp.f32 %v20365_v42 }
 0x787   : > { %v15759_v50 = vpop.permute.xlu0 %15758  ;;  %13986 = vmatprep.mubr.msk.f32.mxu0 %vm431_vm0, %v6906_v16  ;;  %16265 = vrcp.f32 %v20381_v36 }
 0x788   : > { %v15761_v25 = vunpack.i.h.bf16 %v15759_v50  ;;  %v15760_v40 = vunpack.i.l.bf16 %v15759_v50  ;;  %v5925_v16 = vsel %vm431_vm0, %v20633_v20, -inf  ;;  %16267 = vrcp.f32 %v20389_v46  ;;  %v22832_v46 = vld [vmem:[#allocation129_spill] sm:$0xff] }
 0x789   : > { %16269 = vrcp.f32 %v20455_v56 }
 0x78a   : > { %13987 = vmatmul.mubr.msk.f32.gmra.mrb[114].mxu0 %vm431_vm0, %v6907_v48  ;;  %v14957_v15 = vpack.c.bf16 %v15761_v25, %v15760_v40 }
 0x78b   : > { %14011 = vmatprep.mubr.msk.f32.mxu0 %vm431_vm0, %v6912_v7 }
 0x78c   : > { %14958 = vmatprep.subr.bf16.mxu1 %v14957_v15 }
 0x78d   : > { %14960 = vmatpush3.bf16.msra.mxu1 %v14957_v15 }
 0x78f   : > { %v20630_v48 = vpop.eup %16261 }
 0x790   : > { %v6558_v39 = vsel %vm431_vm0, %v20630_v48, 0.0  ;;  %v16264_v42 = vpop.eup %16263 }
 0x793   : > { %5917 = vmax.xlane.f32.xlu1 %v5916_v27  ;;  %v22827_v27 = vld [vmem:[#allocation121_spill] sm:$0xff] }
 0x797   : > { %6556 = vadd.xlane.f32.xlu1 %v6555_v10 }
 0x79d   : > { %6559 = vadd.xlane.f32.xlu0 %v6558_v39  ;;  %v6035_v39 = vsub.f32 %v22828_v23, %v20082_v18  ;;  %v5438_v23 = vld [vmem:[#allocation7 + $0x390] sm:$0xff] }
 0x7a1   : > { %5926 = vmax.xlane.f32.xlu0 %v5925_v16 }
 0x7a8   : > { %15783 = vrot.lane.b32.xlu1 %v22822_v31, %s16749_s25  ;;  %v6234_v31 = vmul.f32 1.442695, %v6035_v39 }
 0x7aa   : > { %16271 = vpow2.f32 %v6234_v31  ;;  %v22834_v31 = vld [vmem:[#allocation143_spill] sm:$0xff] }
 0x7ae   : > { %v20641_v59 = vpop.xlane.xlu1 %5905 }
 0x7b0   : > { %v20643_v50 = vpop.f32.mrb[84].mxu1 }
 0x7b1   : > { %22823 = vst [vmem:[#allocation109_spill] sm:$0xff] %v20643_v50  ;;  %v20645_v25 = vpop.f32.mrb[85].mxu1  ;;  %v6909_v50 = vmul.f32 %v16264_v42, %v22832_v46  ;;  %v22838_v46 = vld [vmem:[#allocation135_spill] sm:$0xff] }
 0x7b2   : > { %22824 = vst [vmem:[#allocation52_spill] sm:$0xff] %v20645_v25  ;;  %v20647_v40 = vpop.xlane.xlu1 %6544  ;;  %v22833_v25 = vld [vmem:[#allocation115_spill] sm:$0xff] }
 0x7b4   : > { %v20649_v7 = vpop.f32.mrb[86].mxu1 }
 0x7b5   : > { %22825 = vst [vmem:[#allocation51_spill] sm:$0xff] %v20649_v7  ;;  %v20651_v15 = vpop.f32.mrb[87].mxu1 }
 0x7b6   : > { %22826 = vst [vmem:[#allocation69_spill] sm:$0xff] %v20651_v15  ;;  %v15764_v45 = vpop.permute.xlu1 %15763  ;;  %v16266_v15 = vpop.eup %16265 }
 0x7b7   : > { %v15766_v26 = vunpack.i.h.bf16 %v15764_v45  ;;  %v15765_v35 = vunpack.i.l.bf16 %v15764_v45  ;;  %15788 = vrot.lane.b32.xlu0 %v22827_v27, %s16749_s25  ;;  %v22829_v45 = vld [vmem:[#allocation56_spill] sm:$0xff]  ;;  %v16268_v56 = vpop.eup %16267 }
 0x7b8   : > { %v20655_v10 = vpop.xlane.xlu0 %6547  ;;  %v6036_v27 = vsub.f32 %v22829_v45, %v20073_v44  ;;  %v6910_v44 = vmul.f32 %v16266_v15, %v22833_v25  ;;  %v16270_v45 = vpop.eup %16269  ;;  %v5441_v15 = vld [vmem:[#allocation7 + $0x3a8] sm:$0xff] }
 0x7b9   : > { %v14965_v5 = vpack.c.bf16 %v15766_v26, %v15765_v35 }
 0x7ba   : > { %v6236_v36 = vmul.f32 1.442695, %v6036_v27  ;;  %v6911_v27 = vmul.f32 %v16268_v56, %v22834_v31 }
 0x7bb   : > { %14966 = vmatprep.subr.bf16.mxu0 %v14965_v5 }
 0x7bc   : > { %v20661_v16 = vpop.xlane.xlu0 %5914  ;;  %14968 = vmatpush3.bf16.msra.mxu0 %v14965_v5  ;;  %v22830_v5 = vld [vmem:[#allocation155_spill] sm:$0xff]  ;;  %16273 = vpow2.f32 %v6236_v36 }
 0x7bd   : > { %v20668_v39 = vadd.f32 %v5438_v23, %v22830_v5  ;;  %16275 = vrcp.f32 %v20435_v41  ;;  %v22843_v41 = vld [vmem:[#allocation112_spill] sm:$0xff] }
 0x7be   : > { %16277 = vrcp.f32 %v20385_v55 }
 0x7bf   : > { %22831 = vst [vmem:[#allocation28_spill] sm:$0xff] %v20668_v39  ;;  %16279 = vrcp.f32 %v20451_v13 }
 0x7c0   : > { %v15769_v26 = vpop.permute.xlu0 %15768  ;;  %16281 = vrcp.f32 %v20457_v30 }
 0x7c1   : > { %v15771_v35 = vunpack.i.h.bf16 %v15769_v26  ;;  %v15770_v7 = vunpack.i.l.bf16 %v15769_v26  ;;  %v20677_v26 = vpop.eup %16271 }
 0x7c2   : > { %v6561_v25 = vsel %vm431_vm0, %v20677_v26, 0.0 }
 0x7c3   : > { %v14961_v18 = vpack.c.bf16 %v15771_v35, %v15770_v7  ;;  %v5922_v7 = vsel %vm431_vm0, %v20668_v39, -inf  ;;  %v6916_v35 = vmul.f32 %v16270_v45, %v20259_v1  ;;  %v22870_v39 = vld [vmem:[#allocation98_spill] sm:$0xff] }
 0x7c5   : > { %14962 = vmatprep.subr.bf16.mxu1 %v14961_v18 }
 0x7c6   : > { %14964 = vmatpush3.bf16.msra.mxu1 %v14961_v18  ;;  %v22835_v18 = vld [vmem:[#allocation173_spill] sm:$0xff] }
 0x7c7   : > { %v20687_v42 = vadd.f32 %v22835_v18, %v5441_v15 }
 0x7c9   : > { %13998 = vmatmul.mubr.msk.f32.vlgmr.msra.gmra.mrb[92].mxu1 %vm431_vm0, %v6909_v50  ;;  %v20684_v50 = vpop.eup %16273  ;;  %v5931_v1 = vsel %vm431_vm0, %v20687_v42, -inf }
 0x7ca   : > { %14000 = vmatprep.mubr.msk.f32.mxu1 %vm431_vm0, %v6910_v44  ;;  %v6564_v23 = vsel %vm431_vm0, %v20684_v50, 0.0 }
 0x7cc   : > { %5923 = vmax.xlane.f32.xlu1 %v5922_v7 }
 0x7cd   : > { %14001 = vmatmul.mubr.msk.f32.gmra.mrb[94].mxu1 %vm431_vm0, %v6911_v27 }
 0x7ce   : > { %14025 = vmatprep.mubr.msk.f32.mxu1 %vm431_vm0, %v6916_v35 }
 0x7d0   : > { %6562 = vadd.xlane.f32.xlu1 %v6561_v25  ;;  %v22841_v25 = vld [vmem:[#allocation66_spill] sm:$0xff] }
 0x7d6   : > { %6565 = vadd.xlane.f32.xlu0 %v6564_v23  ;;  %v16276_v23 = vpop.eup %16275 }
 0x7d7   : > { %v16278_v55 = vpop.eup %16277  ;;  %v6913_v13 = vmul.f32 %v16276_v23, %v20220_v19 }
 0x7d8   : > { %v16280_v30 = vpop.eup %16279 }
 0x7da   : > { %5932 = vmax.xlane.f32.xlu0 %v5931_v1  ;;  %v22842_v1 = vld [vmem:[#allocation106_spill] sm:$0xff] }
 0x7df   : > { %v20693_v36 = vpop.f32.mrb[108].mxu0 }
 0x7e0   : > { %22836 = vst [vmem:[#allocation168_spill] sm:$0xff] %v20693_v36  ;;  %v20695_v5 = vpop.f32.mrb[109].mxu0 }
 0x7e1   : > { %22837 = vst [vmem:[#allocation150_spill] sm:$0xff] %v20695_v5  ;;  %15793 = vrot.lane.b32.xlu1 %v22838_v46, %s16749_s25  ;;  %v6037_v46 = vsub.f32 %v22843_v41, %v22842_v1  ;;  %v16282_v5 = vpop.eup %16281  ;;  %v6915_v1 = vmul.f32 %v16280_v30, %v20244_v53  ;;  %v22845_v41 = vld [vmem:[#allocation46_spill] sm:$0xff]  ;;  %v22850_v53 = vld [vmem:[#allocation119_spill] sm:$0xff] }
 0x7e2   : > { %v6920_v19 = vmul.f32 %v16282_v5, %v20267_v57  ;;  %v22851_v30 = vld [vmem:[#allocation31_spill] sm:$0xff] }
 0x7e3   : > { %v20699_v56 = vpop.f32.mrb[110].mxu0 }
 0x7e4   : > { %22839 = vst [vmem:[#allocation111_spill] sm:$0xff] %v20699_v56  ;;  %v20701_v44 = vpop.f32.mrb[111].mxu0 }
 0x7e5   : > { %22840 = vst [vmem:[#allocation50_spill] sm:$0xff] %v20701_v44  ;;  %v6238_v44 = vmul.f32 1.442695, %v6037_v46  ;;  %v5440_v46 = vld [vmem:[#allocation7 + $0x3a0] sm:$0xff] }
 0x7e7   : > { %v20703_v45 = vpop.xlane.xlu1 %5911  ;;  %16283 = vpow2.f32 %v6238_v44 }
 0x7eb   : > { %v20707_v7 = vpop.xlane.xlu1 %6550 }
 0x7ef   : > { %v15774_v31 = vpop.permute.xlu1 %15773 }
 0x7f0   : > { %v15776_v27 = vunpack.i.h.bf16 %v15774_v31  ;;  %v15775_v35 = vunpack.i.l.bf16 %v15774_v31  ;;  %15798 = vrot.lane.b32.xlu0 %v22841_v25, %s16749_s25  ;;  %v22844_v31 = vld [vmem:[#allocation142_spill] sm:$0xff] }
 0x7f1   : > { %v20713_v15 = vpop.xlane.xlu0 %6553  ;;  %v6914_v36 = vmul.f32 %v16278_v55, %v22844_v31  ;;  %v22849_v31 = vld [vmem:[#allocation116_spill] sm:$0xff]  ;;  %v20738_v5 = vpop.eup %16283 }
 0x7f2   : > { %v14969_v18 = vpack.c.bf16 %v15776_v27, %v15775_v35  ;;  %v6041_v44 = vsub.f32 %v22850_v53, %v22849_v31 }
 0x7f4   : > { %14970 = vmatprep.subr.bf16.mxu0 %v14969_v18 }
 0x7f5   : > { %v20717_v56 = vpop.xlane.xlu0 %5920  ;;  %14972 = vmatpush3.bf16.msra.mxu0 %v14969_v18  ;;  %v6038_v18 = vsub.f32 %v22846_v22, %v22845_v41 }
 0x7f7   : > { %v6240_v55 = vmul.f32 1.442695, %v6038_v18  ;;  %v22853_v18 = vld [vmem:[#allocation178_spill] sm:$0xff] }
 0x7f8   : > { %14012 = vmatmul.mubr.msk.f32.vlgmr.msra.gmra.mrb[116].mxu0 %vm431_vm0, %v6913_v13 }
 0x7f9   : > { %v15779_v25 = vpop.permute.xlu0 %15778  ;;  %14014 = vmatprep.mubr.msk.f32.mxu0 %vm431_vm0, %v6914_v36  ;;  %v22847_v36 = vld [vmem:[#allocation175_spill] sm:$0xff]  ;;  %16285 = vpow2.f32 %v6240_v55 }
 0x7fa   : > { %v15781_v27 = vunpack.i.h.bf16 %v15779_v25  ;;  %v15780_v35 = vunpack.i.l.bf16 %v15779_v25  ;;  %v20730_v13 = vadd.f32 %v5440_v46, %v22847_v36  ;;  %v22852_v25 = vld [vmem:[#allocation117_spill] sm:$0xff]  ;;  %v22855_v46 = vld [vmem:[#allocation164_spill] sm:$0xff]  ;;  %v5445_v36 = vld [vmem:[#allocation7 + $0x3c8] sm:$0xff] }
 0x7fb   : > { %v6039_v22 = vsub.f32 %v22852_v25, %v22851_v30  ;;  %v22857_v30 = vld [vmem:[#allocation162_spill] sm:$0xff] }
 0x7fc   : > { %14015 = vmatmul.mubr.msk.f32.gmra.mrb[118].mxu0 %vm431_vm0, %v6915_v1  ;;  %v14973_v23 = vpack.c.bf16 %v15781_v27, %v15780_v35  ;;  %22848 = vst [vmem:[#allocation22_spill] sm:$0xff] %v20730_v13  ;;  %v5928_v57 = vsel %vm431_vm0, %v20730_v13, -inf  ;;  %v5442_v27 = vld [vmem:[#allocation7 + $0x3b0] sm:$0xff]  ;;  %v6246_v35 = vmul.f32 1.442695, %v6041_v44  ;;  %v5444_v1 = vld [vmem:[#allocation7 + $0x3c0] sm:$0xff]  ;;  %v20753_v25 = vadd.f32 %v22857_v30, %v5445_v36 }
 0x7fd   : > { %14039 = vmatprep.mubr.msk.f32.mxu0 %vm431_vm0, %v6920_v19  ;;  %v6242_v41 = vmul.f32 1.442695, %v6039_v22  ;;  %v20741_v19 = vadd.f32 %v5442_v27, %v22853_v18  ;;  %v20746_v55 = vadd.f32 %v5444_v1, %v22855_v46  ;;  %v5443_v44 = vld [vmem:[#allocation7 + $0x3b8] sm:$0xff] }
 0x7fe   : > { %14974 = vmatprep.subr.bf16.mxu1 %v14973_v23  ;;  %16287 = vpow2.f32 %v6246_v35  ;;  %22858 = vst [vmem:[#allocation154_spill] sm:$0xff] %v20753_v25  ;;  %v5943_v1 = vsel %vm431_vm0, %v20753_v25, -inf }
 0x7ff   : > { %14976 = vmatpush3.bf16.msra.mxu1 %v14973_v23  ;;  %22854 = vst [vmem:[#allocation73_spill] sm:$0xff] %v20741_v19  ;;  %v6567_v23 = vsel %vm431_vm0, %v20738_v5, 0.0  ;;  %22856 = vst [vmem:[#allocation151_spill] sm:$0xff] %v20746_v55  ;;  %16289 = vpow2.f32 %v6242_v41  ;;  %v5934_v31 = vsel %vm431_vm0, %v20741_v19, -inf  ;;  %v5940_v22 = vsel %vm431_vm0, %v20746_v55, -inf }
 0x800   : > { %16291 = vrcp.f32 %v20464_v0 }
 0x801   : > { %16293 = vrcp.f32 %v20533_v24 }
 0x802   : > { %16295 = vrcp.f32 %v20551_v34 }
 0x803   : > { %v20750_v53 = vpop.eup %16285  ;;  %16297 = vrcp.f32 %v20605_v49  ;;  %v22871_v49 = vld [vmem:[#allocation149_spill] sm:$0xff] }
 0x804   : > { %v6570_v35 = vsel %vm431_vm0, %v20750_v53, 0.0  ;;  %v6044_v3 = vsub.f32 %v22871_v49, %v20174_v9 }
 0x805   : > { %5929 = vmax.xlane.f32.xlu1 %v5928_v57  ;;  %v22859_v57 = vld [vmem:[#allocation176_spill] sm:$0xff] }
 0x806   : > { %v20758_v27 = vadd.f32 %v22859_v57, %v5443_v44 }
 0x808   : > { %22860 = vst [vmem:[#allocation43_spill] sm:$0xff] %v20758_v27  ;;  %v20764_v41 = vpop.eup %16287  ;;  %v5937_v18 = vsel %vm431_vm0, %v20758_v27, -inf  ;;  %v22869_v27 = vld [vmem:[#allocation89_spill] sm:$0xff] }
 0x809   : > { %6568 = vadd.xlane.f32.xlu1 %v6567_v23  ;;  %v20768_v23 = vpop.eup %16289  ;;  %v6579_v46 = vsel %vm431_vm0, %v20764_v41, 0.0 }
 0x80a   : > { %v6573_v36 = vsel %vm431_vm0, %v20768_v23, 0.0  ;;  %v16292_v24 = vpop.eup %16291 }
 0x80b   : > { %v16294_v25 = vpop.eup %16293 }
 0x80d   : > { %5935 = vmax.xlane.f32.xlu1 %v5934_v31 }
 0x80f   : > { %5941 = vmax.xlane.f32.xlu0 %v5940_v22 }
 0x811   : > { %6571 = vadd.xlane.f32.xlu1 %v6570_v35 }
 0x813   : > { %5944 = vmax.xlane.f32.xlu0 %v5943_v1  ;;  %v22861_v1 = vld [vmem:[#allocation65_spill] sm:$0xff] }
 0x815   : > { %5938 = vmax.xlane.f32.xlu1 %v5937_v18 }
 0x817   : > { %6580 = vadd.xlane.f32.xlu0 %v6579_v46 }
 0x819   : > { %6574 = vadd.xlane.f32.xlu1 %v6573_v36  ;;  %v22864_v36 = vld [vmem:[#allocation77_spill] sm:$0xff] }
 0x820   : > { %v20774_v31 = vpop.xlane.xlu1 %5917 }
 0x824   : > { %v20776_v44 = vpop.xlane.xlu1 %6556 }
 0x828   : > { %v15784_v30 = vpop.permute.xlu1 %15783 }
 0x829   : > { %v15786_v22 = vunpack.i.h.bf16 %v15784_v30  ;;  %v15785_v57 = vunpack.i.l.bf16 %v15784_v30 }
 0x82a   : > { %v20778_v35 = vpop.xlane.xlu0 %6559  ;;  %15803 = vrot.lane.b32.xlu1 %v22861_v1, %s16749_s25  ;;  %v20782_v18 = vpop.f32.mrb[88].mxu1 }
 0x82b   : > { %22862 = vst [vmem:[#allocation121_spill] sm:$0xff] %v20782_v18  ;;  %v20784_v55 = vpop.f32.mrb[89].mxu1  ;;  %v14981_v46 = vpack.c.bf16 %v15786_v22, %v15785_v57  ;;  %v22867_v18 = vld [vmem:[#allocation81_spill] sm:$0xff] }
 0x82c   : > { %22863 = vst [vmem:[#allocation110_spill] sm:$0xff] %v20784_v55  ;;  %v22868_v55 = vld [vmem:[#allocation126_spill] sm:$0xff] }
 0x82d   : > { %15808 = vrot.lane.b32.xlu0 %v22864_v36, %s16749_s25  ;;  %14982 = vmatprep.subr.bf16.mxu0 %v14981_v46  ;;  %v6043_v36 = vsub.f32 %v22868_v55, %v22867_v18  ;;  %v22873_v18 = vld [vmem:[#allocation145_spill] sm:$0xff] }
 0x82e   : > { %v20790_v19 = vpop.xlane.xlu0 %5926  ;;  %v20792_v30 = vpop.f32.mrb[90].mxu1  ;;  %14984 = vmatpush3.bf16.msra.mxu0 %v14981_v46  ;;  %v6917_v46 = vmul.f32 %v16292_v24, %v20273_v47  ;;  %v22872_v47 = vld [vmem:[#allocation30_spill] sm:$0xff] }
 0x82f   : > { %22865 = vst [vmem:[#allocation56_spill] sm:$0xff] %v20792_v30  ;;  %v20794_v13 = vpop.f32.mrb[91].mxu1  ;;  %v6040_v30 = vsub.f32 %v22870_v39, %v22869_v27  ;;  %v6250_v34 = vmul.f32 1.442695, %v6043_v36  ;;  %v6252_v39 = vmul.f32 1.442695, %v6044_v3  ;;  %v6042_v9 = vsub.f32 %v22873_v18, %v22872_v47 }
 0x830   : > { %22866 = vst [vmem:[#allocation155_spill] sm:$0xff] %v20794_v13  ;;  %v16296_v13 = vpop.eup %16295  ;;  %v5447_v47 = vld [vmem:[#allocation7 + $0x3d8] sm:$0xff] }
 0x831   : > { %v6919_v55 = vmul.f32 %v16296_v13, %v20363_v32  ;;  %16299 = vpow2.f32 %v6250_v34  ;;  %v22876_v34 = vld [vmem:[#allocation169_spill] sm:$0xff] }
 0x832   : > { %v15789_v22 = vpop.permute.xlu0 %15788 }
 0x833   : > { %v15791_v57 = vunpack.i.h.bf16 %v15789_v22  ;;  %v15790_v0 = vunpack.i.l.bf16 %v15789_v22  ;;  %v6918_v22 = vmul.f32 %v16294_v25, %v20347_v62  ;;  %v22874_v62 = vld [vmem:[#allocation26_spill] sm:$0xff] }
 0x834   : > { %v22875_v25 = vld [vmem:[#allocation146_spill] sm:$0xff] }
 0x835   : > { %v14977_v1 = vpack.c.bf16 %v15791_v57, %v15790_v0  ;;  %v16298_v57 = vpop.eup %16297  ;;  %v6244_v0 = vmul.f32 1.442695, %v6040_v30  ;;  %v6248_v30 = vmul.f32 1.442695, %v6042_v9 }
 0x836   : > { %v6924_v27 = vmul.f32 %v16298_v57, %v20426_v60  ;;  %v5446_v60 = vld [vmem:[#allocation7 + $0x3d0] sm:$0xff]  ;;  %v22878_v57 = vld [vmem:[#allocation55_spill] sm:$0xff] }
 0x837   : > { %14978 = vmatprep.subr.bf16.mxu1 %v14977_v1  ;;  %16301 = vpow2.f32 %v6244_v0  ;;  %v20825_v49 = vadd.f32 %v5446_v60, %v22876_v34 }
 0x838   : > { %14980 = vmatpush3.bf16.msra.mxu1 %v14977_v1  ;;  %v6045_v1 = vsub.f32 %v22875_v25, %v22874_v62  ;;  %16303 = vpow2.f32 %v6252_v39  ;;  %v22880_v62 = vld [vmem:[#allocation167_spill] sm:$0xff] }
 0x839   : > { %16305 = vpow2.f32 %v6248_v30  ;;  %22877 = vst [vmem:[#allocation129_spill] sm:$0xff] %v20825_v49  ;;  %v5946_v39 = vsel %vm431_vm0, %v20825_v49, -inf  ;;  %v20843_v25 = vadd.f32 %v22880_v62, %v5447_v47  ;;  %v22910_v49 = vld [vmem:[#allocation84_spill] sm:$0xff] }
 0x83a   : > { %v6254_v24 = vmul.f32 1.442695, %v6045_v1 }
 0x83b   : > { %14026 = vmatmul.mubr.msk.f32.vlgmr.msra.gmra.mrb[96].mxu1 %vm431_vm0, %v6917_v46  ;;  %v20816_v36 = vpop.eup %16299  ;;  %v5449_v46 = vld [vmem:[#allocation7 + $0x3e8] sm:$0xff]  ;;  %22881 = vst [vmem:[#allocation143_spill] sm:$0xff] %v20843_v25 }
 0x83c   : > { %14028 = vmatprep.mubr.msk.f32.mxu1 %vm431_vm0, %v6918_v22  ;;  %16307 = vpow2.f32 %v6254_v24  ;;  %v6585_v3 = vsel %vm431_vm0, %v20816_v36, 0.0  ;;  %v20830_v0 = vadd.f32 %v22878_v57, %v5449_v46 }
 0x83d   : > { %16309 = vrcp.f32 %v20531_v29 }
 0x83e   : > { %22879 = vst [vmem:[#allocation115_spill] sm:$0xff] %v20830_v0  ;;  %v5955_v18 = vsel %vm431_vm0, %v20830_v0, -inf  ;;  %16311 = vrcp.f32 %v20541_v52 }
 0x83f   : > { %14029 = vmatmul.mubr.msk.f32.gmra.mrb[98].mxu1 %vm431_vm0, %v6919_v55  ;;  %16313 = vrcp.f32 %v20597_v43 }
 0x840   : > { %14053 = vmatprep.mubr.msk.f32.mxu1 %vm431_vm0, %v6924_v27  ;;  %16315 = vrcp.f32 %v20713_v15 }
 0x841   : > { %v20818_v32 = vpop.eup %16301 }
 0x842   : > { %v20822_v13 = vpop.eup %16303  ;;  %v6576_v22 = vsel %vm431_vm0, %v20818_v32, 0.0 }
 0x843   : > { %v6588_v55 = vsel %vm431_vm0, %v20822_v13, 0.0  ;;  %v20836_v27 = vpop.eup %16305 }
 0x844   : > { %v6582_v1 = vsel %vm431_vm0, %v20836_v27, 0.0 }
 0x846   : > { %v20840_v9 = vpop.eup %16307 }
 0x847   : > { %v6591_v30 = vsel %vm431_vm0, %v20840_v9, 0.0 }
 0x84c   : > { %6586 = vadd.xlane.f32.xlu0 %v6585_v3  ;;  %v5949_v3 = vsel %vm431_vm0, %v20843_v25, -inf }
 0x84e   : > { %6577 = vadd.xlane.f32.xlu1 %v6576_v22 }
 0x850   : > { %6589 = vadd.xlane.f32.xlu0 %v6588_v55 }
 0x852   : > { %5947 = vmax.xlane.f32.xlu1 %v5946_v39 }
 0x854   : > { %5956 = vmax.xlane.f32.xlu0 %v5955_v18 }
 0x856   : > { %6583 = vadd.xlane.f32.xlu1 %v6582_v1  ;;  %v16310_v1 = vpop.eup %16309 }
 0x857   : > { %v16312_v29 = vpop.eup %16311 }
 0x858   : > { %6592 = vadd.xlane.f32.xlu0 %v6591_v30  ;;  %v6921_v30 = vmul.f32 %v16310_v1, %v20337_v38  ;;  %v22888_v38 = vld [vmem:[#allocation86_spill] sm:$0xff] }
 0x859   : > { %v20849_v24 = vpop.xlane.xlu1 %5923  ;;  %v20851_v60 = vpop.f32.mrb[112].mxu0 }
 0x85a   : > { %22882 = vst [vmem:[#allocation173_spill] sm:$0xff] %v20849_v24  ;;  %22883 = vst [vmem:[#allocation135_spill] sm:$0xff] %v20851_v60  ;;  %5950 = vmax.xlane.f32.xlu1 %v5949_v3  ;;  %v20855_v46 = vpop.f32.mrb[113].mxu0  ;;  %v16314_v3 = vpop.eup %16313 }
 0x85b   : > { %22884 = vst [vmem:[#allocation66_spill] sm:$0xff] %v20855_v46  ;;  %v16316_v43 = vpop.eup %16315 }
 0x85d   : > { %v20859_v34 = vpop.xlane.xlu1 %6562  ;;  %v20861_v22 = vpop.f32.mrb[114].mxu0 }
 0x85e   : > { %22885 = vst [vmem:[#allocation106_spill] sm:$0xff] %v20861_v22  ;;  %v20863_v57 = vpop.f32.mrb[115].mxu0  ;;  %v6922_v22 = vmul.f32 %v16312_v29, %v20355_v51  ;;  %v22889_v51 = vld [vmem:[#allocation152_spill] sm:$0xff]  ;;  %v22890_v29 = vld [vmem:[#allocation29_spill] sm:$0xff] }
 0x85f   : > { %22886 = vst [vmem:[#allocation112_spill] sm:$0xff] %v20863_v57  ;;  %v6923_v57 = vmul.f32 %v16314_v3, %v20416_v37  ;;  %v6047_v1 = vsub.f32 %v22889_v51, %v20182_v54  ;;  %v22893_v3 = vld [vmem:[#allocation156_spill] sm:$0xff]  ;;  %v22896_v51 = vld [vmem:[#allocation182_spill] sm:$0xff] }
 0x861   : > { %v15794_v55 = vpop.permute.xlu1 %15793 }
 0x862   : > { %v15796_v39 = vunpack.i.h.bf16 %v15794_v55  ;;  %v15795_v47 = vunpack.i.l.bf16 %v15794_v55  ;;  %v22887_v55 = vld [vmem:[#allocation76_spill] sm:$0xff] }
 0x863   : > { %v20867_v18 = vpop.xlane.xlu0 %6565 }
 0x864   : > { %v14985_v62 = vpack.c.bf16 %v15796_v39, %v15795_v47 }
 0x866   : > { %14986 = vmatprep.subr.bf16.mxu0 %v14985_v62 }
 0x867   : > { %v20869_v52 = vpop.xlane.xlu0 %5932  ;;  %14988 = vmatpush3.bf16.msra.mxu0 %v14985_v62  ;;  %v6928_v62 = vmul.f32 %v16316_v43, %v20574_v61  ;;  %v22892_v61 = vld [vmem:[#allocation20_spill] sm:$0xff] }
 0x868   : > { %v6046_v43 = vsub.f32 %v22893_v3, %v22892_v61  ;;  %v5451_v61 = vld [vmem:[#allocation7 + $0x3f8] sm:$0xff] }
 0x869   : > { %v22899_v3 = vld [vmem:[#allocation181_spill] sm:$0xff] }
 0x86a   : > { %14040 = vmatmul.mubr.msk.f32.vlgmr.msra.gmra.mrb[120].mxu0 %vm431_vm0, %v6921_v30  ;;  %v22891_v30 = vld [vmem:[#allocation158_spill] sm:$0xff] }
 0x86b   : > { %v15799_v15 = vpop.permute.xlu0 %15798  ;;  %15813 = vrot.lane.b32.xlu1 %v22887_v55, %s16749_s25  ;;  %14042 = vmatprep.mubr.msk.f32.mxu0 %vm431_vm0, %v6922_v22  ;;  %v6258_v22 = vmul.f32 1.442695, %v6047_v1  ;;  %v6256_v55 = vmul.f32 1.442695, %v6046_v43  ;;  %v20912_v43 = vadd.f32 %v22899_v3, %v5451_v61 }
 0x86c   : > { %v15801_v39 = vunpack.i.h.bf16 %v15799_v15  ;;  %v15800_v47 = vunpack.i.l.bf16 %v15799_v15  ;;  %v6049_v15 = vsub.f32 %v22891_v30, %v22890_v29 }
 0x86d   : > { %16317 = vpow2.f32 %v6258_v22  ;;  %22900 = vst [vmem:[#allocation175_spill] sm:$0xff] %v20912_v43 }
 0x86e   : > { %v14989_v60 = vpack.c.bf16 %v15801_v39, %v15800_v47  ;;  %15818 = vrot.lane.b32.xlu0 %v22888_v38, %s16749_s25  ;;  %14043 = vmatmul.mubr.msk.f32.gmra.mrb[122].mxu0 %vm431_vm0, %v6923_v57  ;;  %v6262_v37 = vmul.f32 1.442695, %v6049_v15  ;;  %v5448_v39 = vld [vmem:[#allocation7 + $0x3e0] sm:$0xff]  ;;  %v22894_v47 = vld [vmem:[#allocation180_spill] sm:$0xff] }
 0x86f   : > { %14067 = vmatprep.mubr.msk.f32.mxu0 %vm431_vm0, %v6928_v62  ;;  %v5450_v62 = vld [vmem:[#allocation7 + $0x3f0] sm:$0xff] }
 0x870   : > { %14990 = vmatprep.subr.bf16.mxu1 %v14989_v60  ;;  %16319 = vpow2.f32 %v6262_v37  ;;  %v20899_v1 = vadd.f32 %v5450_v62, %v22896_v51  ;;  %v5961_v62 = vsel %vm431_vm0, %v20912_v43, -inf }
 0x871   : > { %14992 = vmatpush3.bf16.msra.mxu1 %v14989_v60  ;;  %16321 = vpow2.f32 %v6256_v55  ;;  %v20892_v60 = vadd.f32 %v5448_v39, %v22894_v47 }
 0x872   : > { %22897 = vst [vmem:[#allocation46_spill] sm:$0xff] %v20899_v1  ;;  %v5958_v15 = vsel %vm431_vm0, %v20899_v1, -inf  ;;  %16323 = vrcp.f32 %v20647_v40 }
 0x873   : > { %22895 = vst [vmem:[#allocation142_spill] sm:$0xff] %v20892_v60  ;;  %v5952_v22 = vsel %vm431_vm0, %v20892_v60, -inf  ;;  %16325 = vrcp.f32 %v20655_v10 }
 0x874   : > { %16327 = vrcp.f32 %v20707_v7  ;;  %v22912_v7 = vld [vmem:[#allocation153_spill] sm:$0xff] }
 0x875   : > { %16329 = vrcp.f32 %v20867_v18 }
 0x877   : > { %v20889_v57 = vpop.eup %16317 }
 0x878   : > { %v6597_v54 = vsel %vm431_vm0, %v20889_v57, 0.0 }
 0x87a   : > { %v20896_v38 = vpop.eup %16319 }
 0x87b   : > { %v6603_v29 = vsel %vm431_vm0, %v20896_v38, 0.0  ;;  %v20909_v37 = vpop.eup %16321 }
 0x87c   : > { %v6594_v39 = vsel %vm431_vm0, %v20909_v37, 0.0 }
 0x88d   : > { %6598 = vadd.xlane.f32.xlu0 %v6597_v54 }
 0x88f   : > { %5953 = vmax.xlane.f32.xlu1 %v5952_v22 }
 0x891   : > { %6604 = vadd.xlane.f32.xlu0 %v6603_v29 }
 0x892   : > { %v20905_v30 = vpop.xlane.xlu1 %5929 }
 0x893   : > { %22898 = vst [vmem:[#allocation59_spill] sm:$0xff] %v20905_v30  ;;  %5959 = vmax.xlane.f32.xlu1 %v5958_v15 }
 0x896   : > { %v20914_v55 = vpop.xlane.xlu1 %6568 }
 0x897   : > { %6595 = vadd.xlane.f32.xlu1 %v6594_v39 }
 0x89a   : > { %v20918_v47 = vpop.xlane.xlu1 %5935 }
 0x89b   : > { %22901 = vst [vmem:[#allocation116_spill] sm:$0xff] %v20918_v47  ;;  %5962 = vmax.xlane.f32.xlu1 %v5961_v62 }
 0x89c   : > { %v20922_v54 = vpop.xlane.xlu0 %5941  ;;  %v20924_v51 = vpop.f32.mrb[92].mxu1 }
 0x89d   : > { %22902 = vst [vmem:[#allocation119_spill] sm:$0xff] %v20922_v54  ;;  %22903 = vst [vmem:[#allocation31_spill] sm:$0xff] %v20924_v51  ;;  %v20926_v22 = vpop.f32.mrb[93].mxu1  ;;  %v22909_v51 = vld [vmem:[#allocation95_spill] sm:$0xff]  ;;  %v16324_v54 = vpop.eup %16323 }
 0x89e   : > { %22904 = vst [vmem:[#allocation117_spill] sm:$0xff] %v20926_v22  ;;  %v20928_v29 = vpop.xlane.xlu1 %6571  ;;  %v16326_v0 = vpop.eup %16325  ;;  %v6925_v18 = vmul.f32 %v16324_v54, %v20500_v8 }
 0x8a0   : > { %v20930_v15 = vpop.xlane.xlu0 %5944  ;;  %v20932_v61 = vpop.f32.mrb[94].mxu1 }
 0x8a1   : > { %22905 = vst [vmem:[#allocation178_spill] sm:$0xff] %v20930_v15  ;;  %22906 = vst [vmem:[#allocation164_spill] sm:$0xff] %v20932_v61  ;;  %v20934_v3 = vpop.f32.mrb[95].mxu1  ;;  %v22930_v15 = vld [vmem:[#allocation124_spill] sm:$0xff] }
 0x8a2   : > { %22907 = vst [vmem:[#allocation162_spill] sm:$0xff] %v20934_v3  ;;  %v20936_v39 = vpop.xlane.xlu1 %5938 }
 0x8a3   : > { %22908 = vst [vmem:[#allocation176_spill] sm:$0xff] %v20936_v39 }
 0x8a4   : > { %v20939_v46 = vpop.xlane.xlu0 %6580 }
 0x8a6   : > { %v20942_v62 = vpop.xlane.xlu1 %6574 }
 0x8a7   : > { %15828 = vrot.lane.b32.xlu0 %v22909_v51, %s16749_s25  ;;  %v22911_v51 = vld [vmem:[#allocation23_spill] sm:$0xff] }
 0x8a8   : > { %v15809_v22 = vpop.permute.xlu0 %15808  ;;  %v6051_v25 = vsub.f32 %v22912_v7, %v22911_v51 }
 0x8a9   : > { %v15811_v61 = vunpack.i.h.bf16 %v15809_v22  ;;  %v15810_v3 = vunpack.i.l.bf16 %v15809_v22  ;;  %v16328_v22 = vpop.eup %16327 }
 0x8aa   : > { %v15804_v1 = vpop.permute.xlu1 %15803 }
 0x8ab   : > { %v14997_v60 = vpack.c.bf16 %v15811_v61, %v15810_v3  ;;  %v15806_v43 = vunpack.i.h.bf16 %v15804_v1  ;;  %v15805_v40 = vunpack.i.l.bf16 %v15804_v1  ;;  %v6926_v61 = vmul.f32 %v16326_v0, %v20508_v17  ;;  %v16330_v3 = vpop.eup %16329  ;;  %v22915_v17 = vld [vmem:[#allocation64_spill] sm:$0xff] }
 0x8ac   : > { %15823 = vrot.lane.b32.xlu1 %v22910_v49, %s16749_s25  ;;  %v6266_v1 = vmul.f32 1.442695, %v6051_v25  ;;  %v22913_v49 = vld [vmem:[#allocation139_spill] sm:$0xff]  ;;  %v6932_v47 = vmul.f32 %v16330_v3, %v20684_v50  ;;  %v22916_v0 = vld [vmem:[#allocation160_spill] sm:$0xff] }
 0x8ad   : > { %v14993_v10 = vpack.c.bf16 %v15806_v43, %v15805_v40  ;;  %14998 = vmatprep.subr.bf16.mxu0 %v14997_v60  ;;  %v22914_v43 = vld [vmem:[#allocation172_spill] sm:$0xff]  ;;  %v6048_v54 = vsub.f32 %v22916_v0, %v22915_v17  ;;  %v22917_v25 = vld [vmem:[#allocation83_spill] sm:$0xff] }
 0x8ae   : > { %15000 = vmatpush3.bf16.msra.mxu0 %v14997_v60  ;;  %v6053_v40 = vsub.f32 %v22914_v43, %v22913_v49  ;;  %v6927_v60 = vmul.f32 %v16328_v22, %v20567_v6  ;;  %16331 = vpow2.f32 %v6266_v1 }
 0x8af   : > { %14994 = vmatprep.subr.bf16.mxu1 %v14993_v10  ;;  %v6260_v7 = vmul.f32 1.442695, %v6048_v54 }
 0x8b0   : > { %14996 = vmatpush3.bf16.msra.mxu1 %v14993_v10  ;;  %v6270_v8 = vmul.f32 1.442695, %v6053_v40  ;;  %v22918_v10 = vld [vmem:[#allocation157_spill] sm:$0xff] }
 0x8b1   : > { %v6050_v51 = vsub.f32 %v22918_v10, %v22917_v25  ;;  %v22924_v10 = vld [vmem:[#allocation103_spill] sm:$0xff] }
 0x8b2   : > { %16333 = vpow2.f32 %v6270_v8 }
 0x8b3   : > { %14054 = vmatmul.mubr.msk.f32.vlgmr.msra.gmra.mrb[100].mxu1 %vm431_vm0, %v6925_v18  ;;  %16335 = vpow2.f32 %v6260_v7 }
 0x8b4   : > { %14056 = vmatprep.mubr.msk.f32.mxu1 %vm431_vm0, %v6926_v61  ;;  %v6264_v61 = vmul.f32 1.442695, %v6050_v51 }
 0x8b6   : > { %16337 = vpow2.f32 %v6264_v61 }
 0x8b7   : > { %14057 = vmatmul.mubr.msk.f32.gmra.mrb[102].mxu1 %vm431_vm0, %v6927_v60  ;;  %16339 = vrcp.f32 %v20776_v44 }
 0x8b8   : > { %14081 = vmatprep.mubr.msk.f32.mxu1 %vm431_vm0, %v6932_v47  ;;  %v20966_v18 = vpop.eup %16331  ;;  %16341 = vrcp.f32 %v20778_v35 }
 0x8b9   : > { %v6609_v6 = vsel %vm431_vm0, %v20966_v18, 0.0  ;;  %16343 = vrcp.f32 %v20859_v34 }
 0x8bc   : > { %v20970_v50 = vpop.eup %16333 }
 0x8bd   : > { %v6615_v47 = vsel %vm431_vm0, %v20970_v50, 0.0  ;;  %v20976_v3 = vpop.eup %16335 }
 0x8be   : > { %v6600_v43 = vsel %vm431_vm0, %v20976_v3, 0.0 }
 0x8c0   : > { %v20984_v40 = vpop.eup %16337 }
 0x8c1   : > { %v6606_v8 = vsel %vm431_vm0, %v20984_v40, 0.0 }
 0x8c6   : > { %6610 = vadd.xlane.f32.xlu0 %v6609_v6  ;;  %v22926_v6 = vld [vmem:[#allocation40_spill] sm:$0xff] }
 0x8ca   : > { %6616 = vadd.xlane.f32.xlu0 %v6615_v47 }
 0x8cb   : > { %v20974_v22 = vpop.f32.mrb[116].mxu0 }
 0x8cc   : > { %22919 = vst [vmem:[#allocation65_spill] sm:$0xff] %v20974_v22  ;;  %v20978_v1 = vpop.f32.mrb[117].mxu0 }
 0x8cd   : > { %22920 = vst [vmem:[#allocation77_spill] sm:$0xff] %v20978_v1 }
 0x8cf   : > { %v20980_v49 = vpop.f32.mrb[118].mxu0 }
 0x8d0   : > { %22921 = vst [vmem:[#allocation81_spill] sm:$0xff] %v20980_v49  ;;  %6601 = vadd.xlane.f32.xlu1 %v6600_v43  ;;  %v20986_v60 = vpop.f32.mrb[119].mxu0  ;;  %v22928_v43 = vld [vmem:[#allocation85_spill] sm:$0xff] }
 0x8d1   : > { %22922 = vst [vmem:[#allocation126_spill] sm:$0xff] %v20986_v60 }
 0x8d4   : > { %6607 = vadd.xlane.f32.xlu1 %v6606_v8  ;;  %v22929_v8 = vld [vmem:[#allocation177_spill] sm:$0xff] }
 0x8d5   : > { %v6055_v49 = vsub.f32 %v22929_v8, %v22928_v43  ;;  %v22932_v8 = vld [vmem:[#allocation91_spill] sm:$0xff] }
 0x8d7   : > { %v6274_v30 = vmul.f32 1.442695, %v6055_v49 }
 0x8d9   : > { %v20990_v17 = vpop.xlane.xlu0 %6586 }
 0x8db   : > { %v6578_v0 = vpop.xlane.xlu1 %6577 }
 0x8dc   : > { %16345 = vrcp.f32 %v6578_v0 }
 0x8dd   : > { %v20992_v54 = vpop.xlane.xlu0 %6589  ;;  %16347 = vpow2.f32 %v6274_v30  ;;  %v22934_v30 = vld [vmem:[#allocation34_spill] sm:$0xff] }
 0x8df   : > { %v20994_v25 = vpop.xlane.xlu1 %5947 }
 0x8e0   : > { %22923 = vst [vmem:[#allocation89_spill] sm:$0xff] %v20994_v25  ;;  %15838 = vrot.lane.b32.xlu0 %v22924_v10, %s16749_s25 }
 0x8e1   : > { %v20998_v51 = vpop.xlane.xlu0 %5956 }
 0x8e2   : > { %22925 = vst [vmem:[#allocation98_spill] sm:$0xff] %v20998_v51 }
 0x8e3   : > { %v21000_v7 = vpop.xlane.xlu1 %6583 }
 0x8e5   : > { %v21003_v61 = vpop.xlane.xlu0 %6592  ;;  %15833 = vrot.lane.b32.xlu1 %v22926_v6, %s16749_s25  ;;  %v22931_v6 = vld [vmem:[#allocation35_spill] sm:$0xff] }
 0x8e6   : > { %v6057_v39 = vsub.f32 %v22931_v6, %v22930_v15 }
 0x8e7   : > { %v21008_v47 = vpop.xlane.xlu1 %5950 }
 0x8e8   : > { %22927 = vst [vmem:[#allocation149_spill] sm:$0xff] %v21008_v47  ;;  %v16340_v47 = vpop.eup %16339  ;;  %v6278_v34 = vmul.f32 1.442695, %v6057_v39  ;;  %v22935_v39 = vld [vmem:[#allocation63_spill] sm:$0xff] }
 0x8e9   : > { %v15819_v10 = vpop.permute.xlu0 %15818  ;;  %v16342_v24 = vpop.eup %16341  ;;  %v6929_v0 = vmul.f32 %v16340_v47, %v20626_v28 }
 0x8ea   : > { %v15821_v60 = vunpack.i.h.bf16 %v15819_v10  ;;  %v15820_v22 = vunpack.i.l.bf16 %v15819_v10  ;;  %v16344_v43 = vpop.eup %16343  ;;  %16349 = vpow2.f32 %v6278_v34 }
 0x8eb   : > { %v15814_v1 = vpop.permute.xlu1 %15813  ;;  %v16346_v49 = vpop.eup %16345  ;;  %v6931_v15 = vmul.f32 %v16344_v43, %v20677_v26 }
 0x8ec   : > { %v15005_v44 = vpack.c.bf16 %v15821_v60, %v15820_v22  ;;  %v15816_v25 = vunpack.i.h.bf16 %v15814_v1  ;;  %v15815_v51 = vunpack.i.l.bf16 %v15814_v1  ;;  %v22933_v22 = vld [vmem:[#allocation174_spill] sm:$0xff]  ;;  %v6930_v1 = vmul.f32 %v16342_v24, %v20630_v48  ;;  %v21027_v47 = vpop.eup %16347 }
 0x8ed   : > { %v6052_v60 = vsub.f32 %v22933_v22, %v22932_v8  ;;  %v6936_v28 = vmul.f32 %v16346_v49, %v20818_v32  ;;  %v6621_v24 = vsel %vm431_vm0, %v21027_v47, 0.0  ;;  %v22940_v22 = vld [vmem:[#allocation113_spill] sm:$0xff] }
 0x8ee   : > { %v15001_v35 = vpack.c.bf16 %v15816_v25, %v15815_v51  ;;  %15006 = vmatprep.subr.bf16.mxu1 %v15005_v44  ;;  %v6054_v51 = vsub.f32 %v22935_v39, %v22934_v30  ;;  %v22944_v30 = vld [vmem:[#allocation25_spill] sm:$0xff]  ;;  %v22945_v39 = vld [vmem:[#allocation38_spill] sm:$0xff] }
 0x8ef   : > { %15008 = vmatpush3.bf16.msra.mxu1 %v15005_v44  ;;  %v6268_v25 = vmul.f32 1.442695, %v6052_v60 }
 0x8f0   : > { %15002 = vmatprep.subr.bf16.mxu0 %v15001_v35  ;;  %v6272_v48 = vmul.f32 1.442695, %v6054_v51  ;;  %v6059_v51 = vsub.f32 %v22945_v39, %v22944_v30  ;;  %v22948_v39 = vld [vmem:[#allocation48_spill] sm:$0xff] }
 0x8f1   : > { %15004 = vmatpush3.bf16.msra.mxu0 %v15001_v35  ;;  %16351 = vpow2.f32 %v6268_v25 }
 0x8f2   : > { %16353 = vpow2.f32 %v6272_v48 }
 0x8f3   : > { %16355 = vrcp.f32 %v20914_v55 }
 0x8f4   : > { %14068 = vmatmul.mubr.msk.f32.vlgmr.msra.gmra.mrb[124].mxu0 %vm431_vm0, %v6929_v0  ;;  %v21031_v10 = vpop.eup %16349  ;;  %16357 = vrcp.f32 %v20928_v29 }
 0x8f5   : > { %14070 = vmatprep.mubr.msk.f32.mxu0 %vm431_vm0, %v6930_v1  ;;  %v6627_v26 = vsel %vm431_vm0, %v21031_v10, 0.0 }
 0x8f8   : > { %14071 = vmatmul.mubr.msk.f32.gmra.mrb[126].mxu0 %vm431_vm0, %v6931_v15  ;;  %v22942_v15 = vld [vmem:[#allocation104_spill] sm:$0xff] }
 0x8f9   : > { %14095 = vmatprep.mubr.msk.f32.mxu0 %vm431_vm0, %v6936_v28 }
 0x8fb   : > { %v21035_v32 = vpop.eup %16351 }
 0x8fc   : > { %v6612_v44 = vsel %vm431_vm0, %v21035_v32, 0.0  ;;  %v21039_v6 = vpop.eup %16353 }
 0x8fd   : > { %v6618_v35 = vsel %vm431_vm0, %v21039_v6, 0.0 }
 0x8ff   : > { %6622 = vadd.xlane.f32.xlu0 %v6621_v24 }
 0x903   : > { %6628 = vadd.xlane.f32.xlu0 %v6627_v26 }
 0x909   : > { %6613 = vadd.xlane.f32.xlu1 %v6612_v44  ;;  %v6282_v44 = vmul.f32 1.442695, %v6059_v51  ;;  %v22949_v51 = vld [vmem:[#allocation179_spill] sm:$0xff] }
 0x90b   : > { %16359 = vpow2.f32 %v6282_v44 }
 0x90c   : > { %16361 = vrcp.f32 %v20942_v62 }
 0x90d   : > { %6619 = vadd.xlane.f32.xlu1 %v6618_v35  ;;  %16363 = vrcp.f32 %v20992_v54 }
 0x90e   : > { %v21043_v34 = vpop.f32.mrb[96].mxu1 }
 0x90f   : > { %22936 = vst [vmem:[#allocation30_spill] sm:$0xff] %v21043_v34  ;;  %v21045_v0 = vpop.f32.mrb[97].mxu1  ;;  %v22950_v34 = vld [vmem:[#allocation102_spill] sm:$0xff] }
 0x910   : > { %22937 = vst [vmem:[#allocation145_spill] sm:$0xff] %v21045_v0  ;;  %v22951_v0 = vld [vmem:[#allocation21_spill] sm:$0xff] }
 0x912   : > { %v21047_v43 = vpop.f32.mrb[98].mxu1 }
 0x913   : > { %22938 = vst [vmem:[#allocation26_spill] sm:$0xff] %v21047_v43  ;;  %v21049_v8 = vpop.f32.mrb[99].mxu1  ;;  %v22947_v43 = vld [vmem:[#allocation71_spill] sm:$0xff] }
 0x914   : > { %22939 = vst [vmem:[#allocation146_spill] sm:$0xff] %v21049_v8 }
 0x919   : > { %15848 = vrot.lane.b32.xlu0 %v22940_v22, %s16749_s25  ;;  %v22946_v22 = vld [vmem:[#allocation75_spill] sm:$0xff] }
 0x91a   : > { %v21053_v60 = vpop.xlane.xlu0 %6598  ;;  %v6061_v8 = vsub.f32 %v22947_v43, %v22946_v22  ;;  %v16356_v22 = vpop.eup %16355 }
 0x91b   : > { %v6933_v62 = vmul.f32 %v16356_v22, %v20738_v5  ;;  %v22956_v22 = vld [vmem:[#allocation118_spill] sm:$0xff] }
 0x91c   : > { %v21055_v1 = vpop.xlane.xlu1 %5953  ;;  %v6286_v30 = vmul.f32 1.442695, %v6061_v8 }
 0x91d   : > { %22941 = vst [vmem:[#allocation169_spill] sm:$0xff] %v21055_v1 }
 0x91e   : > { %v21057_v49 = vpop.xlane.xlu0 %6604  ;;  %15843 = vrot.lane.b32.xlu1 %v22942_v15, %s16749_s25  ;;  %16365 = vpow2.f32 %v6286_v30 }
 0x920   : > { %v21061_v25 = vpop.xlane.xlu1 %5959 }
 0x921   : > { %22943 = vst [vmem:[#allocation55_spill] sm:$0xff] %v21061_v25  ;;  %v6058_v25 = vsub.f32 %v22951_v0, %v22950_v34 }
 0x922   : > { %v15829_v28 = vpop.permute.xlu0 %15828 }
 0x923   : > { %v15831_v48 = vunpack.i.h.bf16 %v15829_v28  ;;  %v15830_v24 = vunpack.i.l.bf16 %v15829_v28  ;;  %v6056_v28 = vsub.f32 %v22949_v51, %v22948_v39  ;;  %v6280_v44 = vmul.f32 1.442695, %v6058_v25 }
 0x924   : > { %v21065_v26 = vpop.xlane.xlu1 %6595 }
 0x925   : > { %v15013_v35 = vpack.c.bf16 %v15831_v48, %v15830_v24  ;;  %v6276_v29 = vmul.f32 1.442695, %v6056_v28 }
 0x927   : > { %15014 = vmatprep.subr.bf16.mxu0 %v15013_v35  ;;  %16367 = vpow2.f32 %v6276_v29 }
 0x928   : > { %v21071_v15 = vpop.xlane.xlu1 %5962  ;;  %15016 = vmatpush3.bf16.msra.mxu0 %v15013_v35  ;;  %v16358_v35 = vpop.eup %16357  ;;  %16369 = vpow2.f32 %v6280_v44  ;;  %v22959_v44 = vld [vmem:[#allocation108_spill] sm:$0xff] }
 0x929   : > { %v21079_v8 = vpop.eup %16359  ;;  %v6934_v39 = vmul.f32 %v16358_v35, %v20750_v53  ;;  %16371 = vrcp.f32 %v20939_v46 }
 0x92a   : > { %v16362_v54 = vpop.eup %16361  ;;  %v6633_v34 = vsel %vm431_vm0, %v21079_v8, 0.0  ;;  %16373 = vrcp.f32 %v21000_v7  ;;  %v22964_v7 = vld [vmem:[#allocation128_spill] sm:$0xff] }
 0x92b   : > { %v16364_v51 = vpop.eup %16363  ;;  %v6935_v0 = vmul.f32 %v16362_v54, %v20768_v23  ;;  %v22958_v54 = vld [vmem:[#allocation39_spill] sm:$0xff] }
 0x92c   : > { %v15824_v48 = vpop.permute.xlu1 %15823  ;;  %v21088_v30 = vpop.eup %16365  ;;  %v6940_v5 = vmul.f32 %v16364_v51, %v20822_v13 }
 0x92d   : > { %v15826_v24 = vunpack.i.h.bf16 %v15824_v48  ;;  %v15825_v43 = vunpack.i.l.bf16 %v15824_v48  ;;  %v6639_v53 = vsel %vm431_vm0, %v21088_v30, 0.0 }
 0x92f   : > { %v15009_v55 = vpack.c.bf16 %v15826_v24, %v15825_v43 }
 0x931   : > { %15010 = vmatprep.subr.bf16.mxu1 %v15009_v55  ;;  %v21097_v28 = vpop.eup %16367 }
 0x932   : > { %15012 = vmatpush3.bf16.msra.mxu1 %v15009_v55  ;;  %v6624_v24 = vsel %vm431_vm0, %v21097_v28, 0.0  ;;  %v21105_v13 = vpop.eup %16369 }
 0x933   : > { %v6630_v55 = vsel %vm431_vm0, %v21105_v13, 0.0  ;;  %v16372_v46 = vpop.eup %16371 }
 0x934   : > { %v16374_v1 = vpop.eup %16373 }
 0x935   : > { %14082 = vmatmul.mubr.msk.f32.vlgmr.msra.gmra.mrb[104].mxu1 %vm431_vm0, %v6933_v62  ;;  %v22957_v62 = vld [vmem:[#allocation27_spill] sm:$0xff] }
 0x936   : > { %14084 = vmatprep.mubr.msk.f32.mxu1 %vm431_vm0, %v6934_v39  ;;  %v6063_v39 = vsub.f32 %v22959_v44, %v22958_v54  ;;  %v22962_v54 = vld [vmem:[#allocation147_spill] sm:$0xff]  ;;  %v22963_v44 = vld [vmem:[#allocation53_spill] sm:$0xff] }
 0x938   : > { %6634 = vadd.xlane.f32.xlu0 %v6633_v34 }
 0x939   : > { %14085 = vmatmul.mubr.msk.f32.gmra.mrb[106].mxu1 %vm431_vm0, %v6935_v0 }
 0x93a   : > { %14109 = vmatprep.mubr.msk.f32.mxu1 %vm431_vm0, %v6940_v5 }
 0x93c   : > { %6640 = vadd.xlane.f32.xlu0 %v6639_v53  ;;  %v6290_v53 = vmul.f32 1.442695, %v6063_v39  ;;  %v6060_v39 = vsub.f32 %v22963_v44, %v22962_v54 }
 0x93d   : > { %v21095_v25 = vpop.f32.mrb[120].mxu0 }
 0x93e   : > { %22952 = vst [vmem:[#allocation167_spill] sm:$0xff] %v21095_v25  ;;  %v21099_v48 = vpop.f32.mrb[121].mxu0  ;;  %v22961_v25 = vld [vmem:[#allocation58_spill] sm:$0xff]  ;;  %16375 = vpow2.f32 %v6290_v53 }
 0x93f   : > { %22953 = vst [vmem:[#allocation76_spill] sm:$0xff] %v21099_v48  ;;  %16377 = vrcp.f32 %v20990_v17  ;;  %v6937_v17 = vmul.f32 %v16372_v46, %v20764_v41 }
 0x941   : > { %v21101_v23 = vpop.f32.mrb[122].mxu0 }
 0x942   : > { %22954 = vst [vmem:[#allocation86_spill] sm:$0xff] %v21101_v23  ;;  %6625 = vadd.xlane.f32.xlu1 %v6624_v24  ;;  %v21107_v43 = vpop.f32.mrb[123].mxu0  ;;  %v22965_v23 = vld [vmem:[#allocation138_spill] sm:$0xff] }
 0x943   : > { %22955 = vst [vmem:[#allocation152_spill] sm:$0xff] %v21107_v43  ;;  %v6062_v43 = vsub.f32 %v22965_v23, %v22964_v7  ;;  %v22968_v7 = vld [vmem:[#allocation122_spill] sm:$0xff] }
 0x945   : > { %v6288_v53 = vmul.f32 1.442695, %v6062_v43 }
 0x946   : > { %6631 = vadd.xlane.f32.xlu1 %v6630_v55  ;;  %v22960_v55 = vld [vmem:[#allocation57_spill] sm:$0xff] }
 0x947   : > { %v6065_v48 = vsub.f32 %v22961_v25, %v22960_v55  ;;  %v6284_v55 = vmul.f32 1.442695, %v6060_v39 }
 0x952   : > { %15858 = vrot.lane.b32.xlu0 %v22956_v22, %s16749_s25 }
 0x953   : > { %v21113_v29 = vpop.xlane.xlu0 %6610 }
 0x957   : > { %v21115_v35 = vpop.xlane.xlu0 %6616  ;;  %15853 = vrot.lane.b32.xlu1 %v22957_v62, %s16749_s25  ;;  %v6294_v62 = vmul.f32 1.442695, %v6065_v48  ;;  %v21132_v48 = vpop.eup %16375 }
 0x958   : > { %v6645_v23 = vsel %vm431_vm0, %v21132_v48, 0.0 }
 0x95b   : > { %v15839_v51 = vpop.permute.xlu0 %15838 }
 0x95c   : > { %v15841_v34 = vunpack.i.h.bf16 %v15839_v51  ;;  %v15840_v0 = vunpack.i.l.bf16 %v15839_v51 }
 0x95d   : > { %v6602_v5 = vpop.xlane.xlu1 %6601 }
 0x95e   : > { %v15021_v24 = vpack.c.bf16 %v15841_v34, %v15840_v0  ;;  %16379 = vrcp.f32 %v6602_v5  ;;  %v16378_v5 = vpop.eup %16377 }
 0x95f   : > { %16381 = vpow2.f32 %v6294_v62  ;;  %v6939_v62 = vmul.f32 %v16378_v5, %v20816_v36 }
 0x960   : > { %15022 = vmatprep.subr.bf16.mxu1 %v15021_v24  ;;  %16383 = vpow2.f32 %v6284_v55 }
 0x961   : > { %v21125_v22 = vpop.xlane.xlu1 %6607  ;;  %15024 = vmatpush3.bf16.msra.mxu1 %v15021_v24  ;;  %v6938_v24 = vmul.f32 %v16374_v1, %v20836_v27  ;;  %16385 = vpow2.f32 %v6288_v53 }
 0x962   : > { %16387 = vrcp.f32 %v21003_v61 }
 0x963   : > { %16389 = vrcp.f32 %v21065_v26  ;;  %v22973_v26 = vld [vmem:[#allocation72_spill] sm:$0xff] }
 0x965   : > { %v15834_v51 = vpop.permute.xlu1 %15833 }
 0x966   : > { %v15836_v34 = vunpack.i.h.bf16 %v15834_v51  ;;  %v15835_v0 = vunpack.i.l.bf16 %v15834_v51 }
 0x968   : > { %v15017_v25 = vpack.c.bf16 %v15836_v34, %v15835_v0  ;;  %v16380_v54 = vpop.eup %16379  ;;  %v22967_v0 = vld [vmem:[#allocation130_spill] sm:$0xff] }
 0x969   : > { %v21141_v44 = vpop.eup %16381  ;;  %v6944_v41 = vmul.f32 %v16380_v54, %v20976_v3 }
 0x96a   : > { %15018 = vmatprep.subr.bf16.mxu0 %v15017_v25  ;;  %v6651_v27 = vsel %vm431_vm0, %v21141_v44, 0.0  ;;  %v21148_v1 = vpop.eup %16383 }
 0x96b   : > { %15020 = vmatpush3.bf16.msra.mxu0 %v15017_v25  ;;  %v6636_v43 = vsel %vm431_vm0, %v21148_v1, 0.0  ;;  %v21152_v36 = vpop.eup %16385 }
 0x96c   : > { %v6642_v39 = vsel %vm431_vm0, %v21152_v36, 0.0  ;;  %v16388_v61 = vpop.eup %16387 }
 0x96e   : > { %14096 = vmatmul.mubr.msk.f32.vlgmr.msra.gmra.mrb[128].mxu0 %vm431_vm0, %v6937_v17  ;;  %v22969_v17 = vld [vmem:[#allocation114_spill] sm:$0xff] }
 0x96f   : > { %14098 = vmatprep.mubr.msk.f32.mxu0 %vm431_vm0, %v6938_v24  ;;  %v6067_v5 = vsub.f32 %v22969_v17, %v20445_v58  ;;  %v22971_v58 = vld [vmem:[#allocation141_spill] sm:$0xff] }
 0x971   : > { %6646 = vadd.xlane.f32.xlu0 %v6645_v23 }
 0x972   : > { %14099 = vmatmul.mubr.msk.f32.gmra.mrb[130].mxu0 %vm431_vm0, %v6939_v62  ;;  %v6298_v62 = vmul.f32 1.442695, %v6067_v5 }
 0x973   : > { %14123 = vmatprep.mubr.msk.f32.mxu0 %vm431_vm0, %v6944_v41 }
 0x974   : > { %16391 = vpow2.f32 %v6298_v62 }
 0x975   : > { %6652 = vadd.xlane.f32.xlu0 %v6651_v27  ;;  %v22970_v27 = vld [vmem:[#allocation100_spill] sm:$0xff]  ;;  %16393 = vrcp.f32 %v21053_v60  ;;  %v6941_v60 = vmul.f32 %v16388_v61, %v20840_v9 }
 0x97b   : > { %6637 = vadd.xlane.f32.xlu1 %v6636_v43  ;;  %v6069_v43 = vsub.f32 %v22970_v27, %v20529_v12  ;;  %v6066_v27 = vsub.f32 %v22973_v26, %v20439_v33 }
 0x97f   : > { %6643 = vadd.xlane.f32.xlu1 %v6642_v39 }
 0x986   : > { %v21156_v3 = vpop.f32.mrb[100].mxu1 }
 0x987   : > { %v21158_v51 = vpop.f32.mrb[101].mxu1 }
 0x98a   : > { %v21160_v34 = vpop.f32.mrb[102].mxu1 }
 0x98b   : > { %22966 = vst [vmem:[#allocation29_spill] sm:$0xff] %v21160_v34  ;;  %15868 = vrot.lane.b32.xlu0 %v22967_v0, %s16749_s25  ;;  %v21164_v25 = vpop.f32.mrb[103].mxu1  ;;  %v6302_v0 = vmul.f32 1.442695, %v6069_v43  ;;  %v16390_v34 = vpop.eup %16389 }
 0x98c   : > { %v21166_v46 = vpop.xlane.xlu0 %6622  ;;  %v21185_v62 = vpop.eup %16391  ;;  %v6942_v43 = vmul.f32 %v16390_v34, %v20909_v37 }
 0x98d   : > { %v6657_v33 = vsel %vm431_vm0, %v21185_v62, 0.0 }
 0x990   : > { %v21168_v55 = vpop.xlane.xlu0 %6628  ;;  %15863 = vrot.lane.b32.xlu1 %v22968_v7, %s16749_s25  ;;  %v22972_v7 = vld [vmem:[#allocation61_spill] sm:$0xff] }
 0x991   : > { %v6064_v17 = vsub.f32 %v22972_v7, %v22971_v58 }
 0x994   : > { %v15849_v53 = vpop.permute.xlu0 %15848 }
 0x995   : > { %v15851_v24 = vunpack.i.h.bf16 %v15849_v53  ;;  %v15850_v54 = vunpack.i.l.bf16 %v15849_v53 }
 0x996   : > { %v6614_v23 = vpop.xlane.xlu1 %6613 }
 0x997   : > { %v15029_v41 = vpack.c.bf16 %v15851_v24, %v15850_v54  ;;  %16395 = vrcp.f32 %v6614_v23  ;;  %v6292_v54 = vmul.f32 1.442695, %v6064_v17  ;;  %v16394_v23 = vpop.eup %16393 }
 0x998   : > { %16397 = vpow2.f32 %v6302_v0  ;;  %v6943_v0 = vmul.f32 %v16394_v23, %v20889_v57 }
 0x999   : > { %15030 = vmatprep.subr.bf16.mxu0 %v15029_v41  ;;  %16399 = vpow2.f32 %v6292_v54  ;;  %v22975_v54 = vld [vmem:[#allocation136_spill] sm:$0xff] }
 0x99a   : > { %v21178_v39 = vpop.xlane.xlu1 %6619  ;;  %15032 = vmatpush3.bf16.msra.mxu0 %v15029_v41  ;;  %v6296_v41 = vmul.f32 1.442695, %v6066_v27  ;;  %v6071_v27 = vsub.f32 %v20410_v11, %v20591_v63  ;;  %v22977_v63 = vld [vmem:[#allocation132_spill] sm:$0xff] }
 0x99c   : > { %16401 = vpow2.f32 %v6296_v41 }
 0x99d   : > { %16403 = vrcp.f32 %v21057_v49 }
 0x99e   : > { %v15844_v5 = vpop.permute.xlu1 %15843  ;;  %16405 = vrcp.f32 %v21125_v22  ;;  %v22979_v22 = vld [vmem:[#allocation67_spill] sm:$0xff] }
 0x99f   : > { %v15846_v53 = vunpack.i.h.bf16 %v15844_v5  ;;  %v15845_v24 = vunpack.i.l.bf16 %v15844_v5 }
 0x9a1   : > { %v15025_v12 = vpack.c.bf16 %v15846_v53, %v15845_v24  ;;  %v16396_v58 = vpop.eup %16395 }
 0x9a2   : > { %v21194_v7 = vpop.eup %16397  ;;  %v6948_v9 = vmul.f32 %v16396_v58, %v21035_v32  ;;  %v22974_v32 = vld [vmem:[#allocation70_spill] sm:$0xff] }
 0x9a3   : > { %15026 = vmatprep.subr.bf16.mxu1 %v15025_v12  ;;  %v6663_v37 = vsel %vm431_vm0, %v21194_v7, 0.0  ;;  %v21201_v34 = vpop.eup %16399 }
 0x9a4   : > { %15028 = vmatpush3.bf16.msra.mxu1 %v15025_v12  ;;  %v6648_v17 = vsel %vm431_vm0, %v21201_v34, 0.0 }
 0x9a6   : > { %v21205_v57 = vpop.eup %16401 }
 0x9a7   : > { %14110 = vmatmul.mubr.msk.f32.vlgmr.msra.gmra.mrb[108].mxu1 %vm431_vm0, %v6941_v60  ;;  %v6654_v5 = vsel %vm431_vm0, %v21205_v57, 0.0  ;;  %v16404_v49 = vpop.eup %16403 }
 0x9a8   : > { %14112 = vmatprep.mubr.msk.f32.mxu1 %vm431_vm0, %v6942_v43 }
 0x9aa   : > { %6658 = vadd.xlane.f32.xlu0 %v6657_v33  ;;  %v6306_v33 = vmul.f32 1.442695, %v6071_v27 }
 0x9ab   : > { %14113 = vmatmul.mubr.msk.f32.gmra.mrb[110].mxu1 %vm431_vm0, %v6943_v0 }
 0x9ac   : > { %14137 = vmatprep.mubr.msk.f32.mxu1 %vm431_vm0, %v6948_v9  ;;  %v22976_v9 = vld [vmem:[#allocation24_spill] sm:$0xff]  ;;  %16407 = vpow2.f32 %v6306_v33 }
 0x9ad   : > { %16409 = vrcp.f32 %v21113_v29  ;;  %v6945_v29 = vmul.f32 %v16404_v49, %v20896_v38  ;;  %v22981_v49 = vld [vmem:[#allocation68_spill] sm:$0xff] }
 0x9ae   : > { %6664 = vadd.xlane.f32.xlu0 %v6663_v37  ;;  %v6073_v37 = vsub.f32 %v22976_v9, %v20609_v4  ;;  %v16406_v9 = vpop.eup %16405 }
 0x9b0   : > { %v6310_v11 = vmul.f32 1.442695, %v6073_v37  ;;  %v6946_v37 = vmul.f32 %v16406_v9, %v20984_v40 }
 0x9b4   : > { %6649 = vadd.xlane.f32.xlu1 %v6648_v17 }
 0x9b6   : > { %v21238_v33 = vpop.eup %16407 }
 0x9b8   : > { %6655 = vadd.xlane.f32.xlu1 %v6654_v5  ;;  %v22978_v5 = vld [vmem:[#allocation54_spill] sm:$0xff] }
 0x9c4   : > { %15878 = vrot.lane.b32.xlu0 %v22974_v32, %s16749_s25  ;;  %v6068_v32 = vsub.f32 %v22978_v5, %v22977_v63 }
 0x9c5   : > { %v21211_v53 = vpop.xlane.xlu0 %6634 }
 0x9c7   : > { %v21213_v24 = vpop.f32.mrb[124].mxu0 }
 0x9c8   : > { %v21215_v12 = vpop.f32.mrb[125].mxu0 }
 0x9c9   : > { %v21217_v61 = vpop.xlane.xlu0 %6640  ;;  %15873 = vrot.lane.b32.xlu1 %v22975_v54, %s16749_s25 }
 0x9cb   : > { %v21221_v26 = vpop.f32.mrb[126].mxu0 }
 0x9cc   : > { %v21225_v60 = vpop.f32.mrb[127].mxu0 }
 0x9cd   : > { %v15859_v23 = vpop.permute.xlu0 %15858 }
 0x9ce   : > { %v15861_v41 = vunpack.i.h.bf16 %v15859_v23  ;;  %v15860_v43 = vunpack.i.l.bf16 %v15859_v23 }
 0x9cf   : > { %v6626_v58 = vpop.xlane.xlu1 %6625 }
 0x9d0   : > { %v15037_v0 = vpack.c.bf16 %v15861_v41, %v15860_v43  ;;  %16411 = vrcp.f32 %v6626_v58  ;;  %v6300_v41 = vmul.f32 1.442695, %v6068_v32  ;;  %v6070_v43 = vsub.f32 %v22979_v22, %v20589_v2  ;;  %v16410_v58 = vpop.eup %16409 }
 0x9d1   : > { %16413 = vpow2.f32 %v6310_v11  ;;  %v6669_v2 = vsel %vm431_vm0, %v21238_v33, 0.0  ;;  %v6947_v11 = vmul.f32 %v16410_v58, %v20966_v18 }
 0x9d2   : > { %15038 = vmatprep.subr.bf16.mxu1 %v15037_v0  ;;  %16415 = vpow2.f32 %v6300_v41  ;;  %v22982_v41 = vld [vmem:[#allocation92_spill] sm:$0xff] }
 0x9d3   : > { %v21231_v17 = vpop.xlane.xlu1 %6631  ;;  %15040 = vmatpush3.bf16.msra.mxu1 %v15037_v0  ;;  %v6304_v0 = vmul.f32 1.442695, %v6070_v43  ;;  %v6075_v22 = vsub.f32 %v22982_v41, %v20661_v16 }
 0x9d5   : > { %16417 = vpow2.f32 %v6304_v0 }
 0x9d6   : > { %16419 = vrcp.f32 %v21115_v35 }
 0x9d7   : > { %v15854_v54 = vpop.permute.xlu1 %15853  ;;  %16421 = vrcp.f32 %v21178_v39 }
 0x9d8   : > { %v15856_v27 = vunpack.i.h.bf16 %v15854_v54  ;;  %v15855_v23 = vunpack.i.l.bf16 %v15854_v54 }
 0x9da   : > { %v15033_v4 = vpack.c.bf16 %v15856_v27, %v15855_v23  ;;  %v16412_v63 = vpop.eup %16411 }
 0x9db   : > { %v21247_v5 = vpop.eup %16413  ;;  %v6952_v38 = vmul.f32 %v16412_v63, %v21097_v28  ;;  %v22980_v28 = vld [vmem:[#allocation79_spill] sm:$0xff] }
 0x9dc   : > { %15034 = vmatprep.subr.bf16.mxu0 %v15033_v4  ;;  %v6675_v40 = vsel %vm431_vm0, %v21247_v5, 0.0  ;;  %v21254_v32 = vpop.eup %16415 }
 0x9dd   : > { %15036 = vmatpush3.bf16.msra.mxu0 %v15033_v4  ;;  %v6660_v54 = vsel %vm431_vm0, %v21254_v32, 0.0 }
 0x9df   : > { %v21258_v18 = vpop.eup %16417 }
 0x9e0   : > { %14124 = vmatmul.mubr.msk.f32.vlgmr.msra.gmra.mrb[132].mxu0 %vm431_vm0, %v6945_v29  ;;  %v6666_v27 = vsel %vm431_vm0, %v21258_v18, 0.0 }
 0x9e1   : > { %14126 = vmatprep.mubr.msk.f32.mxu0 %vm431_vm0, %v6946_v37  ;;  %v6314_v37 = vmul.f32 1.442695, %v6075_v22  ;;  %v6074_v22 = vsub.f32 %v20558_v14, %v20703_v45 }
 0x9e3   : > { %6670 = vadd.xlane.f32.xlu0 %v6669_v2  ;;  %16423 = vpow2.f32 %v6314_v37 }
 0x9e4   : > { %14127 = vmatmul.mubr.msk.f32.gmra.mrb[134].mxu0 %vm431_vm0, %v6947_v11  ;;  %v6077_v11 = vsub.f32 %v20577_v21, %v20717_v56  ;;  %16425 = vrcp.f32 %v21166_v46 }
 0x9e5   : > { %14151 = vmatprep.mubr.msk.f32.mxu0 %vm431_vm0, %v6952_v38 }
 0x9e7   : > { %6676 = vadd.xlane.f32.xlu0 %v6675_v40 }
 0x9ed   : > { %6661 = vadd.xlane.f32.xlu1 %v6660_v54  ;;  %v6318_v54 = vmul.f32 1.442695, %v6077_v11 }
 0x9f1   : > { %6667 = vadd.xlane.f32.xlu1 %v6666_v27  ;;  %v22983_v27 = vld [vmem:[#allocation80_spill] sm:$0xff] }
 0x9f2   : > { %v6072_v21 = vsub.f32 %v22983_v27, %v20641_v59  ;;  %v6312_v59 = vmul.f32 1.442695, %v6074_v22 }
 0x9f4   : > { %v6308_v41 = vmul.f32 1.442695, %v6072_v21 }
 0x9fd   : > { %15888 = vrot.lane.b32.xlu0 %v22980_v28, %s16749_s25 }
 0x9fe   : > { %v21264_v23 = vpop.xlane.xlu0 %6646 }
 0xa02   : > { %v21266_v4 = vpop.xlane.xlu0 %6652  ;;  %15883 = vrot.lane.b32.xlu1 %v22981_v49, %s16749_s25  ;;  %v16420_v49 = vpop.eup %16419 }
 0xa03   : > { %v6949_v46 = vmul.f32 %v16420_v49, %v20970_v50 }
 0xa06   : > { %v15869_v43 = vpop.permute.xlu0 %15868 }
 0xa07   : > { %v15871_v9 = vunpack.i.h.bf16 %v15869_v43  ;;  %v15870_v29 = vunpack.i.l.bf16 %v15869_v43  ;;  %v16422_v43 = vpop.eup %16421 }
 0xa08   : > { %v6638_v58 = vpop.xlane.xlu1 %6637  ;;  %v21272_v0 = vpop.f32.mrb[104].mxu1 }
 0xa09   : > { %v15045_v63 = vpack.c.bf16 %v15871_v9, %v15870_v29  ;;  %v21274_v2 = vpop.f32.mrb[105].mxu1  ;;  %16427 = vrcp.f32 %v6638_v58  ;;  %v21291_v9 = vpop.eup %16423  ;;  %v6950_v58 = vmul.f32 %v16422_v43, %v21039_v6 }
 0xa0a   : > { %16429 = vpow2.f32 %v6318_v54  ;;  %v16426_v29 = vpop.eup %16425  ;;  %v6681_v14 = vsel %vm431_vm0, %v21291_v9, 0.0 }
 0xa0b   : > { %15046 = vmatprep.subr.bf16.mxu0 %v15045_v63  ;;  %16431 = vpow2.f32 %v6308_v41  ;;  %v6951_v45 = vmul.f32 %v16426_v29, %v21027_v47 }
 0xa0c   : > { %v21280_v38 = vpop.xlane.xlu1 %6643  ;;  %v21282_v16 = vpop.f32.mrb[106].mxu1  ;;  %15048 = vmatpush3.bf16.msra.mxu0 %v15045_v63  ;;  %16433 = vpow2.f32 %v6312_v59 }
 0xa0d   : > { %v21284_v40 = vpop.f32.mrb[107].mxu1  ;;  %16435 = vrcp.f32 %v21168_v55 }
 0xa0e   : > { %16437 = vrcp.f32 %v21231_v17 }
 0xa10   : > { %v15864_v56 = vpop.permute.xlu1 %15863 }
 0xa11   : > { %v15866_v35 = vunpack.i.h.bf16 %v15864_v56  ;;  %v15865_v28 = vunpack.i.l.bf16 %v15864_v56 }
 0xa13   : > { %v15041_v39 = vpack.c.bf16 %v15866_v35, %v15865_v28  ;;  %v16428_v37 = vpop.eup %16427  ;;  %v22985_v35 = vld [vmem:[#allocation78_spill] sm:$0xff]  ;;  %v6079_v28 = vsub.f32 %v20633_v20, %v20790_v19 }
 0xa14   : > { %v21300_v63 = vpop.eup %16429  ;;  %v6956_v50 = vmul.f32 %v16428_v37, %v21148_v1  ;;  %v22984_v1 = vld [vmem:[#allocation90_spill] sm:$0xff] }
 0xa15   : > { %15042 = vmatprep.subr.bf16.mxu1 %v15041_v39  ;;  %v6687_v6 = vsel %vm431_vm0, %v21300_v63, 0.0  ;;  %v21307_v11 = vpop.eup %16431 }
 0xa16   : > { %15044 = vmatpush3.bf16.msra.mxu1 %v15041_v39  ;;  %v6672_v54 = vsel %vm431_vm0, %v21307_v11, 0.0  ;;  %v21311_v47 = vpop.eup %16433 }
 0xa17   : > { %v6678_v27 = vsel %vm431_vm0, %v21311_v47, 0.0 }
 0xa19   : > { %14138 = vmatmul.mubr.msk.f32.vlgmr.msra.gmra.mrb[112].mxu1 %vm431_vm0, %v6949_v46  ;;  %v6322_v46 = vmul.f32 1.442695, %v6079_v28 }
 0xa1a   : > { %14140 = vmatprep.mubr.msk.f32.mxu1 %vm431_vm0, %v6950_v58  ;;  %v6081_v58 = vsub.f32 %v20687_v42, %v20869_v52 }
 0xa1b   : > { %16439 = vpow2.f32 %v6322_v46 }
 0xa1c   : > { %6682 = vadd.xlane.f32.xlu0 %v6681_v14  ;;  %v6326_v14 = vmul.f32 1.442695, %v6081_v58  ;;  %16441 = vrcp.f32 %v21211_v53 }
 0xa1d   : > { %14141 = vmatmul.mubr.msk.f32.gmra.mrb[114].mxu1 %vm431_vm0, %v6951_v45  ;;  %v22986_v45 = vld [vmem:[#allocation166_spill] sm:$0xff] }
 0xa1e   : > { %14165 = vmatprep.mubr.msk.f32.mxu1 %vm431_vm0, %v6956_v50  ;;  %v6076_v42 = vsub.f32 %v22986_v45, %v20774_v31 }
 0xa20   : > { %6688 = vadd.xlane.f32.xlu0 %v6687_v6  ;;  %v16436_v6 = vpop.eup %16435 }
 0xa21   : > { %v16438_v28 = vpop.eup %16437  ;;  %v6953_v53 = vmul.f32 %v16436_v6, %v21031_v10  ;;  %v22992_v6 = vld [vmem:[#allocation43_spill] sm:$0xff] }
 0xa26   : > { %6673 = vadd.xlane.f32.xlu1 %v6672_v54  ;;  %v6316_v54 = vmul.f32 1.442695, %v6076_v42 }
 0xa2a   : > { %6679 = vadd.xlane.f32.xlu1 %v6678_v27  ;;  %v22987_v27 = vld [vmem:[#allocation173_spill] sm:$0xff] }
 0xa36   : > { %15898 = vrot.lane.b32.xlu0 %v22984_v1, %s16749_s25  ;;  %v22988_v1 = vld [vmem:[#allocation28_spill] sm:$0xff] }
 0xa37   : > { %v21317_v21 = vpop.xlane.xlu0 %6658 }
 0xa3b   : > { %v21319_v56 = vpop.xlane.xlu0 %6664  ;;  %15893 = vrot.lane.b32.xlu1 %v22985_v35, %s16749_s25  ;;  %v6078_v35 = vsub.f32 %v22988_v1, %v22987_v27 }
 0xa3d   : > { %v6320_v31 = vmul.f32 1.442695, %v6078_v35 }
 0xa3f   : > { %v15879_v39 = vpop.permute.xlu0 %15878 }
 0xa40   : > { %v15881_v49 = vunpack.i.h.bf16 %v15879_v39  ;;  %v15880_v41 = vunpack.i.l.bf16 %v15879_v39  ;;  %v21344_v39 = vpop.eup %16439 }
 0xa41   : > { %v6650_v22 = vpop.xlane.xlu1 %6649  ;;  %v21325_v43 = vpop.f32.mrb[128].mxu0  ;;  %v6693_v46 = vsel %vm431_vm0, %v21344_v39, 0.0 }
 0xa42   : > { %v15053_v29 = vpack.c.bf16 %v15881_v49, %v15880_v41  ;;  %v21327_v59 = vpop.f32.mrb[129].mxu0  ;;  %16443 = vrcp.f32 %v6650_v22  ;;  %v16442_v49 = vpop.eup %16441  ;;  %v6954_v41 = vmul.f32 %v16438_v28, %v21105_v13 }
 0xa43   : > { %16445 = vpow2.f32 %v6326_v14 }
 0xa44   : > { %15054 = vmatprep.subr.bf16.mxu1 %v15053_v29  ;;  %16447 = vpow2.f32 %v6316_v54 }
 0xa45   : > { %v21333_v37 = vpop.xlane.xlu1 %6655  ;;  %v21335_v20 = vpop.f32.mrb[130].mxu0  ;;  %15056 = vmatpush3.bf16.msra.mxu1 %v15053_v29  ;;  %v6955_v29 = vmul.f32 %v16442_v49, %v21079_v8  ;;  %16449 = vpow2.f32 %v6320_v31 }
 0xa46   : > { %v21337_v19 = vpop.f32.mrb[131].mxu0  ;;  %16451 = vrcp.f32 %v21217_v61 }
 0xa47   : > { %16453 = vrcp.f32 %v21280_v38 }
 0xa49   : > { %v15874_v52 = vpop.permute.xlu1 %15873 }
 0xa4a   : > { %v15876_v55 = vunpack.i.h.bf16 %v15874_v52  ;;  %v15875_v50 = vunpack.i.l.bf16 %v15874_v52 }
 0xa4c   : > { %v15049_v17 = vpack.c.bf16 %v15876_v55, %v15875_v50  ;;  %v16444_v22 = vpop.eup %16443  ;;  %v22990_v50 = vld [vmem:[#allocation88_spill] sm:$0xff] }
 0xa4d   : > { %v21353_v58 = vpop.eup %16445  ;;  %v6960_v10 = vmul.f32 %v16444_v22, %v21201_v34  ;;  %v22989_v34 = vld [vmem:[#allocation99_spill] sm:$0xff]  ;;  %v22993_v22 = vld [vmem:[#allocation178_spill] sm:$0xff] }
 0xa4e   : > { %15050 = vmatprep.subr.bf16.mxu0 %v15049_v17  ;;  %v6699_v13 = vsel %vm431_vm0, %v21353_v58, 0.0  ;;  %v21360_v14 = vpop.eup %16447 }
 0xa4f   : > { %15052 = vmatpush3.bf16.msra.mxu0 %v15049_v17  ;;  %v6684_v45 = vsel %vm431_vm0, %v21360_v14, 0.0  ;;  %v21364_v8 = vpop.eup %16449  ;;  %v22991_v17 = vld [vmem:[#allocation176_spill] sm:$0xff] }
 0xa50   : > { %v6690_v42 = vsel %vm431_vm0, %v21364_v8, 0.0  ;;  %v6083_v54 = vsub.f32 %v22992_v6, %v22991_v17 }
 0xa52   : > { %14152 = vmatmul.mubr.msk.f32.vlgmr.msra.gmra.mrb[136].mxu0 %vm431_vm0, %v6953_v53  ;;  %v6330_v49 = vmul.f32 1.442695, %v6083_v54 }
 0xa53   : > { %14154 = vmatprep.mubr.msk.f32.mxu0 %vm431_vm0, %v6954_v41 }
 0xa54   : > { %16455 = vpow2.f32 %v6330_v49 }
 0xa55   : > { %6694 = vadd.xlane.f32.xlu0 %v6693_v46  ;;  %v22994_v46 = vld [vmem:[#allocation154_spill] sm:$0xff]  ;;  %16457 = vrcp.f32 %v21264_v23 }
 0xa56   : > { %14155 = vmatmul.mubr.msk.f32.gmra.mrb[138].mxu0 %vm431_vm0, %v6955_v29  ;;  %v6085_v29 = vsub.f32 %v22994_v46, %v22993_v22  ;;  %v22998_v22 = vld [vmem:[#allocation73_spill] sm:$0xff] }
 0xa57   : > { %14179 = vmatprep.mubr.msk.f32.mxu0 %vm431_vm0, %v6960_v10 }
 0xa59   : > { %6700 = vadd.xlane.f32.xlu0 %v6699_v13 }
 0xa5f   : > { %6685 = vadd.xlane.f32.xlu1 %v6684_v45 }
 0xa63   : > { %6691 = vadd.xlane.f32.xlu1 %v6690_v42  ;;  %v6334_v42 = vmul.f32 1.442695, %v6085_v29 }
 0xa6f   : > { %15908 = vrot.lane.b32.xlu0 %v22989_v34, %s16749_s25  ;;  %v22995_v34 = vld [vmem:[#allocation59_spill] sm:$0xff] }
 0xa70   : > { %v21370_v52 = vpop.xlane.xlu0 %6670 }
 0xa74   : > { %v21372_v55 = vpop.xlane.xlu0 %6676  ;;  %15903 = vrot.lane.b32.xlu1 %v22990_v50, %s16749_s25  ;;  %v22996_v50 = vld [vmem:[#allocation22_spill] sm:$0xff] }
 0xa75   : > { %v6080_v17 = vsub.f32 %v22996_v50, %v22995_v34 }
 0xa78   : > { %v15889_v27 = vpop.permute.xlu0 %15888 }
 0xa79   : > { %v15891_v1 = vunpack.i.h.bf16 %v15889_v27  ;;  %v15890_v35 = vunpack.i.l.bf16 %v15889_v27  ;;  %v16452_v27 = vpop.eup %16451 }
 0xa7a   : > { %v6662_v28 = vpop.xlane.xlu1 %6661  ;;  %v21378_v53 = vpop.f32.mrb[108].mxu1  ;;  %v6957_v23 = vmul.f32 %v16452_v27, %v21088_v30 }
 0xa7b   : > { %v15061_v31 = vpack.c.bf16 %v15891_v1, %v15890_v35  ;;  %v21380_v41 = vpop.f32.mrb[109].mxu1  ;;  %16459 = vrcp.f32 %v6662_v28  ;;  %v6324_v1 = vmul.f32 1.442695, %v6080_v17  ;;  %v22997_v35 = vld [vmem:[#allocation116_spill] sm:$0xff]  ;;  %v16454_v49 = vpop.eup %16453 }
 0xa7c   : > { %16461 = vpow2.f32 %v6334_v42  ;;  %v21397_v46 = vpop.eup %16455  ;;  %v6958_v34 = vmul.f32 %v16454_v49, %v21152_v36 }
 0xa7d   : > { %15062 = vmatprep.subr.bf16.mxu0 %v15061_v31  ;;  %v16458_v28 = vpop.eup %16457  ;;  %16463 = vpow2.f32 %v6324_v1  ;;  %v6705_v42 = vsel %vm431_vm0, %v21397_v46, 0.0 }
 0xa7e   : > { %v21386_v10 = vpop.xlane.xlu1 %6667  ;;  %v21388_v13 = vpop.f32.mrb[110].mxu1  ;;  %15064 = vmatpush3.bf16.msra.mxu0 %v15061_v31  ;;  %v6082_v31 = vsub.f32 %v22998_v22, %v22997_v35  ;;  %v6959_v17 = vmul.f32 %v16458_v28, %v21132_v48  ;;  %v23000_v35 = vld [vmem:[#allocation97_spill] sm:$0xff] }
 0xa7f   : > { %v21390_v45 = vpop.f32.mrb[111].mxu1  ;;  %v23001_v22 = vld [vmem:[#allocation149_spill] sm:$0xff] }
 0xa80   : > { %v6328_v29 = vmul.f32 1.442695, %v6082_v31  ;;  %v23002_v31 = vld [vmem:[#allocation143_spill] sm:$0xff] }
 0xa81   : > { %v6087_v49 = vsub.f32 %v23002_v31, %v23001_v22 }
 0xa82   : > { %v15884_v6 = vpop.permute.xlu1 %15883  ;;  %16465 = vpow2.f32 %v6328_v29 }
 0xa83   : > { %v15886_v61 = vunpack.i.h.bf16 %v15884_v6  ;;  %v15885_v54 = vunpack.i.l.bf16 %v15884_v6  ;;  %16467 = vrcp.f32 %v21266_v4 }
 0xa84   : > { %16469 = vrcp.f32 %v21333_v37 }
 0xa85   : > { %v15057_v38 = vpack.c.bf16 %v15886_v61, %v15885_v54  ;;  %v16460_v50 = vpop.eup %16459 }
 0xa86   : > { %v21406_v6 = vpop.eup %16461  ;;  %v6964_v30 = vmul.f32 %v16460_v50, %v21254_v32  ;;  %v22999_v32 = vld [vmem:[#allocation105_spill] sm:$0xff] }
 0xa87   : > { %15058 = vmatprep.subr.bf16.mxu1 %v15057_v38  ;;  %v6711_v36 = vsel %vm431_vm0, %v21406_v6, 0.0  ;;  %v21413_v61 = vpop.eup %16463 }
 0xa88   : > { %15060 = vmatpush3.bf16.msra.mxu1 %v15057_v38  ;;  %v6696_v54 = vsel %vm431_vm0, %v21413_v61, 0.0 }
 0xa8b   : > { %14166 = vmatmul.mubr.msk.f32.vlgmr.msra.gmra.mrb[116].mxu1 %vm431_vm0, %v6957_v23 }
 0xa8c   : > { %14168 = vmatprep.mubr.msk.f32.mxu1 %vm431_vm0, %v6958_v34  ;;  %v21417_v48 = vpop.eup %16465 }
 0xa8d   : > { %v6702_v38 = vsel %vm431_vm0, %v21417_v48, 0.0 }
 0xa8e   : > { %6706 = vadd.xlane.f32.xlu0 %v6705_v42  ;;  %v6338_v42 = vmul.f32 1.442695, %v6087_v49  ;;  %v23008_v49 = vld [vmem:[#allocation119_spill] sm:$0xff] }
 0xa8f   : > { %14169 = vmatmul.mubr.msk.f32.gmra.mrb[118].mxu1 %vm431_vm0, %v6959_v17 }
 0xa90   : > { %14193 = vmatprep.mubr.msk.f32.mxu1 %vm431_vm0, %v6964_v30  ;;  %16471 = vpow2.f32 %v6338_v42 }
 0xa91   : > { %16473 = vrcp.f32 %v21317_v21 }
 0xa92   : > { %6712 = vadd.xlane.f32.xlu0 %v6711_v36  ;;  %v23005_v36 = vld [vmem:[#allocation98_spill] sm:$0xff] }
 0xa98   : > { %6697 = vadd.xlane.f32.xlu1 %v6696_v54  ;;  %v23006_v54 = vld [vmem:[#allocation115_spill] sm:$0xff] }
 0xa9c   : > { %6703 = vadd.xlane.f32.xlu1 %v6702_v38  ;;  %v6089_v38 = vsub.f32 %v23006_v54, %v23005_v36  ;;  %v16468_v54 = vpop.eup %16467 }
 0xa9d   : > { %v16470_v42 = vpop.eup %16469  ;;  %v6961_v21 = vmul.f32 %v16468_v54, %v21141_v44  ;;  %v23013_v54 = vld [vmem:[#allocation107_spill] sm:$0xff] }
 0xa9e   : > { %v6342_v31 = vmul.f32 1.442695, %v6089_v38  ;;  %v21450_v38 = vpop.eup %16471 }
 0xaa8   : > { %15918 = vrot.lane.b32.xlu0 %v22999_v32, %s16749_s25 }
 0xaa9   : > { %v21423_v27 = vpop.xlane.xlu0 %6682 }
 0xaad   : > { %v21425_v1 = vpop.xlane.xlu0 %6688  ;;  %15913 = vrot.lane.b32.xlu1 %v23000_v35, %s16749_s25 }
 0xab1   : > { %v15899_v23 = vpop.permute.xlu0 %15898 }
 0xab2   : > { %v15901_v28 = vunpack.i.h.bf16 %v15899_v23  ;;  %v15900_v29 = vunpack.i.l.bf16 %v15899_v23  ;;  %v23009_v23 = vld [vmem:[#allocation151_spill] sm:$0xff] }
 0xab3   : > { %v6674_v34 = vpop.xlane.xlu1 %6673  ;;  %v21431_v50 = vpop.f32.mrb[132].mxu0 }
 0xab4   : > { %23003 = vst [vmem:[#allocation158_spill] sm:$0xff] %v21431_v50  ;;  %v15069_v17 = vpack.c.bf16 %v15901_v28, %v15900_v29  ;;  %v21433_v30 = vpop.f32.mrb[133].mxu0  ;;  %16475 = vrcp.f32 %v6674_v34  ;;  %v6084_v28 = vsub.f32 %v23009_v23, %v23008_v49  ;;  %v16474_v34 = vpop.eup %16473  ;;  %v6962_v23 = vmul.f32 %v16470_v42, %v21205_v57 }
 0xab5   : > { %23004 = vst [vmem:[#allocation20_spill] sm:$0xff] %v21433_v30  ;;  %16477 = vpow2.f32 %v6342_v31  ;;  %v23010_v30 = vld [vmem:[#allocation89_spill] sm:$0xff] }
 0xab6   : > { %15070 = vmatprep.subr.bf16.mxu1 %v15069_v17  ;;  %v6332_v50 = vmul.f32 1.442695, %v6084_v28 }
 0xab7   : > { %v21439_v32 = vpop.xlane.xlu1 %6679  ;;  %v21441_v35 = vpop.f32.mrb[134].mxu0  ;;  %15072 = vmatpush3.bf16.msra.mxu1 %v15069_v17 }
 0xab8   : > { %23007 = vst [vmem:[#allocation156_spill] sm:$0xff] %v21441_v35  ;;  %v21443_v22 = vpop.f32.mrb[135].mxu0  ;;  %v23011_v35 = vld [vmem:[#allocation129_spill] sm:$0xff]  ;;  %16479 = vpow2.f32 %v6332_v50 }
 0xab9   : > { %v6086_v17 = vsub.f32 %v23011_v35, %v23010_v30  ;;  %v6717_v30 = vsel %vm431_vm0, %v21450_v38, 0.0  ;;  %v6963_v35 = vmul.f32 %v16474_v34, %v21185_v62 }
 0xabb   : > { %v15894_v29 = vpop.permute.xlu1 %15893  ;;  %v6336_v49 = vmul.f32 1.442695, %v6086_v17  ;;  %v23014_v17 = vld [vmem:[#allocation175_spill] sm:$0xff] }
 0xabc   : > { %v15896_v4 = vunpack.i.h.bf16 %v15894_v29  ;;  %v15895_v36 = vunpack.i.l.bf16 %v15894_v29  ;;  %v6091_v42 = vsub.f32 %v23014_v17, %v21071_v15 }
 0xabd   : > { %16481 = vpow2.f32 %v6336_v49 }
 0xabe   : > { %v15065_v37 = vpack.c.bf16 %v15896_v4, %v15895_v36  ;;  %v16476_v29 = vpop.eup %16475  ;;  %16483 = vrcp.f32 %v21319_v56 }
 0xabf   : > { %v21459_v31 = vpop.eup %16477  ;;  %v6968_v44 = vmul.f32 %v16476_v29, %v21307_v11  ;;  %v23012_v11 = vld [vmem:[#allocation36_spill] sm:$0xff]  ;;  %16485 = vrcp.f32 %v21386_v10 }
 0xac0   : > { %15066 = vmatprep.subr.bf16.mxu0 %v15065_v37  ;;  %v6723_v57 = vsel %vm431_vm0, %v21459_v31, 0.0 }
 0xac1   : > { %15068 = vmatpush3.bf16.msra.mxu0 %v15065_v37 }
 0xac2   : > { %v21466_v50 = vpop.eup %16479 }
 0xac3   : > { %v6708_v28 = vsel %vm431_vm0, %v21466_v50, 0.0 }
 0xac4   : > { %14180 = vmatmul.mubr.msk.f32.vlgmr.msra.gmra.mrb[140].mxu0 %vm431_vm0, %v6961_v21 }
 0xac5   : > { %14182 = vmatprep.mubr.msk.f32.mxu0 %vm431_vm0, %v6962_v23 }
 0xac7   : > { %6718 = vadd.xlane.f32.xlu0 %v6717_v30  ;;  %v21470_v62 = vpop.eup %16481  ;;  %v6346_v30 = vmul.f32 1.442695, %v6091_v42 }
 0xac8   : > { %14183 = vmatmul.mubr.msk.f32.gmra.mrb[142].mxu0 %vm431_vm0, %v6963_v35  ;;  %v6714_v4 = vsel %vm431_vm0, %v21470_v62, 0.0  ;;  %v16484_v10 = vpop.eup %16483 }
 0xac9   : > { %14207 = vmatprep.mubr.msk.f32.mxu0 %vm431_vm0, %v6968_v44  ;;  %16487 = vpow2.f32 %v6346_v30 }
 0xaca   : > { %16489 = vrcp.f32 %v21370_v52  ;;  %v6965_v52 = vmul.f32 %v16484_v10, %v21194_v7 }
 0xacb   : > { %6724 = vadd.xlane.f32.xlu0 %v6723_v57 }
 0xad1   : > { %6709 = vadd.xlane.f32.xlu1 %v6708_v28 }
 0xad5   : > { %6715 = vadd.xlane.f32.xlu1 %v6714_v4  ;;  %v23018_v4 = vld [vmem:[#allocation169_spill] sm:$0xff] }
 0xae1   : > { %15928 = vrot.lane.b32.xlu0 %v23012_v11, %s16749_s25  ;;  %v23019_v11 = vld [vmem:[#allocation142_spill] sm:$0xff] }
 0xae2   : > { %v21476_v36 = vpop.xlane.xlu0 %6694 }
 0xae6   : > { %v21478_v37 = vpop.xlane.xlu0 %6700  ;;  %15923 = vrot.lane.b32.xlu1 %v23013_v54, %s16749_s25  ;;  %v6088_v54 = vsub.f32 %v23019_v11, %v23018_v4 }
 0xaea   : > { %v15909_v21 = vpop.permute.xlu0 %15908 }
 0xaeb   : > { %v15911_v34 = vunpack.i.h.bf16 %v15909_v21  ;;  %v15910_v49 = vunpack.i.l.bf16 %v15909_v21 }
 0xaec   : > { %v6686_v23 = vpop.xlane.xlu1 %6685  ;;  %v21484_v29 = vpop.f32.mrb[112].mxu1 }
 0xaed   : > { %23015 = vst [vmem:[#allocation180_spill] sm:$0xff] %v21484_v29  ;;  %v15077_v35 = vpack.c.bf16 %v15911_v34, %v15910_v49  ;;  %v21486_v44 = vpop.f32.mrb[113].mxu1  ;;  %16491 = vrcp.f32 %v6686_v23  ;;  %v6340_v34 = vmul.f32 1.442695, %v6088_v54  ;;  %v23020_v49 = vld [vmem:[#allocation55_spill] sm:$0xff]  ;;  %v23021_v29 = vld [vmem:[#allocation46_spill] sm:$0xff] }
 0xaee   : > { %23016 = vst [vmem:[#allocation182_spill] sm:$0xff] %v21486_v44  ;;  %v6090_v44 = vsub.f32 %v23021_v29, %v23020_v49 }
 0xaef   : > { %15078 = vmatprep.subr.bf16.mxu0 %v15077_v35  ;;  %16493 = vpow2.f32 %v6340_v34 }
 0xaf0   : > { %v21490_v57 = vpop.xlane.xlu1 %6691  ;;  %v21492_v28 = vpop.f32.mrb[114].mxu1  ;;  %15080 = vmatpush3.bf16.msra.mxu0 %v15077_v35  ;;  %v6344_v35 = vmul.f32 1.442695, %v6090_v44 }
 0xaf1   : > { %23017 = vst [vmem:[#allocation181_spill] sm:$0xff] %v21492_v28  ;;  %v21494_v15 = vpop.f32.mrb[115].mxu1  ;;  %v16486_v28 = vpop.eup %16485 }
 0xaf2   : > { %v21501_v30 = vpop.eup %16487  ;;  %v6966_v4 = vmul.f32 %v16486_v28, %v21258_v18  ;;  %16495 = vpow2.f32 %v6344_v35 }
 0xaf3   : > { %v16490_v23 = vpop.eup %16489  ;;  %v6729_v29 = vsel %vm431_vm0, %v21501_v30, 0.0  ;;  %16497 = vrcp.f32 %v21372_v55 }
 0xaf4   : > { %v15904_v17 = vpop.permute.xlu1 %15903  ;;  %v6967_v54 = vmul.f32 %v16490_v23, %v21238_v33  ;;  %16499 = vrcp.f32 %v21439_v32 }
 0xaf5   : > { %v15906_v42 = vunpack.i.h.bf16 %v15904_v17  ;;  %v15905_v56 = vunpack.i.l.bf16 %v15904_v17  ;;  %16501 = vrcp.f32 %v21423_v27 }
 0xaf7   : > { %v15073_v21 = vpack.c.bf16 %v15906_v42, %v15905_v56  ;;  %v16492_v11 = vpop.eup %16491 }
 0xaf8   : > { %v6972_v17 = vmul.f32 %v16492_v11, %v21360_v14  ;;  %v23022_v14 = vld [vmem:[#allocation33_spill] sm:$0xff] }
 0xaf9   : > { %15074 = vmatprep.subr.bf16.mxu1 %v15073_v21  ;;  %v21513_v7 = vpop.eup %16493 }
 0xafa   : > { %15076 = vmatpush3.bf16.msra.mxu1 %v15073_v21  ;;  %v6720_v18 = vsel %vm431_vm0, %v21513_v7, 0.0  ;;  %v23023_v21 = vld [vmem:[#allocation120_spill] sm:$0xff] }
 0xafc   : > { %v21517_v44 = vpop.eup %16495 }
 0xafd   : > { %14194 = vmatmul.mubr.msk.f32.vlgmr.msra.gmra.mrb[120].mxu1 %vm431_vm0, %v6965_v52  ;;  %v6726_v28 = vsel %vm431_vm0, %v21517_v44, 0.0 }
 0xafe   : > { %14196 = vmatprep.mubr.msk.f32.mxu1 %vm431_vm0, %v6966_v4  ;;  %v23024_v4 = vld [vmem:[#allocation125_spill] sm:$0xff] }
 0xb00   : > { %6730 = vadd.xlane.f32.xlu0 %v6729_v29 }
 0xb01   : > { %14197 = vmatmul.mubr.msk.f32.gmra.mrb[122].mxu1 %vm431_vm0, %v6967_v54 }
 0xb02   : > { %14221 = vmatprep.mubr.msk.f32.mxu1 %vm431_vm0, %v6972_v17  ;;  %v23025_v17 = vld [vmem:[#allocation133_spill] sm:$0xff] }
 0xb0a   : > { %6721 = vadd.xlane.f32.xlu1 %v6720_v18 }
 0xb0e   : > { %6727 = vadd.xlane.f32.xlu1 %v6726_v28 }
 0xb1b   : > { %v21521_v33 = vpop.xlane.xlu0 %6706 }
 0xb1f   : > { %v21523_v42 = vpop.xlane.xlu0 %6712  ;;  %15933 = vrot.lane.b32.xlu1 %v23022_v14, %s16749_s25  ;;  %v23026_v14 = vld [vmem:[#allocation137_spill] sm:$0xff] }
 0xb23   : > { %v15919_v56 = vpop.permute.xlu0 %15918  ;;  %15938 = vrot.lane.b32.xlu1 %v23023_v21, %s16749_s25 }
 0xb24   : > { %v15921_v10 = vunpack.i.h.bf16 %v15919_v56  ;;  %v15920_v34 = vunpack.i.l.bf16 %v15919_v56  ;;  %v16498_v56 = vpop.eup %16497 }
 0xb25   : > { %v6698_v49 = vpop.xlane.xlu1 %6697  ;;  %v21529_v52 = vpop.f32.mrb[136].mxu0 }
 0xb26   : > { %v15085_v23 = vpack.c.bf16 %v15921_v10, %v15920_v34  ;;  %v21531_v35 = vpop.f32.mrb[137].mxu0  ;;  %16503 = vrcp.f32 %v6698_v49  ;;  %v16500_v21 = vpop.eup %16499  ;;  %v6969_v10 = vmul.f32 %v16498_v56, %v21247_v5 }
 0xb27   : > { %15943 = vrot.lane.b32.xlu1 %v23024_v4, %s16749_s25  ;;  %v16502_v34 = vpop.eup %16501  ;;  %v6970_v27 = vmul.f32 %v16500_v21, %v21311_v47  ;;  %16505 = vrcp.f32 %v21425_v1 }
 0xb28   : > { %15086 = vmatprep.subr.bf16.mxu1 %v15085_v23  ;;  %v6971_v49 = vmul.f32 %v16502_v34, %v21291_v9  ;;  %16507 = vrcp.f32 %v21490_v57 }
 0xb29   : > { %v21537_v11 = vpop.xlane.xlu1 %6703  ;;  %v21539_v29 = vpop.f32.mrb[138].mxu0  ;;  %15088 = vmatpush3.bf16.msra.mxu1 %v15085_v23  ;;  %16509 = vrcp.f32 %v21476_v36 }
 0xb2a   : > { %v21541_v54 = vpop.f32.mrb[139].mxu0 }
 0xb2b   : > { %15948 = vrot.lane.b32.xlu1 %v23025_v17, %s16749_s25 }
 0xb2d   : > { %v15914_v55 = vpop.permute.xlu1 %15913 }
 0xb2e   : > { %v15916_v18 = vunpack.i.h.bf16 %v15914_v55  ;;  %v15915_v28 = vunpack.i.l.bf16 %v15914_v55 }
 0xb2f   : > { %15953 = vrot.lane.b32.xlu1 %v23026_v14, %s16749_s25  ;;  %s16653_s25 = scalar_lea.vmem %s16652_s27, 8192 }
 0xb30   : > { %v15081_v32 = vpack.c.bf16 %v15916_v18, %v15915_v28  ;;  %v16504_v23 = vpop.eup %16503  ;;  %p16655_p7 = scmp.lt.s32.totalorder %s16653_s25, %s16647_s7 }
 0xb31   : > { %v6976_v4 = vmul.f32 %v16504_v23, %v21413_v61 }
 0xb32   : > { %15082 = vmatprep.subr.bf16.mxu0 %v15081_v32  ;;  %p16656_p9 = por %p16655_p7, %p16654_p5 }
 0xb33   : > { %15084 = vmatpush3.bf16.msra.mxu0 %v15081_v32 }
 0xb34   : > { %p16657_p0 = pnand %p16656_p9, %p16650_p3 }
 0xb36   : > { %14208 = vmatmul.mubr.msk.f32.vlgmr.msra.gmra.mrb[144].mxu0 %vm431_vm0, %v6969_v10 }
 0xb37   : > { %14210 = vmatprep.mubr.msk.f32.mxu0 %vm431_vm0, %v6970_v27 }
 0xb3a   : > { %14211 = vmatmul.mubr.msk.f32.gmra.mrb[146].mxu0 %vm431_vm0, %v6971_v49  ;;  %v16506_v49 = vpop.eup %16505 }
 0xb3b   : > { %14235 = vmatprep.mubr.msk.f32.mxu0 %vm431_vm0, %v6976_v4  ;;  %v16508_v4 = vpop.eup %16507  ;;  %v6973_v1 = vmul.f32 %v16506_v49, %v21300_v63 }
 0xb3c   : > { %v16510_v57 = vpop.eup %16509 }
 0xb3d   : > { %v6975_v36 = vmul.f32 %v16510_v57, %v21344_v39 }
 0xb54   : > { %v6719_v17 = vpop.xlane.xlu0 %6718 }
 0xb58   : > { %v21556_v55 = vpop.xlane.xlu0 %6724 }
 0xb5c   : > { %v15929_v5 = vpop.permute.xlu0 %15928 }
 0xb5d   : > { %v15931_v18 = vunpack.i.h.bf16 %v15929_v5  ;;  %v15930_v28 = vunpack.i.l.bf16 %v15929_v5  ;;  %v6974_v5 = vmul.f32 %v16508_v4, %v21364_v8 }
 0xb5e   : > { %v6710_v47 = vpop.xlane.xlu1 %6709  ;;  %v21558_v14 = vpop.f32.mrb[116].mxu1 }
 0xb5f   : > { %v15093_v32 = vpack.c.bf16 %v15931_v18, %v15930_v28  ;;  %v21560_v56 = vpop.f32.mrb[117].mxu1  ;;  %16511 = vrcp.f32 %v6710_v47 }
 0xb60   : > { %16513 = vrcp.f32 %v21478_v37 }
 0xb61   : > { %15094 = vmatprep.subr.bf16.mxu0 %v15093_v32  ;;  %16515 = vrcp.f32 %v21537_v11 }
 0xb62   : > { %v6716_v9 = vpop.xlane.xlu1 %6715  ;;  %v21564_v61 = vpop.f32.mrb[118].mxu1  ;;  %15096 = vmatpush3.bf16.msra.mxu0 %v15093_v32  ;;  %16517 = vrcp.f32 %v21521_v33 }
 0xb63   : > { %v21566_v21 = vpop.f32.mrb[119].mxu1 }
 0xb66   : > { %v15924_v10 = vpop.permute.xlu1 %15923 }
 0xb67   : > { %v15926_v34 = vunpack.i.h.bf16 %v15924_v10  ;;  %v15925_v27 = vunpack.i.l.bf16 %v15924_v10 }
 0xb69   : > { %v15089_v23 = vpack.c.bf16 %v15926_v34, %v15925_v27  ;;  %v16512_v18 = vpop.eup %16511 }
 0xb6a   : > { %v6980_v28 = vmul.f32 %v16512_v18, %v21466_v50  ;;  %v16514_v49 = vpop.eup %16513 }
 0xb6b   : > { %15090 = vmatprep.subr.bf16.mxu1 %v15089_v23  ;;  %v16516_v37 = vpop.eup %16515  ;;  %v6977_v57 = vmul.f32 %v16514_v49, %v21353_v58 }
 0xb6c   : > { %15092 = vmatpush3.bf16.msra.mxu1 %v15089_v23  ;;  %v16518_v33 = vpop.eup %16517 }
 0xb6d   : > { %v6979_v58 = vmul.f32 %v16518_v33, %v21397_v46 }
 0xb6f   : > { %14222 = vmatmul.mubr.msk.f32.vlgmr.msra.gmra.mrb[124].mxu1 %vm431_vm0, %v6973_v1 }
 0xb70   : > { %14224 = vmatprep.mubr.msk.f32.mxu1 %vm431_vm0, %v6974_v5 }
 0xb73   : > { %14225 = vmatmul.mubr.msk.f32.gmra.mrb[126].mxu1 %vm431_vm0, %v6975_v36  ;;  %v6978_v36 = vmul.f32 %v16516_v37, %v21417_v48 }
 0xb74   : > { %14249 = vmatprep.mubr.msk.f32.mxu1 %vm431_vm0, %v6980_v28 }
 0xb97   : > { %v6722_v47 = vpop.xlane.xlu1 %6721  ;;  %v21577_v32 = vpop.f32.mrb[140].mxu0 }
 0xb98   : > { %v21579_v63 = vpop.f32.mrb[141].mxu0  ;;  %16519 = vrcp.f32 %v6722_v47 }
 0xb99   : > { %16521 = vrcp.f32 %v21523_v42 }
 0xb9a   : > { %16523 = vrcp.f32 %v6716_v9 }
 0xb9b   : > { %v6728_v8 = vpop.xlane.xlu1 %6727  ;;  %v21583_v10 = vpop.f32.mrb[142].mxu0  ;;  %16525 = vrcp.f32 %v6719_v17 }
 0xb9c   : > { %v21585_v34 = vpop.f32.mrb[143].mxu0  ;;  %16527 = vrcp.f32 %v21556_v55  ;;  %v6731_v17 = vpop.xlane.xlu0 %6730 }
 0xb9d   : > { %16529 = vrcp.f32 %v6728_v8 }
 0xb9e   : > { %16531 = vrcp.f32 %v6731_v17  ;;  %v10479_v17 = vld [vmem:[#allocation8 + $0x18] sm:$0xff] }
 0xb9f   : > { %v15934_v39 = vpop.permute.xlu1 %15933 }
 0xba0   : > { %v15936_v50 = vunpack.i.h.bf16 %v15934_v39  ;;  %v15935_v27 = vunpack.i.l.bf16 %v15934_v39 }
 0xba2   : > { %v15097_v23 = vpack.c.bf16 %v15936_v50, %v15935_v27  ;;  %v16520_v28 = vpop.eup %16519  ;;  %v10477_v27 = vld [vmem:[#allocation8 + $0x8] sm:$0xff] }
 0xba3   : > { %v15939_v4 = vpop.permute.xlu1 %15938  ;;  %v16522_v39 = vpop.eup %16521  ;;  %v6984_v48 = vmul.f32 %v16520_v28, %v21513_v7 }
 0xba4   : > { %v15941_v1 = vunpack.i.h.bf16 %v15939_v4  ;;  %v15940_v11 = vunpack.i.l.bf16 %v15939_v4  ;;  %15098 = vmatprep.subr.bf16.mxu0 %v15097_v23  ;;  %v6981_v55 = vmul.f32 %v16522_v39, %v21406_v6  ;;  %v23037_v39 = vld [vmem:[#allocation37_spill] sm:$0xff] }
 0xba5   : > { %15100 = vmatpush3.bf16.msra.mxu0 %v15097_v23  ;;  %v16524_v23 = vpop.eup %16523 }
 0xba6   : > { %v15101_v5 = vpack.c.bf16 %v15941_v1, %v15940_v11  ;;  %v16526_v46 = vpop.eup %16525  ;;  %v6982_v1 = vmul.f32 %v16524_v23, %v21470_v62  ;;  %v23027_v62 = vld [vmem:[#allocation152_spill] sm:$0xff]  ;;  %v23046_v23 = vld [vmem:[#allocation82_spill] sm:$0xff] }
 0xba7   : > { %v15944_v18 = vpop.permute.xlu1 %15943  ;;  %v6983_v33 = vmul.f32 %v16526_v46, %v21450_v38  ;;  %v16528_v6 = vpop.eup %16527  ;;  %v23028_v38 = vld [vmem:[#allocation86_spill] sm:$0xff]  ;;  %v23057_v46 = vld [vmem:[#allocation101_spill] sm:$0xff] }
 0xba8   : > { %v15946_v47 = vunpack.i.h.bf16 %v15944_v18  ;;  %v15945_v42 = vunpack.i.l.bf16 %v15944_v18  ;;  %14236 = vmatmul.mubr.msk.f32.vlgmr.msra.gmra.mrb[148].mxu0 %vm431_vm0, %v6977_v57  ;;  %15102 = vmatprep.subr.bf16.mxu1 %v15101_v5  ;;  %v10478_v57 = vld [vmem:[#allocation8 + $0x10] sm:$0xff]  ;;  %v10476_v18 = vld [vmem:[#allocation8] sm:$0xff]  ;;  %v6985_v28 = vmul.f32 %v16528_v6, %v21459_v31  ;;  %v23029_v31 = vld [vmem:[#allocation87_spill] sm:$0xff] }
 0xba9   : > { %14238 = vmatprep.mubr.msk.f32.mxu0 %vm431_vm0, %v6978_v36  ;;  %15104 = vmatpush3.bf16.msra.mxu1 %v15101_v5  ;;  %v16530_v36 = vpop.eup %16529 }
 0xbaa   : > { %v15105_v9 = vpack.c.bf16 %v15946_v47, %v15945_v42  ;;  %v16532_v47 = vpop.eup %16531  ;;  %v6986_v42 = vmul.f32 %v16530_v36, %v21517_v44  ;;  %v23030_v44 = vld [vmem:[#allocation41_spill] sm:$0xff] }
 0xbab   : > { %v15949_v50 = vpop.permute.xlu1 %15948  ;;  %v23077_v36 = vld [vmem:[#allocation121_spill] sm:$0xff] }
 0xbac   : > { %v15951_v49 = vunpack.i.h.bf16 %v15949_v50  ;;  %v15950_v4 = vunpack.i.l.bf16 %v15949_v50  ;;  %14239 = vmatmul.mubr.msk.f32.gmra.mrb[150].mxu0 %vm431_vm0, %v6979_v58  ;;  %15106 = vmatprep.subr.bf16.mxu1 %v15105_v9  ;;  %v23035_v58 = vld [vmem:[#allocation74_spill] sm:$0xff]  ;;  %v23040_v50 = vld [vmem:[#allocation171_spill] sm:$0xff] }
 0xbad   : > { %15108 = vmatpush3.bf16.msra.mxu1 %v15105_v9  ;;  %14263 = vmatprep.mubr.msk.f32.mxu0 %vm431_vm0, %v6984_v48  ;;  %v6987_v9 = vmul.f32 %v16532_v47, %v21501_v30  ;;  %v23032_v30 = vld [vmem:[#allocation144_spill] sm:$0xff]  ;;  %v23041_v48 = vld [vmem:[#allocation165_spill] sm:$0xff]  ;;  %v23080_v47 = vld [vmem:[#allocation66_spill] sm:$0xff] }
 0xbae   : > { %v15109_v8 = vpack.c.bf16 %v15951_v49, %v15950_v4  ;;  %15117 = vmatprep.subr.mxu1 %v10477_v27  ;;  %v23050_v49 = vld [vmem:[#allocation127_spill] sm:$0xff]  ;;  %v23052_v4 = vld [vmem:[#allocation60_spill] sm:$0xff] }
 0xbaf   : > { %v15954_v37 = vpop.permute.xlu1 %15953 }
 0xbb0   : > { %v15956_v7 = vunpack.i.h.bf16 %v15954_v37  ;;  %v15955_v11 = vunpack.i.l.bf16 %v15954_v37  ;;  %14250 = vmatmul.mubr.msk.f32.vlgmr.msra.gmra.mrb[128].mxu1 %vm431_vm0, %v6981_v55  ;;  %15110 = vmatprep.subr.bf16.mxu0 %v15109_v8  ;;  %v23055_v55 = vld [vmem:[#allocation47_spill] sm:$0xff]  ;;  %v23058_v37 = vld [vmem:[#allocation180_spill] sm:$0xff] }
 0xbb1   : > { %14252 = vmatprep.mubr.msk.f32.mxu1 %vm431_vm0, %v6982_v1  ;;  %15112 = vmatpush3.bf16.msra.mxu0 %v15109_v8  ;;  %v23056_v8 = vld [vmem:[#allocation182_spill] sm:$0xff]  ;;  %v23059_v1 = vld [vmem:[#allocation96_spill] sm:$0xff] }
 0xbb2   : > { %v15113_v5 = vpack.c.bf16 %v15956_v7, %v15955_v11  ;;  %15118 = vmatpush3.msra.mxu1 %v10477_v27  ;;  %v23061_v7 = vld [vmem:[#allocation181_spill] sm:$0xff]  ;;  %v23062_v11 = vld [vmem:[#allocation44_spill] sm:$0xff] }
 0xbb3   : > { %14369 = vmatprep.subr.mxu1 %v10478_v57 }
 0xbb4   : > { %14253 = vmatmul.mubr.msk.f32.gmra.mrb[130].mxu1 %vm431_vm0, %v6983_v33  ;;  %15114 = vmatprep.subr.bf16.mxu0 %v15113_v5  ;;  %v23066_v33 = vld [vmem:[#allocation163_spill] sm:$0xff] }
 0xbb5   : > { %15116 = vmatpush3.bf16.msra.mxu0 %v15113_v5  ;;  %14366 = vmatprep.mubr.msk.f32.mxu1 %vm1715_vm1, %v23027_v62  ;;  %v23064_v5 = vld [vmem:[#allocation32_spill] sm:$0xff]  ;;  %v23078_v62 = vld [vmem:[#allocation155_spill] sm:$0xff] }
 0xbb6   : > { %14269 = vmatprep.subr.mxu0 %v10476_v18 }
 0xbb8   : > { %14264 = vmatmul.mubr.msk.f32.vlgmr.msra.gmra.mrb[152].mxu0 %vm431_vm0, %v6985_v28  ;;  %14367 = vmatmul.mubr.msk.f32.vlgmr.msra.gmra.mrb[132].mxu1 %vm1715_vm1, %v23028_v38  ;;  %v23079_v28 = vld [vmem:[#allocation56_spill] sm:$0xff] }
 0xbb9   : > { %14266 = vmatprep.mubr.msk.f32.mxu0 %vm431_vm0, %v6986_v42  ;;  %14371 = vmatprep.mubr.msk.f32.mxu1 %vm1715_vm1, %v21158_v51  ;;  %v23031_v51 = vld [vmem:[#allocation29_spill] sm:$0xff]  ;;  %v23081_v42 = vld [vmem:[#allocation135_spill] sm:$0xff]  ;;  %v23082_v38 = vld [vmem:[#allocation112_spill] sm:$0xff] }
 0xbba   : > { %14370 = vmatpush3.msra.mxu1 %v10478_v57  ;;  %14270 = vmatpush3.msra.mxu0 %v10476_v18  ;;  %v23063_v57 = vld [vmem:[#allocation93_spill] sm:$0xff]  ;;  %v23076_v18 = vld [vmem:[#allocation110_spill] sm:$0xff] }
 0xbbb   : > { %14419 = vmatprep.subr.mxu1 %v10479_v17  ;;  %14319 = vmatprep.subr.mxu0 %v10477_v27 }
 0xbbc   : > { %14267 = vmatmul.mubr.msk.f32.gmra.mrb[154].mxu0 %vm431_vm0, %v6987_v9  ;;  %14372 = vmatmul.mubr.msk.f32.vlgmr.msra.gmra.mrb[134].mxu1 %vm1715_vm1, %v21156_v3  ;;  %v23033_v3 = vld [vmem:[#allocation148_spill] sm:$0xff]  ;;  %v23084_v9 = vld [vmem:[#allocation117_spill] sm:$0xff] }
 0xbbd   : > { %14271 = vmatprep.mubr.msk.f32.mxu0 %vm1715_vm1, %v23029_v31  ;;  %14374 = vmatprep.mubr.msk.f32.mxu1 %vm1715_vm1, %v21164_v25  ;;  %v23034_v25 = vld [vmem:[#allocation19_spill] sm:$0xff] }
 0xbbe   : > { %14420 = vmatpush3.msra.mxu1 %v10479_v17  ;;  %v23083_v17 = vld [vmem:[#allocation106_spill] sm:$0xff]  ;;  %v23085_v31 = vld [vmem:[#allocation31_spill] sm:$0xff] }
 0xbc0   : > { %14272 = vmatmul.mubr.msk.f32.vlgmr.msra.gmra.mrb[156].mxu0 %vm1715_vm1, %v23030_v44  ;;  %14375 = vmatmul.mubr.msk.f32.gmra.mrb[136].mxu1 %vm1715_vm1, %v23031_v51  ;;  %v23086_v44 = vld [vmem:[#allocation162_spill] sm:$0xff]  ;;  %v23087_v51 = vld [vmem:[#allocation164_spill] sm:$0xff] }
 0xbc1   : > { %14274 = vmatprep.mubr.msk.f32.mxu0 %vm1715_vm1, %v23032_v30  ;;  %14377 = vmatprep.mubr.msk.f32.mxu1 %vm1715_vm1, %v21215_v12  ;;  %v23036_v12 = vld [vmem:[#allocation94_spill] sm:$0xff]  ;;  %v23088_v30 = vld [vmem:[#allocation77_spill] sm:$0xff] }
 0xbc2   : > { %14320 = vmatpush3.msra.mxu0 %v10477_v27  ;;  %v23042_v27 = vld [vmem:[#allocation42_spill] sm:$0xff] }
 0xbc4   : > { %14275 = vmatmul.mubr.msk.f32.gmra.mrb[158].mxu0 %vm1715_vm1, %v23033_v3  ;;  %14378 = vmatmul.mubr.msk.f32.gmra.mrb[138].mxu1 %vm1715_vm1, %v21213_v24  ;;  %v23038_v24 = vld [vmem:[#allocation170_spill] sm:$0xff]  ;;  %v23089_v3 = vld [vmem:[#allocation65_spill] sm:$0xff] }
 0xbc5   : > { %14277 = vmatprep.mubr.msk.f32.mxu0 %vm1715_vm1, %v23034_v25  ;;  %14380 = vmatprep.mubr.msk.f32.mxu1 %vm1715_vm1, %v21225_v60  ;;  %v23090_v25 = vld [vmem:[#allocation126_spill] sm:$0xff] }
 0xbc8   : > { %14278 = vmatmul.mubr.msk.f32.gmra.mrb[160].mxu0 %vm1715_vm1, %v23035_v58  ;;  %14381 = vmatmul.mubr.msk.f32.gmra.mrb[140].mxu1 %vm1715_vm1, %v21221_v26  ;;  %v23039_v26 = vld [vmem:[#allocation134_spill] sm:$0xff]  ;;  %v23091_v58 = vld [vmem:[#allocation81_spill] sm:$0xff] }
 0xbc9   : > { %14280 = vmatprep.mubr.msk.f32.mxu0 %vm1715_vm1, %v23036_v12  ;;  %14383 = vmatprep.mubr.msk.f32.mxu1 %vm1715_vm1, %v21274_v2  ;;  %v23092_v12 = vld [vmem:[#allocation145_spill] sm:$0xff] }
 0xbcc   : > { %14281 = vmatmul.mubr.msk.f32.gmra.mrb[162].mxu0 %vm1715_vm1, %v23037_v39  ;;  %14384 = vmatmul.mubr.msk.f32.gmra.mrb[142].mxu1 %vm1715_vm1, %v21272_v0  ;;  %v23093_v39 = vld [vmem:[#allocation30_spill] sm:$0xff] }
 0xbcd   : > { %14283 = vmatprep.mubr.msk.f32.mxu0 %vm1715_vm1, %v23038_v24  ;;  %14386 = vmatprep.mubr.msk.f32.mxu1 %vm1715_vm1, %v21284_v40  ;;  %v23094_v24 = vld [vmem:[#allocation146_spill] sm:$0xff] }
 0xbd0   : > { %v21654_v60 = vpop.f32.mrb[120].mxu1  ;;  %14284 = vmatmul.mubr.msk.f32.gmra.mrb[164].mxu0 %vm1715_vm1, %v23039_v26  ;;  %14387 = vmatmul.mubr.msk.f32.gmra.mrb[144].mxu1 %vm1715_vm1, %v21282_v16  ;;  %v23043_v16 = vld [vmem:[#allocation131_spill] sm:$0xff]  ;;  %v23096_v26 = vld [vmem:[#allocation76_spill] sm:$0xff] }
 0xbd1   : > { %v9912_v2 = vpop.f32.mrb[121].mxu1  ;;  %14286 = vmatprep.mubr.msk.f32.mxu0 %vm1715_vm1, %v23040_v50  ;;  %14389 = vmatprep.mubr.msk.f32.mxu1 %vm1715_vm1, %v21327_v59  ;;  %v23044_v59 = vld [vmem:[#allocation18_spill] sm:$0xff] }
 0xbd4   : > { %v21664_v0 = vpop.f32.mrb[122].mxu1  ;;  %14287 = vmatmul.mubr.msk.f32.gmra.mrb[166].mxu0 %vm1715_vm1, %v23041_v48  ;;  %14390 = vmatmul.mubr.msk.f32.gmra.mrb[146].mxu1 %vm1715_vm1, %v21325_v43  ;;  %v23045_v43 = vld [vmem:[#allocation140_spill] sm:$0xff] }
 0xbd5   : > { %v9922_v40 = vpop.f32.mrb[123].mxu1  ;;  %14289 = vmatprep.mubr.msk.f32.mxu0 %vm1715_vm1, %v23042_v27  ;;  %14392 = vmatprep.mubr.msk.f32.mxu1 %vm1715_vm1, %v21337_v19  ;;  %v23047_v19 = vld [vmem:[#allocation159_spill] sm:$0xff] }
 0xbd8   : > { %14290 = vmatmul.mubr.msk.f32.gmra.mrb[168].mxu0 %vm1715_vm1, %v23043_v16  ;;  %14393 = vmatmul.mubr.msk.f32.gmra.mrb[148].mxu1 %vm1715_vm1, %v21335_v20  ;;  %v23048_v20 = vld [vmem:[#allocation123_spill] sm:$0xff] }
 0xbd9   : > { %14292 = vmatprep.mubr.msk.f32.mxu0 %vm1715_vm1, %v23044_v59  ;;  %14395 = vmatprep.mubr.msk.f32.mxu1 %vm1715_vm1, %v21380_v41  ;;  %v23049_v41 = vld [vmem:[#allocation20_spill] sm:$0xff] }
 0xbdc   : > { %14293 = vmatmul.mubr.msk.f32.gmra.mrb[170].mxu0 %vm1715_vm1, %v23045_v43  ;;  %14396 = vmatmul.mubr.msk.f32.gmra.mrb[150].mxu1 %vm1715_vm1, %v21378_v53  ;;  %v23051_v53 = vld [vmem:[#allocation158_spill] sm:$0xff] }
 0xbdd   : > { %14295 = vmatprep.mubr.msk.f32.mxu0 %vm1715_vm1, %v23046_v23  ;;  %14398 = vmatprep.mubr.msk.f32.mxu1 %vm1715_vm1, %v21390_v45  ;;  %v23053_v45 = vld [vmem:[#allocation161_spill] sm:$0xff] }
 0xbe0   : > { %14296 = vmatmul.mubr.msk.f32.gmra.mrb[172].mxu0 %vm1715_vm1, %v23047_v19  ;;  %14399 = vmatmul.mubr.msk.f32.gmra.mrb[152].mxu1 %vm1715_vm1, %v21388_v13  ;;  %v23054_v13 = vld [vmem:[#allocation156_spill] sm:$0xff] }
 0xbe1   : > { %14298 = vmatprep.mubr.msk.f32.mxu0 %vm1715_vm1, %v23048_v20  ;;  %14401 = vmatprep.mubr.msk.f32.mxu1 %vm1715_vm1, %v23049_v41 }
 0xbe4   : > { %14299 = vmatmul.mubr.msk.f32.gmra.mrb[174].mxu0 %vm1715_vm1, %v23050_v49  ;;  %14402 = vmatmul.mubr.msk.f32.gmra.mrb[154].mxu1 %vm1715_vm1, %v23051_v53 }
 0xbe5   : > { %14301 = vmatprep.mubr.msk.f32.mxu0 %vm1715_vm1, %v23052_v4  ;;  %14404 = vmatprep.mubr.msk.f32.mxu1 %vm1715_vm1, %v21443_v22  ;;  %v23060_v22 = vld [vmem:[#allocation45_spill] sm:$0xff] }
 0xbe8   : > { %14302 = vmatmul.mubr.msk.f32.gmra.mrb[176].mxu0 %vm1715_vm1, %v23053_v45  ;;  %14405 = vmatmul.mubr.msk.f32.gmra.mrb[156].mxu1 %vm1715_vm1, %v23054_v13 }
 0xbe9   : > { %14304 = vmatprep.mubr.msk.f32.mxu0 %vm1715_vm1, %v23055_v55  ;;  %14407 = vmatprep.mubr.msk.f32.mxu1 %vm1715_vm1, %v23056_v8 }
 0xbec   : > { %14305 = vmatmul.mubr.msk.f32.gmra.mrb[178].mxu0 %vm1715_vm1, %v23057_v46  ;;  %14408 = vmatmul.mubr.msk.f32.gmra.mrb[158].mxu1 %vm1715_vm1, %v23058_v37 }
 0xbed   : > { %14307 = vmatprep.mubr.msk.f32.mxu0 %vm1715_vm1, %v23059_v1  ;;  %14410 = vmatprep.mubr.msk.f32.mxu1 %vm1715_vm1, %v21494_v15  ;;  %v23065_v15 = vld [vmem:[#allocation62_spill] sm:$0xff] }
 0xbee   : > { %v21855_v1 = vld [vmem:[%s23098_s21] ss:$0 sm:$0xff] }
 0xbf0   : > { %14308 = vmatmul.mubr.msk.f32.gmra.mrb[180].mxu0 %vm1715_vm1, %v23060_v22  ;;  %14411 = vmatmul.mubr.msk.f32.gmra.mrb[160].mxu1 %vm1715_vm1, %v23061_v7 }
 0xbf1   : > { %14310 = vmatprep.mubr.msk.f32.mxu0 %vm1715_vm1, %v23062_v11  ;;  %14413 = vmatprep.mubr.msk.f32.mxu1 %vm1715_vm1, %v21531_v35  ;;  %v23067_v35 = vld [vmem:[#allocation49_spill] sm:$0xff] }
 0xbf4   : > { %14311 = vmatmul.mubr.msk.f32.gmra.mrb[182].mxu0 %vm1715_vm1, %v23063_v57  ;;  %14414 = vmatmul.mubr.msk.f32.gmra.mrb[162].mxu1 %vm1715_vm1, %v21529_v52  ;;  %v23068_v52 = vld [vmem:[#allocation52_spill] sm:$0xff] }
 0xbf5   : > { %14313 = vmatprep.mubr.msk.f32.mxu0 %vm1715_vm1, %v23064_v5  ;;  %14416 = vmatprep.mubr.msk.f32.mxu1 %vm1715_vm1, %v21541_v54  ;;  %v23069_v54 = vld [vmem:[#allocation109_spill] sm:$0xff] }
 0xbf8   : > { %14314 = vmatmul.mubr.msk.f32.gmra.mrb[184].mxu0 %vm1715_vm1, %v23065_v15  ;;  %14417 = vmatmul.mubr.msk.f32.gmra.mrb[132].mxu1 %vm1715_vm1, %v21539_v29  ;;  %v23070_v29 = vld [vmem:[#allocation69_spill] sm:$0xff] }
 0xbf9   : > { %14316 = vmatprep.mubr.msk.f32.mxu0 %vm1715_vm1, %v23066_v33  ;;  %14421 = vmatprep.mubr.msk.f32.mxu1 %vm1715_vm1, %v21560_v56  ;;  %v23071_v56 = vld [vmem:[#allocation51_spill] sm:$0xff] }
 0xbfc   : > { %14317 = vmatmul.mubr.msk.f32.gmra.mrb[186].mxu0 %vm1715_vm1, %v23067_v35  ;;  %14422 = vmatmul.mubr.msk.f32.vlgmr.msra.gmra.mrb[134].mxu1 %vm1715_vm1, %v21558_v14  ;;  %v23072_v14 = vld [vmem:[#allocation150_spill] sm:$0xff] }
 0xbfd   : > { %14321 = vmatprep.mubr.msk.f32.mxu0 %vm1715_vm1, %v23068_v52  ;;  %14424 = vmatprep.mubr.msk.f32.mxu1 %vm1715_vm1, %v21566_v21  ;;  %v23073_v21 = vld [vmem:[#allocation168_spill] sm:$0xff] }
 0xc00   : > { %14322 = vmatmul.mubr.msk.f32.vlgmr.msra.gmra.mrb[156].mxu0 %vm1715_vm1, %v23069_v54  ;;  %14425 = vmatmul.mubr.msk.f32.gmra.mrb[136].mxu1 %vm1715_vm1, %v21564_v61 }
 0xc01   : > { %14324 = vmatprep.mubr.msk.f32.mxu0 %vm1715_vm1, %v23070_v29  ;;  %14427 = vmatprep.mubr.msk.f32.mxu1 %vm1715_vm1, %v21579_v63  ;;  %v23074_v63 = vld [vmem:[#allocation50_spill] sm:$0xff] }
 0xc04   : > { %14325 = vmatmul.mubr.msk.f32.gmra.mrb[158].mxu0 %vm1715_vm1, %v23071_v56  ;;  %14428 = vmatmul.mubr.msk.f32.gmra.mrb[138].mxu1 %vm1715_vm1, %v21577_v32  ;;  %v23075_v32 = vld [vmem:[#allocation111_spill] sm:$0xff] }
 0xc05   : > { %14327 = vmatprep.mubr.msk.f32.mxu0 %vm1715_vm1, %v23072_v14  ;;  %14430 = vmatprep.mubr.msk.f32.mxu1 %vm1715_vm1, %v21585_v34 }
 0xc08   : > { %14328 = vmatmul.mubr.msk.f32.gmra.mrb[160].mxu0 %vm1715_vm1, %v23073_v21  ;;  %14431 = vmatmul.mubr.msk.f32.gmra.mrb[140].mxu1 %vm1715_vm1, %v21583_v10 }
 0xc09   : > { %v14209_v61 = vpop.f32.mrb[144].mxu0  ;;  %14330 = vmatprep.mubr.msk.f32.mxu0 %vm1715_vm1, %v23074_v63  ;;  %14433 = vmatprep.mubr.msk.f32.mxu1 %vm1715_vm1, %v9912_v2  ;;  %v23097_v2 = vld [vmem:[#allocation167_spill] sm:$0xff] }
 0xc0a   : > { %v10021_v6 = vpop.f32.mrb[145].mxu0 }
 0xc0c   : > { %14331 = vmatmul.mubr.msk.f32.gmra.mrb[162].mxu0 %vm1715_vm1, %v23075_v32  ;;  %14434 = vmatmul.mubr.msk.f32.gmra.mrb[142].mxu1 %vm1715_vm1, %v21654_v60  ;;  %v23095_v60 = vld [vmem:[#allocation26_spill] sm:$0xff] }
 0xc0d   : > { %v14212_v34 = vpop.f32.mrb[146].mxu0  ;;  %14333 = vmatprep.mubr.msk.f32.mxu0 %vm1715_vm1, %v23076_v18  ;;  %14436 = vmatprep.mubr.msk.f32.mxu1 %vm1715_vm1, %v9922_v40 }
 0xc0e   : > { %v10031_v10 = vpop.f32.mrb[147].mxu0 }
 0xc10   : > { %14334 = vmatmul.mubr.msk.f32.gmra.mrb[164].mxu0 %vm1715_vm1, %v23077_v36  ;;  %14437 = vmatmul.mubr.msk.f32.gmra.mrb[144].mxu1 %vm1715_vm1, %v21664_v0 }
 0xc11   : > { %14336 = vmatprep.mubr.msk.f32.mxu0 %vm1715_vm1, %v23078_v62  ;;  %14439 = vmatprep.mubr.msk.f32.mxu1 %vm1715_vm1, %v10021_v6 }
 0xc14   : > { %14337 = vmatmul.mubr.msk.f32.gmra.mrb[166].mxu0 %vm1715_vm1, %v23079_v28  ;;  %14440 = vmatmul.mubr.msk.f32.gmra.mrb[146].mxu1 %vm1715_vm1, %v14209_v61 }
 0xc15   : > { %14339 = vmatprep.mubr.msk.f32.mxu0 %vm1715_vm1, %v23080_v47  ;;  %14442 = vmatprep.mubr.msk.f32.mxu1 %vm1715_vm1, %v10031_v10 }
 0xc18   : > { %14340 = vmatmul.mubr.msk.f32.gmra.mrb[168].mxu0 %vm1715_vm1, %v23081_v42  ;;  %14443 = vmatmul.mubr.msk.f32.gmra.mrb[148].mxu1 %vm1715_vm1, %v14212_v34 }
 0xc19   : > { %14342 = vmatprep.mubr.msk.f32.mxu0 %vm1715_vm1, %v23082_v38 }
 0xc1c   : > { %14343 = vmatmul.mubr.msk.f32.gmra.mrb[170].mxu0 %vm1715_vm1, %v23083_v17 }
 0xc1d   : > { %14345 = vmatprep.mubr.msk.f32.mxu0 %vm1715_vm1, %v23084_v9 }
 0xc20   : > { %14346 = vmatmul.mubr.msk.f32.gmra.mrb[172].mxu0 %vm1715_vm1, %v23085_v31 }
 0xc21   : > { %14348 = vmatprep.mubr.msk.f32.mxu0 %vm1715_vm1, %v23086_v44 }
 0xc24   : > { %14349 = vmatmul.mubr.msk.f32.gmra.mrb[174].mxu0 %vm1715_vm1, %v23087_v51 }
 0xc25   : > { %14351 = vmatprep.mubr.msk.f32.mxu0 %vm1715_vm1, %v23088_v30 }
 0xc28   : > { %14352 = vmatmul.mubr.msk.f32.gmra.mrb[176].mxu0 %vm1715_vm1, %v23089_v3 }
 0xc29   : > { %14354 = vmatprep.mubr.msk.f32.mxu0 %vm1715_vm1, %v23090_v25 }
 0xc2c   : > { %14355 = vmatmul.mubr.msk.f32.gmra.mrb[178].mxu0 %vm1715_vm1, %v23091_v58 }
 0xc2d   : > { %14357 = vmatprep.mubr.msk.f32.mxu0 %vm1715_vm1, %v23092_v12 }
 0xc30   : > { %14358 = vmatmul.mubr.msk.f32.gmra.mrb[180].mxu0 %vm1715_vm1, %v23093_v39 }
 0xc31   : > { %14360 = vmatprep.mubr.msk.f32.mxu0 %vm1715_vm1, %v23094_v24 }
 0xc34   : > { %14361 = vmatmul.mubr.msk.f32.gmra.mrb[182].mxu0 %vm1715_vm1, %v23095_v60 }
 0xc35   : > { %14363 = vmatprep.mubr.msk.f32.mxu0 %vm1715_vm1, %v23096_v26 }
 0xc38   : > { %14364 = vmatmul.mubr.msk.f32.gmra.mrb[184].mxu0 %vm1715_vm1, %v23097_v2 }
 0xc42   : > { %v14223_v50 = vpop.f32.mrb[124].mxu1 }
 0xc43   : > { %v10130_v0 = vpop.f32.mrb[125].mxu1 }
 0xc44   : > { %14445 = vmatprep.mubr.msk.f32.mxu1 %vm1715_vm1, %v10130_v0 }
 0xc45   : > { %14446 = vmatmul.mubr.msk.f32.gmra.mrb[150].mxu1 %vm1715_vm1, %v14223_v50 }
 0xc46   : > { %v14226_v48 = vpop.f32.mrb[126].mxu1 }
 0xc47   : > { %v10140_v40 = vpop.f32.mrb[127].mxu1 }
 0xc48   : > { %14448 = vmatprep.mubr.msk.f32.mxu1 %vm1715_vm1, %v10140_v40 }
 0xc49   : > { %14449 = vmatmul.mubr.msk.f32.gmra.mrb[152].mxu1 %vm1715_vm1, %v14226_v48 }
 0xc7b   : > { %v14237_v27 = vpop.f32.mrb[148].mxu0 }
 0xc7c   : > { %v10239_v16 = vpop.f32.mrb[149].mxu0 }
 0xc7d   : > { %14451 = vmatprep.mubr.msk.f32.mxu1 %vm1715_vm1, %v10239_v16 }
 0xc7e   : > { %14452 = vmatmul.mubr.msk.f32.gmra.mrb[154].mxu1 %vm1715_vm1, %v14237_v27 }
 0xc7f   : > { %v14240_v59 = vpop.f32.mrb[150].mxu0 }
 0xc80   : > { %v10249_v43 = vpop.f32.mrb[151].mxu0 }
 0xc81   : > { %14454 = vmatprep.mubr.msk.f32.mxu1 %vm1715_vm1, %v10249_v43 }
 0xc82   : > { %14455 = vmatmul.mubr.msk.f32.gmra.mrb[156].mxu1 %vm1715_vm1, %v14240_v59 }
 0xc83   : > { %v14251_v23 = vpop.f32.mrb[128].mxu1 }
 0xc84   : > { %v10348_v19 = vpop.f32.mrb[129].mxu1 }
 0xc85   : > { %14457 = vmatprep.mubr.msk.f32.mxu1 %vm1715_vm1, %v10348_v19 }
 0xc86   : > { %14458 = vmatmul.mubr.msk.f32.gmra.mrb[158].mxu1 %vm1715_vm1, %v14251_v23 }
 0xc87   : > { %v14254_v20 = vpop.f32.mrb[130].mxu1 }
 0xc88   : > { %v10358_v41 = vpop.f32.mrb[131].mxu1 }
 0xc89   : > { %14460 = vmatprep.mubr.msk.f32.mxu1 %vm1715_vm1, %v10358_v41 }
 0xc8a   : > { %14461 = vmatmul.mubr.msk.f32.gmra.mrb[160].mxu1 %vm1715_vm1, %v14254_v20 }
 0xc8b   : > { %v14265_v49 = vpop.f32.mrb[152].mxu0 }
 0xc8c   : > { %v10457_v53 = vpop.f32.mrb[153].mxu0 }
 0xc8d   : > { %14463 = vmatprep.mubr.msk.f32.mxu1 %vm1715_vm1, %v10457_v53 }
 0xc8e   : > { %14464 = vmatmul.mubr.msk.f32.gmra.mrb[162].mxu1 %vm1715_vm1, %v14265_v49 }
 0xc8f   : > { %v14268_v4 = vpop.f32.mrb[154].mxu0 }
 0xc90   : > { %v10467_v45 = vpop.f32.mrb[155].mxu0 }
 0xc91   : > { %14466 = vmatprep.mubr.msk.f32.mxu1 %vm1715_vm1, %v10467_v45 }
 0xc92   : > { %14467 = vmatmul.mubr.msk.f32.gmra.mrb[132].mxu1 %vm1715_vm1, %v14268_v4 }
 0xccf   : > { %v21848_v13 = vpop.f32.mrb[186].mxu0  ;;  %v14423_v55 = vpop.f32.mrb[134].mxu1 }
 0xcd0   : > { %v21850_v8 = vpop.f32.mrb[187].mxu0  ;;  %v11605_v46 = vpop.f32.mrb[135].mxu1 }
 0xcd3   : > { %v14323_v37 = vpop.f32.mrb[156].mxu0  ;;  %v14426_v22 = vpop.f32.mrb[136].mxu1 }
 0xcd4   : > { %v15119_v7 = vadd.f32 %v14423_v55, %v14323_v37  ;;  %v10963_v11 = vpop.f32.mrb[157].mxu0  ;;  %v11615_v57 = vpop.f32.mrb[137].mxu1 }
 0xcd5   : > { %v15120_v5 = vadd.f32 %v11605_v46, %v10963_v11 }
 0xcd6   : > { %v11868_v15 = vadd.f32 %v15119_v7, %v21855_v1 }
 0xcd7   : > { %v11867_v33 = vadd.f32 %v15120_v5, %v21855_v1  ;;  %v14326_v35 = vpop.f32.mrb[158].mxu0  ;;  %v14429_v52 = vpop.f32.mrb[138].mxu1 }
 0xcd8   : > { %11900 = vst.msk [vmem:[%s21861_s22 + $0x8] sm:$0xff] %vm431_vm0, %v11868_v15  ;;  %v15121_v54 = vadd.f32 %v14426_v22, %v14326_v35  ;;  %v10973_v29 = vpop.f32.mrb[159].mxu0  ;;  %v11625_v56 = vpop.f32.mrb[139].mxu1 }
 0xcd9   : > { %11899 = vst.msk [vmem:[%s21861_s22] sm:$0xff] %vm431_vm0, %v11867_v33  ;;  %v15122_v14 = vadd.f32 %v11615_v57, %v10973_v29 }
 0xcda   : > { %v11870_v21 = vadd.f32 %v15121_v54, %v21855_v1 }
 0xcdb   : > { %v11869_v61 = vadd.f32 %v15122_v14, %v21855_v1  ;;  %v14329_v63 = vpop.f32.mrb[160].mxu0  ;;  %v14432_v6 = vpop.f32.mrb[140].mxu1 }
 0xcdc   : > { %11902 = vst.msk [vmem:[%s21861_s22 + $0x18] sm:$0xff] %vm431_vm0, %v11870_v21  ;;  %v15123_v32 = vadd.f32 %v14429_v52, %v14329_v63  ;;  %v10983_v34 = vpop.f32.mrb[161].mxu0  ;;  %v11635_v18 = vpop.f32.mrb[141].mxu1 }
 0xcdd   : > { %11901 = vst.msk [vmem:[%s21861_s22 + $0x10] sm:$0xff] %vm431_vm0, %v11869_v61  ;;  %v15124_v10 = vadd.f32 %v11625_v56, %v10983_v34 }
 0xcde   : > { %v11872_v36 = vadd.f32 %v15123_v32, %v21855_v1 }
 0xcdf   : > { %v11871_v62 = vadd.f32 %v15124_v10, %v21855_v1  ;;  %v14332_v28 = vpop.f32.mrb[162].mxu0  ;;  %v14435_v47 = vpop.f32.mrb[142].mxu1 }
 0xce0   : > { %11904 = vst.msk [vmem:[%s21861_s22 + $0x28] sm:$0xff] %vm431_vm0, %v11872_v36  ;;  %v15125_v42 = vadd.f32 %v14432_v6, %v14332_v28  ;;  %v10993_v38 = vpop.f32.mrb[163].mxu0  ;;  %v11645_v17 = vpop.f32.mrb[143].mxu1 }
 0xce1   : > { %11903 = vst.msk [vmem:[%s21861_s22 + $0x20] sm:$0xff] %vm431_vm0, %v11871_v62  ;;  %v15126_v9 = vadd.f32 %v11635_v18, %v10993_v38 }
 0xce2   : > { %v11874_v31 = vadd.f32 %v15125_v42, %v21855_v1 }
 0xce3   : > { %v11873_v44 = vadd.f32 %v15126_v9, %v21855_v1  ;;  %v14335_v51 = vpop.f32.mrb[164].mxu0  ;;  %v14438_v30 = vpop.f32.mrb[144].mxu1 }
 0xce4   : > { %11906 = vst.msk [vmem:[%s21861_s22 + $0x38] sm:$0xff] %vm431_vm0, %v11874_v31  ;;  %v15127_v3 = vadd.f32 %v14435_v47, %v14335_v51  ;;  %v11003_v25 = vpop.f32.mrb[165].mxu0  ;;  %v11655_v58 = vpop.f32.mrb[145].mxu1 }
 0xce5   : > { %11905 = vst.msk [vmem:[%s21861_s22 + $0x30] sm:$0xff] %vm431_vm0, %v11873_v44  ;;  %v15128_v12 = vadd.f32 %v11645_v17, %v11003_v25 }
 0xce6   : > { %v11876_v39 = vadd.f32 %v15127_v3, %v21855_v1 }
 0xce7   : > { %v11875_v24 = vadd.f32 %v15128_v12, %v21855_v1  ;;  %v14338_v60 = vpop.f32.mrb[166].mxu0  ;;  %v14441_v26 = vpop.f32.mrb[146].mxu1 }
 0xce8   : > { %11908 = vst.msk [vmem:[%s21861_s22 + $0x48] sm:$0xff] %vm431_vm0, %v11876_v39  ;;  %v15129_v2 = vadd.f32 %v14438_v30, %v14338_v60  ;;  %v11013_v50 = vpop.f32.mrb[167].mxu0  ;;  %v11665_v0 = vpop.f32.mrb[147].mxu1 }
 0xce9   : > { %11907 = vst.msk [vmem:[%s21861_s22 + $0x40] sm:$0xff] %vm431_vm0, %v11875_v24  ;;  %v15130_v48 = vadd.f32 %v11655_v58, %v11013_v50 }
 0xcea   : > { %v11878_v40 = vadd.f32 %v15129_v2, %v21855_v1 }
 0xceb   : > { %v11877_v27 = vadd.f32 %v15130_v48, %v21855_v1  ;;  %v14341_v16 = vpop.f32.mrb[168].mxu0  ;;  %v14444_v59 = vpop.f32.mrb[148].mxu1 }
 0xcec   : > { %11910 = vst.msk [vmem:[%s21861_s22 + $0x58] sm:$0xff] %vm431_vm0, %v11878_v40  ;;  %v15131_v43 = vadd.f32 %v14441_v26, %v14341_v16  ;;  %v11023_v23 = vpop.f32.mrb[169].mxu0  ;;  %v11675_v19 = vpop.f32.mrb[149].mxu1 }
 0xced   : > { %11909 = vst.msk [vmem:[%s21861_s22 + $0x50] sm:$0xff] %vm431_vm0, %v11877_v27  ;;  %v15132_v20 = vadd.f32 %v11665_v0, %v11023_v23 }
 0xcee   : > { %v11880_v41 = vadd.f32 %v15131_v43, %v21855_v1 }
 0xcef   : > { %v11879_v49 = vadd.f32 %v15132_v20, %v21855_v1  ;;  %v14344_v53 = vpop.f32.mrb[170].mxu0 }
 0xcf0   : > { %11912 = vst.msk [vmem:[%s21861_s22 + $0x68] sm:$0xff] %vm431_vm0, %v11880_v41  ;;  %v15133_v4 = vadd.f32 %v14444_v59, %v14344_v53  ;;  %v11033_v45 = vpop.f32.mrb[171].mxu0 }
 0xcf1   : > { %11911 = vst.msk [vmem:[%s21861_s22 + $0x60] sm:$0xff] %vm431_vm0, %v11879_v49  ;;  %v15134_v55 = vadd.f32 %v11675_v19, %v11033_v45 }
 0xcf2   : > { %v11882_v46 = vadd.f32 %v15133_v4, %v21855_v1 }
 0xcf3   : > { %v11881_v37 = vadd.f32 %v15134_v55, %v21855_v1  ;;  %v14347_v22 = vpop.f32.mrb[172].mxu0 }
 0xcf4   : > { %11914 = vst.msk [vmem:[%s21861_s22 + $0x78] sm:$0xff] %vm431_vm0, %v11882_v46  ;;  %v11043_v7 = vpop.f32.mrb[173].mxu0 }
 0xcf5   : > { %11913 = vst.msk [vmem:[%s21861_s22 + $0x70] sm:$0xff] %vm431_vm0, %v11881_v37 }
 0xcf7   : > { %v14350_v11 = vpop.f32.mrb[174].mxu0 }
 0xcf8   : > { %v11053_v57 = vpop.f32.mrb[175].mxu0 }
 0xcfb   : > { %v14353_v5 = vpop.f32.mrb[176].mxu0 }
 0xcfc   : > { %v11063_v15 = vpop.f32.mrb[177].mxu0 }
 0xcff   : > { %v14356_v33 = vpop.f32.mrb[178].mxu0 }
 0xd00   : > { %v11073_v35 = vpop.f32.mrb[179].mxu0 }
 0xd03   : > { %v14359_v52 = vpop.f32.mrb[180].mxu0 }
 0xd04   : > { %v11083_v54 = vpop.f32.mrb[181].mxu0 }
 0xd07   : > { %v14362_v29 = vpop.f32.mrb[182].mxu0 }
 0xd08   : > { %v11093_v56 = vpop.f32.mrb[183].mxu0 }
 0xd0b   : > { %v14365_v14 = vpop.f32.mrb[184].mxu0 }
 0xd0c   : > { %v11103_v21 = vpop.f32.mrb[185].mxu0 }
 0xd18   : > { %v14447_v61 = vpop.f32.mrb[150].mxu1 }
 0xd19   : > { %v15135_v63 = vadd.f32 %v14447_v61, %v14347_v22  ;;  %v11685_v6 = vpop.f32.mrb[151].mxu1 }
 0xd1a   : > { %v15136_v32 = vadd.f32 %v11685_v6, %v11043_v7 }
 0xd1b   : > { %v11884_v34 = vadd.f32 %v15135_v63, %v21855_v1 }
 0xd1c   : > { %v11883_v18 = vadd.f32 %v15136_v32, %v21855_v1  ;;  %v14450_v10 = vpop.f32.mrb[152].mxu1 }
 0xd1d   : > { %11916 = vst.msk [vmem:[%s21861_s22 + $0x88] sm:$0xff] %vm431_vm0, %v11884_v34  ;;  %v15137_v36 = vadd.f32 %v14450_v10, %v14350_v11  ;;  %v11695_v62 = vpop.f32.mrb[153].mxu1 }
 0xd1e   : > { %11915 = vst.msk [vmem:[%s21861_s22 + $0x80] sm:$0xff] %vm431_vm0, %v11883_v18  ;;  %v15138_v28 = vadd.f32 %v11695_v62, %v11053_v57 }
 0xd1f   : > { %v11886_v47 = vadd.f32 %v15137_v36, %v21855_v1 }
 0xd20   : > { %v11885_v42 = vadd.f32 %v15138_v28, %v21855_v1 }
 0xd21   : > { %11918 = vst.msk [vmem:[%s21861_s22 + $0x98] sm:$0xff] %vm431_vm0, %v11886_v47 }
 0xd22   : > { %11917 = vst.msk [vmem:[%s21861_s22 + $0x90] sm:$0xff] %vm431_vm0, %v11885_v42 }
 0xd51   : > { %v14453_v38 = vpop.f32.mrb[154].mxu1 }
 0xd52   : > { %v15139_v17 = vadd.f32 %v14453_v38, %v14353_v5  ;;  %v11705_v9 = vpop.f32.mrb[155].mxu1 }
 0xd53   : > { %v15140_v31 = vadd.f32 %v11705_v9, %v11063_v15 }
 0xd54   : > { %v11888_v44 = vadd.f32 %v15139_v17, %v21855_v1 }
 0xd55   : > { %v11887_v51 = vadd.f32 %v15140_v31, %v21855_v1  ;;  %v14456_v30 = vpop.f32.mrb[156].mxu1 }
 0xd56   : > { %11920 = vst.msk [vmem:[%s21861_s22 + $0xa8] sm:$0xff] %vm431_vm0, %v11888_v44  ;;  %v15141_v3 = vadd.f32 %v14456_v30, %v14356_v33  ;;  %v11715_v25 = vpop.f32.mrb[157].mxu1 }
 0xd57   : > { %11919 = vst.msk [vmem:[%s21861_s22 + $0xa0] sm:$0xff] %vm431_vm0, %v11887_v51  ;;  %v15142_v58 = vadd.f32 %v11715_v25, %v11073_v35 }
 0xd58   : > { %v11890_v12 = vadd.f32 %v15141_v3, %v21855_v1 }
 0xd59   : > { %v11889_v39 = vadd.f32 %v15142_v58, %v21855_v1  ;;  %v14459_v24 = vpop.f32.mrb[158].mxu1 }
 0xd5a   : > { %11922 = vst.msk [vmem:[%s21861_s22 + $0xb8] sm:$0xff] %vm431_vm0, %v11890_v12  ;;  %v15143_v60 = vadd.f32 %v14459_v24, %v14359_v52  ;;  %v11725_v26 = vpop.f32.mrb[159].mxu1 }
 0xd5b   : > { %11921 = vst.msk [vmem:[%s21861_s22 + $0xb0] sm:$0xff] %vm431_vm0, %v11889_v39  ;;  %v15144_v2 = vadd.f32 %v11725_v26, %v11083_v54 }
 0xd5c   : > { %v11892_v50 = vadd.f32 %v15143_v60, %v21855_v1 }
 0xd5d   : > { %v11891_v0 = vadd.f32 %v15144_v2, %v21855_v1  ;;  %v14462_v48 = vpop.f32.mrb[160].mxu1 }
 0xd5e   : > { %11924 = vst.msk [vmem:[%s21861_s22 + $0xc8] sm:$0xff] %vm431_vm0, %v11892_v50  ;;  %v15145_v40 = vadd.f32 %v14462_v48, %v14362_v29  ;;  %v11735_v27 = vpop.f32.mrb[161].mxu1 }
 0xd5f   : > { %11923 = vst.msk [vmem:[%s21861_s22 + $0xc0] sm:$0xff] %vm431_vm0, %v11891_v0  ;;  %v15146_v16 = vadd.f32 %v11735_v27, %v11093_v56 }
 0xd60   : > { %v11894_v59 = vadd.f32 %v15145_v40, %v21855_v1 }
 0xd61   : > { %v11893_v43 = vadd.f32 %v15146_v16, %v21855_v1  ;;  %v14465_v23 = vpop.f32.mrb[162].mxu1 }
 0xd62   : > { %11926 = vst.msk [vmem:[%s21861_s22 + $0xd8] sm:$0xff] %vm431_vm0, %v11894_v59  ;;  %v15147_v19 = vadd.f32 %v14465_v23, %v14365_v14  ;;  %v11745_v20 = vpop.f32.mrb[163].mxu1 }
 0xd63   : > { %11925 = vst.msk [vmem:[%s21861_s22 + $0xd0] sm:$0xff] %vm431_vm0, %v11893_v43  ;;  %v15148_v41 = vadd.f32 %v11745_v20, %v11103_v21 }
 0xd64   : > { %v11896_v49 = vadd.f32 %v15147_v19, %v21855_v1 }
 0xd65   : > { %v11895_v53 = vadd.f32 %v15148_v41, %v21855_v1  ;;  %v14468_v4 = vpop.f32.mrb[132].mxu1 }
 0xd66   : > { %11928 = vst.msk [vmem:[%s21861_s22 + $0xe8] sm:$0xff] %vm431_vm0, %v11896_v49  ;;  %v15149_v45 = vadd.f32 %v14468_v4, %v21848_v13  ;;  %v11755_v55 = vpop.f32.mrb[133].mxu1 }
 0xd67   : > { %11927 = vst.msk [vmem:[%s21861_s22 + $0xe0] sm:$0xff] %vm431_vm0, %v11895_v53  ;;  %v15150_v46 = vadd.f32 %v11755_v55, %v21850_v8 }
 0xd68   : > { %v11898_v37 = vadd.f32 %v15149_v45, %v21855_v1 }
 0xd69   : > { %v11897_v22 = vadd.f32 %v15150_v46, %v21855_v1 }
 0xd6a   : > { %11930 = vst.msk [vmem:[%s21861_s22 + $0xf8] sm:$0xff] %vm431_vm0, %v11898_v37 }
 0xd6b   : > { %11929 = vst.msk [vmem:[%s21861_s22 + $0xf0] sm:$0xff] %vm431_vm0, %v11897_v22 }
 0xd6c   : > { %16660 = shalt.err (!%p16657_p0)
}
 0xd6d   : > { %s16661_s30 = scalar_lea.hbm %s21959_s14, 4096  ;;  %s16665_s22 = scalar_lea.hbm %s23100_s11, 8192 }
 0xd6e   : > { %p16662_p4 = scmp.ne.s32.totalorder %s21959_s14, %s16661_s30  ;;  %p16666_p12 = scmp.lt.u32.totalorder %s21959_s14, %s23100_s11 }
 0xd6f   : > { %p16667_p1 = scmp.lt.u32.totalorder %s16665_s22, %s16661_s30  ;;  %p16669_p13 = scmp.lt.u32.totalorder %s16661_s30, %s21959_s14 }
 0xd70   : > { %p16663_p2 = pnand %p16662_p4, %p16958_p10 }
 0xd71   : > { %p16668_p11 = por %p16667_p1, %p16666_p12 }
 0xd72   : > { %p16664_p8 = pneg %p16663_p2 }
 0xd73   : > { %p16670_p6 = por %p16669_p13, %p16668_p11 }
 0xd75   : > { %p16671_p3 = pnand %p16670_p6, %p16664_p8 }
 0xd77   : > { %16674 = shalt.err (!%p16671_p3)
}
 0xd78   : > { %s16751_s17 = smov 128   ;;  %s16752_s26 = smov 8  }
 0xd79   : > { %15229 = dma.vmem_to_hbm [thread:$0]  (%p16958_p10), %s21961_s15, 4096, %s21959_s14, %s11932_s19, %s16751_s17, %s16751_s17, %s16752_s26  }
 0xd7a PF: > { %s23101_s7 = sld [smem:[#allocation15_spill]]  ;;  %s23102_s23 = sld [smem:[#allocation17_spill]] }
 0xd7b   : > { %p23104_p7 = scmp.ge.s32.totalorder %s16737_s10, 2 }
 0xd80   : > { %s11963_s27 = sand.u32 1, %s23101_s7   ;;  %p23103_p5 = scmp.ne.s32.totalorder %s23102_s23, 0 }
 0xd81   : > { %s11964_s25 = scalar_lea.sflag [#allocation4], %s11963_s27 }
 0xd82   : > { %p15246_p9 = pnand %p23104_p7, %p23103_p5 }
 0xd84   : > { %16712 = dma.done.wait (!%p15246_p9), %s11964_s25, 4096  }
 0xd85   : > { %16714 = vsyncadd (!%p15246_p9), %s11964_s25, 4294963200  ;;  %s26_s10 = sadd.s32 1, %s16737_s10   ;;  %s23105_s27 = smov %s16721_s28 }
 0xd86   : > { %p23_p0 = scmp.ge.s32.totalorder %s26_s10, 4   ;;  %s23106_s28 = smov %s16725_s29 }
 0xd87   : > { %s23107_s29 = smov %s16970_s18  ;;  %s23108_s30 = smov %s16733_s9 }
 0xd88   : > { %s23109_s9 = smov %s23111_s20  ;;  %25 = sbr.rel (!%p23_p0) target bundleno = 11 (0xb), region = 110 }
 0xd8f   :  { %11969 = vsyncpa [#allocation3], 1 }
 0xd90   :  { %11971 = vsyncpa [#allocation3 + $0x1], 1 }
 0xd91   :  { %11972 = vsyncpa [#allocation6], 1 }
 0xd92   :  { %11973 = vsyncpa [#allocation9], 1 }
 0xd93   :  { %11974 = vsyncpa [#allocation4], 1 }
 0xd94   :  { %11976 = vsyncpa [#allocation4 + $0x1], 1 }

</bundles_post_ra>
